<compile_context>
chip_gen: v6e
topology: v6e:2x2x1
jax: 0.10.0
libtpu: 0.0.40
codegen_flags: <defaults>
</compile_context>

<pallas_src>
import functools

import jax
import jax.numpy as jnp
from jax.experimental import pallas as pl
from jax.experimental.pallas import tpu as pltpu

DATASET_NUM_CLASS = {"modelnet40": 40, "synthetic8": 8}

MATMUL_DTYPE = jnp.bfloat16          # MXU-native on v5e/v6e/v7x; accumulation stays f32
_VMEM_LIMIT = 32 * 1024 * 1024       # safe on v5e/v6e (128 MiB) and v7x (64 MiB / TC)


def _pick_tile(n, target):
    """Largest tile <= target that divides n and is a multiple of 8, else n (full dim)."""
    t = min(target, n)
    t -= t % 8
    while t >= 8:
        if n % t == 0:
            return t
        t -= 8
    return n


# ----------------------------------------------------------------------------
# Fused STN conv chain: conv1 -> conv2 -> conv3 (+relu each) -> max pool
# ----------------------------------------------------------------------------
def _stn_chain_kernel(x_ref, w1_ref, t1_ref, w2_ref, t2_ref, w3_ref, t3_ref,
                      o_ref, acc_ref):
    # grid = (B, N-tiles); N-tile axis is the (innermost, 'arbitrary') reduction axis.
    j = pl.program_id(1)

    @pl.when(j == 0)
    def _():
        acc_ref[...] = jnp.full(acc_ref.shape, -jnp.inf, acc_ref.dtype)

    x = x_ref[0].astype(MATMUL_DTYPE)                                    # [TN, Cin]
    h = jnp.dot(x, w1_ref[...], preferred_element_type=jnp.float32)
    h = jnp.maximum(h + t1_ref[...], 0.0)                                # [TN, 64]
    h = jnp.dot(h.astype(MATMUL_DTYPE), w2_ref[...],
                preferred_element_type=jnp.float32)
    h = jnp.maximum(h + t2_ref[...], 0.0)                                # [TN, 128]
    y = jnp.dot(h.astype(MATMUL_DTYPE), w3_ref[...],
                preferred_element_type=jnp.float32)
    y = jnp.maximum(y + t3_ref[...], 0.0)                                # [TN, 1024]
    acc_ref[...] = jnp.maximum(acc_ref[...], jnp.max(y, axis=0, keepdims=True))

    @pl.when(j == pl.num_programs(1) - 1)
    def _():
        o_ref[0] = acc_ref[...]


def stn_conv_pool(x, p1, p2, p3, *, tile=1024):
    """x: [B, N, Cin] -> [B, 1024].  Whole STN conv chain + max pool in one kernel;
    all three (scale-folded) weights live in VMEM, wide activations never hit HBM."""
    (w1, t1), (w2, t2), (w3, t3) = p1, p2, p3
    B, N, Cin = x.shape
    C1, C2, C3 = w1.shape[1], w2.shape[1], w3.shape[1]
    TN = _pick_tile(N, tile)
    out = pl.pallas_call(
        _stn_chain_kernel,
        out_shape=jax.ShapeDtypeStruct((B, 1, C3), jnp.float32),
        grid=(B, N // TN),
        in_specs=[
            pl.BlockSpec((1, TN, Cin), lambda i, j: (i, j, 0)),
            pl.BlockSpec((Cin, C1), lambda i, j: (0, 0)),
            pl.BlockSpec((1, C1), lambda i, j: (0, 0)),
            pl.BlockSpec((C1, C2), lambda i, j: (0, 0)),
            pl.BlockSpec((1, C2), lambda i, j: (0, 0)),
            pl.BlockSpec((C2, C3), lambda i, j: (0, 0)),
            pl.BlockSpec((1, C3), lambda i, j: (0, 0)),
        ],
        out_specs=pl.BlockSpec((1, 1, C3), lambda i, j: (i, 0, 0)),
        scratch_shapes=[pltpu.VMEM((1, C3), jnp.float32)],
        compiler_params=pltpu.CompilerParams(
            dimension_semantics=("parallel", "arbitrary"),
            vmem_limit_bytes=_VMEM_LIMIT),
    )(x, w1, t1.reshape(1, C1), w2, t2.reshape(1, C2), w3, t3.reshape(1, C3))
    return out.reshape(B, C3)


# ----------------------------------------------------------------------------
# Fused bmm(x, trans) + 1x1 conv + folded BN + ReLU  (feat_conv1)
# ----------------------------------------------------------------------------
def _transform_pointwise_kernel(x_ref, tr_ref, w_ref, t_ref, o_ref):
    # (x @ trans) @ W == x @ (trans @ W); trans@W is tiny ([Cin,Cin]@[Cin,Cout]).
    w_eff = jnp.dot(tr_ref[0].astype(MATMUL_DTYPE), w_ref[...],
                    preferred_element_type=jnp.float32)
    y = jnp.dot(x_ref[0].astype(MATMUL_DTYPE), w_eff.astype(MATMUL_DTYPE),
                preferred_element_type=jnp.float32)
    y = jnp.maximum(y + t_ref[...], 0.0)
    o_ref[0] = y.astype(o_ref.dtype)


def transform_pointwise_linear(x, trans, p, *, tile=2048, out_dtype=MATMUL_DTYPE):
    """x: [B, N, Cin], trans: [B, Cin, Cin] -> [B, N, Cout] (bf16 to halve HBM traffic)."""
    w, t = p
    B, N, Cin = x.shape
    Cout = w.shape[1]
    TN = _pick_tile(N, tile)
    return pl.pallas_call(
        _transform_pointwise_kernel,
        out_shape=jax.ShapeDtypeStruct((B, N, Cout), out_dtype),
        grid=(B, N // TN),
        in_specs=[
            pl.BlockSpec((1, TN, Cin), lambda i, j: (i, j, 0)),
            pl.BlockSpec((1, Cin, Cin), lambda i, j: (i, 0, 0)),
            pl.BlockSpec((Cin, Cout), lambda i, j: (0, 0)),
            pl.BlockSpec((1, Cout), lambda i, j: (0, 0)),
        ],
        out_specs=pl.BlockSpec((1, TN, Cout), lambda i, j: (i, j, 0)),
        compiler_params=pltpu.CompilerParams(
            dimension_semantics=("parallel", "parallel"),
            vmem_limit_bytes=_VMEM_LIMIT),
    )(x, trans, w, t.reshape(1, Cout))


# ----------------------------------------------------------------------------
# Fused bmm(x, trans_feat) + conv2(+bn,relu) + conv3(+bn) + mean pool
# ----------------------------------------------------------------------------
def _feat_tail_kernel(x_ref, tr_ref, w2_ref, t2_ref, w3_ref, t3_ref, o_ref,
                      weff_ref, acc_ref, *, inv_n):
    j = pl.program_id(1)

    @pl.when(j == 0)
    def _():
        acc_ref[...] = jnp.zeros_like(acc_ref)
        # Hoist trans_feat @ W2 ([64,64]@[64,128]) out of the per-N-tile loop.
        weff_ref[...] = jnp.dot(tr_ref[0].astype(MATMUL_DTYPE), w2_ref[...],
                                preferred_element_type=jnp.float32
                                ).astype(weff_ref.dtype)

    h = jnp.dot(x_ref[0].astype(MATMUL_DTYPE), weff_ref[...],
                preferred_element_type=jnp.float32)
    h = jnp.maximum(h + t2_ref[...], 0.0)                                # [TN, 128]
    y = jnp.dot(h.astype(MATMUL_DTYPE), w3_ref[...],
                preferred_element_type=jnp.float32)                      # [TN, 1024]
    acc_ref[...] = acc_ref[...] + jnp.sum(y, axis=0, keepdims=True)

    @pl.when(j == pl.num_programs(1) - 1)
    def _():
        # mean over N, then the (bias-folded) bn3 shift; conv3/bn3 has no ReLU.
        o_ref[0] = acc_ref[...] * inv_n + t3_ref[...]


def feat_transform_conv_pool(x, trans, p2, p3, *, tile=1024):
    """x: [B, N, 64], trans: [B, 64, 64] -> global feature [B, 1024] (mean pool)."""
    (w2, t2), (w3, t3) = p2, p3
    B, N, Cin = x.shape
    C2, C3 = w2.shape[1], w3.shape[1]
    TN = _pick_tile(N, tile)
    out = pl.pallas_call(
        functools.partial(_feat_tail_kernel, inv_n=1.0 / N),
        out_shape=jax.ShapeDtypeStruct((B, 1, C3), jnp.float32),
        grid=(B, N // TN),
        in_specs=[
            pl.BlockSpec((1, TN, Cin), lambda i, j: (i, j, 0)),
            pl.BlockSpec((1, Cin, Cin), lambda i, j: (i, 0, 0)),
            pl.BlockSpec((Cin, C2), lambda i, j: (0, 0)),
            pl.BlockSpec((1, C2), lambda i, j: (0, 0)),
            pl.BlockSpec((C2, C3), lambda i, j: (0, 0)),
            pl.BlockSpec((1, C3), lambda i, j: (0, 0)),
        ],
        out_specs=pl.BlockSpec((1, 1, C3), lambda i, j: (i, 0, 0)),
        scratch_shapes=[pltpu.VMEM((Cin, C2), MATMUL_DTYPE),
                        pltpu.VMEM((1, C3), jnp.float32)],
        compiler_params=pltpu.CompilerParams(
            dimension_semantics=("parallel", "arbitrary"),
            vmem_limit_bytes=_VMEM_LIMIT),
    )(x, trans, w2, t2.reshape(1, C2), w3, t3.reshape(1, C3))
    return out.reshape(B, C3)


# ----------------------------------------------------------------------------
# Fused fc head: fc1(+bn,relu) -> fc2(+bn,relu) -> fc3 (+optional log_softmax)
# ----------------------------------------------------------------------------
def _head_kernel(g_ref, w1, t1, w2, t2, w3, t3, o_ref, *, log_sm):
    h = jnp.dot(g_ref[...].astype(MATMUL_DTYPE), w1[...],
                preferred_element_type=jnp.float32)
    h = jnp.maximum(h + t1[...], 0.0)
    h = jnp.dot(h.astype(MATMUL_DTYPE), w2[...], preferred_element_type=jnp.float32)
    h = jnp.maximum(h + t2[...], 0.0)
    y = jnp.dot(h.astype(MATMUL_DTYPE), w3[...], preferred_element_type=jnp.float32)
    y = y + t3[...]
    if log_sm:
        m = jnp.max(y, axis=-1, keepdims=True)
        z = y - m
        y = z - jnp.log(jnp.sum(jnp.exp(z), axis=-1, keepdims=True))
    o_ref[...] = y


def mlp_head(g, p1, p2, p3, *, log_sm, tile=256):
    """g: [B, Cin] -> [B, K].  Weight-DMA bound at small B; weights are bf16."""
    B, Cin = g.shape
    K = p3[0].shape[1]
    TB = _pick_tile(B, tile)
    in_specs = [pl.BlockSpec((TB, Cin), lambda i: (i, 0))]
    operands = [g]
    for (w, t) in (p1, p2, p3):
        ci, co = w.shape
        in_specs += [
            pl.BlockSpec((ci, co), lambda i: (0, 0)),
            pl.BlockSpec((1, co), lambda i: (0, 0)),
        ]
        operands += [w, t.reshape(1, co)]
    return pl.pallas_call(
        functools.partial(_head_kernel, log_sm=log_sm),
        out_shape=jax.ShapeDtypeStruct((B, K), jnp.float32),
        grid=(B // TB,),
        in_specs=in_specs,
        out_specs=pl.BlockSpec((TB, K), lambda i: (i, 0)),
        compiler_params=pltpu.CompilerParams(
            dimension_semantics=("parallel",), vmem_limit_bytes=_VMEM_LIMIT),
    )(*operands)


# ----------------------------------------------------------------------------
# Model composition (glue in plain JAX)
# ----------------------------------------------------------------------------
def stn_forward(x, p, k):
    """STN3d (k=3) / STNkd (k=64): fused conv chain + max pool, then fused fc chain.
    The '+ identity' is pre-folded into fc3's shift at init time."""
    g = stn_conv_pool(x, p["conv1"], p["conv2"], p["conv3"])            # [B, 1024]
    g = mlp_head(g, p["fc1"], p["fc2"], p["fc3"], log_sm=False)         # [B, k*k]
    return g.reshape(-1, k, k)


def pointnet_mean_forward(params, pc):
    """PointNetMean.forward (task='cls_trans', return_emb=False).

    pc: [B, N, 3] float32 point cloud (the tensor PyTorch receives before transpose(2,1)).
    Returns {'logit': [B, num_class] log-probs, 'trans_feat': [B, 64, 64]}.
    """
    x = pc.astype(jnp.float32)

    # PointNetfeat --------------------------------------------------------
    trans = stn_forward(x, params["stn3"], 3)                                 # [B,3,3]
    x1 = transform_pointwise_linear(x, trans, params["feat_conv1"])           # [B,N,64] bf16
    trans_feat = stn_forward(x1, params["stn64"], 64)                         # [B,64,64]
    global_feat = feat_transform_conv_pool(x1, trans_feat,
                                           params["feat_conv2"],
                                           params["feat_conv3"])              # [B,1024]

    # PointNetCls head ----------------------------------------------------
    # TODO(synk): Dropout(p=0.3) between fc2 and bn2 is identity in eval mode; not implemented.
    logit = mlp_head(global_feat, params["cls_fc1"], params["cls_fc2"],
                     params["cls_fc3"], log_sm=True)

    return {"logit": logit, "trans_feat": trans_feat}


# ----------------------------------------------------------------------------
# Deterministic synthetic parameters.
# BN folded (eval mode): scale into the weight columns, bias + shift into one shift.
# ----------------------------------------------------------------------------
def _init_linear(key, cin, cout, std=0.05):
    kw, kb = jax.random.split(key)
    w = jax.random.normal(kw, (cin, cout), jnp.float32) * std
    b = jax.random.normal(kb, (cout,), jnp.float32) * std
    return w, b


def _init_bn(key, c, eps=1e-5):
    kg, kb, km, kv = jax.random.split(key, 4)
    gamma = 1.0 + 0.1 * jax.random.normal(kg, (c,), jnp.float32)
    beta = 0.1 * jax.random.normal(kb, (c,), jnp.float32)
    mean = 0.1 * jax.random.normal(km, (c,), jnp.float32)
    var = 1.0 + 0.1 * jnp.abs(jax.random.normal(kv, (c,), jnp.float32))
    scale = gamma / jnp.sqrt(var + eps)
    shift = beta - mean * scale
    return scale, shift


def init_params(key, num_class):
    keys = iter(jax.random.split(key, 64))

    def layer_bn(cin, cout):
        # Conv1d(k=1)/Linear + BatchNorm1d (eval): y = x @ (w*s) + (b*s + t_bn)
        w, b = _init_linear(next(keys), cin, cout)
        s, t_bn = _init_bn(next(keys), cout)
        return ((w * s[None, :]).astype(MATMUL_DTYPE),
                (b * s + t_bn).astype(jnp.float32))

    def layer(cin, cout, extra_shift=None):
        # plain linear; optional constant added to the bias (STN identity fold)
        w, b = _init_linear(next(keys), cin, cout)
        if extra_shift is not None:
            b = b + extra_shift
        return (w.astype(MATMUL_DTYPE), b.astype(jnp.float32))

    def stn_params(k):
        return {
            "conv1": layer_bn(k, 64),
            "conv2": layer_bn(64, 128),
            "conv3": layer_bn(128, 1024),
            "fc1": layer_bn(1024, 512),
            "fc2": layer_bn(512, 256),
            "fc3": layer(256, k * k,
                         extra_shift=jnp.eye(k, dtype=jnp.float32).reshape(k * k)),
        }

    return {
        "stn3": stn_params(3),
        "stn64": stn_params(64),
        "feat_conv1": layer_bn(3, 64),
        "feat_conv2": layer_bn(64, 128),
        "feat_conv3": layer_bn(128, 1024),
        "cls_fc1": layer_bn(1024, 512),
        "cls_fc2": layer_bn(512, 256),
        "cls_fc3": layer(256, num_class),
    }


# ----------------------------------------------------------------------------
if __name__ == "__main__":
    num_class = DATASET_NUM_CLASS["synthetic8"]
    key = jax.random.PRNGKey(0)
    kparam, kdata = jax.random.split(key)

    params = init_params(kparam, num_class)
    B, N = 2, 64
    pc = jax.random.normal(kdata, (B, N, 3), jnp.float32)   # [batch, points, xyz]

    out = jax.jit(pointnet_mean_forward)(params, pc)
    jax.block_until_ready(out)

    assert out["logit"].shape == (B, num_class)
    assert out["trans_feat"].shape == (B, 64, 64)
    assert bool(jnp.all(jnp.isfinite(out["logit"])))
    print("KERNEL_OK")
</pallas_src>

<mosaic_0001>
module attributes {stable_mosaic.version = 11 : i64} {
  func.func @_stn_chain_kernel(%arg0: i32, %arg1: i32, %arg2: memref<1x64x3xf32, #tpu.memory_space<vmem>>, %arg3: memref<3x64xbf16, #tpu.memory_space<vmem>>, %arg4: memref<1x64xf32, #tpu.memory_space<vmem>>, %arg5: memref<64x128xbf16, #tpu.memory_space<vmem>>, %arg6: memref<1x128xf32, #tpu.memory_space<vmem>>, %arg7: memref<128x1024xbf16, #tpu.memory_space<vmem>>, %arg8: memref<1x1024xf32, #tpu.memory_space<vmem>>, %arg9: memref<1x1x1024xf32, #tpu.memory_space<vmem>>, %arg10: memref<1x1024xf32, #tpu.memory_space<vmem>>) attributes {dimension_semantics = [#tpu.dimension_semantics<parallel>, #tpu.dimension_semantics<arbitrary>], iteration_bounds = array<i64: 2, 1>, scalar_prefetch = 0 : i64, scratch_operands = 1 : i64, tpu.core_type = #tpu.core_type<tc>, window_params = [{transform_indices = @transform_0, window_bounds = array<i64: 1, 64, 3>}, {pipeline_mode = #tpu.pipeline_mode<synchronous>, transform_indices = @transform_1, window_bounds = array<i64: 3, 64>}, {pipeline_mode = #tpu.pipeline_mode<synchronous>, transform_indices = @transform_2, window_bounds = array<i64: 1, 64>}, {pipeline_mode = #tpu.pipeline_mode<synchronous>, transform_indices = @transform_3, window_bounds = array<i64: 64, 128>}, {pipeline_mode = #tpu.pipeline_mode<synchronous>, transform_indices = @transform_4, window_bounds = array<i64: 1, 128>}, {pipeline_mode = #tpu.pipeline_mode<synchronous>, transform_indices = @transform_5, window_bounds = array<i64: 128, 1024>}, {pipeline_mode = #tpu.pipeline_mode<synchronous>, transform_indices = @transform_6, window_bounds = array<i64: 1, 1024>}, {transform_indices = @transform_7, window_bounds = array<i64: 1, 1, 1024>}]} {
    %c0_i32 = arith.constant 0 : i32
    %0 = arith.cmpi eq, %arg1, %c0_i32 : i32
    %1 = arith.extui %0 : i1 to i32
    %c0_i32_0 = arith.constant 0 : i32
    %2 = arith.cmpi ne, %1, %c0_i32_0 : i32
    scf.if %2 {
      %cst_27 = arith.constant 0xFF800000 : f32
      %37 = vector.broadcast %cst_27 : f32 to vector<1x1024xf32>
      %c0_28 = arith.constant 0 : index
      %c0_29 = arith.constant 0 : index
      %38 = vector.load %arg10[%c0_28, %c0_29] : memref<1x1024xf32, #tpu.memory_space<vmem>>, vector<1x1024xf32>
      tpu.vector_store %arg10[%c0_28, %c0_29], %37 {strides = array<i32>} : memref<1x1024xf32, #tpu.memory_space<vmem>>, vector<1x1024xf32>,
    } else {
    }
    %c0 = arith.constant 0 : index
    %c0_1 = arith.constant 0 : index
    %c0_2 = arith.constant 0 : index
    %3 = vector.load %arg2[%c0, %c0_1, %c0_2] : memref<1x64x3xf32, #tpu.memory_space<vmem>>, vector<1x64x3xf32>
    %4 = vector.shape_cast %3 : vector<1x64x3xf32> to vector<64x3xf32>
    %5 = arith.truncf %4 : vector<64x3xf32> to vector<64x3xbf16>
    %c0_3 = arith.constant 0 : index
    %c0_4 = arith.constant 0 : index
    %6 = vector.load %arg3[%c0_3, %c0_4] : memref<3x64xbf16, #tpu.memory_space<vmem>>, vector<3x64xbf16>
    %cst = arith.constant dense<0.000000e+00> : vector<64x64xf32>
    %7 = tpu.matmul %5, %6, %cst {dimension_numbers = #tpu.dot_dimension_numbers<[1], [0], [0], [1], [0, 0, 1, 1], [], []>} : vector<64x3xbf16>, vector<3x64xbf16>, vector<64x64xf32> -> vector<64x64xf32>
    %c0_5 = arith.constant 0 : index
    %c0_6 = arith.constant 0 : index
    %8 = vector.load %arg4[%c0_5, %c0_6] : memref<1x64xf32, #tpu.memory_space<vmem>>, vector<1x64xf32>
    %9 = vector.broadcast %8 : vector<1x64xf32> to vector<64x64xf32>
    %10 = arith.addf %7, %9 : vector<64x64xf32>
    %cst_7 = arith.constant 0.000000e+00 : f32
    %11 = vector.broadcast %cst_7 : f32 to vector<64x64xf32>
    %12 = arith.maximumf %10, %11 : vector<64x64xf32>
    %13 = arith.truncf %12 : vector<64x64xf32> to vector<64x64xbf16>
    %c0_8 = arith.constant 0 : index
    %c0_9 = arith.constant 0 : index
    %14 = vector.load %arg5[%c0_8, %c0_9] : memref<64x128xbf16, #tpu.memory_space<vmem>>, vector<64x128xbf16>
    %cst_10 = arith.constant dense<0.000000e+00> : vector<64x128xf32>
    %15 = tpu.matmul %13, %14, %cst_10 {dimension_numbers = #tpu.dot_dimension_numbers<[1], [0], [0], [1], [0, 0, 1, 1], [], []>} : vector<64x64xbf16>, vector<64x128xbf16>, vector<64x128xf32> -> vector<64x128xf32>
    %c0_11 = arith.constant 0 : index
    %c0_12 = arith.constant 0 : index
    %16 = vector.load %arg6[%c0_11, %c0_12] : memref<1x128xf32, #tpu.memory_space<vmem>>, vector<1x128xf32>
    %17 = vector.broadcast %16 : vector<1x128xf32> to vector<64x128xf32>
    %18 = arith.addf %15, %17 : vector<64x128xf32>
    %cst_13 = arith.constant 0.000000e+00 : f32
    %19 = vector.broadcast %cst_13 : f32 to vector<64x128xf32>
    %20 = arith.maximumf %18, %19 : vector<64x128xf32>
    %21 = arith.truncf %20 : vector<64x128xf32> to vector<64x128xbf16>
    %c0_14 = arith.constant 0 : index
    %c0_15 = arith.constant 0 : index
    %22 = vector.load %arg7[%c0_14, %c0_15] : memref<128x1024xbf16, #tpu.memory_space<vmem>>, vector<128x1024xbf16>
    %cst_16 = arith.constant dense<0.000000e+00> : vector<64x1024xf32>
    %23 = tpu.matmul %21, %22, %cst_16 {dimension_numbers = #tpu.dot_dimension_numbers<[1], [0], [0], [1], [0, 0, 1, 1], [], []>} : vector<64x128xbf16>, vector<128x1024xbf16>, vector<64x1024xf32> -> vector<64x1024xf32>
    %c0_17 = arith.constant 0 : index
    %c0_18 = arith.constant 0 : index
    %24 = vector.load %arg8[%c0_17, %c0_18] : memref<1x1024xf32, #tpu.memory_space<vmem>>, vector<1x1024xf32>
    %25 = vector.broadcast %24 : vector<1x1024xf32> to vector<64x1024xf32>
    %26 = arith.addf %23, %25 : vector<64x1024xf32>
    %cst_19 = arith.constant 0.000000e+00 : f32
    %27 = vector.broadcast %cst_19 : f32 to vector<64x1024xf32>
    %28 = arith.maximumf %26, %27 : vector<64x1024xf32>
    %c0_20 = arith.constant 0 : index
    %c0_21 = arith.constant 0 : index
    %29 = vector.load %arg10[%c0_20, %c0_21] : memref<1x1024xf32, #tpu.memory_space<vmem>>, vector<1x1024xf32>
    %cst_22 = arith.constant dense<0xFF800000> : vector<1024xf32>
    %30 = vector.multi_reduction <maximumf>, %28, %cst_22 [0] : vector<64x1024xf32> to vector<1024xf32>
    %31 = vector.shape_cast %30 : vector<1024xf32> to vector<1x1024xf32>
    %32 = arith.maximumf %29, %31 : vector<1x1024xf32>
    %c0_23 = arith.constant 0 : index
    %c0_24 = arith.constant 0 : index
    %33 = vector.load %arg10[%c0_23, %c0_24] : memref<1x1024xf32, #tpu.memory_space<vmem>>, vector<1x1024xf32>
    tpu.vector_store %arg10[%c0_23, %c0_24], %32 {strides = array<i32>} : memref<1x1024xf32, #tpu.memory_space<vmem>>, vector<1x1024xf32>,
    %c0_i32_25 = arith.constant 0 : i32
    %34 = arith.cmpi eq, %arg1, %c0_i32_25 : i32
    %35 = arith.extui %34 : i1 to i32
    %c0_i32_26 = arith.constant 0 : i32
    %36 = arith.cmpi ne, %35, %c0_i32_26 : i32
    scf.if %36 {
      %c0_27 = arith.constant 0 : index
      %c0_28 = arith.constant 0 : index
      %37 = vector.load %arg10[%c0_27, %c0_28] : memref<1x1024xf32, #tpu.memory_space<vmem>>, vector<1x1024xf32>
      %c0_29 = arith.constant 0 : index
      %c0_30 = arith.constant 0 : index
      %c0_31 = arith.constant 0 : index
      %38 = vector.load %arg9[%c0_29, %c0_30, %c0_31] : memref<1x1x1024xf32, #tpu.memory_space<vmem>>, vector<1x1x1024xf32>
      %39 = vector.shape_cast %38 : vector<1x1x1024xf32> to vector<1x1024xf32>
      %40 = vector.shape_cast %37 : vector<1x1024xf32> to vector<1x1x1024xf32>
      tpu.vector_store %arg9[%c0_29, %c0_30, %c0_31], %40 {strides = array<i32>} : memref<1x1x1024xf32, #tpu.memory_space<vmem>>, vector<1x1x1024xf32>,
    } else {
    }
    return
  }
  func.func @transform_0(%arg0: i32, %arg1: i32) -> (i32, i32, i32) {
    %c0_i32 = arith.constant 0 : i32
    %c0_i32_0 = arith.constant 0 : i32
    return %arg0, %arg1, %c0_i32 : i32, i32, i32
  }
  func.func @transform_1(%arg0: i32, %arg1: i32) -> (i32, i32) {
    %c0_i32 = arith.constant 0 : i32
    %c0_i32_0 = arith.constant 0 : i32
    %c0_i32_1 = arith.constant 0 : i32
    return %c0_i32, %c0_i32_0 : i32, i32
  }
  func.func @transform_2(%arg0: i32, %arg1: i32) -> (i32, i32) {
    %c0_i32 = arith.constant 0 : i32
    %c0_i32_0 = arith.constant 0 : i32
    %c0_i32_1 = arith.constant 0 : i32
    return %c0_i32, %c0_i32_0 : i32, i32
  }
  func.func @transform_3(%arg0: i32, %arg1: i32) -> (i32, i32) {
    %c0_i32 = arith.constant 0 : i32
    %c0_i32_0 = arith.constant 0 : i32
    %c0_i32_1 = arith.constant 0 : i32
    return %c0_i32, %c0_i32_0 : i32, i32
  }
  func.func @transform_4(%arg0: i32, %arg1: i32) -> (i32, i32) {
    %c0_i32 = arith.constant 0 : i32
    %c0_i32_0 = arith.constant 0 : i32
    %c0_i32_1 = arith.constant 0 : i32
    return %c0_i32, %c0_i32_0 : i32, i32
  }
  func.func @transform_5(%arg0: i32, %arg1: i32) -> (i32, i32) {
    %c0_i32 = arith.constant 0 : i32
    %c0_i32_0 = arith.constant 0 : i32
    %c0_i32_1 = arith.constant 0 : i32
    return %c0_i32, %c0_i32_0 : i32, i32
  }
  func.func @transform_6(%arg0: i32, %arg1: i32) -> (i32, i32) {
    %c0_i32 = arith.constant 0 : i32
    %c0_i32_0 = arith.constant 0 : i32
    %c0_i32_1 = arith.constant 0 : i32
    return %c0_i32, %c0_i32_0 : i32, i32
  }
  func.func @transform_7(%arg0: i32, %arg1: i32) -> (i32, i32, i32) {
    %c0_i32 = arith.constant 0 : i32
    %c0_i32_0 = arith.constant 0 : i32
    %c0_i32_1 = arith.constant 0 : i32
    return %arg0, %c0_i32, %c0_i32_0 : i32, i32, i32
  }
}

module attributes {stable_mosaic.version = 11 : i64} {
  func.func @_transform_pointwise_kernel(%arg0: i32, %arg1: i32, %arg2: memref<1x64x3xf32, #tpu.memory_space<vmem>>, %arg3: memref<1x3x3xf32, #tpu.memory_space<vmem>>, %arg4: memref<3x64xbf16, #tpu.memory_space<vmem>>, %arg5: memref<1x64xf32, #tpu.memory_space<vmem>>, %arg6: memref<1x64x64xbf16, #tpu.memory_space<vmem>>) attributes {dimension_semantics = [#tpu.dimension_semantics<parallel>, #tpu.dimension_semantics<parallel>], iteration_bounds = array<i64: 2, 1>, scalar_prefetch = 0 : i64, scratch_operands = 0 : i64, tpu.core_type = #tpu.core_type<tc>, window_params = [{transform_indices = @transform_0, window_bounds = array<i64: 1, 64, 3>}, {transform_indices = @transform_1, window_bounds = array<i64: 1, 3, 3>}, {pipeline_mode = #tpu.pipeline_mode<synchronous>, transform_indices = @transform_2, window_bounds = array<i64: 3, 64>}, {pipeline_mode = #tpu.pipeline_mode<synchronous>, transform_indices = @transform_3, window_bounds = array<i64: 1, 64>}, {transform_indices = @transform_4, window_bounds = array<i64: 1, 64, 64>}]} {
    %c0 = arith.constant 0 : index
    %c0_0 = arith.constant 0 : index
    %c0_1 = arith.constant 0 : index
    %0 = vector.load %arg3[%c0, %c0_0, %c0_1] : memref<1x3x3xf32, #tpu.memory_space<vmem>>, vector<1x3x3xf32>
    %1 = vector.shape_cast %0 : vector<1x3x3xf32> to vector<3x3xf32>
    %2 = arith.truncf %1 : vector<3x3xf32> to vector<3x3xbf16>
    %c0_2 = arith.constant 0 : index
    %c0_3 = arith.constant 0 : index
    %3 = vector.load %arg4[%c0_2, %c0_3] : memref<3x64xbf16, #tpu.memory_space<vmem>>, vector<3x64xbf16>
    %cst = arith.constant dense<0.000000e+00> : vector<3x64xf32>
    %4 = tpu.matmul %2, %3, %cst {dimension_numbers = #tpu.dot_dimension_numbers<[1], [0], [0], [1], [0, 0, 1, 1], [], []>} : vector<3x3xbf16>, vector<3x64xbf16>, vector<3x64xf32> -> vector<3x64xf32>
    %c0_4 = arith.constant 0 : index
    %c0_5 = arith.constant 0 : index
    %c0_6 = arith.constant 0 : index
    %5 = vector.load %arg2[%c0_4, %c0_5, %c0_6] : memref<1x64x3xf32, #tpu.memory_space<vmem>>, vector<1x64x3xf32>
    %6 = vector.shape_cast %5 : vector<1x64x3xf32> to vector<64x3xf32>
    %7 = arith.truncf %6 : vector<64x3xf32> to vector<64x3xbf16>
    %8 = arith.truncf %4 : vector<3x64xf32> to vector<3x64xbf16>
    %cst_7 = arith.constant dense<0.000000e+00> : vector<64x64xf32>
    %9 = tpu.matmul %7, %8, %cst_7 {dimension_numbers = #tpu.dot_dimension_numbers<[1], [0], [0], [1], [0, 0, 1, 1], [], []>} : vector<64x3xbf16>, vector<3x64xbf16>, vector<64x64xf32> -> vector<64x64xf32>
    %c0_8 = arith.constant 0 : index
    %c0_9 = arith.constant 0 : index
    %10 = vector.load %arg5[%c0_8, %c0_9] : memref<1x64xf32, #tpu.memory_space<vmem>>, vector<1x64xf32>
    %11 = vector.broadcast %10 : vector<1x64xf32> to vector<64x64xf32>
    %12 = arith.addf %9, %11 : vector<64x64xf32>
    %cst_10 = arith.constant 0.000000e+00 : f32
    %13 = vector.broadcast %cst_10 : f32 to vector<64x64xf32>
    %14 = arith.maximumf %12, %13 : vector<64x64xf32>
    %15 = arith.truncf %14 : vector<64x64xf32> to vector<64x64xbf16>
    %c0_11 = arith.constant 0 : index
    %c0_12 = arith.constant 0 : index
    %c0_13 = arith.constant 0 : index
    %16 = vector.load %arg6[%c0_11, %c0_12, %c0_13] : memref<1x64x64xbf16, #tpu.memory_space<vmem>>, vector<1x64x64xbf16>
    %17 = vector.shape_cast %16 : vector<1x64x64xbf16> to vector<64x64xbf16>
    %18 = vector.shape_cast %15 : vector<64x64xbf16> to vector<1x64x64xbf16>
    tpu.vector_store %arg6[%c0_11, %c0_12, %c0_13], %18 {strides = array<i32>} : memref<1x64x64xbf16, #tpu.memory_space<vmem>>, vector<1x64x64xbf16>,
    return
  }
  func.func @transform_0(%arg0: i32, %arg1: i32) -> (i32, i32, i32) {
    %c0_i32 = arith.constant 0 : i32
    %c0_i32_0 = arith.constant 0 : i32
    return %arg0, %arg1, %c0_i32 : i32, i32, i32
  }
  func.func @transform_1(%arg0: i32, %arg1: i32) -> (i32, i32, i32) {
    %c0_i32 = arith.constant 0 : i32
    %c0_i32_0 = arith.constant 0 : i32
    %c0_i32_1 = arith.constant 0 : i32
    return %arg0, %c0_i32, %c0_i32_0 : i32, i32, i32
  }
  func.func @transform_2(%arg0: i32, %arg1: i32) -> (i32, i32) {
    %c0_i32 = arith.constant 0 : i32
    %c0_i32_0 = arith.constant 0 : i32
    %c0_i32_1 = arith.constant 0 : i32
    return %c0_i32, %c0_i32_0 : i32, i32
  }
  func.func @transform_3(%arg0: i32, %arg1: i32) -> (i32, i32) {
    %c0_i32 = arith.constant 0 : i32
    %c0_i32_0 = arith.constant 0 : i32
    %c0_i32_1 = arith.constant 0 : i32
    return %c0_i32, %c0_i32_0 : i32, i32
  }
  func.func @transform_4(%arg0: i32, %arg1: i32) -> (i32, i32, i32) {
    %c0_i32 = arith.constant 0 : i32
    %c0_i32_0 = arith.constant 0 : i32
    return %arg0, %arg1, %c0_i32 : i32, i32, i32
  }
}

module attributes {stable_mosaic.version = 11 : i64} {
  func.func @_head_kernel(%arg0: i32, %arg1: memref<2x1024xf32, #tpu.memory_space<vmem>>, %arg2: memref<1024x512xbf16, #tpu.memory_space<vmem>>, %arg3: memref<1x512xf32, #tpu.memory_space<vmem>>, %arg4: memref<512x256xbf16, #tpu.memory_space<vmem>>, %arg5: memref<1x256xf32, #tpu.memory_space<vmem>>, %arg6: memref<256x9xbf16, #tpu.memory_space<vmem>>, %arg7: memref<1x9xf32, #tpu.memory_space<vmem>>, %arg8: memref<2x9xf32, #tpu.memory_space<vmem>>) attributes {dimension_semantics = [#tpu.dimension_semantics<parallel>], iteration_bounds = array<i64: 1>, scalar_prefetch = 0 : i64, scratch_operands = 0 : i64, tpu.core_type = #tpu.core_type<tc>, window_params = [{transform_indices = @transform_0, window_bounds = array<i64: 2, 1024>}, {pipeline_mode = #tpu.pipeline_mode<synchronous>, transform_indices = @transform_1, window_bounds = array<i64: 1024, 512>}, {pipeline_mode = #tpu.pipeline_mode<synchronous>, transform_indices = @transform_2, window_bounds = array<i64: 1, 512>}, {pipeline_mode = #tpu.pipeline_mode<synchronous>, transform_indices = @transform_3, window_bounds = array<i64: 512, 256>}, {pipeline_mode = #tpu.pipeline_mode<synchronous>, transform_indices = @transform_4, window_bounds = array<i64: 1, 256>}, {pipeline_mode = #tpu.pipeline_mode<synchronous>, transform_indices = @transform_5, window_bounds = array<i64: 256, 9>}, {pipeline_mode = #tpu.pipeline_mode<synchronous>, transform_indices = @transform_6, window_bounds = array<i64: 1, 9>}, {transform_indices = @transform_7, window_bounds = array<i64: 2, 9>}]} {
    %c0 = arith.constant 0 : index
    %c0_0 = arith.constant 0 : index
    %0 = vector.load %arg1[%c0, %c0_0] : memref<2x1024xf32, #tpu.memory_space<vmem>>, vector<2x1024xf32>
    %1 = arith.truncf %0 : vector<2x1024xf32> to vector<2x1024xbf16>
    %c0_1 = arith.constant 0 : index
    %c0_2 = arith.constant 0 : index
    %2 = vector.load %arg2[%c0_1, %c0_2] : memref<1024x512xbf16, #tpu.memory_space<vmem>>, vector<1024x512xbf16>
    %cst = arith.constant dense<0.000000e+00> : vector<2x512xf32>
    %3 = tpu.matmul %1, %2, %cst {dimension_numbers = #tpu.dot_dimension_numbers<[1], [0], [0], [1], [0, 0, 1, 1], [], []>} : vector<2x1024xbf16>, vector<1024x512xbf16>, vector<2x512xf32> -> vector<2x512xf32>
    %c0_3 = arith.constant 0 : index
    %c0_4 = arith.constant 0 : index
    %4 = vector.load %arg3[%c0_3, %c0_4] : memref<1x512xf32, #tpu.memory_space<vmem>>, vector<1x512xf32>
    %5 = vector.broadcast %4 : vector<1x512xf32> to vector<2x512xf32>
    %6 = arith.addf %3, %5 : vector<2x512xf32>
    %cst_5 = arith.constant 0.000000e+00 : f32
    %7 = vector.broadcast %cst_5 : f32 to vector<2x512xf32>
    %8 = arith.maximumf %6, %7 : vector<2x512xf32>
    %9 = arith.truncf %8 : vector<2x512xf32> to vector<2x512xbf16>
    %c0_6 = arith.constant 0 : index
    %c0_7 = arith.constant 0 : index
    %10 = vector.load %arg4[%c0_6, %c0_7] : memref<512x256xbf16, #tpu.memory_space<vmem>>, vector<512x256xbf16>
    %cst_8 = arith.constant dense<0.000000e+00> : vector<2x256xf32>
    %11 = tpu.matmul %9, %10, %cst_8 {dimension_numbers = #tpu.dot_dimension_numbers<[1], [0], [0], [1], [0, 0, 1, 1], [], []>} : vector<2x512xbf16>, vector<512x256xbf16>, vector<2x256xf32> -> vector<2x256xf32>
    %c0_9 = arith.constant 0 : index
    %c0_10 = arith.constant 0 : index
    %12 = vector.load %arg5[%c0_9, %c0_10] : memref<1x256xf32, #tpu.memory_space<vmem>>, vector<1x256xf32>
    %13 = vector.broadcast %12 : vector<1x256xf32> to vector<2x256xf32>
    %14 = arith.addf %11, %13 : vector<2x256xf32>
    %cst_11 = arith.constant 0.000000e+00 : f32
    %15 = vector.broadcast %cst_11 : f32 to vector<2x256xf32>
    %16 = arith.maximumf %14, %15 : vector<2x256xf32>
    %17 = arith.truncf %16 : vector<2x256xf32> to vector<2x256xbf16>
    %c0_12 = arith.constant 0 : index
    %c0_13 = arith.constant 0 : index
    %18 = vector.load %arg6[%c0_12, %c0_13] : memref<256x9xbf16, #tpu.memory_space<vmem>>, vector<256x9xbf16>
    %cst_14 = arith.constant dense<0.000000e+00> : vector<2x9xf32>
    %19 = tpu.matmul %17, %18, %cst_14 {dimension_numbers = #tpu.dot_dimension_numbers<[1], [0], [0], [1], [0, 0, 1, 1], [], []>} : vector<2x256xbf16>, vector<256x9xbf16>, vector<2x9xf32> -> vector<2x9xf32>
    %c0_15 = arith.constant 0 : index
    %c0_16 = arith.constant 0 : index
    %20 = vector.load %arg7[%c0_15, %c0_16] : memref<1x9xf32, #tpu.memory_space<vmem>>, vector<1x9xf32>
    %21 = vector.broadcast %20 : vector<1x9xf32> to vector<2x9xf32>
    %22 = arith.addf %19, %21 : vector<2x9xf32>
    %c0_17 = arith.constant 0 : index
    %c0_18 = arith.constant 0 : index
    %23 = vector.load %arg8[%c0_17, %c0_18] : memref<2x9xf32, #tpu.memory_space<vmem>>, vector<2x9xf32>
    tpu.vector_store %arg8[%c0_17, %c0_18], %22 {strides = array<i32>} : memref<2x9xf32, #tpu.memory_space<vmem>>, vector<2x9xf32>,
    return
  }
  func.func @transform_0(%arg0: i32) -> (i32, i32) {
    %c0_i32 = arith.constant 0 : i32
    %c0_i32_0 = arith.constant 0 : i32
    return %arg0, %c0_i32 : i32, i32
  }
  func.func @transform_1(%arg0: i32) -> (i32, i32) {
    %c0_i32 = arith.constant 0 : i32
    %c0_i32_0 = arith.constant 0 : i32
    %c0_i32_1 = arith.constant 0 : i32
    return %c0_i32, %c0_i32_0 : i32, i32
  }
  func.func @transform_2(%arg0: i32) -> (i32, i32) {
    %c0_i32 = arith.constant 0 : i32
    %c0_i32_0 = arith.constant 0 : i32
    %c0_i32_1 = arith.constant 0 : i32
    return %c0_i32, %c0_i32_0 : i32, i32
  }
  func.func @transform_3(%arg0: i32) -> (i32, i32) {
    %c0_i32 = arith.constant 0 : i32
    %c0_i32_0 = arith.constant 0 : i32
    %c0_i32_1 = arith.constant 0 : i32
    return %c0_i32, %c0_i32_0 : i32, i32
  }
  func.func @transform_4(%arg0: i32) -> (i32, i32) {
    %c0_i32 = arith.constant 0 : i32
    %c0_i32_0 = arith.constant 0 : i32
    %c0_i32_1 = arith.constant 0 : i32
    return %c0_i32, %c0_i32_0 : i32, i32
  }
  func.func @transform_5(%arg0: i32) -> (i32, i32) {
    %c0_i32 = arith.constant 0 : i32
    %c0_i32_0 = arith.constant 0 : i32
    %c0_i32_1 = arith.constant 0 : i32
    return %c0_i32, %c0_i32_0 : i32, i32
  }
  func.func @transform_6(%arg0: i32) -> (i32, i32) {
    %c0_i32 = arith.constant 0 : i32
    %c0_i32_0 = arith.constant 0 : i32
    %c0_i32_1 = arith.constant 0 : i32
    return %c0_i32, %c0_i32_0 : i32, i32
  }
  func.func @transform_7(%arg0: i32) -> (i32, i32) {
    %c0_i32 = arith.constant 0 : i32
    %c0_i32_0 = arith.constant 0 : i32
    return %arg0, %c0_i32 : i32, i32
  }
}

module attributes {stable_mosaic.version = 11 : i64} {
  func.func @_stn_chain_kernel(%arg0: i32, %arg1: i32, %arg2: memref<1x64x64xbf16, #tpu.memory_space<vmem>>, %arg3: memref<64x64xbf16, #tpu.memory_space<vmem>>, %arg4: memref<1x64xf32, #tpu.memory_space<vmem>>, %arg5: memref<64x128xbf16, #tpu.memory_space<vmem>>, %arg6: memref<1x128xf32, #tpu.memory_space<vmem>>, %arg7: memref<128x1024xbf16, #tpu.memory_space<vmem>>, %arg8: memref<1x1024xf32, #tpu.memory_space<vmem>>, %arg9: memref<1x1x1024xf32, #tpu.memory_space<vmem>>, %arg10: memref<1x1024xf32, #tpu.memory_space<vmem>>) attributes {dimension_semantics = [#tpu.dimension_semantics<parallel>, #tpu.dimension_semantics<arbitrary>], iteration_bounds = array<i64: 2, 1>, scalar_prefetch = 0 : i64, scratch_operands = 1 : i64, tpu.core_type = #tpu.core_type<tc>, window_params = [{transform_indices = @transform_0, window_bounds = array<i64: 1, 64, 64>}, {pipeline_mode = #tpu.pipeline_mode<synchronous>, transform_indices = @transform_1, window_bounds = array<i64: 64, 64>}, {pipeline_mode = #tpu.pipeline_mode<synchronous>, transform_indices = @transform_2, window_bounds = array<i64: 1, 64>}, {pipeline_mode = #tpu.pipeline_mode<synchronous>, transform_indices = @transform_3, window_bounds = array<i64: 64, 128>}, {pipeline_mode = #tpu.pipeline_mode<synchronous>, transform_indices = @transform_4, window_bounds = array<i64: 1, 128>}, {pipeline_mode = #tpu.pipeline_mode<synchronous>, transform_indices = @transform_5, window_bounds = array<i64: 128, 1024>}, {pipeline_mode = #tpu.pipeline_mode<synchronous>, transform_indices = @transform_6, window_bounds = array<i64: 1, 1024>}, {transform_indices = @transform_7, window_bounds = array<i64: 1, 1, 1024>}]} {
    %c0_i32 = arith.constant 0 : i32
    %0 = arith.cmpi eq, %arg1, %c0_i32 : i32
    %1 = arith.extui %0 : i1 to i32
    %c0_i32_0 = arith.constant 0 : i32
    %2 = arith.cmpi ne, %1, %c0_i32_0 : i32
    scf.if %2 {
      %cst_27 = arith.constant 0xFF800000 : f32
      %36 = vector.broadcast %cst_27 : f32 to vector<1x1024xf32>
      %c0_28 = arith.constant 0 : index
      %c0_29 = arith.constant 0 : index
      %37 = vector.load %arg10[%c0_28, %c0_29] : memref<1x1024xf32, #tpu.memory_space<vmem>>, vector<1x1024xf32>
      tpu.vector_store %arg10[%c0_28, %c0_29], %36 {strides = array<i32>} : memref<1x1024xf32, #tpu.memory_space<vmem>>, vector<1x1024xf32>,
    } else {
    }
    %c0 = arith.constant 0 : index
    %c0_1 = arith.constant 0 : index
    %c0_2 = arith.constant 0 : index
    %3 = vector.load %arg2[%c0, %c0_1, %c0_2] : memref<1x64x64xbf16, #tpu.memory_space<vmem>>, vector<1x64x64xbf16>
    %4 = vector.shape_cast %3 : vector<1x64x64xbf16> to vector<64x64xbf16>
    %c0_3 = arith.constant 0 : index
    %c0_4 = arith.constant 0 : index
    %5 = vector.load %arg3[%c0_3, %c0_4] : memref<64x64xbf16, #tpu.memory_space<vmem>>, vector<64x64xbf16>
    %cst = arith.constant dense<0.000000e+00> : vector<64x64xf32>
    %6 = tpu.matmul %4, %5, %cst {dimension_numbers = #tpu.dot_dimension_numbers<[1], [0], [0], [1], [0, 0, 1, 1], [], []>} : vector<64x64xbf16>, vector<64x64xbf16>, vector<64x64xf32> -> vector<64x64xf32>
    %c0_5 = arith.constant 0 : index
    %c0_6 = arith.constant 0 : index
    %7 = vector.load %arg4[%c0_5, %c0_6] : memref<1x64xf32, #tpu.memory_space<vmem>>, vector<1x64xf32>
    %8 = vector.broadcast %7 : vector<1x64xf32> to vector<64x64xf32>
    %9 = arith.addf %6, %8 : vector<64x64xf32>
    %cst_7 = arith.constant 0.000000e+00 : f32
    %10 = vector.broadcast %cst_7 : f32 to vector<64x64xf32>
    %11 = arith.maximumf %9, %10 : vector<64x64xf32>
    %12 = arith.truncf %11 : vector<64x64xf32> to vector<64x64xbf16>
    %c0_8 = arith.constant 0 : index
    %c0_9 = arith.constant 0 : index
    %13 = vector.load %arg5[%c0_8, %c0_9] : memref<64x128xbf16, #tpu.memory_space<vmem>>, vector<64x128xbf16>
    %cst_10 = arith.constant dense<0.000000e+00> : vector<64x128xf32>
    %14 = tpu.matmul %12, %13, %cst_10 {dimension_numbers = #tpu.dot_dimension_numbers<[1], [0], [0], [1], [0, 0, 1, 1], [], []>} : vector<64x64xbf16>, vector<64x128xbf16>, vector<64x128xf32> -> vector<64x128xf32>
    %c0_11 = arith.constant 0 : index
    %c0_12 = arith.constant 0 : index
    %15 = vector.load %arg6[%c0_11, %c0_12] : memref<1x128xf32, #tpu.memory_space<vmem>>, vector<1x128xf32>
    %16 = vector.broadcast %15 : vector<1x128xf32> to vector<64x128xf32>
    %17 = arith.addf %14, %16 : vector<64x128xf32>
    %cst_13 = arith.constant 0.000000e+00 : f32
    %18 = vector.broadcast %cst_13 : f32 to vector<64x128xf32>
    %19 = arith.maximumf %17, %18 : vector<64x128xf32>
    %20 = arith.truncf %19 : vector<64x128xf32> to vector<64x128xbf16>
    %c0_14 = arith.constant 0 : index
    %c0_15 = arith.constant 0 : index
    %21 = vector.load %arg7[%c0_14, %c0_15] : memref<128x1024xbf16, #tpu.memory_space<vmem>>, vector<128x1024xbf16>
    %cst_16 = arith.constant dense<0.000000e+00> : vector<64x1024xf32>
    %22 = tpu.matmul %20, %21, %cst_16 {dimension_numbers = #tpu.dot_dimension_numbers<[1], [0], [0], [1], [0, 0, 1, 1], [], []>} : vector<64x128xbf16>, vector<128x1024xbf16>, vector<64x1024xf32> -> vector<64x1024xf32>
    %c0_17 = arith.constant 0 : index
    %c0_18 = arith.constant 0 : index
    %23 = vector.load %arg8[%c0_17, %c0_18] : memref<1x1024xf32, #tpu.memory_space<vmem>>, vector<1x1024xf32>
    %24 = vector.broadcast %23 : vector<1x1024xf32> to vector<64x1024xf32>
    %25 = arith.addf %22, %24 : vector<64x1024xf32>
    %cst_19 = arith.constant 0.000000e+00 : f32
    %26 = vector.broadcast %cst_19 : f32 to vector<64x1024xf32>
    %27 = arith.maximumf %25, %26 : vector<64x1024xf32>
    %c0_20 = arith.constant 0 : index
    %c0_21 = arith.constant 0 : index
    %28 = vector.load %arg10[%c0_20, %c0_21] : memref<1x1024xf32, #tpu.memory_space<vmem>>, vector<1x1024xf32>
    %cst_22 = arith.constant dense<0xFF800000> : vector<1024xf32>
    %29 = vector.multi_reduction <maximumf>, %27, %cst_22 [0] : vector<64x1024xf32> to vector<1024xf32>
    %30 = vector.shape_cast %29 : vector<1024xf32> to vector<1x1024xf32>
    %31 = arith.maximumf %28, %30 : vector<1x1024xf32>
    %c0_23 = arith.constant 0 : index
    %c0_24 = arith.constant 0 : index
    %32 = vector.load %arg10[%c0_23, %c0_24] : memref<1x1024xf32, #tpu.memory_space<vmem>>, vector<1x1024xf32>
    tpu.vector_store %arg10[%c0_23, %c0_24], %31 {strides = array<i32>} : memref<1x1024xf32, #tpu.memory_space<vmem>>, vector<1x1024xf32>,
    %c0_i32_25 = arith.constant 0 : i32
    %33 = arith.cmpi eq, %arg1, %c0_i32_25 : i32
    %34 = arith.extui %33 : i1 to i32
    %c0_i32_26 = arith.constant 0 : i32
    %35 = arith.cmpi ne, %34, %c0_i32_26 : i32
    scf.if %35 {
      %c0_27 = arith.constant 0 : index
      %c0_28 = arith.constant 0 : index
      %36 = vector.load %arg10[%c0_27, %c0_28] : memref<1x1024xf32, #tpu.memory_space<vmem>>, vector<1x1024xf32>
      %c0_29 = arith.constant 0 : index
      %c0_30 = arith.constant 0 : index
      %c0_31 = arith.constant 0 : index
      %37 = vector.load %arg9[%c0_29, %c0_30, %c0_31] : memref<1x1x1024xf32, #tpu.memory_space<vmem>>, vector<1x1x1024xf32>
      %38 = vector.shape_cast %37 : vector<1x1x1024xf32> to vector<1x1024xf32>
      %39 = vector.shape_cast %36 : vector<1x1024xf32> to vector<1x1x1024xf32>
      tpu.vector_store %arg9[%c0_29, %c0_30, %c0_31], %39 {strides = array<i32>} : memref<1x1x1024xf32, #tpu.memory_space<vmem>>, vector<1x1x1024xf32>,
    } else {
    }
    return
  }
  func.func @transform_0(%arg0: i32, %arg1: i32) -> (i32, i32, i32) {
    %c0_i32 = arith.constant 0 : i32
    %c0_i32_0 = arith.constant 0 : i32
    return %arg0, %arg1, %c0_i32 : i32, i32, i32
  }
  func.func @transform_1(%arg0: i32, %arg1: i32) -> (i32, i32) {
    %c0_i32 = arith.constant 0 : i32
    %c0_i32_0 = arith.constant 0 : i32
    %c0_i32_1 = arith.constant 0 : i32
    return %c0_i32, %c0_i32_0 : i32, i32
  }
  func.func @transform_2(%arg0: i32, %arg1: i32) -> (i32, i32) {
    %c0_i32 = arith.constant 0 : i32
    %c0_i32_0 = arith.constant 0 : i32
    %c0_i32_1 = arith.constant 0 : i32
    return %c0_i32, %c0_i32_0 : i32, i32
  }
  func.func @transform_3(%arg0: i32, %arg1: i32) -> (i32, i32) {
    %c0_i32 = arith.constant 0 : i32
    %c0_i32_0 = arith.constant 0 : i32
    %c0_i32_1 = arith.constant 0 : i32
    return %c0_i32, %c0_i32_0 : i32, i32
  }
  func.func @transform_4(%arg0: i32, %arg1: i32) -> (i32, i32) {
    %c0_i32 = arith.constant 0 : i32
    %c0_i32_0 = arith.constant 0 : i32
    %c0_i32_1 = arith.constant 0 : i32
    return %c0_i32, %c0_i32_0 : i32, i32
  }
  func.func @transform_5(%arg0: i32, %arg1: i32) -> (i32, i32) {
    %c0_i32 = arith.constant 0 : i32
    %c0_i32_0 = arith.constant 0 : i32
    %c0_i32_1 = arith.constant 0 : i32
    return %c0_i32, %c0_i32_0 : i32, i32
  }
  func.func @transform_6(%arg0: i32, %arg1: i32) -> (i32, i32) {
    %c0_i32 = arith.constant 0 : i32
    %c0_i32_0 = arith.constant 0 : i32
    %c0_i32_1 = arith.constant 0 : i32
    return %c0_i32, %c0_i32_0 : i32, i32
  }
  func.func @transform_7(%arg0: i32, %arg1: i32) -> (i32, i32, i32) {
    %c0_i32 = arith.constant 0 : i32
    %c0_i32_0 = arith.constant 0 : i32
    %c0_i32_1 = arith.constant 0 : i32
    return %arg0, %c0_i32, %c0_i32_0 : i32, i32, i32
  }
}

module attributes {stable_mosaic.version = 11 : i64} {
  func.func @_head_kernel(%arg0: i32, %arg1: memref<2x1024xf32, #tpu.memory_space<vmem>>, %arg2: memref<1024x512xbf16, #tpu.memory_space<vmem>>, %arg3: memref<1x512xf32, #tpu.memory_space<vmem>>, %arg4: memref<512x256xbf16, #tpu.memory_space<vmem>>, %arg5: memref<1x256xf32, #tpu.memory_space<vmem>>, %arg6: memref<256x4096xbf16, #tpu.memory_space<vmem>>, %arg7: memref<1x4096xf32, #tpu.memory_space<vmem>>, %arg8: memref<2x4096xf32, #tpu.memory_space<vmem>>) attributes {dimension_semantics = [#tpu.dimension_semantics<parallel>], iteration_bounds = array<i64: 1>, scalar_prefetch = 0 : i64, scratch_operands = 0 : i64, tpu.core_type = #tpu.core_type<tc>, window_params = [{transform_indices = @transform_0, window_bounds = array<i64: 2, 1024>}, {pipeline_mode = #tpu.pipeline_mode<synchronous>, transform_indices = @transform_1, window_bounds = array<i64: 1024, 512>}, {pipeline_mode = #tpu.pipeline_mode<synchronous>, transform_indices = @transform_2, window_bounds = array<i64: 1, 512>}, {pipeline_mode = #tpu.pipeline_mode<synchronous>, transform_indices = @transform_3, window_bounds = array<i64: 512, 256>}, {pipeline_mode = #tpu.pipeline_mode<synchronous>, transform_indices = @transform_4, window_bounds = array<i64: 1, 256>}, {pipeline_mode = #tpu.pipeline_mode<synchronous>, transform_indices = @transform_5, window_bounds = array<i64: 256, 4096>}, {pipeline_mode = #tpu.pipeline_mode<synchronous>, transform_indices = @transform_6, window_bounds = array<i64: 1, 4096>}, {transform_indices = @transform_7, window_bounds = array<i64: 2, 4096>}]} {
    %c0 = arith.constant 0 : index
    %c0_0 = arith.constant 0 : index
    %0 = vector.load %arg1[%c0, %c0_0] : memref<2x1024xf32, #tpu.memory_space<vmem>>, vector<2x1024xf32>
    %1 = arith.truncf %0 : vector<2x1024xf32> to vector<2x1024xbf16>
    %c0_1 = arith.constant 0 : index
    %c0_2 = arith.constant 0 : index
    %2 = vector.load %arg2[%c0_1, %c0_2] : memref<1024x512xbf16, #tpu.memory_space<vmem>>, vector<1024x512xbf16>
    %cst = arith.constant dense<0.000000e+00> : vector<2x512xf32>
    %3 = tpu.matmul %1, %2, %cst {dimension_numbers = #tpu.dot_dimension_numbers<[1], [0], [0], [1], [0, 0, 1, 1], [], []>} : vector<2x1024xbf16>, vector<1024x512xbf16>, vector<2x512xf32> -> vector<2x512xf32>
    %c0_3 = arith.constant 0 : index
    %c0_4 = arith.constant 0 : index
    %4 = vector.load %arg3[%c0_3, %c0_4] : memref<1x512xf32, #tpu.memory_space<vmem>>, vector<1x512xf32>
    %5 = vector.broadcast %4 : vector<1x512xf32> to vector<2x512xf32>
    %6 = arith.addf %3, %5 : vector<2x512xf32>
    %cst_5 = arith.constant 0.000000e+00 : f32
    %7 = vector.broadcast %cst_5 : f32 to vector<2x512xf32>
    %8 = arith.maximumf %6, %7 : vector<2x512xf32>
    %9 = arith.truncf %8 : vector<2x512xf32> to vector<2x512xbf16>
    %c0_6 = arith.constant 0 : index
    %c0_7 = arith.constant 0 : index
    %10 = vector.load %arg4[%c0_6, %c0_7] : memref<512x256xbf16, #tpu.memory_space<vmem>>, vector<512x256xbf16>
    %cst_8 = arith.constant dense<0.000000e+00> : vector<2x256xf32>
    %11 = tpu.matmul %9, %10, %cst_8 {dimension_numbers = #tpu.dot_dimension_numbers<[1], [0], [0], [1], [0, 0, 1, 1], [], []>} : vector<2x512xbf16>, vector<512x256xbf16>, vector<2x256xf32> -> vector<2x256xf32>
    %c0_9 = arith.constant 0 : index
    %c0_10 = arith.constant 0 : index
    %12 = vector.load %arg5[%c0_9, %c0_10] : memref<1x256xf32, #tpu.memory_space<vmem>>, vector<1x256xf32>
    %13 = vector.broadcast %12 : vector<1x256xf32> to vector<2x256xf32>
    %14 = arith.addf %11, %13 : vector<2x256xf32>
    %cst_11 = arith.constant 0.000000e+00 : f32
    %15 = vector.broadcast %cst_11 : f32 to vector<2x256xf32>
    %16 = arith.maximumf %14, %15 : vector<2x256xf32>
    %17 = arith.truncf %16 : vector<2x256xf32> to vector<2x256xbf16>
    %c0_12 = arith.constant 0 : index
    %c0_13 = arith.constant 0 : index
    %18 = vector.load %arg6[%c0_12, %c0_13] : memref<256x4096xbf16, #tpu.memory_space<vmem>>, vector<256x4096xbf16>
    %cst_14 = arith.constant dense<0.000000e+00> : vector<2x4096xf32>
    %19 = tpu.matmul %17, %18, %cst_14 {dimension_numbers = #tpu.dot_dimension_numbers<[1], [0], [0], [1], [0, 0, 1, 1], [], []>} : vector<2x256xbf16>, vector<256x4096xbf16>, vector<2x4096xf32> -> vector<2x4096xf32>
    %c0_15 = arith.constant 0 : index
    %c0_16 = arith.constant 0 : index
    %20 = vector.load %arg7[%c0_15, %c0_16] : memref<1x4096xf32, #tpu.memory_space<vmem>>, vector<1x4096xf32>
    %21 = vector.broadcast %20 : vector<1x4096xf32> to vector<2x4096xf32>
    %22 = arith.addf %19, %21 : vector<2x4096xf32>
    %c0_17 = arith.constant 0 : index
    %c0_18 = arith.constant 0 : index
    %23 = vector.load %arg8[%c0_17, %c0_18] : memref<2x4096xf32, #tpu.memory_space<vmem>>, vector<2x4096xf32>
    tpu.vector_store %arg8[%c0_17, %c0_18], %22 {strides = array<i32>} : memref<2x4096xf32, #tpu.memory_space<vmem>>, vector<2x4096xf32>,
    return
  }
  func.func @transform_0(%arg0: i32) -> (i32, i32) {
    %c0_i32 = arith.constant 0 : i32
    %c0_i32_0 = arith.constant 0 : i32
    return %arg0, %c0_i32 : i32, i32
  }
  func.func @transform_1(%arg0: i32) -> (i32, i32) {
    %c0_i32 = arith.constant 0 : i32
    %c0_i32_0 = arith.constant 0 : i32
    %c0_i32_1 = arith.constant 0 : i32
    return %c0_i32, %c0_i32_0 : i32, i32
  }
  func.func @transform_2(%arg0: i32) -> (i32, i32) {
    %c0_i32 = arith.constant 0 : i32
    %c0_i32_0 = arith.constant 0 : i32
    %c0_i32_1 = arith.constant 0 : i32
    return %c0_i32, %c0_i32_0 : i32, i32
  }
  func.func @transform_3(%arg0: i32) -> (i32, i32) {
    %c0_i32 = arith.constant 0 : i32
    %c0_i32_0 = arith.constant 0 : i32
    %c0_i32_1 = arith.constant 0 : i32
    return %c0_i32, %c0_i32_0 : i32, i32
  }
  func.func @transform_4(%arg0: i32) -> (i32, i32) {
    %c0_i32 = arith.constant 0 : i32
    %c0_i32_0 = arith.constant 0 : i32
    %c0_i32_1 = arith.constant 0 : i32
    return %c0_i32, %c0_i32_0 : i32, i32
  }
  func.func @transform_5(%arg0: i32) -> (i32, i32) {
    %c0_i32 = arith.constant 0 : i32
    %c0_i32_0 = arith.constant 0 : i32
    %c0_i32_1 = arith.constant 0 : i32
    return %c0_i32, %c0_i32_0 : i32, i32
  }
  func.func @transform_6(%arg0: i32) -> (i32, i32) {
    %c0_i32 = arith.constant 0 : i32
    %c0_i32_0 = arith.constant 0 : i32
    %c0_i32_1 = arith.constant 0 : i32
    return %c0_i32, %c0_i32_0 : i32, i32
  }
  func.func @transform_7(%arg0: i32) -> (i32, i32) {
    %c0_i32 = arith.constant 0 : i32
    %c0_i32_0 = arith.constant 0 : i32
    return %arg0, %c0_i32 : i32, i32
  }
}

module attributes {stable_mosaic.version = 11 : i64} {
  func.func @_feat_tail_kernel(%arg0: i32, %arg1: i32, %arg2: memref<1x64x64xbf16, #tpu.memory_space<vmem>>, %arg3: memref<1x64x64xf32, #tpu.memory_space<vmem>>, %arg4: memref<64x128xbf16, #tpu.memory_space<vmem>>, %arg5: memref<1x128xf32, #tpu.memory_space<vmem>>, %arg6: memref<128x1024xbf16, #tpu.memory_space<vmem>>, %arg7: memref<1x1024xf32, #tpu.memory_space<vmem>>, %arg8: memref<1x1x1024xf32, #tpu.memory_space<vmem>>, %arg9: memref<64x128xbf16, #tpu.memory_space<vmem>>, %arg10: memref<1x1024xf32, #tpu.memory_space<vmem>>) attributes {dimension_semantics = [#tpu.dimension_semantics<parallel>, #tpu.dimension_semantics<arbitrary>], iteration_bounds = array<i64: 2, 1>, scalar_prefetch = 0 : i64, scratch_operands = 2 : i64, tpu.core_type = #tpu.core_type<tc>, window_params = [{transform_indices = @transform_0, window_bounds = array<i64: 1, 64, 64>}, {transform_indices = @transform_1, window_bounds = array<i64: 1, 64, 64>}, {pipeline_mode = #tpu.pipeline_mode<synchronous>, transform_indices = @transform_2, window_bounds = array<i64: 64, 128>}, {pipeline_mode = #tpu.pipeline_mode<synchronous>, transform_indices = @transform_3, window_bounds = array<i64: 1, 128>}, {pipeline_mode = #tpu.pipeline_mode<synchronous>, transform_indices = @transform_4, window_bounds = array<i64: 128, 1024>}, {pipeline_mode = #tpu.pipeline_mode<synchronous>, transform_indices = @transform_5, window_bounds = array<i64: 1, 1024>}, {transform_indices = @transform_6, window_bounds = array<i64: 1, 1, 1024>}]} {
    %c0_i32 = arith.constant 0 : i32
    %0 = arith.cmpi eq, %arg1, %c0_i32 : i32
    %1 = arith.extui %0 : i1 to i32
    %c0_i32_0 = arith.constant 0 : i32
    %2 = arith.cmpi ne, %1, %c0_i32_0 : i32
    scf.if %2 {
      %cst_18 = arith.constant 0.000000e+00 : f32
      %23 = vector.broadcast %cst_18 : f32 to vector<1x1024xf32>
      %c0_19 = arith.constant 0 : index
      %c0_20 = arith.constant 0 : index
      %24 = vector.load %arg10[%c0_19, %c0_20] : memref<1x1024xf32, #tpu.memory_space<vmem>>, vector<1x1024xf32>
      tpu.vector_store %arg10[%c0_19, %c0_20], %23 {strides = array<i32>} : memref<1x1024xf32, #tpu.memory_space<vmem>>, vector<1x1024xf32>,
      %c0_21 = arith.constant 0 : index
      %c0_22 = arith.constant 0 : index
      %c0_23 = arith.constant 0 : index
      %25 = vector.load %arg3[%c0_21, %c0_22, %c0_23] : memref<1x64x64xf32, #tpu.memory_space<vmem>>, vector<1x64x64xf32>
      %26 = vector.shape_cast %25 : vector<1x64x64xf32> to vector<64x64xf32>
      %27 = arith.truncf %26 : vector<64x64xf32> to vector<64x64xbf16>
      %c0_24 = arith.constant 0 : index
      %c0_25 = arith.constant 0 : index
      %28 = vector.load %arg4[%c0_24, %c0_25] : memref<64x128xbf16, #tpu.memory_space<vmem>>, vector<64x128xbf16>
      %cst_26 = arith.constant dense<0.000000e+00> : vector<64x128xf32>
      %29 = tpu.matmul %27, %28, %cst_26 {dimension_numbers = #tpu.dot_dimension_numbers<[1], [0], [0], [1], [0, 0, 1, 1], [], []>} : vector<64x64xbf16>, vector<64x128xbf16>, vector<64x128xf32> -> vector<64x128xf32>
      %30 = arith.truncf %29 : vector<64x128xf32> to vector<64x128xbf16>
      %c0_27 = arith.constant 0 : index
      %c0_28 = arith.constant 0 : index
      %31 = vector.load %arg9[%c0_27, %c0_28] : memref<64x128xbf16, #tpu.memory_space<vmem>>, vector<64x128xbf16>
      tpu.vector_store %arg9[%c0_27, %c0_28], %30 {strides = array<i32>} : memref<64x128xbf16, #tpu.memory_space<vmem>>, vector<64x128xbf16>,
    } else {
    }
    %c0 = arith.constant 0 : index
    %c0_1 = arith.constant 0 : index
    %c0_2 = arith.constant 0 : index
    %3 = vector.load %arg2[%c0, %c0_1, %c0_2] : memref<1x64x64xbf16, #tpu.memory_space<vmem>>, vector<1x64x64xbf16>
    %4 = vector.shape_cast %3 : vector<1x64x64xbf16> to vector<64x64xbf16>
    %c0_3 = arith.constant 0 : index
    %c0_4 = arith.constant 0 : index
    %5 = vector.load %arg9[%c0_3, %c0_4] : memref<64x128xbf16, #tpu.memory_space<vmem>>, vector<64x128xbf16>
    %cst = arith.constant dense<0.000000e+00> : vector<64x128xf32>
    %6 = tpu.matmul %4, %5, %cst {dimension_numbers = #tpu.dot_dimension_numbers<[1], [0], [0], [1], [0, 0, 1, 1], [], []>} : vector<64x64xbf16>, vector<64x128xbf16>, vector<64x128xf32> -> vector<64x128xf32>
    %c0_5 = arith.constant 0 : index
    %c0_6 = arith.constant 0 : index
    %7 = vector.load %arg5[%c0_5, %c0_6] : memref<1x128xf32, #tpu.memory_space<vmem>>, vector<1x128xf32>
    %8 = vector.broadcast %7 : vector<1x128xf32> to vector<64x128xf32>
    %9 = arith.addf %6, %8 : vector<64x128xf32>
    %cst_7 = arith.constant 0.000000e+00 : f32
    %10 = vector.broadcast %cst_7 : f32 to vector<64x128xf32>
    %11 = arith.maximumf %9, %10 : vector<64x128xf32>
    %12 = arith.truncf %11 : vector<64x128xf32> to vector<64x128xbf16>
    %c0_8 = arith.constant 0 : index
    %c0_9 = arith.constant 0 : index
    %13 = vector.load %arg6[%c0_8, %c0_9] : memref<128x1024xbf16, #tpu.memory_space<vmem>>, vector<128x1024xbf16>
    %cst_10 = arith.constant dense<0.000000e+00> : vector<64x1024xf32>
    %14 = tpu.matmul %12, %13, %cst_10 {dimension_numbers = #tpu.dot_dimension_numbers<[1], [0], [0], [1], [0, 0, 1, 1], [], []>} : vector<64x128xbf16>, vector<128x1024xbf16>, vector<64x1024xf32> -> vector<64x1024xf32>
    %c0_11 = arith.constant 0 : index
    %c0_12 = arith.constant 0 : index
    %15 = vector.load %arg10[%c0_11, %c0_12] : memref<1x1024xf32, #tpu.memory_space<vmem>>, vector<1x1024xf32>
    %cst_13 = arith.constant dense<0.000000e+00> : vector<1024xf32>
    %16 = vector.multi_reduction <add>, %14, %cst_13 [0] : vector<64x1024xf32> to vector<1024xf32>
    %17 = vector.shape_cast %16 : vector<1024xf32> to vector<1x1024xf32>
    %18 = arith.addf %15, %17 : vector<1x1024xf32>
    %c0_14 = arith.constant 0 : index
    %c0_15 = arith.constant 0 : index
    %19 = vector.load %arg10[%c0_14, %c0_15] : memref<1x1024xf32, #tpu.memory_space<vmem>>, vector<1x1024xf32>
    tpu.vector_store %arg10[%c0_14, %c0_15], %18 {strides = array<i32>} : memref<1x1024xf32, #tpu.memory_space<vmem>>, vector<1x1024xf32>,
    %c0_i32_16 = arith.constant 0 : i32
    %20 = arith.cmpi eq, %arg1, %c0_i32_16 : i32
    %21 = arith.extui %20 : i1 to i32
    %c0_i32_17 = arith.constant 0 : i32
    %22 = arith.cmpi ne, %21, %c0_i32_17 : i32
    scf.if %22 {
      %c0_18 = arith.constant 0 : index
      %c0_19 = arith.constant 0 : index
      %23 = vector.load %arg10[%c0_18, %c0_19] : memref<1x1024xf32, #tpu.memory_space<vmem>>, vector<1x1024xf32>
      %cst_20 = arith.constant 1.562500e-02 : f32
      %24 = vector.broadcast %cst_20 : f32 to vector<1x1024xf32>
      %25 = arith.mulf %23, %24 : vector<1x1024xf32>
      %c0_21 = arith.constant 0 : index
      %c0_22 = arith.constant 0 : index
      %26 = vector.load %arg7[%c0_21, %c0_22] : memref<1x1024xf32, #tpu.memory_space<vmem>>, vector<1x1024xf32>
      %27 = arith.addf %25, %26 : vector<1x1024xf32>
      %c0_23 = arith.constant 0 : index
      %c0_24 = arith.constant 0 : index
      %c0_25 = arith.constant 0 : index
      %28 = vector.load %arg8[%c0_23, %c0_24, %c0_25] : memref<1x1x1024xf32, #tpu.memory_space<vmem>>, vector<1x1x1024xf32>
      %29 = vector.shape_cast %28 : vector<1x1x1024xf32> to vector<1x1024xf32>
      %30 = vector.shape_cast %27 : vector<1x1024xf32> to vector<1x1x1024xf32>
      tpu.vector_store %arg8[%c0_23, %c0_24, %c0_25], %30 {strides = array<i32>} : memref<1x1x1024xf32, #tpu.memory_space<vmem>>, vector<1x1x1024xf32>,
    } else {
    }
    return
  }
  func.func @transform_0(%arg0: i32, %arg1: i32) -> (i32, i32, i32) {
    %c0_i32 = arith.constant 0 : i32
    %c0_i32_0 = arith.constant 0 : i32
    return %arg0, %arg1, %c0_i32 : i32, i32, i32
  }
  func.func @transform_1(%arg0: i32, %arg1: i32) -> (i32, i32, i32) {
    %c0_i32 = arith.constant 0 : i32
    %c0_i32_0 = arith.constant 0 : i32
    %c0_i32_1 = arith.constant 0 : i32
    return %arg0, %c0_i32, %c0_i32_0 : i32, i32, i32
  }
  func.func @transform_2(%arg0: i32, %arg1: i32) -> (i32, i32) {
    %c0_i32 = arith.constant 0 : i32
    %c0_i32_0 = arith.constant 0 : i32
    %c0_i32_1 = arith.constant 0 : i32
    return %c0_i32, %c0_i32_0 : i32, i32
  }
  func.func @transform_3(%arg0: i32, %arg1: i32) -> (i32, i32) {
    %c0_i32 = arith.constant 0 : i32
    %c0_i32_0 = arith.constant 0 : i32
    %c0_i32_1 = arith.constant 0 : i32
    return %c0_i32, %c0_i32_0 : i32, i32
  }
  func.func @transform_4(%arg0: i32, %arg1: i32) -> (i32, i32) {
    %c0_i32 = arith.constant 0 : i32
    %c0_i32_0 = arith.constant 0 : i32
    %c0_i32_1 = arith.constant 0 : i32
    return %c0_i32, %c0_i32_0 : i32, i32
  }
  func.func @transform_5(%arg0: i32, %arg1: i32) -> (i32, i32) {
    %c0_i32 = arith.constant 0 : i32
    %c0_i32_0 = arith.constant 0 : i32
    %c0_i32_1 = arith.constant 0 : i32
    return %c0_i32, %c0_i32_0 : i32, i32
  }
  func.func @transform_6(%arg0: i32, %arg1: i32) -> (i32, i32, i32) {
    %c0_i32 = arith.constant 0 : i32
    %c0_i32_0 = arith.constant 0 : i32
    %c0_i32_1 = arith.constant 0 : i32
    return %arg0, %c0_i32, %c0_i32_0 : i32, i32, i32
  }
}

module attributes {stable_mosaic.version = 11 : i64} {
  func.func @_head_kernel(%arg0: i32, %arg1: memref<2x1024xf32, #tpu.memory_space<vmem>>, %arg2: memref<1024x512xbf16, #tpu.memory_space<vmem>>, %arg3: memref<1x512xf32, #tpu.memory_space<vmem>>, %arg4: memref<512x256xbf16, #tpu.memory_space<vmem>>, %arg5: memref<1x256xf32, #tpu.memory_space<vmem>>, %arg6: memref<256x8xbf16, #tpu.memory_space<vmem>>, %arg7: memref<1x8xf32, #tpu.memory_space<vmem>>, %arg8: memref<2x8xf32, #tpu.memory_space<vmem>>) attributes {dimension_semantics = [#tpu.dimension_semantics<parallel>], iteration_bounds = array<i64: 1>, scalar_prefetch = 0 : i64, scratch_operands = 0 : i64, tpu.core_type = #tpu.core_type<tc>, window_params = [{transform_indices = @transform_0, window_bounds = array<i64: 2, 1024>}, {pipeline_mode = #tpu.pipeline_mode<synchronous>, transform_indices = @transform_1, window_bounds = array<i64: 1024, 512>}, {pipeline_mode = #tpu.pipeline_mode<synchronous>, transform_indices = @transform_2, window_bounds = array<i64: 1, 512>}, {pipeline_mode = #tpu.pipeline_mode<synchronous>, transform_indices = @transform_3, window_bounds = array<i64: 512, 256>}, {pipeline_mode = #tpu.pipeline_mode<synchronous>, transform_indices = @transform_4, window_bounds = array<i64: 1, 256>}, {pipeline_mode = #tpu.pipeline_mode<synchronous>, transform_indices = @transform_5, window_bounds = array<i64: 256, 8>}, {pipeline_mode = #tpu.pipeline_mode<synchronous>, transform_indices = @transform_6, window_bounds = array<i64: 1, 8>}, {transform_indices = @transform_7, window_bounds = array<i64: 2, 8>}]} {
    %c0 = arith.constant 0 : index
    %c0_0 = arith.constant 0 : index
    %0 = vector.load %arg1[%c0, %c0_0] : memref<2x1024xf32, #tpu.memory_space<vmem>>, vector<2x1024xf32>
    %1 = arith.truncf %0 : vector<2x1024xf32> to vector<2x1024xbf16>
    %c0_1 = arith.constant 0 : index
    %c0_2 = arith.constant 0 : index
    %2 = vector.load %arg2[%c0_1, %c0_2] : memref<1024x512xbf16, #tpu.memory_space<vmem>>, vector<1024x512xbf16>
    %cst = arith.constant dense<0.000000e+00> : vector<2x512xf32>
    %3 = tpu.matmul %1, %2, %cst {dimension_numbers = #tpu.dot_dimension_numbers<[1], [0], [0], [1], [0, 0, 1, 1], [], []>} : vector<2x1024xbf16>, vector<1024x512xbf16>, vector<2x512xf32> -> vector<2x512xf32>
    %c0_3 = arith.constant 0 : index
    %c0_4 = arith.constant 0 : index
    %4 = vector.load %arg3[%c0_3, %c0_4] : memref<1x512xf32, #tpu.memory_space<vmem>>, vector<1x512xf32>
    %5 = vector.broadcast %4 : vector<1x512xf32> to vector<2x512xf32>
    %6 = arith.addf %3, %5 : vector<2x512xf32>
    %cst_5 = arith.constant 0.000000e+00 : f32
    %7 = vector.broadcast %cst_5 : f32 to vector<2x512xf32>
    %8 = arith.maximumf %6, %7 : vector<2x512xf32>
    %9 = arith.truncf %8 : vector<2x512xf32> to vector<2x512xbf16>
    %c0_6 = arith.constant 0 : index
    %c0_7 = arith.constant 0 : index
    %10 = vector.load %arg4[%c0_6, %c0_7] : memref<512x256xbf16, #tpu.memory_space<vmem>>, vector<512x256xbf16>
    %cst_8 = arith.constant dense<0.000000e+00> : vector<2x256xf32>
    %11 = tpu.matmul %9, %10, %cst_8 {dimension_numbers = #tpu.dot_dimension_numbers<[1], [0], [0], [1], [0, 0, 1, 1], [], []>} : vector<2x512xbf16>, vector<512x256xbf16>, vector<2x256xf32> -> vector<2x256xf32>
    %c0_9 = arith.constant 0 : index
    %c0_10 = arith.constant 0 : index
    %12 = vector.load %arg5[%c0_9, %c0_10] : memref<1x256xf32, #tpu.memory_space<vmem>>, vector<1x256xf32>
    %13 = vector.broadcast %12 : vector<1x256xf32> to vector<2x256xf32>
    %14 = arith.addf %11, %13 : vector<2x256xf32>
    %cst_11 = arith.constant 0.000000e+00 : f32
    %15 = vector.broadcast %cst_11 : f32 to vector<2x256xf32>
    %16 = arith.maximumf %14, %15 : vector<2x256xf32>
    %17 = arith.truncf %16 : vector<2x256xf32> to vector<2x256xbf16>
    %c0_12 = arith.constant 0 : index
    %c0_13 = arith.constant 0 : index
    %18 = vector.load %arg6[%c0_12, %c0_13] : memref<256x8xbf16, #tpu.memory_space<vmem>>, vector<256x8xbf16>
    %cst_14 = arith.constant dense<0.000000e+00> : vector<2x8xf32>
    %19 = tpu.matmul %17, %18, %cst_14 {dimension_numbers = #tpu.dot_dimension_numbers<[1], [0], [0], [1], [0, 0, 1, 1], [], []>} : vector<2x256xbf16>, vector<256x8xbf16>, vector<2x8xf32> -> vector<2x8xf32>
    %c0_15 = arith.constant 0 : index
    %c0_16 = arith.constant 0 : index
    %20 = vector.load %arg7[%c0_15, %c0_16] : memref<1x8xf32, #tpu.memory_space<vmem>>, vector<1x8xf32>
    %21 = vector.broadcast %20 : vector<1x8xf32> to vector<2x8xf32>
    %22 = arith.addf %19, %21 : vector<2x8xf32>
    %cst_17 = arith.constant dense<0xFF800000> : vector<2xf32>
    %23 = vector.multi_reduction <maximumf>, %22, %cst_17 [1] : vector<2x8xf32> to vector<2xf32>
    %24 = vector.shape_cast %23 : vector<2xf32> to vector<2x1xf32>
    %25 = vector.broadcast %24 : vector<2x1xf32> to vector<2x8xf32>
    %26 = arith.subf %22, %25 : vector<2x8xf32>
    %27 = math.exp %26 : vector<2x8xf32>
    %cst_18 = arith.constant dense<0.000000e+00> : vector<2xf32>
    %28 = vector.multi_reduction <add>, %27, %cst_18 [1] : vector<2x8xf32> to vector<2xf32>
    %29 = vector.shape_cast %28 : vector<2xf32> to vector<2x1xf32>
    %30 = math.log %29 : vector<2x1xf32>
    %31 = vector.broadcast %30 : vector<2x1xf32> to vector<2x8xf32>
    %32 = arith.subf %26, %31 : vector<2x8xf32>
    %c0_19 = arith.constant 0 : index
    %c0_20 = arith.constant 0 : index
    %33 = vector.load %arg8[%c0_19, %c0_20] : memref<2x8xf32, #tpu.memory_space<vmem>>, vector<2x8xf32>
    tpu.vector_store %arg8[%c0_19, %c0_20], %32 {strides = array<i32>} : memref<2x8xf32, #tpu.memory_space<vmem>>, vector<2x8xf32>,
    return
  }
  func.func @transform_0(%arg0: i32) -> (i32, i32) {
    %c0_i32 = arith.constant 0 : i32
    %c0_i32_0 = arith.constant 0 : i32
    return %arg0, %c0_i32 : i32, i32
  }
  func.func @transform_1(%arg0: i32) -> (i32, i32) {
    %c0_i32 = arith.constant 0 : i32
    %c0_i32_0 = arith.constant 0 : i32
    %c0_i32_1 = arith.constant 0 : i32
    return %c0_i32, %c0_i32_0 : i32, i32
  }
  func.func @transform_2(%arg0: i32) -> (i32, i32) {
    %c0_i32 = arith.constant 0 : i32
    %c0_i32_0 = arith.constant 0 : i32
    %c0_i32_1 = arith.constant 0 : i32
    return %c0_i32, %c0_i32_0 : i32, i32
  }
  func.func @transform_3(%arg0: i32) -> (i32, i32) {
    %c0_i32 = arith.constant 0 : i32
    %c0_i32_0 = arith.constant 0 : i32
    %c0_i32_1 = arith.constant 0 : i32
    return %c0_i32, %c0_i32_0 : i32, i32
  }
  func.func @transform_4(%arg0: i32) -> (i32, i32) {
    %c0_i32 = arith.constant 0 : i32
    %c0_i32_0 = arith.constant 0 : i32
    %c0_i32_1 = arith.constant 0 : i32
    return %c0_i32, %c0_i32_0 : i32, i32
  }
  func.func @transform_5(%arg0: i32) -> (i32, i32) {
    %c0_i32 = arith.constant 0 : i32
    %c0_i32_0 = arith.constant 0 : i32
    %c0_i32_1 = arith.constant 0 : i32
    return %c0_i32, %c0_i32_0 : i32, i32
  }
  func.func @transform_6(%arg0: i32) -> (i32, i32) {
    %c0_i32 = arith.constant 0 : i32
    %c0_i32_0 = arith.constant 0 : i32
    %c0_i32_1 = arith.constant 0 : i32
    return %c0_i32, %c0_i32_0 : i32, i32
  }
  func.func @transform_7(%arg0: i32) -> (i32, i32) {
    %c0_i32 = arith.constant 0 : i32
    %c0_i32_0 = arith.constant 0 : i32
    return %arg0, %c0_i32 : i32, i32
  }
}

</mosaic_0001>

<bundles_post_ra>
// kernel: pointnet_mean_forward.9
= control target key start
LH: loop header
LB: loop body
LE: loop exit
PB: predicated region body
PF: predicated region fallthrough
CT: control target
= control target key end

     0   :  { %9 = vsyncpa [#allocation3], 0  ;;  %s943_s0 = inlined_call_operand.vmem [shape: f32[2,64,3], index: 0, kind: input, shape index: {}]   ;;  %s944_s1 = inlined_call_operand.vmem [shape: f32[2,3,3], index: 1, kind: input, shape index: {}]   ;;  %s945_s2 = inlined_call_operand.hbm [shape: bf16[3,64], index: 2, kind: input, shape index: {}]   ;;  %s946_s3 = inlined_call_operand.hbm [shape: f32[1,64], index: 3, kind: input, shape index: {}]   ;;  %s947_s4 = inlined_call_operand.vmem [shape: bf16[2,64,64], index: 4, kind: output, shape index: {}]  }
   0x1   :  { %10 = vsyncpa [#allocation5], 0  ;;  %s830_s15 = smov 0   ;;  %s832_s16 = smov 0  }
   0x2   :  { %s834_s17 = smov 0  }
   0x3 LB: > { %s605_s18 = sadd.s32 4294967295, %s798_s17   ;;  %s28_s19 = sadd.s32 1, %s794_s16  ;;  %s798_s17 = sphi %s834_s17, %s16_s17   ;;  %s794_s16 = sphi %s832_s16, %s955_s16   ;;  %s790_s15 = sphi %s830_s15, %s954_s15  }
   0x4   : > { %p30_p0 = scmp.ge.s32.totalorder %s28_s19, 2  ;;  %p607_p1 = scmp.ge.s32.totalorder %s798_s17, 1 }
   0x5   : > { %p157_p2 = scmp.lt.s32.totalorder %s798_s17, 3  ;;  %p855_p4 = scmp.eq.s32.totalorder %s605_s18, 0 }
   0x6   : > { %s957_s19 = smov (%p30_p0, %s28_s19), 0  ;;  %s800_s22 = smov [#allocation2]  }
   0x7   : > { %p851_p3 = pnand %p607_p1, %p157_p2  ;;  %s170_s23 = sshll.u32 %s800_s22, 4  ;;  %s171_s23 = int_to_ptr.vmem [resolvable:$true] %s170_s23 }
   0x8   : > { %s951_s21 = scalar_select %p855_p4, 1, 0 }
   0x9   : > { %p676_p5 = pneg %p851_p3  ;;  %s801_s24 = smov [#allocation4]  }
   0xa   : > { %s181_s25 = sshll.u32 %s801_s24, 4  ;;  %s727_s27 = scalar_lea.vmem %s171_s23, 32  ;;  %s182_s25 = int_to_ptr.vmem [resolvable:$true] %s181_s25 }
   0xb   : > { %p863_p6 = pnand %p855_p4, %p676_p5  ;;  %p728_p8 = scmp.ne.s32.totalorder %s171_s23, %s727_s27 }
   0xc   : > { %p735_p11 = scmp.lt.s32.totalorder %s171_s23, %s171_s23  ;;  %p736_p12 = scmp.lt.s32.totalorder %s727_s27, %s727_s27 }
   0xd   : > { %p718_p7 = pneg %p863_p6 }
   0xe   : > { %p737_p13 = por %p736_p12, %p735_p11 }
   0xf   : > { %p730_p9 = pnand %p728_p8, %p718_p7 }
  0x11   : > { %p731_p10 = pneg %p730_p9 }
  0x13   : > { %p738_p0 = pnand %p737_p13, %p731_p10 }
  0x15   : > { %741 = shalt.err (!%p738_p0)
}
  0x16   : > { %679 = dma.hbm_to_vmem [thread:$0]  (!%p863_p6), %s945_s2, 32, %s171_s23, [#allocation3]  }
  0x17   : > { %s753_s30 = scalar_lea.vmem %s182_s25, 16  ;;  %s760_s5 = scalar_lea.vmem %s182_s25, 32 }
  0x18   : > { %p754_p1 = scmp.ne.s32.totalorder %s182_s25, %s753_s30  ;;  %p761_p8 = scmp.lt.s32.totalorder %s182_s25, %s182_s25 }
  0x19   : > { %p762_p9 = scmp.lt.s32.totalorder %s760_s5, %s753_s30 }
  0x1a   : > { %p756_p2 = pnand %p754_p1, %p718_p7 }
  0x1b   : > { %p763_p4 = por %p762_p9, %p761_p8 }
  0x1c   : > { %p757_p5 = pneg %p756_p2 }
  0x1e   : > { %p764_p11 = pnand %p763_p4, %p757_p5 }
  0x20   : > { %767 = shalt.err (!%p764_p11)
}
  0x21   : > { %682 = dma.hbm_to_vmem [thread:$0]  (!%p863_p6), %s946_s3, 16, %s182_s25, [#allocation5]  }
  0x22   : > { %214 = sbr.rel (%p851_p3) target bundleno = 466 (0x1d2), region = 36  ;;  %p953_p10 = scmp.ne.s32.totalorder (!%p851_p3), %s951_s21, 0 }
  0x27   : > { %781 = dma.done.wait (%p953_p10), [#allocation3], 32  }
  0x28   : > { %783 = vsyncadd (%p953_p10), [#allocation3], 4294967264 }
  0x29   : > { %785 = dma.done.wait (%p953_p10), [#allocation5], 16  }
  0x2a   : > { %787 = vsyncadd (%p953_p10), [#allocation5], 4294967280  ;;  %vm288_vm0 = vcmask 1040384   ;;  %v802_v0 = vmov 0.0   ;;  %p257_p4 = scmp.lt.s32.totalorder %s790_s15, 1  ;;  %vm289_vm1 = vcmask 1041408  }
  0x2b   : > { %652 = vmatprep.subr.bf16.mxu0 %v802_v0  ;;  %v803_v1 = vmov 65535   ;;  %vm804_vm2 = vmmov 0   ;;  %v283_v4 = vld [vmem:[#allocation2] sm:$0x3]  ;;  %vm284_vm3 = vcmask 23552   ;;  %vm475_vm4 = vcmask 519168  }
  0x2c   : > { %v290_v2 = vsel %vm288_vm0, 4294967295, %v803_v1  ;;  %654 = vmatprep.mubr.msk.bf16.mxu0 %vm804_vm2, %v802_v0  ;;  %s959_s15 = smov (!%p257_p4, %s790_s15), 1  ;;  %v620_v26 = vld [vmem:[#allocation4] ss:$0 sm:$0xff] }
  0x2d   : > { %v291_v3 = vsel %vm289_vm1, %v290_v2, 0  ;;  %s616_s8 = sshll.u32 %s959_s15, 2  ;;  %s635_s12 = sshll.u32 %s959_s15, 6 }
  0x2e   : > { %s269_s11 = scalar_lea.vmem %s944_s1, %s616_s8  ;;  %v293_v6 = vand.u32 %v291_v3, %v283_v4  ;;  %s264_s18 = scalar_lea.vmem %s943_s0, %s635_s12 }
  0x2f   : > { %v281_v5 = vld [vmem:[%s269_s11] sm:$0x7]  ;;  %v336_v9 = vld [vmem:[%s264_s18 + $0x8] sm:$0xff]  ;;  %v337_v14 = vld [vmem:[%s264_s18 + $0x10] sm:$0xff]  ;;  %s636_s20 = sshll.u32 %s959_s15, 5 }
  0x30   : > { %v282_v7 = vpack.c.bf16 %v281_v5, %v281_v5  ;;  %653 = vmatpush3.bf16.msra.mxu0 %v293_v6  ;;  %v335_v8 = vld [vmem:[%s264_s18] sm:$0xff]  ;;  %v338_v15 = vld [vmem:[%s264_s18 + $0x18] sm:$0xff]  ;;  %v340_v18 = vld [vmem:[%s264_s18 + $0x28] sm:$0xff]  ;;  %s916_s23 = scalar_lea.vmem %s947_s4, %s636_s20 }
  0x31   : > { %v343_v10 = vpack.c.bf16 %v336_v9, %v335_v8  ;;  %v339_v17 = vld [vmem:[%s264_s18 + $0x20] sm:$0xff]  ;;  %v344_v20 = vpack.c.bf16 %v338_v15, %v337_v14  ;;  %v341_v23 = vld [vmem:[%s264_s18 + $0x30] sm:$0xff]  ;;  %v342_v24 = vld [vmem:[%s264_s18 + $0x38] sm:$0xff] }
  0x32   : > { %v345_v22 = vpack.c.bf16 %v340_v18, %v339_v17  ;;  %v346_v25 = vpack.c.bf16 %v342_v24, %v341_v23 }
  0x33   : > { %655 = vmatmul.mubr.msk.bf16.vlgmr.msra.gmra.mxu0 %vm284_vm3, %v282_v7  ;;  %660 = vmatprep.mubr.msk.bf16.mxu1 %vm284_vm3, %v343_v10 }
  0xf3   : > { %v329_v11 = vpop.f32.mrf.mxu0 }
  0xf4   : > { %v347_v12 = vpack.c.bf16 %v329_v11, %v329_v11 }
  0xf5   : > { %v656_v13 = vpop.f32.mrf.mxu0 }
  0xf6   : > { %v368_v16 = vand.u32 %v347_v12, %v291_v3 }
  0xf7   : > { %v332_v19 = vpop.f32.mrf.mxu0 }
  0xf8   : > { %658 = vmatprep.subr.bf16.mxu1 %v368_v16 }
  0xf9   : > { %v657_v21 = vpop.f32.mrf.mxu0  ;;  %659 = vmatpush3.bf16.msra.mxu1 %v368_v16 }
  0xfc   : > { %661 = vmatmul.mubr.msk.bf16.vlgmr.msra.gmra.mxu1 %vm284_vm3, %v344_v20 }
  0xfd   : > { %664 = vmatprep.mubr.msk.bf16.mxu1 %vm284_vm3, %v345_v22 }
 0x104   : > { %665 = vmatmul.mubr.msk.bf16.gmra.mxu1 %vm284_vm3, %v346_v25 }
 0x1bc   : > { %v662_v27 = vpop.f32.mrf.mxu1 }
 0x1bd   : > { %v413_v28 = vadd.f32 %v662_v27, %v620_v26 }
 0x1be   : > { %v404_v29 = vpop.f32.mrf.mxu1 }
 0x1bf   : > { %v437_v30 = vmax.f32 %v413_v28, 0.0  ;;  %v405_v31 = vadd.f32 %v620_v26, %v404_v29 }
 0x1c0   : > { %v663_v32 = vpop.f32.mrf.mxu1 }
 0x1c1   : > { %v639_v33 = vpack.c.bf16 %v437_v30, %v437_v30  ;;  %v435_v34 = vmax.f32 %v405_v31, 0.0  ;;  %v416_v35 = vadd.f32 %v663_v32, %v620_v26 }
 0x1c2   : > { %v407_v36 = vpop.f32.mrf.mxu1 }
 0x1c3   : > { %478 = vst.msk [vmem:[%s916_s23 + $0x8] sm:$0xf] %vm475_vm4, %v639_v33  ;;  %v637_v37 = vpack.c.bf16 %v435_v34, %v435_v34  ;;  %v438_v38 = vmax.f32 %v416_v35, 0.0  ;;  %v408_v39 = vadd.f32 %v620_v26, %v407_v36 }
 0x1c4   : > { %v666_v40 = vpop.f32.mrf.mxu1 }
 0x1c5   : > { %476 = vst.msk [vmem:[%s916_s23] sm:$0xf] %vm475_vm4, %v637_v37  ;;  %v640_v41 = vpack.c.bf16 %v438_v38, %v438_v38  ;;  %v436_v42 = vmax.f32 %v408_v39, 0.0  ;;  %v429_v43 = vadd.f32 %v666_v40, %v620_v26 }
 0x1c6   : > { %v420_v44 = vpop.f32.mrf.mxu1 }
 0x1c7   : > { %479 = vst.msk [vmem:[%s916_s23 + $0xc] sm:$0xf] %vm475_vm4, %v640_v41  ;;  %v638_v45 = vpack.c.bf16 %v436_v42, %v436_v42  ;;  %v441_v46 = vmax.f32 %v429_v43, 0.0  ;;  %v421_v47 = vadd.f32 %v620_v26, %v420_v44 }
 0x1c8   : > { %v667_v48 = vpop.f32.mrf.mxu1 }
 0x1c9   : > { %477 = vst.msk [vmem:[%s916_s23 + $0x4] sm:$0xf] %vm475_vm4, %v638_v45  ;;  %v643_v49 = vpack.c.bf16 %v441_v46, %v441_v46  ;;  %v439_v50 = vmax.f32 %v421_v47, 0.0  ;;  %v432_v51 = vadd.f32 %v667_v48, %v620_v26 }
 0x1ca   : > { %v423_v52 = vpop.f32.mrf.mxu1 }
 0x1cb   : > { %482 = vst.msk [vmem:[%s916_s23 + $0x18] sm:$0xf] %vm475_vm4, %v643_v49  ;;  %v641_v53 = vpack.c.bf16 %v439_v50, %v439_v50  ;;  %v442_v54 = vmax.f32 %v432_v51, 0.0  ;;  %v424_v55 = vadd.f32 %v620_v26, %v423_v52 }
 0x1cd   : > { %480 = vst.msk [vmem:[%s916_s23 + $0x10] sm:$0xf] %vm475_vm4, %v641_v53  ;;  %v644_v56 = vpack.c.bf16 %v442_v54, %v442_v54  ;;  %v440_v57 = vmax.f32 %v424_v55, 0.0 }
 0x1cf   : > { %483 = vst.msk [vmem:[%s916_s23 + $0x1c] sm:$0xf] %vm475_vm4, %v644_v56  ;;  %v642_v58 = vpack.c.bf16 %v440_v57, %v440_v57 }
 0x1d1   : > { %481 = vst.msk [vmem:[%s916_s23 + $0x14] sm:$0xf] %vm475_vm4, %v642_v58 }
 0x1d2 PF: > { %s16_s17 = sadd.s32 1, %s798_s17   ;;  %s954_s15 = smov %s794_s16 }
 0x1d3   : > { %p13_p3 = scmp.ge.s32.totalorder %s16_s17, 4   ;;  %s955_s16 = smov %s957_s19 }
 0x1d5   :  { %15 = sbr.rel (!%p13_p3) target bundleno = 3 (0x3), region = 78 }
 0x1da   :  { %514 = vsyncpa [#allocation3], 1 }
 0x1db   :  { %516 = vsyncpa [#allocation3 + $0x1], 1 }
 0x1dc   :  { %517 = vsyncpa [#allocation5], 1 }

// kernel: pointnet_mean_forward.7
= control target key start
LH: loop header
LB: loop body
LE: loop exit
PB: predicated region body
PF: predicated region fallthrough
CT: control target
= control target key end

     0   :  { %12 = vsyncpa [#allocation4], 0  ;;  %s2513_s0 = inlined_call_operand.vmem [shape: f32[2,64,3], index: 0, kind: input, shape index: {}]   ;;  %s2514_s1 = inlined_call_operand.hbm [shape: bf16[3,64], index: 1, kind: input, shape index: {}]   ;;  %s2515_s2 = inlined_call_operand.hbm [shape: f32[1,64], index: 2, kind: input, shape index: {}]   ;;  %s2516_s3 = inlined_call_operand.hbm [shape: bf16[64,128], index: 3, kind: input, shape index: {}]   ;;  %s2517_s4 = inlined_call_operand.hbm [shape: f32[1,128], index: 4, kind: input, shape index: {}]   ;;  %s2518_s5 = inlined_call_operand.hbm [shape: bf16[128,1024], index: 5, kind: input, shape index: {}]   ;;  %s2519_s6 = inlined_call_operand.hbm [shape: f32[1,1024], index: 6, kind: input, shape index: {}]   ;;  %s2520_s7 = inlined_call_operand.vmem [shape: f32[2,1,1024], index: 7, kind: output, shape index: {}]  }
   0x1   :  { %13 = vsyncpa [#allocation6], 0 }
   0x2   :  { %14 = vsyncpa [#allocation9], 0 }
   0x3   :  { %15 = vsyncpa [#allocation12], 0  ;;  %s2202_s24 = smov 0   ;;  %s2204_s25 = smov 0  }
   0x4   :  { %s2206_s26 = smov 0  }
   0x5 LB: > { %s2149_s27 = smov [#allocation5]   ;;  %s1717_s29 = sadd.s32 4294967295, %s2147_s26   ;;  %s2147_s26 = sphi %s2206_s26, %s21_s26   ;;  %s2143_s25 = sphi %s2204_s25, %s2533_s25   ;;  %s2139_s24 = sphi %s2202_s24, %s2532_s24  }
   0x6   : > { %s242_s28 = sshll.u32 %s2149_s27, 4  ;;  %p1719_p0 = scmp.ge.s32.totalorder %s2147_s26, 1  ;;  %s243_s28 = int_to_ptr.vmem [resolvable:$true] %s242_s28 }
   0x7   : > { %p218_p1 = scmp.lt.s32.totalorder %s2147_s26, 3  ;;  %p2220_p2 = scmp.eq.s32.totalorder %s1717_s29, 0 }
   0x8   : > { %s2150_s9 = smov [#allocation8]   ;;  %s33_s12 = sadd.s32 1, %s2143_s25 }
   0x9   : > { %s2524_s30 = scalar_select %p2220_p2, 1, 0 }
   0xa   : > { %p2224_p3 = pnand %p1719_p0, %p218_p1  ;;  %s266_s10 = sshll.u32 %s2150_s9, 4  ;;  %s267_s10 = int_to_ptr.vmem [resolvable:$true] %s266_s10 }
   0xb   : > { %p2237_p6 = scmp.ge.s32.totalorder %s33_s12, 2  ;;  %s1964_s15 = scalar_lea.vmem %s243_s28, 16 }
   0xc   : > { %s2525_s8 = scalar_select %p2224_p3, 1, 0 }
   0xd   : > { %p1881_p4 = pneg %p2224_p3  ;;  %p1965_p8 = scmp.ne.s32.totalorder %s243_s28, %s1964_s15 }
   0xe   : > { %s2527_s13 = scalar_select %p2237_p6, 1, 0 }
   0xf   : > { %p2232_p5 = pnand %p2220_p2, %p1881_p4  ;;  %s1971_s16 = scalar_lea.vmem %s243_s28, 32 }
  0x10   : > { %p1972_p11 = scmp.lt.s32.totalorder %s243_s28, %s243_s28  ;;  %p1973_p12 = scmp.lt.s32.totalorder %s1971_s16, %s1964_s15 }
  0x11   : > { %p2243_p7 = pneg %p2232_p5 }
  0x12   : > { %p1974_p13 = por %p1973_p12, %p1972_p11 }
  0x13   : > { %p1967_p9 = pnand %p1965_p8, %p2243_p7 }
  0x15   : > { %p1968_p10 = pneg %p1967_p9 }
  0x17   : > { %p1975_p0 = pnand %p1974_p13, %p1968_p10 }
  0x19   : > { %1978 = shalt.err (!%p1975_p0)
}
  0x1a   : > { %1887 = dma.hbm_to_vmem [thread:$0]  (!%p2232_p5), %s2515_s2, 16, %s243_s28, [#allocation6]  }
  0x1b   : > { %s1990_s19 = scalar_lea.vmem %s267_s10, 16  ;;  %s1997_s20 = scalar_lea.vmem %s267_s10, 32 }
  0x1c   : > { %p1991_p1 = scmp.ne.s32.totalorder %s267_s10, %s1990_s19  ;;  %p1998_p8 = scmp.lt.s32.totalorder %s267_s10, %s267_s10 }
  0x1d   : > { %p1999_p9 = scmp.lt.s32.totalorder %s1997_s20, %s1990_s19 }
  0x1e   : > { %p1993_p4 = pnand %p1991_p1, %p2243_p7 }
  0x1f   : > { %p2000_p3 = por %p1999_p9, %p1998_p8 }
  0x20   : > { %p1994_p2 = pneg %p1993_p4 }
  0x22   : > { %p2001_p6 = pnand %p2000_p3, %p1994_p2 }
  0x24   : > { %2004 = shalt.err (!%p2001_p6)
}
  0x25   : > { %1893 = dma.hbm_to_vmem [thread:$0]  (!%p2232_p5), %s2517_s4, 16, %s267_s10, [#allocation9]  }
  0x26   : > { %p2529_p10 = scmp.ne.s32.totalorder %s2527_s13, 0  ;;  %s2151_s23 = smov [#allocation3]  }
  0x27   : > { %s231_s27 = sshll.u32 %s2151_s23, 4  ;;  %s2152_s28 = smov [#allocation7]   ;;  %s232_s27 = int_to_ptr.vmem [resolvable:$true] %s231_s27 }
  0x28   : > { %s2535_s12 = smov (%p2529_p10, %s33_s12), 0  ;;  %s252_s29 = sshll.u32 %s2152_s28, 4  ;;  %s253_s29 = int_to_ptr.vmem [resolvable:$true] %s252_s29 }
  0x29   : > { %s2016_s9 = scalar_lea.vmem %s232_s27, 32  ;;  %p2024_p6 = scmp.lt.s32.totalorder %s232_s27, %s232_s27 }
  0x2a   : > { %p2017_p11 = scmp.ne.s32.totalorder %s232_s27, %s2016_s9  ;;  %p2025_p12 = scmp.lt.s32.totalorder %s2016_s9, %s2016_s9 }
  0x2c   : > { %p2019_p2 = pnand %p2017_p11, %p2243_p7  ;;  %p2026_p13 = por %p2025_p12, %p2024_p6 }
  0x2e   : > { %p2020_p3 = pneg %p2019_p2 }
  0x30   : > { %p2027_p0 = pnand %p2026_p13, %p2020_p3 }
  0x32   : > { %2030 = shalt.err (!%p2027_p0)
}
  0x33   : > { %1884 = dma.hbm_to_vmem [thread:$0]  (!%p2232_p5), %s2514_s1, 32, %s232_s27, [#allocation4]  }
  0x34   : > { %s2042_s15 = scalar_lea.vmem %s253_s29, 512  ;;  %p2050_p9 = scmp.lt.s32.totalorder %s253_s29, %s253_s29 }
  0x35   : > { %p2043_p1 = scmp.ne.s32.totalorder %s253_s29, %s2042_s15  ;;  %p2051_p10 = scmp.lt.s32.totalorder %s2042_s15, %s2042_s15 }
  0x37   : > { %p2045_p4 = pnand %p2043_p1, %p2243_p7  ;;  %p2052_p11 = por %p2051_p10, %p2050_p9 }
  0x39   : > { %p2046_p8 = pneg %p2045_p4 }
  0x3b   : > { %p2053_p2 = pnand %p2052_p11, %p2046_p8 }
  0x3d   : > { %2056 = shalt.err (!%p2053_p2)
}
  0x3e   : > { %s2153_s16 = smov 64   ;;  %s2154_s17 = smov 4  }
  0x3f   : > { %1890 = dma.hbm_to_vmem [thread:$0]  (!%p2232_p5), %s2516_s3, 512, %s253_s29, [#allocation6], %s2153_s16, %s2153_s16, %s2154_s17  }
  0x40   : > { %s2155_s20 = smov [#allocation10]  }
  0x41   : > { %s276_s21 = sshll.u32 %s2155_s20, 4  ;;  %s277_s21 = int_to_ptr.vmem [resolvable:$true] %s276_s21 }
  0x42   : > { %s2068_s22 = scalar_lea.vmem %s277_s21, 8192  ;;  %p2076_p13 = scmp.lt.s32.totalorder %s277_s21, %s277_s21 }
  0x43   : > { %p2069_p3 = scmp.ne.s32.totalorder %s277_s21, %s2068_s22  ;;  %p2077_p0 = scmp.lt.s32.totalorder %s2068_s22, %s2068_s22 }
  0x45   : > { %p2071_p6 = pnand %p2069_p3, %p2243_p7  ;;  %p2078_p1 = por %p2077_p0, %p2076_p13 }
  0x47   : > { %p2072_p12 = pneg %p2071_p6 }
  0x49   : > { %p2079_p4 = pnand %p2078_p1, %p2072_p12 }
  0x4b   : > { %2082 = shalt.err (!%p2079_p4)
}
  0x4c   : > { %s2156_s23 = smov 512   ;;  %s2157_s27 = smov 32  }
  0x4d   : > { %1896 = dma.hbm_to_vmem [thread:$0]  (!%p2232_p5), %s2518_s5, 8192, %s277_s21, [#allocation9], %s2156_s23, %s2156_s23, %s2157_s27  }
  0x4e   : > { %s2158_s9 = smov [#allocation11]  }
  0x4f   : > { %s290_s10 = sshll.u32 %s2158_s9, 4  ;;  %s291_s10 = int_to_ptr.vmem [resolvable:$true] %s290_s10 }
  0x50   : > { %s2094_s13 = scalar_lea.vmem %s291_s10, 128  ;;  %p2102_p11 = scmp.lt.s32.totalorder %s291_s10, %s291_s10 }
  0x51   : > { %p2095_p8 = scmp.ne.s32.totalorder %s291_s10, %s2094_s13  ;;  %p2103_p2 = scmp.lt.s32.totalorder %s2094_s13, %s2094_s13 }
  0x53   : > { %p2097_p9 = pnand %p2095_p8, %p2243_p7  ;;  %p2104_p3 = por %p2103_p2, %p2102_p11 }
  0x55   : > { %p2098_p10 = pneg %p2097_p9 }
  0x57   : > { %p2105_p6 = pnand %p2104_p3, %p2098_p10 }
  0x59   : > { %2108 = shalt.err (!%p2105_p6)
}
  0x5a   : > { %1899 = dma.hbm_to_vmem [thread:$0]  (!%p2232_p5), %s2519_s6, 128, %s291_s10, [#allocation12]  }
  0x5b   : > { %p2530_p12 = scmp.ne.s32.totalorder %s2525_s8, 0 }
  0x5c   : > { %p2531_p13 = scmp.ne.s32.totalorder (!%p2530_p12), %s2524_s30, 0 }
  0x5d   : > { %316 = sbr.rel (%p2530_p12) target bundleno = 809 (0x329), region = 48 }
  0x62   : > { %2122 = dma.done.wait (%p2531_p13), [#allocation4], 32  }
  0x63   : > { %2124 = vsyncadd (%p2531_p13), [#allocation4], 4294967264 }
  0x64   : > { %2126 = dma.done.wait (%p2531_p13), [#allocation6], 528  }
  0x65   : > { %2128 = vsyncadd (%p2531_p13), [#allocation6], 4294966768 }
  0x66   : > { %2130 = dma.done.wait (%p2531_p13), [#allocation9], 8208  }
  0x67   : > { %2132 = vsyncadd (%p2531_p13), [#allocation9], 4294959088 }
  0x68   : > { %2134 = dma.done.wait (%p2531_p13), [#allocation12], 128  }
  0x69   : > { %2136 = vsyncadd (%p2531_p13), [#allocation12], 4294967168  ;;  %vm424_vm0 = vcmask 1040384   ;;  %p372_p5 = scmp.lt.s32.totalorder %s2139_s24, 1  ;;  %vm425_vm1 = vcmask 1041408   ;;  %v2159_v0 = vmov 65535  }
  0x6a   : > { %v426_v1 = vsel %vm424_vm0, 4294967295, %v2159_v0  ;;  %v403_v3 = vld [vmem:[#allocation3] sm:$0x3]  ;;  %vm411_vm2 = vcmask 23552   ;;  %v1950_v18 = vld [vmem:[#allocation7 + $0x10] sm:$0xff]   ;;  %v1951_v19 = vld [vmem:[#allocation7 + $0x8] sm:$0xff]  }
  0x6b   : > { %s2537_s24 = smov (!%p372_p5, %s2139_s24), 1  ;;  %v427_v2 = vsel %vm425_vm1, %v426_v1, 0  ;;  %v1949_v13 = vld [vmem:[#allocation7 + $0x18] sm:$0xff]   ;;  %v1952_v20 = vld [vmem:[#allocation7] sm:$0xff]   ;;  %v2323_v23 = vld [vmem:[#allocation10 + $0x1c8] sm:$0xff]  ;;  %vm547_vm3 = vcmask 523264  }
  0x6c   : > { %s1817_s8 = sshll.u32 %s2537_s24, 6  ;;  %v429_v6 = vand.u32 %v427_v2, %v403_v3  ;;  %1841 = vmatprep.subr.bf16.mxu1 %v1949_v13  ;;  %v693_v21 = vld [vmem:[#allocation10 + $0x1c0] sm:$0xff]  ;;  %v2325_v26 = vld [vmem:[#allocation10 + $0x1e8] sm:$0xff]  ;;  %v1737_v47 = vld [vmem:[#allocation5] ss:$0 sm:$0xff]  ;;  %s1736_s30 = sshll.u32 %s2537_s24, 3 }
  0x6d   : > { %s379_s17 = scalar_lea.vmem %s2513_s0, %s1817_s8  ;;  %1842 = vmatpush3.bf16.msra.mxu1 %v1949_v13  ;;  %v697_v22 = vld [vmem:[#allocation10 + $0x1e0] sm:$0xff]  ;;  %v1809_v29 = vcombine.low %v2323_v23, %v2325_v26  ;;  %v1810_v30 = vcombine.high %v2323_v23, %v2325_v26  ;;  %v686_v58 = vld [vmem:[#allocation10 + $0x188] sm:$0xff]  ;;  %s384_s20 = scalar_lea.vmem %s2520_s7, %s1736_s30 }
  0x6e   : > { %v391_v4 = vld [vmem:[%s379_s17] sm:$0xff]  ;;  %v392_v5 = vld [vmem:[%s379_s17 + $0x8] sm:$0xff]  ;;  %v393_v8 = vld [vmem:[%s379_s17 + $0x10] sm:$0xff]  ;;  %1831 = vmatprep.subr.bf16.mxu0 %v429_v6  ;;  %1843 = vmatprep.subr.bf16.mxu1 %v1950_v18  ;;  %v1807_v24 = vcombine.low %v693_v21, %v697_v22  ;;  %v1808_v25 = vcombine.high %v693_v21, %v697_v22 }
  0x6f   : > { %v399_v7 = vpack.c.bf16 %v392_v5, %v391_v4  ;;  %v394_v9 = vld [vmem:[%s379_s17 + $0x18] sm:$0xff]  ;;  %v395_v10 = vld [vmem:[%s379_s17 + $0x20] sm:$0xff]  ;;  %v396_v11 = vld [vmem:[%s379_s17 + $0x28] sm:$0xff]  ;;  %1832 = vmatpush3.bf16.msra.mxu0 %v429_v6 }
  0x70   : > { %v400_v12 = vpack.c.bf16 %v394_v9, %v393_v8  ;;  %v401_v14 = vpack.c.bf16 %v396_v11, %v395_v10  ;;  %v397_v15 = vld [vmem:[%s379_s17 + $0x30] sm:$0xff]  ;;  %v398_v16 = vld [vmem:[%s379_s17 + $0x38] sm:$0xff]  ;;  %v685_v27 = vld [vmem:[#allocation10 + $0x180] sm:$0xff]  ;;  %1063 = vmatprep.subr.bf16.mxu0 %v1808_v25 }
  0x71   : > { %1833 = vmatprep.mubr.msk.bf16.mxu0 %vm411_vm2, %v399_v7  ;;  %v402_v17 = vpack.c.bf16 %v398_v16, %v397_v15  ;;  %1844 = vmatpush3.bf16.msra.mxu1 %v1950_v18  ;;  %v689_v28 = vld [vmem:[#allocation10 + $0x1a0] sm:$0xff]  ;;  %v690_v59 = vld [vmem:[#allocation10 + $0x1a8] sm:$0xff] }
  0x72   : > { %1834 = vmatmul.mubr.msk.bf16.vlgmr.msra.gmra.mxu0 %vm411_vm2, %v400_v12  ;;  %1845 = vmatprep.subr.bf16.mxu1 %v1951_v19  ;;  %v1800_v31 = vcombine.high %v685_v27, %v689_v28  ;;  %v677_v32 = vld [vmem:[#allocation10 + $0x140] sm:$0xff]  ;;  %v1799_v34 = vcombine.low %v685_v27, %v689_v28  ;;  %v1802_v3 = vcombine.high %v686_v58, %v690_v59  ;;  %v678_v5 = vld [vmem:[#allocation10 + $0x148] sm:$0xff] }
  0x73   : > { %1837 = vmatprep.mubr.msk.bf16.mxu0 %vm411_vm2, %v401_v14  ;;  %v681_v33 = vld [vmem:[#allocation10 + $0x160] sm:$0xff]  ;;  %1064 = vmatpush1.bf16.msra.mxu0 %v1807_v24  ;;  %v682_v6 = vld [vmem:[#allocation10 + $0x168] sm:$0xff]  ;;  %v1801_v12 = vcombine.low %v686_v58, %v690_v59 }
  0x74   : > { %1065 = vmatprep.subr.bf16.mxu0 %v1800_v31  ;;  %v1792_v35 = vcombine.high %v677_v32, %v681_v33  ;;  %v669_v36 = vld [vmem:[#allocation10 + $0x100] sm:$0xff]  ;;  %v1791_v38 = vcombine.low %v677_v32, %v681_v33  ;;  %v1794_v13 = vcombine.high %v678_v5, %v682_v6  ;;  %v670_v15 = vld [vmem:[#allocation10 + $0x108] sm:$0xff] }
  0x75   : > { %1846 = vmatpush3.bf16.msra.mxu1 %v1951_v19  ;;  %v673_v37 = vld [vmem:[#allocation10 + $0x120] sm:$0xff]  ;;  %v674_v16 = vld [vmem:[#allocation10 + $0x128] sm:$0xff]  ;;  %v1793_v19 = vcombine.low %v678_v5, %v682_v6  ;;  %v688_v5 = vld [vmem:[#allocation10 + $0x198] sm:$0xff] }
  0x76   : > { %1847 = vmatprep.subr.bf16.mxu1 %v1952_v20  ;;  %v1784_v39 = vcombine.high %v669_v36, %v673_v37  ;;  %v661_v40 = vld [vmem:[#allocation10 + $0xc0] sm:$0xff]  ;;  %v1783_v42 = vcombine.low %v669_v36, %v673_v37  ;;  %v662_v21 = vld [vmem:[#allocation10 + $0xc8] sm:$0xff]  ;;  %v1785_v23 = vcombine.low %v670_v15, %v674_v16  ;;  %v692_v6 = vld [vmem:[#allocation10 + $0x1b8] sm:$0xff] }
  0x77   : > { %1066 = vmatpush1.bf16.msra.mxu0 %v1799_v34  ;;  %v665_v41 = vld [vmem:[#allocation10 + $0xe0] sm:$0xff]  ;;  %v666_v22 = vld [vmem:[#allocation10 + $0xe8] sm:$0xff] }
  0x78   : > { %1067 = vmatprep.subr.bf16.mxu0 %v1792_v35  ;;  %v1776_v43 = vcombine.high %v661_v40, %v665_v41  ;;  %v1775_v44 = vcombine.low %v661_v40, %v665_v41  ;;  %v1778_v24 = vcombine.high %v662_v21, %v666_v22  ;;  %v1777_v25 = vcombine.low %v662_v21, %v666_v22  ;;  %v653_v26 = vld [vmem:[#allocation10 + $0x80] sm:$0xff]  ;;  %v654_v28 = vld [vmem:[#allocation10 + $0x88] sm:$0xff] }
  0x79   : > { %1848 = vmatpush3.bf16.msra.mxu1 %v1952_v20  ;;  %v1786_v20 = vcombine.high %v670_v15, %v674_v16  ;;  %v657_v27 = vld [vmem:[#allocation10 + $0xa0] sm:$0xff]  ;;  %v646_v36 = vld [vmem:[#allocation10 + $0x48] sm:$0xff]  ;;  %v683_v16 = vld [vmem:[#allocation10 + $0x170] sm:$0xff]  ;;  %v1805_v21 = vcombine.low %v688_v5, %v692_v6 }
  0x7a   : > { %1838 = vmatmul.mubr.msk.bf16.gmra.mxu0 %vm411_vm2, %v402_v17  ;;  %1136 = vmatprep.subr.bf16.mxu1 %v1810_v30  ;;  %v658_v30 = vld [vmem:[#allocation10 + $0xa8] sm:$0xff]  ;;  %v1767_v31 = vcombine.low %v653_v26, %v657_v27  ;;  %v645_v34 = vld [vmem:[#allocation10 + $0x40] sm:$0xff] }
  0x7b   : > { %1068 = vmatpush1.bf16.msra.mxu0 %v1791_v38  ;;  %v1769_v32 = vcombine.low %v654_v28, %v658_v30  ;;  %v1770_v33 = vcombine.high %v654_v28, %v658_v30  ;;  %v649_v35 = vld [vmem:[#allocation10 + $0x60] sm:$0xff]  ;;  %v650_v38 = vld [vmem:[#allocation10 + $0x68] sm:$0xff]  ;;  %v672_v28 = vld [vmem:[#allocation10 + $0x118] sm:$0xff] }
  0x7c   : > { %1069 = vmatprep.subr.bf16.mxu0 %v1784_v39  ;;  %v1760_v37 = vcombine.high %v645_v34, %v649_v35  ;;  %v1759_v39 = vcombine.low %v645_v34, %v649_v35  ;;  %v1761_v40 = vcombine.low %v646_v36, %v650_v38  ;;  %v1762_v41 = vcombine.high %v646_v36, %v650_v38  ;;  %v667_v38 = vld [vmem:[#allocation10 + $0xf0] sm:$0xff] }
  0x7f   : > { %1070 = vmatpush1.bf16.msra.mxu0 %v1783_v42  ;;  %v637_v42 = vld [vmem:[#allocation10] sm:$0xff] }
  0x80   : > { %1071 = vmatprep.subr.bf16.mxu0 %v1776_v43  ;;  %v641_v43 = vld [vmem:[#allocation10 + $0x20] sm:$0xff] }
  0x83   : > { %1072 = vmatpush1.bf16.msra.mxu0 %v1775_v44  ;;  %v638_v44 = vld [vmem:[#allocation10 + $0x8] sm:$0xff] }
 0x132   : > { %v1835_v45 = vpop.f32.mrf.mxu0 }
 0x133   : > { %v474_v51 = vadd.f32 %v1835_v45, %v1737_v47  ;;  %v1752_v45 = vcombine.high %v637_v42, %v641_v43 }
 0x134   : > { %v465_v46 = vpop.f32.mrf.mxu0 }
 0x135   : > { %v466_v49 = vadd.f32 %v1737_v47, %v465_v46  ;;  %v498_v60 = vmax.f32 %v474_v51, 0.0  ;;  %v642_v46 = vld [vmem:[#allocation10 + $0x28] sm:$0xff]  ;;  %v699_v51 = vld [vmem:[#allocation10 + $0x1f0] sm:$0xff] }
 0x136   : > { %v1836_v48 = vpop.f32.mrf.mxu0 }
 0x137   : > { %v477_v50 = vadd.f32 %v1836_v48, %v1737_v47  ;;  %v496_v56 = vmax.f32 %v466_v49, 0.0  ;;  %v1753_v48 = vcombine.low %v638_v44, %v642_v46  ;;  %v1754_v49 = vcombine.high %v638_v44, %v642_v46 }
 0x138   : > { %v468_v52 = vpop.f32.mrf.mxu0 }
 0x139   : > { %v469_v53 = vadd.f32 %v1737_v47, %v468_v52  ;;  %v499_v54 = vmax.f32 %v477_v50, 0.0  ;;  %v695_v50 = vld [vmem:[#allocation10 + $0x1d0] sm:$0xff]  ;;  %v696_v52 = vld [vmem:[#allocation10 + $0x1d8] sm:$0xff] }
 0x13a   : > { %v1839_v55 = vpop.f32.mrf.mxu0 }
 0x13b   : > { %v497_v57 = vmax.f32 %v469_v53, 0.0  ;;  %v490_v61 = vadd.f32 %v1839_v55, %v1737_v47  ;;  %v505_v1 = vpack.c.bf16 %v499_v54, %v498_v60  ;;  %v1812_v53 = vcombine.high %v695_v50, %v699_v51  ;;  %v700_v54 = vld [vmem:[#allocation10 + $0x1f8] sm:$0xff] }
 0x13c   : > { %v481_v62 = vpop.f32.mrf.mxu0  ;;  %v2160_v55 = vmov 0   ;;  %v1814_v58 = vcombine.high %v696_v52, %v700_v54 }
 0x13d   : > { %v482_v63 = vadd.f32 %v1737_v47, %v481_v62  ;;  %v504_v0 = vpack.c.bf16 %v497_v57, %v496_v56  ;;  %v502_v7 = vmax.f32 %v490_v61, 0.0  ;;  %1095 = vmatprep.mubr.bf16.mxu0 %v2160_v55  ;;  %v1811_v56 = vcombine.low %v695_v50, %v699_v51  ;;  %v2337_v61 = vld [vmem:[#allocation8] ss:$0 sm:$0xff] }
 0x13e   : > { %v1840_v2 = vpop.f32.mrf.mxu0  ;;  %v1813_v57 = vcombine.low %v696_v52, %v700_v54  ;;  %v660_v50 = vld [vmem:[#allocation10 + $0xb8] sm:$0xff] }
 0x13f   : > { %v493_v4 = vadd.f32 %v1840_v2, %v1737_v47  ;;  %1849 = vmatprep.mubr.msk.bf16.mxu1 %vm547_vm3, %v504_v0  ;;  %v500_v9 = vmax.f32 %v482_v63, 0.0  ;;  %v687_v2 = vld [vmem:[#allocation10 + $0x190] sm:$0xff] }
 0x140   : > { %v484_v8 = vpop.f32.mrf.mxu0  ;;  %1850 = vmatmul.mubr.msk.bf16.vlgmr.msra.gmra.mxu1 %vm547_vm3, %v505_v1 }
 0x141   : > { %v503_v10 = vmax.f32 %v493_v4, 0.0  ;;  %v485_v11 = vadd.f32 %v1737_v47, %v484_v8  ;;  %1137 = vmatpush1.bf16.msra.mxu1 %v1809_v29  ;;  %v1768_v29 = vcombine.high %v653_v26, %v657_v27  ;;  %v1751_v47 = vcombine.low %v637_v42, %v641_v43  ;;  %v691_v4 = vld [vmem:[#allocation10 + $0x1b0] sm:$0xff] }
 0x142   : > { %1138 = vmatprep.subr.bf16.mxu1 %v1802_v3  ;;  %v675_v26 = vld [vmem:[#allocation10 + $0x130] sm:$0xff] }
 0x143   : > { %v501_v14 = vmax.f32 %v485_v11, 0.0  ;;  %v507_v17 = vpack.c.bf16 %v503_v10, %v502_v7  ;;  %1073 = vmatprep.subr.bf16.mxu0 %v1768_v29  ;;  %v676_v29 = vld [vmem:[#allocation10 + $0x138] sm:$0xff] }
 0x144   : > { %1074 = vmatpush1.bf16.msra.mxu0 %v1767_v31  ;;  %v1790_v36 = vcombine.high %v672_v28, %v676_v29  ;;  %v1789_v43 = vcombine.low %v672_v28, %v676_v29 }
 0x145   : > { %v506_v18 = vpack.c.bf16 %v501_v14, %v500_v9  ;;  %1139 = vmatpush1.bf16.msra.mxu1 %v1801_v12  ;;  %1075 = vmatprep.subr.bf16.mxu0 %v1760_v37  ;;  %v1804_v12 = vcombine.high %v687_v2, %v691_v4  ;;  %v679_v14 = vld [vmem:[#allocation10 + $0x150] sm:$0xff] }
 0x146   : > { %1140 = vmatprep.subr.bf16.mxu1 %v1794_v13  ;;  %v1806_v13 = vcombine.high %v688_v5, %v692_v6  ;;  %v1795_v31 = vcombine.low %v679_v14, %v683_v16  ;;  %v663_v37 = vld [vmem:[#allocation10 + $0xd0] sm:$0xff] }
 0x147   : > { %1853 = vmatprep.mubr.msk.bf16.mxu1 %vm547_vm3, %v506_v18  ;;  %v684_v18 = vld [vmem:[#allocation10 + $0x178] sm:$0xff]  ;;  %v1779_v52 = vcombine.low %v663_v37, %v667_v38 }
 0x148   : > { %1854 = vmatmul.mubr.msk.bf16.gmra.mxu1 %vm547_vm3, %v507_v17  ;;  %1076 = vmatpush1.bf16.msra.mxu0 %v1759_v39  ;;  %v680_v17 = vld [vmem:[#allocation10 + $0x158] sm:$0xff] }
 0x149   : > { %1141 = vmatpush1.bf16.msra.mxu1 %v1793_v19  ;;  %1077 = vmatprep.subr.bf16.mxu0 %v1752_v45  ;;  %v664_v39 = vld [vmem:[#allocation10 + $0xd8] sm:$0xff]  ;;  %v1780_v45 = vcombine.high %v663_v37, %v667_v38 }
 0x14a   : > { %1142 = vmatprep.subr.bf16.mxu1 %v1786_v20  ;;  %1168 = vmatprep.mubr.bf16.mxu1 %v2160_v55  ;;  %v1803_v20 = vcombine.low %v687_v2, %v691_v4 }
 0x14c   : > { %1078 = vmatpush1.bf16.msra.mxu0 %v1751_v47  ;;  %v655_v47 = vld [vmem:[#allocation10 + $0x90] sm:$0xff] }
 0x14d   : > { %1143 = vmatpush1.bf16.msra.mxu1 %v1785_v23  ;;  %1209 = vmatprep.subr.bf16.mxu0 %v1812_v53  ;;  %v1796_v23 = vcombine.high %v679_v14, %v683_v16 }
 0x14e   : > { %1144 = vmatprep.subr.bf16.mxu1 %v1778_v24  ;;  %v1798_v24 = vcombine.high %v680_v17, %v684_v18 }
 0x151   : > { %1145 = vmatpush1.bf16.msra.mxu1 %v1777_v25  ;;  %v671_v25 = vld [vmem:[#allocation10 + $0x110] sm:$0xff] }
 0x152   : > { %1146 = vmatprep.subr.bf16.mxu1 %v1770_v33  ;;  %v1788_v33 = vcombine.high %v671_v25, %v675_v26  ;;  %v1787_v42 = vcombine.low %v671_v25, %v675_v26  ;;  %v2380_v25 = vld [vmem:[#allocation11] sm:$0xff] }
 0x155   : > { %1147 = vmatpush1.bf16.msra.mxu1 %v1769_v32  ;;  %v1797_v32 = vcombine.low %v680_v17, %v684_v18 }
 0x156   : > { %1148 = vmatprep.subr.bf16.mxu1 %v1762_v41 }
 0x159   : > { %1149 = vmatpush1.bf16.msra.mxu1 %v1761_v40  ;;  %v668_v40 = vld [vmem:[#allocation10 + $0xf8] sm:$0xff] }
 0x15a   : > { %1150 = vmatprep.subr.bf16.mxu1 %v1754_v49  ;;  %v1782_v46 = vcombine.high %v664_v39, %v668_v40  ;;  %v656_v49 = vld [vmem:[#allocation10 + $0x98] sm:$0xff]  ;;  %v1781_v53 = vcombine.low %v664_v39, %v668_v40 }
 0x15b   : > { %v1773_v2 = vcombine.low %v656_v49, %v660_v50 }
 0x15d   : > { %1151 = vmatpush1.bf16.msra.mxu1 %v1753_v48  ;;  %v659_v48 = vld [vmem:[#allocation10 + $0xb0] sm:$0xff] }
 0x15e   : > { %1282 = vmatprep.subr.bf16.mxu1 %v1814_v58  ;;  %v1772_v54 = vcombine.high %v655_v47, %v659_v48  ;;  %v1774_v58 = vcombine.high %v656_v49, %v660_v50 }
 0x200   : > { %v1851_v59 = vpop.f32.mrf.mxu1 }
 0x201   : > { %v603_v19 = vadd.f32 %v1851_v59, %v2337_v61  ;;  %v647_v59 = vld [vmem:[#allocation10 + $0x50] sm:$0xff] }
 0x202   : > { %v594_v60 = vpop.f32.mrf.mxu1 }
 0x203   : > { %v595_v63 = vadd.f32 %v2337_v61, %v594_v60  ;;  %v627_v30 = vmax.f32 %v603_v19, 0.0  ;;  %v651_v60 = vld [vmem:[#allocation10 + $0x70] sm:$0xff] }
 0x204   : > { %v1852_v62 = vpop.f32.mrf.mxu1  ;;  %v1764_v5 = vcombine.high %v647_v59, %v651_v60 }
 0x205   : > { %v625_v7 = vmax.f32 %v595_v63, 0.0  ;;  %v606_v10 = vadd.f32 %v1852_v62, %v2337_v61  ;;  %v648_v62 = vld [vmem:[#allocation10 + $0x58] sm:$0xff] }
 0x206   : > { %v597_v0 = vpop.f32.mrf.mxu1  ;;  %v652_v63 = vld [vmem:[#allocation10 + $0x78] sm:$0xff] }
 0x207   : > { %v598_v1 = vadd.f32 %v2337_v61, %v597_v0  ;;  %v628_v22 = vmax.f32 %v606_v10, 0.0  ;;  %v1766_v6 = vcombine.high %v648_v62, %v652_v63  ;;  %v644_v10 = vld [vmem:[#allocation10 + $0x38] sm:$0xff] }
 0x208   : > { %v2341_v3 = vpop.f32.mrf.mxu1 }
 0x209   : > { %v626_v8 = vmax.f32 %v598_v1, 0.0  ;;  %v2351_v34 = vpack.c.bf16 %v628_v22, %v627_v30  ;;  %v619_v0 = vadd.f32 %v2341_v3, %v2337_v61  ;;  %v1771_v1 = vcombine.low %v655_v47, %v659_v48 }
 0x20a   : > { %v610_v9 = vpop.f32.mrf.mxu1  ;;  %v1763_v3 = vcombine.low %v647_v59, %v651_v60 }
 0x20b   : > { %v2344_v11 = vpack.c.bf16 %v626_v8, %v625_v7  ;;  %v611_v41 = vadd.f32 %v2337_v61, %v610_v9  ;;  %v639_v7 = vld [vmem:[#allocation10 + $0x10] sm:$0xff]  ;;  %v640_v9 = vld [vmem:[#allocation10 + $0x18] sm:$0xff] }
 0x20c   : > { %v1856_v15 = vpop.f32.mrf.mxu1  ;;  %v643_v8 = vld [vmem:[#allocation10 + $0x30] sm:$0xff]  ;;  %v1757_v17 = vcombine.low %v640_v9, %v644_v10 }
 0x20d   : > { %1096 = vmatmul.mubr.bf16.vlgmr.msra.gmra.mxu0 %v2344_v11  ;;  %1169 = vmatmul.mubr.bf16.vlgmr.msra.gmra.mxu1 %v2344_v11  ;;  %v629_v51 = vmax.f32 %v611_v41, 0.0  ;;  %v1756_v14 = vcombine.high %v639_v7, %v643_v8  ;;  %v1755_v16 = vcombine.low %v639_v7, %v643_v8 }
 0x20e   : > { %1210 = vmatpush1.bf16.msra.mxu0 %v1811_v56  ;;  %1283 = vmatpush1.bf16.msra.mxu1 %v1813_v57  ;;  %v613_v27 = vpop.f32.mrf.mxu1  ;;  %v622_v56 = vadd.f32 %v1856_v15, %v2337_v61  ;;  %v1758_v15 = vcombine.high %v640_v9, %v644_v10 }
 0x20f   : > { %1211 = vmatprep.subr.bf16.mxu0 %v1804_v12  ;;  %1284 = vmatprep.subr.bf16.mxu1 %v1806_v13  ;;  %v614_v35 = vadd.f32 %v2337_v61, %v613_v27  ;;  %v631_v61 = vmax.f32 %v619_v0, 0.0  ;;  %v1765_v12 = vcombine.low %v648_v62, %v652_v63 }
 0x210   : > { %1105 = vmatprep.mubr.bf16.mxu0 %v2160_v55  ;;  %1178 = vmatprep.mubr.bf16.mxu1 %v2160_v55  ;;  %v632_v4 = vmax.f32 %v622_v56, 0.0 }
 0x211   : > { %v630_v44 = vmax.f32 %v614_v35, 0.0 }
 0x212   : > { %1212 = vmatpush1.bf16.msra.mxu0 %v1803_v20  ;;  %1285 = vmatpush1.bf16.msra.mxu1 %v1805_v21  ;;  %v636_v13 = vpack.c.bf16 %v632_v4, %v631_v61 }
 0x213   : > { %1213 = vmatprep.subr.bf16.mxu0 %v1796_v23  ;;  %1286 = vmatprep.subr.bf16.mxu1 %v1798_v24  ;;  %v635_v57 = vpack.c.bf16 %v630_v44, %v629_v51 }
 0x215   : > { %1106 = vmatmul.mubr.bf16.gmra.mxu0 %v2351_v34  ;;  %1179 = vmatmul.mubr.bf16.gmra.mxu1 %v2351_v34 }
 0x216   : > { %1214 = vmatpush1.bf16.msra.mxu0 %v1795_v31  ;;  %1287 = vmatpush1.bf16.msra.mxu1 %v1797_v32 }
 0x217   : > { %1215 = vmatprep.subr.bf16.mxu0 %v1788_v33  ;;  %1288 = vmatprep.subr.bf16.mxu1 %v1790_v36 }
 0x218   : > { %1115 = vmatprep.mubr.bf16.mxu0 %v2160_v55  ;;  %1188 = vmatprep.mubr.bf16.mxu1 %v2160_v55 }
 0x21a   : > { %1216 = vmatpush1.bf16.msra.mxu0 %v1787_v42  ;;  %1289 = vmatpush1.bf16.msra.mxu1 %v1789_v43 }
 0x21b   : > { %1217 = vmatprep.subr.bf16.mxu0 %v1780_v45  ;;  %1290 = vmatprep.subr.bf16.mxu1 %v1782_v46 }
 0x21d   : > { %1116 = vmatmul.mubr.bf16.gmra.mxu0 %v635_v57  ;;  %1189 = vmatmul.mubr.bf16.gmra.mxu1 %v635_v57 }
 0x21e   : > { %1218 = vmatpush1.bf16.msra.mxu0 %v1779_v52  ;;  %1291 = vmatpush1.bf16.msra.mxu1 %v1781_v53 }
 0x21f   : > { %1219 = vmatprep.subr.bf16.mxu0 %v1772_v54  ;;  %1292 = vmatprep.subr.bf16.mxu1 %v1774_v58 }
 0x220   : > { %1125 = vmatprep.mubr.bf16.mxu0 %v2160_v55  ;;  %1198 = vmatprep.mubr.bf16.mxu1 %v2160_v55 }
 0x222   : > { %1220 = vmatpush1.bf16.msra.mxu0 %v1771_v1  ;;  %1293 = vmatpush1.bf16.msra.mxu1 %v1773_v2 }
 0x223   : > { %1221 = vmatprep.subr.bf16.mxu0 %v1764_v5  ;;  %1294 = vmatprep.subr.bf16.mxu1 %v1766_v6 }
 0x225   : > { %1126 = vmatmul.mubr.bf16.gmra.mxu0 %v636_v13  ;;  %1199 = vmatmul.mubr.bf16.gmra.mxu1 %v636_v13 }
 0x226   : > { %1222 = vmatpush1.bf16.msra.mxu0 %v1763_v3  ;;  %1295 = vmatpush1.bf16.msra.mxu1 %v1765_v12 }
 0x227   : > { %1223 = vmatprep.subr.bf16.mxu0 %v1756_v14  ;;  %1296 = vmatprep.subr.bf16.mxu1 %v1758_v15 }
 0x228   : > { %1241 = vmatprep.mubr.bf16.mxu0 %v2160_v55  ;;  %1314 = vmatprep.mubr.bf16.mxu1 %v2160_v55 }
 0x22a   : > { %1224 = vmatpush1.bf16.msra.mxu0 %v1755_v16  ;;  %1297 = vmatpush1.bf16.msra.mxu1 %v1757_v17 }
 0x22d   : > { %1242 = vmatmul.mubr.bf16.vlgmr.msra.gmra.mxu0 %v2344_v11  ;;  %1315 = vmatmul.mubr.bf16.vlgmr.msra.gmra.mxu1 %v2344_v11  ;;  %v703_v11 = vlaneseq }
 0x22e   : > { %1251 = vmatprep.mubr.bf16.mxu0 %v2160_v55  ;;  %1324 = vmatprep.mubr.bf16.mxu1 %v2160_v55 }
 0x22f   : > { %v2376_v18 = vshrl.u32 %v703_v11, 7 }
 0x231   : > { %v705_v21 = vsub.s32 0, %v2376_v18  ;;  %v713_v22 = vsub.s32 2, %v2376_v18  ;;  %v709_v28 = vsub.s32 1, %v2376_v18  ;;  %v721_v51 = vsub.s32 4, %v2376_v18 }
 0x232   : > { %v729_v52 = vsub.s32 6, %v2376_v18 }
 0x233   : > { %v2385_v29 = vrot.slane %v2380_v25, %v705_v21  ;;  %v2388_v30 = vrot.slane %v2380_v25, %v713_v22  ;;  %v2391_v35 = vrot.slane %v2380_v25, %v709_v28 }
 0x235   : > { %1252 = vmatmul.mubr.bf16.gmra.mxu0 %v2351_v34  ;;  %1325 = vmatmul.mubr.bf16.gmra.mxu1 %v2351_v34 }
 0x236   : > { %1261 = vmatprep.mubr.bf16.mxu0 %v2160_v55  ;;  %1334 = vmatprep.mubr.bf16.mxu1 %v2160_v55 }
 0x23d   : > { %1262 = vmatmul.mubr.bf16.gmra.mxu0 %v635_v57  ;;  %1335 = vmatmul.mubr.bf16.gmra.mxu1 %v635_v57 }
 0x23e   : > { %1271 = vmatprep.mubr.bf16.mxu0 %v2160_v55  ;;  %1344 = vmatprep.mubr.bf16.mxu1 %v2160_v55  ;;  %v717_v55 = vsub.s32 3, %v2376_v18 }
 0x240   : > { %v2394_v36 = vrot.slane %v2380_v25, %v717_v55 }
 0x245   : > { %1272 = vmatmul.mubr.bf16.gmra.mxu0 %v636_v13  ;;  %1345 = vmatmul.mubr.bf16.gmra.mxu1 %v636_v13 }
 0x2cd   : > { %v1097_v19 = vpop.f32.mrf.mxu0  ;;  %v1170_v20 = vpop.f32.mrf.mxu1 }
 0x2ce   : > { %v1098_v37 = vadd.f32 %v1097_v19, %v2385_v29  ;;  %v1171_v38 = vadd.f32 %v1170_v20, %v2388_v30 }
 0x2cf   : > { %v1099_v23 = vpop.f32.mrf.mxu0  ;;  %v1172_v24 = vpop.f32.mrf.mxu1 }
 0x2d0   : > { %v1100_v49 = vadd.f32 %v1099_v23, %v2391_v35  ;;  %v1173_v50 = vadd.f32 %v1172_v24, %v2394_v36  ;;  %v1355_v53 = vmax.f32 %v1098_v37, 0.0  ;;  %v1357_v54 = vmax.f32 %v1171_v38, 0.0 }
 0x2d1   : > { %v1101_v26 = vpop.f32.mrf.mxu0  ;;  %v1174_v27 = vpop.f32.mrf.mxu1 }
 0x2d2   : > { %v1102_v39 = vadd.f32 %v1101_v26, %v2385_v29  ;;  %v1175_v40 = vadd.f32 %v1174_v27, %v2388_v30  ;;  %v1356_v8 = vmax.f32 %v1100_v49, 0.0  ;;  %v1358_v9 = vmax.f32 %v1173_v50, 0.0 }
 0x2d3   : > { %v1103_v31 = vpop.f32.mrf.mxu0  ;;  %v1176_v32 = vpop.f32.mrf.mxu1 }
 0x2d4   : > { %v1104_v43 = vadd.f32 %v1103_v31, %v2391_v35  ;;  %v1177_v44 = vadd.f32 %v1176_v32, %v2394_v36  ;;  %v1363_v56 = vmax.f32 %v1102_v39, 0.0  ;;  %v1365_v57 = vmax.f32 %v1175_v40, 0.0 }
 0x2d5   : > { %v1107_v33 = vpop.f32.mrf.mxu0  ;;  %v1180_v34 = vpop.f32.mrf.mxu1 }
 0x2d6   : > { %v1108_v45 = vadd.f32 %v1107_v33, %v2385_v29  ;;  %v1181_v46 = vadd.f32 %v1180_v34, %v2388_v30  ;;  %v1364_v60 = vmax.f32 %v1104_v43, 0.0  ;;  %v1366_v62 = vmax.f32 %v1177_v44, 0.0 }
 0x2d7   : > { %v1109_v41 = vpop.f32.mrf.mxu0  ;;  %v1182_v42 = vpop.f32.mrf.mxu1  ;;  %v1420_v3 = vmax.f32 %v1355_v53, %v1363_v56  ;;  %v1446_v12 = vmax.f32 %v1357_v54, %v1365_v57 }
 0x2d8   : > { %v1110_v63 = vadd.f32 %v1109_v41, %v2391_v35  ;;  %v1183_v0 = vadd.f32 %v1182_v42, %v2394_v36  ;;  %v1371_v1 = vmax.f32 %v1108_v45, 0.0  ;;  %v1373_v2 = vmax.f32 %v1181_v46, 0.0 }
 0x2d9   : > { %v1111_v47 = vpop.f32.mrf.mxu0  ;;  %v1184_v48 = vpop.f32.mrf.mxu1  ;;  %v1433_v17 = vmax.f32 %v1356_v8, %v1364_v60  ;;  %v1459_v11 = vmax.f32 %v1358_v9, %v1366_v62 }
 0x2da   : > { %v1112_v4 = vadd.f32 %v1111_v47, %v2385_v29  ;;  %v1185_v5 = vadd.f32 %v1184_v48, %v2388_v30  ;;  %v1372_v19 = vmax.f32 %v1110_v63, 0.0  ;;  %v1374_v20 = vmax.f32 %v1183_v0, 0.0 }
 0x2db   : > { %v1113_v58 = vpop.f32.mrf.mxu0  ;;  %v1186_v59 = vpop.f32.mrf.mxu1  ;;  %v1421_v21 = vmax.f32 %v1420_v3, %v1371_v1  ;;  %v1447_v22 = vmax.f32 %v1446_v12, %v1373_v2 }
 0x2dc   : > { %v1114_v10 = vadd.f32 %v1113_v58, %v2391_v35  ;;  %v1187_v61 = vadd.f32 %v1186_v59, %v2394_v36  ;;  %v1379_v23 = vmax.f32 %v1112_v4, 0.0  ;;  %v1381_v24 = vmax.f32 %v1185_v5, 0.0 }
 0x2dd   : > { %v1117_v6 = vpop.f32.mrf.mxu0  ;;  %v1190_v7 = vpop.f32.mrf.mxu1  ;;  %v1434_v41 = vmax.f32 %v1433_v17, %v1372_v19  ;;  %v1460_v42 = vmax.f32 %v1459_v11, %v1374_v20 }
 0x2de   : > { %v1118_v13 = vadd.f32 %v1117_v6, %v2385_v29  ;;  %v1191_v14 = vadd.f32 %v1190_v7, %v2388_v30  ;;  %v1380_v28 = vmax.f32 %v1114_v10, 0.0  ;;  %v1382_v55 = vmax.f32 %v1187_v61, 0.0 }
 0x2df   : > { %v1119_v15 = vpop.f32.mrf.mxu0  ;;  %v1192_v16 = vpop.f32.mrf.mxu1  ;;  %v1422_v45 = vmax.f32 %v1421_v21, %v1379_v23  ;;  %v1448_v46 = vmax.f32 %v1447_v22, %v1381_v24 }
 0x2e0   : > { %v1120_v31 = vadd.f32 %v1119_v15, %v2391_v35  ;;  %v1193_v32 = vadd.f32 %v1192_v16, %v2394_v36  ;;  %v1387_v33 = vmax.f32 %v1118_v13, 0.0  ;;  %v1389_v34 = vmax.f32 %v1191_v14, 0.0 }
 0x2e1   : > { %v1121_v26 = vpop.f32.mrf.mxu0  ;;  %v1194_v27 = vpop.f32.mrf.mxu1  ;;  %v1435_v58 = vmax.f32 %v1434_v41, %v1380_v28  ;;  %v1461_v59 = vmax.f32 %v1460_v42, %v1382_v55 }
 0x2e2   : > { %v1122_v37 = vadd.f32 %v1121_v26, %v2385_v29  ;;  %v1195_v38 = vadd.f32 %v1194_v27, %v2388_v30  ;;  %v1388_v53 = vmax.f32 %v1120_v31, 0.0  ;;  %v1390_v54 = vmax.f32 %v1193_v32, 0.0 }
 0x2e3   : > { %v1123_v39 = vpop.f32.mrf.mxu0  ;;  %v1196_v40 = vpop.f32.mrf.mxu1  ;;  %v1423_v60 = vmax.f32 %v1422_v45, %v1387_v33  ;;  %v1449_v62 = vmax.f32 %v1448_v46, %v1389_v34 }
 0x2e4   : > { %v1124_v43 = vadd.f32 %v1123_v39, %v2391_v35  ;;  %v1197_v44 = vadd.f32 %v1196_v40, %v2394_v36  ;;  %v1395_v47 = vmax.f32 %v1122_v37, 0.0  ;;  %v1397_v48 = vmax.f32 %v1195_v38, 0.0 }
 0x2e5   : > { %v1127_v49 = vpop.f32.mrf.mxu0  ;;  %v1200_v50 = vpop.f32.mrf.mxu1  ;;  %v1436_v3 = vmax.f32 %v1435_v58, %v1388_v53  ;;  %v1462_v12 = vmax.f32 %v1461_v59, %v1390_v54  ;;  %v733_v38 = vsub.s32 7, %v2376_v18 }
 0x2e6   : > { %v1128_v56 = vadd.f32 %v1127_v49, %v2385_v29  ;;  %v1201_v57 = vadd.f32 %v1200_v50, %v2388_v30  ;;  %v1396_v1 = vmax.f32 %v1124_v43, 0.0  ;;  %v1398_v2 = vmax.f32 %v1197_v44, 0.0 }
 0x2e7   : > { %v1129_v63 = vpop.f32.mrf.mxu0  ;;  %v1202_v0 = vpop.f32.mrf.mxu1  ;;  %v1424_v6 = vmax.f32 %v1423_v60, %v1395_v47  ;;  %v1450_v7 = vmax.f32 %v1449_v62, %v1397_v48  ;;  %v2446_v48 = vrot.slane %v2380_v25, %v733_v38 }
 0x2e8   : > { %v1403_v4 = vmax.f32 %v1128_v56, 0.0  ;;  %v1405_v5 = vmax.f32 %v1201_v57, 0.0  ;;  %v1130_v8 = vadd.f32 %v1129_v63, %v2391_v35  ;;  %v1203_v9 = vadd.f32 %v1202_v0, %v2394_v36 }
 0x2e9   : > { %v1131_v10 = vpop.f32.mrf.mxu0  ;;  %v1204_v61 = vpop.f32.mrf.mxu1  ;;  %v1437_v26 = vmax.f32 %v1436_v3, %v1396_v1  ;;  %v1463_v27 = vmax.f32 %v1462_v12, %v1398_v2 }
 0x2ea   : > { %v1132_v13 = vadd.f32 %v1131_v10, %v2385_v29  ;;  %v1205_v14 = vadd.f32 %v1204_v61, %v2388_v30  ;;  %v1425_v15 = vmax.f32 %v1424_v6, %v1403_v4  ;;  %v1451_v16 = vmax.f32 %v1450_v7, %v1405_v5 }
 0x2eb   : > { %v1404_v17 = vmax.f32 %v1130_v8, 0.0  ;;  %v1406_v11 = vmax.f32 %v1203_v9, 0.0  ;;  %v1133_v19 = vpop.f32.mrf.mxu0  ;;  %v1206_v20 = vpop.f32.mrf.mxu1  ;;  %v725_v29 = vsub.s32 5, %v2376_v18  ;;  %v2161_v4 = vmov 1966171168  }
 0x2ec   : > { %v1411_v21 = vmax.f32 %v1132_v13, 0.0  ;;  %v1413_v22 = vmax.f32 %v1205_v14, 0.0  ;;  %v1134_v23 = vadd.f32 %v1133_v19, %v2391_v35  ;;  %v1207_v24 = vadd.f32 %v1206_v20, %v2394_v36 }
 0x2ed   : > { %v1243_v28 = vpop.f32.mrf.mxu0  ;;  %v1316_v55 = vpop.f32.mrf.mxu1  ;;  %v1438_v34 = vmax.f32 %v1437_v26, %v1404_v17  ;;  %v1464_v40 = vmax.f32 %v1463_v27, %v1406_v11  ;;  %v2435_v35 = vrot.slane %v2380_v25, %v721_v51  ;;  %v2440_v36 = vrot.slane %v2380_v25, %v729_v52 }
 0x2ee   : > { %v1426_v31 = vmax.f32 %v1425_v15, %v1411_v21  ;;  %v1452_v30 = vmax.f32 %v1451_v16, %v1413_v22  ;;  %v1412_v32 = vmax.f32 %v1134_v23, 0.0  ;;  %v1414_v33 = vmax.f32 %v1207_v24, 0.0 }
 0x2ef   : > { %v1245_v37 = vpop.f32.mrf.mxu0  ;;  %v1318_v39 = vpop.f32.mrf.mxu1  ;;  %v2443_v47 = vrot.slane %v2380_v25, %v725_v29  ;;  %v1244_v50 = vadd.f32 %v1243_v28, %v2435_v35  ;;  %v1317_v53 = vadd.f32 %v1316_v55, %v2440_v36  ;;  %v2455_v5 = vunpack.c.l.s4 %v2161_v4 }
 0x2f0   : > { %v1427_v41 = vrot.slane %v1426_v31, 4  ;;  %v1453_v42 = vrot.slane %v1452_v30, 4  ;;  %v1439_v43 = vmax.f32 %v1438_v34, %v1412_v32  ;;  %v1465_v46 = vmax.f32 %v1464_v40, %v1414_v33 }
 0x2f1   : > { %v1247_v44 = vpop.f32.mrf.mxu0  ;;  %v1320_v45 = vpop.f32.mrf.mxu1  ;;  %v1246_v60 = vadd.f32 %v1245_v37, %v2443_v47  ;;  %v1319_v63 = vadd.f32 %v1318_v39, %v2446_v48  ;;  %v1359_v6 = vmax.f32 %v1244_v50, 0.0  ;;  %v1361_v7 = vmax.f32 %v1317_v53, 0.0 }
 0x2f2   : > { %v1428_v52 = vmax.f32 %v1426_v31, %v1427_v41  ;;  %v1454_v54 = vmax.f32 %v1452_v30, %v1453_v42  ;;  %v1440_v56 = vrot.slane %v1439_v43, 4  ;;  %v1466_v59 = vrot.slane %v1465_v46, 4 }
 0x2f3   : > { %v1249_v49 = vpop.f32.mrf.mxu0  ;;  %v1322_v51 = vpop.f32.mrf.mxu1  ;;  %v1248_v62 = vadd.f32 %v1247_v44, %v2435_v35  ;;  %v1321_v25 = vadd.f32 %v1320_v45, %v2440_v36  ;;  %v1360_v15 = vmax.f32 %v1246_v60, 0.0  ;;  %v1362_v11 = vmax.f32 %v1319_v63, 0.0 }
 0x2f4   : > { %v1250_v0 = vadd.f32 %v1249_v49, %v2443_v47  ;;  %v1323_v8 = vadd.f32 %v1322_v51, %v2446_v48  ;;  %v1429_v9 = vrot.slane %v1428_v52, 2  ;;  %v1455_v10 = vrot.slane %v1454_v54, 2 }
 0x2f5   : > { %v1253_v57 = vpop.f32.mrf.mxu0  ;;  %v1326_v58 = vpop.f32.mrf.mxu1  ;;  %v1441_v61 = vmax.f32 %v1439_v43, %v1440_v56  ;;  %v1467_v14 = vmax.f32 %v1465_v46, %v1466_v59  ;;  %v1367_v16 = vmax.f32 %v1248_v62, 0.0  ;;  %v1369_v19 = vmax.f32 %v1321_v25, 0.0 }
 0x2f6   : > { %v1254_v3 = vadd.f32 %v1253_v57, %v2435_v35  ;;  %v1327_v17 = vadd.f32 %v1326_v58, %v2440_v36  ;;  %v1368_v20 = vmax.f32 %v1250_v0, 0.0  ;;  %v1370_v24 = vmax.f32 %v1323_v8, 0.0 }
 0x2f7   : > { %v1255_v1 = vpop.f32.mrf.mxu0  ;;  %v1328_v2 = vpop.f32.mrf.mxu1  ;;  %v2464_v55 = vmax.f32 %v1428_v52, %v1429_v9  ;;  %v2466_v29 = vmax.f32 %v1454_v54, %v1455_v10  ;;  %v1442_v31 = vrot.slane %v1441_v61, 2  ;;  %v1468_v34 = vrot.slane %v1467_v14, 2 }
 0x2f8   : > { %v1256_v21 = vadd.f32 %v1255_v1, %v2443_v47  ;;  %v1329_v26 = vadd.f32 %v1328_v2, %v2446_v48  ;;  %v1375_v30 = vmax.f32 %v1254_v3, 0.0  ;;  %v1472_v37 = vmax.f32 %v1359_v6, %v1367_v16 }
 0x2f9   : > { %v1257_v12 = vpop.f32.mrf.mxu0  ;;  %v1330_v13 = vpop.f32.mrf.mxu1  ;;  %v1377_v38 = vmax.f32 %v1327_v17, 0.0  ;;  %v1498_v40 = vmax.f32 %v1361_v7, %v1369_v19  ;;  %v1485_v41 = vmax.f32 %v1360_v15, %v1368_v20  ;;  %v1511_v46 = vmax.f32 %v1362_v11, %v1370_v24 }
 0x2fa   : > { %v1258_v27 = vadd.f32 %v1257_v12, %v2435_v35  ;;  %v1331_v28 = vadd.f32 %v1330_v13, %v2440_v36  ;;  %v1376_v39 = vmax.f32 %v1256_v21, 0.0  ;;  %v1378_v49 = vmax.f32 %v1329_v26, 0.0 }
 0x2fb   : > { %v1259_v22 = vpop.f32.mrf.mxu0  ;;  %v1332_v23 = vpop.f32.mrf.mxu1  ;;  %v1473_v53 = vmax.f32 %v1472_v37, %v1375_v30  ;;  %v1499_v59 = vmax.f32 %v1498_v40, %v1377_v38  ;;  %v2474_v25 = vmax.f32 %v1441_v61, %v1442_v31  ;;  %v2476_v0 = vmax.f32 %v1467_v14, %v1468_v34 }
 0x2fc   : > { %v1260_v42 = vadd.f32 %v1259_v22, %v2443_v47  ;;  %v1333_v43 = vadd.f32 %v1332_v23, %v2446_v48  ;;  %v1383_v51 = vmax.f32 %v1258_v27, 0.0  ;;  %v1385_v50 = vmax.f32 %v1331_v28, 0.0 }
 0x2fd   : > { %v1263_v32 = vpop.f32.mrf.mxu0  ;;  %v1336_v33 = vpop.f32.mrf.mxu1  ;;  %v1486_v60 = vmax.f32 %v1485_v41, %v1376_v39  ;;  %v1512_v7 = vmax.f32 %v1511_v46, %v1378_v49 }
 0x2fe   : > { %v1384_v52 = vmax.f32 %v1260_v42, 0.0  ;;  %v1264_v54 = vadd.f32 %v1263_v32, %v2435_v35  ;;  %v1337_v56 = vadd.f32 %v1336_v33, %v2440_v36  ;;  %v1386_v1 = vmax.f32 %v1333_v43, 0.0 }
 0x2ff   : > { %v1265_v44 = vpop.f32.mrf.mxu0  ;;  %v1338_v45 = vpop.f32.mrf.mxu1  ;;  %v1474_v8 = vmax.f32 %v1473_v53, %v1383_v51  ;;  %v1500_v9 = vmax.f32 %v1499_v59, %v1385_v50 }
 0x300   : > { %v1266_v62 = vadd.f32 %v1265_v44, %v2443_v47  ;;  %v1339_v63 = vadd.f32 %v1338_v45, %v2446_v48  ;;  %v1487_v10 = vmax.f32 %v1486_v60, %v1384_v52  ;;  %v1391_v3 = vmax.f32 %v1264_v54, 0.0 }
 0x301   : > { %v1267_v57 = vpop.f32.mrf.mxu0  ;;  %v1340_v58 = vpop.f32.mrf.mxu1  ;;  %v1393_v12 = vmax.f32 %v1337_v56, 0.0  ;;  %v1513_v20 = vmax.f32 %v1512_v7, %v1386_v1 }
 0x302   : > { %v1268_v2 = vadd.f32 %v1267_v57, %v2435_v35  ;;  %v1341_v13 = vadd.f32 %v1340_v58, %v2440_v36  ;;  %v1392_v17 = vmax.f32 %v1266_v62, 0.0  ;;  %v1394_v14 = vmax.f32 %v1339_v63, 0.0 }
 0x303   : > { %v1269_v4 = vpop.f32.mrf.mxu0  ;;  %v1342_v6 = vpop.f32.mrf.mxu1  ;;  %v1475_v32 = vmax.f32 %v1474_v8, %v1391_v3  ;;  %v1501_v33 = vmax.f32 %v1500_v9, %v1393_v12  ;;  %v1538_v3 = vunpack.c.0.s8 %v2455_v5 }
 0x304   : > { %v1270_v15 = vadd.f32 %v1269_v4, %v2443_v47  ;;  %v1343_v11 = vadd.f32 %v1342_v6, %v2446_v48  ;;  %v1399_v21 = vmax.f32 %v1268_v2, 0.0  ;;  %v1401_v22 = vmax.f32 %v1341_v13, 0.0 }
 0x305   : > { %v1273_v16 = vpop.f32.mrf.mxu0  ;;  %v1346_v61 = vpop.f32.mrf.mxu1  ;;  %v1488_v40 = vmax.f32 %v1487_v10, %v1392_v17  ;;  %v1514_v41 = vmax.f32 %v1513_v20, %v1394_v14 }
 0x306   : > { %v1274_v19 = vadd.f32 %v1273_v16, %v2435_v35  ;;  %v1347_v23 = vadd.f32 %v1346_v61, %v2440_v36  ;;  %v1400_v27 = vmax.f32 %v1270_v15, 0.0  ;;  %v1402_v28 = vmax.f32 %v1343_v11, 0.0 }
 0x307   : > { %v1275_v24 = vpop.f32.mrf.mxu0  ;;  %v1348_v26 = vpop.f32.mrf.mxu1  ;;  %v1476_v44 = vmax.f32 %v1475_v32, %v1399_v21  ;;  %v1502_v45 = vmax.f32 %v1501_v33, %v1401_v22 }
 0x308   : > { %v1276_v31 = vadd.f32 %v1275_v24, %v2443_v47  ;;  %v1349_v30 = vadd.f32 %v1348_v26, %v2446_v48  ;;  %v1407_v34 = vmax.f32 %v1274_v19, 0.0  ;;  %v1409_v37 = vmax.f32 %v1347_v23, 0.0 }
 0x309   : > { %v1277_v38 = vpop.f32.mrf.mxu0  ;;  %v1350_v39 = vpop.f32.mrf.mxu1  ;;  %v1489_v53 = vmax.f32 %v1488_v40, %v1400_v27  ;;  %v1515_v52 = vmax.f32 %v1514_v41, %v1402_v28  ;;  %v1541_v23 = vsub.s32 %v1538_v3, %v2376_v18 }
 0x30a   : > { %v1408_v42 = vmax.f32 %v1276_v31, 0.0  ;;  %v1410_v43 = vmax.f32 %v1349_v30, 0.0  ;;  %v1278_v46 = vadd.f32 %v1277_v38, %v2435_v35  ;;  %v1351_v49 = vadd.f32 %v1350_v39, %v2440_v36 }
 0x30b   : > { %v1279_v51 = vpop.f32.mrf.mxu0  ;;  %v1352_v50 = vpop.f32.mrf.mxu1  ;;  %v1477_v57 = vmax.f32 %v1476_v44, %v1407_v34  ;;  %v1503_v58 = vmax.f32 %v1502_v45, %v1409_v37  ;;  %v1444_v35 = vrot.slane %v2474_v25, 1  ;;  %v1470_v36 = vrot.slane %v2476_v0, 1 }
 0x30c   : > { %v1280_v54 = vadd.f32 %v1279_v51, %v2443_v47  ;;  %v1353_v56 = vadd.f32 %v1352_v50, %v2446_v48  ;;  %v1415_v59 = vmax.f32 %v1278_v46, 0.0  ;;  %v1417_v60 = vmax.f32 %v1351_v49, 0.0 }
 0x30d   : > { %v1490_v62 = vmax.f32 %v1489_v53, %v1408_v42  ;;  %v1516_v63 = vmax.f32 %v1515_v52, %v1410_v43  ;;  %v1431_v47 = vrot.slane %v2464_v55, 1  ;;  %v1457_v48 = vrot.slane %v2466_v29, 1 }
 0x30e   : > { %v1416_v1 = vmax.f32 %v1280_v54, 0.0  ;;  %v1418_v2 = vmax.f32 %v1353_v56, 0.0  ;;  %v1478_v4 = vmax.f32 %v1477_v57, %v1415_v59  ;;  %v1504_v6 = vmax.f32 %v1503_v58, %v1417_v60 }
 0x30f   : > { %v1445_v15 = vmax.f32 %v2474_v25, %v1444_v35  ;;  %v1471_v16 = vmax.f32 %v2476_v0, %v1470_v36  ;;  %v1432_v19 = vmax.f32 %v2464_v55, %v1431_v47  ;;  %v1458_v20 = vmax.f32 %v2466_v29, %v1457_v48 }
 0x310   : > { %v1491_v7 = vmax.f32 %v1490_v62, %v1416_v1  ;;  %v1517_v8 = vmax.f32 %v1516_v63, %v1418_v2  ;;  %v1479_v9 = vrot.slane %v1478_v4, 4  ;;  %v1505_v10 = vrot.slane %v1504_v6, 4 }
 0x311   : > { %v1532_v26 = vcombine.low %v1432_v19, %v1445_v15  ;;  %v1533_v27 = vcombine.low %v1458_v20, %v1471_v16 }
 0x312   : > { %v1492_v12 = vrot.slane %v1491_v7, 4  ;;  %v1518_v13 = vrot.slane %v1517_v8, 4  ;;  %v1480_v61 = vmax.f32 %v1478_v4, %v1479_v9  ;;  %v1506_v17 = vmax.f32 %v1504_v6, %v1505_v10 }
 0x313   : > { %v1542_v55 = vrot.slane %v1532_v26, %v1541_v23  ;;  %v1549_v37 = vrot.slane %v1533_v27, %v1541_v23 }
 0x314   : > { %v1493_v14 = vmax.f32 %v1491_v7, %v1492_v12  ;;  %v1519_v11 = vmax.f32 %v1517_v8, %v1518_v13  ;;  %v1481_v21 = vrot.slane %v1480_v61, 2  ;;  %v1507_v22 = vrot.slane %v1506_v17, 2 }
 0x315   : > { %v1564_v42 = vcombine.low %v1542_v55, %v1549_v37 }
 0x316   : > { %v1494_v24 = vrot.slane %v1493_v14, 2  ;;  %v1520_v5 = vrot.slane %v1519_v11, 2  ;;  %v1482_v28 = vmax.f32 %v1480_v61, %v1481_v21  ;;  %v1508_v25 = vmax.f32 %v1506_v17, %v1507_v22 }
 0x317   : > { %v1572_v46 = vrot.slane %v1564_v42, %v1541_v23 }
 0x318   : > { %v1495_v31 = vmax.f32 %v1493_v14, %v1494_v24  ;;  %v1521_v0 = vmax.f32 %v1519_v11, %v1520_v5  ;;  %v1483_v30 = vrot.slane %v1482_v28, 1  ;;  %v1509_v32 = vrot.slane %v1508_v25, 1 }
 0x31a   : > { %v1496_v33 = vrot.slane %v1495_v31, 1  ;;  %v1522_v34 = vrot.slane %v1521_v0, 1  ;;  %v1484_v29 = vmax.f32 %v1482_v28, %v1483_v30  ;;  %v1510_v38 = vmax.f32 %v1508_v25, %v1509_v32 }
 0x31c   : > { %v1497_v39 = vmax.f32 %v1495_v31, %v1496_v33  ;;  %v1523_v40 = vmax.f32 %v1521_v0, %v1522_v34 }
 0x31e   : > { %v1534_v18 = vcombine.low %v1484_v29, %v1497_v39  ;;  %v1535_v41 = vcombine.low %v1510_v38, %v1523_v40 }
 0x320   : > { %v1556_v43 = vrot.slane %v1534_v18, %v1541_v23  ;;  %v1563_v44 = vrot.slane %v1535_v41, %v1541_v23 }
 0x322   : > { %v1565_v45 = vcombine.low %v1556_v43, %v1563_v44 }
 0x324   : > { %v1579_v49 = vrot.slane %v1565_v45, %v1541_v23 }
 0x326   : > { %v1580_v51 = vcombine.low %v1572_v46, %v1579_v49 }
 0x328   : > { %1588 = vst [vmem:[%s384_s20] sm:$0xff] %v1580_v51 }
 0x329 PF: > { %s21_s26 = sadd.s32 1, %s2147_s26   ;;  %s2532_s24 = smov %s2143_s25 }
 0x32a   : > { %p18_p7 = scmp.ge.s32.totalorder %s21_s26, 4   ;;  %s2533_s25 = smov %s2535_s12 }
 0x32c   :  { %20 = sbr.rel (!%p18_p7) target bundleno = 5 (0x5), region = 111 }
 0x331   :  { %1608 = vsyncpa [#allocation4], 1 }
 0x332   :  { %1610 = vsyncpa [#allocation4 + $0x1], 1 }
 0x333   :  { %1611 = vsyncpa [#allocation6], 1 }
 0x334   :  { %1612 = vsyncpa [#allocation9], 1 }
 0x335   :  { %1613 = vsyncpa [#allocation12], 1 }

// kernel: pointnet_mean_forward.10
= control target key start
LH: loop header
LB: loop body
LE: loop exit
PB: predicated region body
PF: predicated region fallthrough
CT: control target
= control target key end

     0   :  { %12 = vsyncpa [#allocation4], 0  ;;  %s2686_s0 = inlined_call_operand.vmem [shape: bf16[2,64,64], index: 0, kind: input, shape index: {}]   ;;  %s2687_s1 = inlined_call_operand.hbm [shape: bf16[64,64], index: 1, kind: input, shape index: {}]   ;;  %s2688_s2 = inlined_call_operand.hbm [shape: f32[1,64], index: 2, kind: input, shape index: {}]   ;;  %s2689_s3 = inlined_call_operand.hbm [shape: bf16[64,128], index: 3, kind: input, shape index: {}]   ;;  %s2690_s4 = inlined_call_operand.hbm [shape: f32[1,128], index: 4, kind: input, shape index: {}]   ;;  %s2691_s5 = inlined_call_operand.vmem [shape: bf16[128,1024], index: 5, kind: input, shape index: {}]   ;;  %s2692_s6 = inlined_call_operand.hbm [shape: f32[1,1024], index: 6, kind: input, shape index: {}]   ;;  %s2693_s7 = inlined_call_operand.vmem [shape: f32[2,1,1024], index: 7, kind: output, shape index: {}]  }
   0x1   :  { %13 = vsyncpa [#allocation6], 0 }
   0x2   :  { %14 = vsyncpa [#allocation9], 0  ;;  %s2194_s24 = smov 0   ;;  %s2196_s25 = smov 0  }
   0x3   :  { %s2198_s26 = smov 0  }
   0x4 LB: > { %s2145_s27 = smov [#allocation5]   ;;  %s1733_s29 = sadd.s32 4294967295, %s2143_s26   ;;  %s2143_s26 = sphi %s2198_s26, %s20_s26   ;;  %s2139_s25 = sphi %s2196_s25, %s2706_s25   ;;  %s2135_s24 = sphi %s2194_s24, %s2705_s24  }
   0x5   : > { %s243_s28 = sshll.u32 %s2145_s27, 4  ;;  %p1735_p0 = scmp.ge.s32.totalorder %s2143_s26, 1  ;;  %s244_s28 = int_to_ptr.vmem [resolvable:$true] %s243_s28 }
   0x6   : > { %p217_p1 = scmp.lt.s32.totalorder %s2143_s26, 3  ;;  %p2212_p2 = scmp.eq.s32.totalorder %s1733_s29, 0 }
   0x7   : > { %s2146_s9 = smov [#allocation8]   ;;  %s32_s12 = sadd.s32 1, %s2139_s25 }
   0x8   : > { %s2697_s30 = scalar_select %p2212_p2, 1, 0 }
   0x9   : > { %p2216_p3 = pnand %p1735_p0, %p217_p1  ;;  %s267_s10 = sshll.u32 %s2146_s9, 4  ;;  %s268_s10 = int_to_ptr.vmem [resolvable:$true] %s267_s10 }
   0xa   : > { %p2229_p6 = scmp.ge.s32.totalorder %s32_s12, 2  ;;  %s1990_s15 = scalar_lea.vmem %s244_s28, 16 }
   0xb   : > { %s2698_s8 = scalar_select %p2216_p3, 1, 0 }
   0xc   : > { %p1908_p4 = pneg %p2216_p3  ;;  %p1991_p8 = scmp.ne.s32.totalorder %s244_s28, %s1990_s15 }
   0xd   : > { %s2700_s13 = scalar_select %p2229_p6, 1, 0 }
   0xe   : > { %p2224_p5 = pnand %p2212_p2, %p1908_p4  ;;  %s1997_s16 = scalar_lea.vmem %s244_s28, 32 }
   0xf   : > { %p1998_p11 = scmp.lt.s32.totalorder %s244_s28, %s244_s28  ;;  %p1999_p12 = scmp.lt.s32.totalorder %s1997_s16, %s1990_s15 }
  0x10   : > { %p2235_p7 = pneg %p2224_p5 }
  0x11   : > { %p2000_p13 = por %p1999_p12, %p1998_p11 }
  0x12   : > { %p1993_p9 = pnand %p1991_p8, %p2235_p7 }
  0x14   : > { %p1994_p10 = pneg %p1993_p9 }
  0x16   : > { %p2001_p0 = pnand %p2000_p13, %p1994_p10 }
  0x18   : > { %2004 = shalt.err (!%p2001_p0)
}
  0x19   : > { %1914 = dma.hbm_to_vmem [thread:$0]  (!%p2224_p5), %s2688_s2, 16, %s244_s28, [#allocation6]  }
  0x1a   : > { %s2016_s19 = scalar_lea.vmem %s268_s10, 16  ;;  %s2023_s20 = scalar_lea.vmem %s268_s10, 32 }
  0x1b   : > { %p2017_p1 = scmp.ne.s32.totalorder %s268_s10, %s2016_s19  ;;  %p2024_p8 = scmp.lt.s32.totalorder %s268_s10, %s268_s10 }
  0x1c   : > { %p2025_p9 = scmp.lt.s32.totalorder %s2023_s20, %s2016_s19 }
  0x1d   : > { %p2019_p4 = pnand %p2017_p1, %p2235_p7 }
  0x1e   : > { %p2026_p3 = por %p2025_p9, %p2024_p8 }
  0x1f   : > { %p2020_p2 = pneg %p2019_p4 }
  0x21   : > { %p2027_p6 = pnand %p2026_p3, %p2020_p2 }
  0x23   : > { %2030 = shalt.err (!%p2027_p6)
}
  0x24   : > { %1920 = dma.hbm_to_vmem [thread:$0]  (!%p2224_p5), %s2690_s4, 16, %s268_s10, [#allocation9]  }
  0x25   : > { %p2702_p10 = scmp.ne.s32.totalorder %s2700_s13, 0  ;;  %s2147_s23 = smov [#allocation3]  }
  0x26   : > { %s229_s27 = sshll.u32 %s2147_s23, 4  ;;  %s230_s27 = int_to_ptr.vmem [resolvable:$true] %s229_s27 }
  0x27   : > { %s2708_s12 = smov (%p2702_p10, %s32_s12), 0  ;;  %s2042_s28 = scalar_lea.vmem %s230_s27, 512 }
  0x28   : > { %p2043_p11 = scmp.ne.s32.totalorder %s230_s27, %s2042_s28  ;;  %p2050_p3 = scmp.lt.s32.totalorder %s230_s27, %s230_s27 }
  0x29   : > { %p2051_p6 = scmp.lt.s32.totalorder %s2042_s28, %s2042_s28 }
  0x2a   : > { %p2045_p12 = pnand %p2043_p11, %p2235_p7 }
  0x2b   : > { %p2052_p13 = por %p2051_p6, %p2050_p3 }
  0x2c   : > { %p2046_p2 = pneg %p2045_p12 }
  0x2e   : > { %p2053_p0 = pnand %p2052_p13, %p2046_p2 }
  0x30   : > { %2056 = shalt.err (!%p2053_p0)
}
  0x31   : > { %s2148_s29 = smov 64   ;;  %s2149_s9 = smov 4  }
  0x32   : > { %1911 = dma.hbm_to_vmem [thread:$0]  (!%p2224_p5), %s2687_s1, 512, %s230_s27, [#allocation4], %s2148_s29, %s2148_s29, %s2149_s9  }
  0x33   : > { %s2150_s15 = smov [#allocation7]   ;;  %s2151_s17 = smov [#allocation10]  }
  0x34   : > { %s253_s16 = sshll.u32 %s2150_s15, 4  ;;  %s281_s18 = sshll.u32 %s2151_s17, 4  ;;  %s254_s16 = int_to_ptr.vmem [resolvable:$true] %s253_s16  ;;  %s282_s18 = int_to_ptr.vmem [resolvable:$true] %s281_s18 }
  0x35   : > { %s2068_s19 = scalar_lea.vmem %s254_s16, 512  ;;  %p2076_p9 = scmp.lt.s32.totalorder %s254_s16, %s254_s16 }
  0x36   : > { %p2069_p1 = scmp.ne.s32.totalorder %s254_s16, %s2068_s19  ;;  %p2077_p10 = scmp.lt.s32.totalorder %s2068_s19, %s2068_s19 }
  0x38   : > { %p2071_p4 = pnand %p2069_p1, %p2235_p7  ;;  %p2078_p11 = por %p2077_p10, %p2076_p9 }
  0x3a   : > { %p2072_p8 = pneg %p2071_p4 }
  0x3c   : > { %p2079_p12 = pnand %p2078_p11, %p2072_p8 }
  0x3e   : > { %2082 = shalt.err (!%p2079_p12)
}
  0x3f   : > { %1917 = dma.hbm_to_vmem [thread:$0]  (!%p2224_p5), %s2689_s3, 512, %s254_s16, [#allocation6], %s2148_s29, %s2148_s29, %s2149_s9  }
  0x40   : > { %s2094_s22 = scalar_lea.vmem %s282_s18, 128  ;;  %p2102_p13 = scmp.lt.s32.totalorder %s282_s18, %s282_s18 }
  0x41   : > { %p2095_p2 = scmp.ne.s32.totalorder %s282_s18, %s2094_s22  ;;  %p2103_p0 = scmp.lt.s32.totalorder %s2094_s22, %s2094_s22 }
  0x43   : > { %p2097_p3 = pnand %p2095_p2, %p2235_p7  ;;  %p2104_p1 = por %p2103_p0, %p2102_p13 }
  0x45   : > { %p2098_p6 = pneg %p2097_p3 }
  0x47   : > { %p2105_p4 = pnand %p2104_p1, %p2098_p6 }
  0x49   : > { %2108 = shalt.err (!%p2105_p4)
}
  0x4a   : > { %1923 = dma.hbm_to_vmem [thread:$0]  (!%p2224_p5), %s2692_s6, 128, %s282_s18, [#allocation9]  }
  0x4b   : > { %p2703_p8 = scmp.ne.s32.totalorder %s2698_s8, 0 }
  0x4c   : > { %p2704_p9 = scmp.ne.s32.totalorder (!%p2703_p8), %s2697_s30, 0 }
  0x4d   : > { %307 = sbr.rel (%p2703_p8) target bundleno = 799 (0x31f), region = 48 }
  0x52   : > { %2122 = dma.done.wait (%p2704_p9), [#allocation4], 512  }
  0x53   : > { %2124 = vsyncadd (%p2704_p9), [#allocation4], 4294966784 }
  0x54   : > { %2126 = dma.done.wait (%p2704_p9), [#allocation6], 528  }
  0x55   : > { %2128 = vsyncadd (%p2704_p9), [#allocation6], 4294966768 }
  0x56   : > { %2130 = dma.done.wait (%p2704_p9), [#allocation9], 144  }
  0x57   : > { %2132 = vsyncadd (%p2704_p9), [#allocation9], 4294967152  ;;  %p359_p5 = scmp.lt.s32.totalorder %s2135_s24, 1  ;;  %v1967_v0 = vld [vmem:[#allocation3 + $0x18] sm:$0xff]   ;;  %v1968_v1 = vld [vmem:[#allocation3 + $0x10] sm:$0xff]   ;;  %vm445_vm0 = vcmask 523264  }
  0x58   : > { %1856 = vmatprep.subr.bf16.mxu0 %v1967_v0  ;;  %v1969_v2 = vld [vmem:[#allocation3 + $0x8] sm:$0xff]   ;;  %v1970_v4 = vld [vmem:[#allocation3] sm:$0xff]   ;;  %v1976_v9 = vld [vmem:[#allocation7 + $0x10] sm:$0xff]  }
  0x59   : > { %s2710_s24 = smov (!%p359_p5, %s2135_s24), 1  ;;  %1857 = vmatpush3.bf16.msra.mxu0 %v1967_v0  ;;  %v1975_v5 = vld [vmem:[#allocation7 + $0x18] sm:$0xff]   ;;  %v1977_v10 = vld [vmem:[#allocation7 + $0x8] sm:$0xff]   ;;  %v1978_v11 = vld [vmem:[#allocation7] sm:$0xff]  }
  0x5a   : > { %s1839_s8 = sshll.u32 %s2710_s24, 5  ;;  %1858 = vmatprep.subr.bf16.mxu0 %v1968_v1  ;;  %1872 = vmatprep.subr.bf16.mxu1 %v1975_v5  ;;  %v719_v12 = vld [vmem:[%s2691_s5 + $0x1c0] sm:$0xff]  ;;  %v2313_v14 = vld [vmem:[%s2691_s5 + $0x1c8] sm:$0xff]  ;;  %s1750_s27 = sshll.u32 %s2710_s24, 3 }
  0x5b   : > { %s366_s28 = scalar_lea.vmem %s2686_s0, %s1839_s8  ;;  %1873 = vmatpush3.bf16.msra.mxu1 %v1975_v5  ;;  %v723_v13 = vld [vmem:[%s2691_s5 + $0x1e0] sm:$0xff]  ;;  %v2318_v17 = vld [vmem:[%s2691_s5 + $0x1e8] sm:$0xff]  ;;  %s371_s14 = scalar_lea.vmem %s2693_s7, %s1750_s27 }
  0x5c   : > { %v1971_v3 = vld [vmem:[%s366_s28] sm:$0xff]   ;;  %v1972_v6 = vld [vmem:[%s366_s28 + $0x8] sm:$0xff]   ;;  %v1973_v7 = vld [vmem:[%s366_s28 + $0x10] sm:$0xff]   ;;  %1874 = vmatprep.subr.bf16.mxu1 %v1976_v9  ;;  %v1829_v15 = vcombine.low %v719_v12, %v723_v13  ;;  %v1830_v16 = vcombine.high %v719_v12, %v723_v13  ;;  %v1831_v20 = vcombine.low %v2313_v14, %v2318_v17  ;;  %v1832_v21 = vcombine.high %v2313_v14, %v2318_v17 }
  0x5d   : > { %1864 = vmatprep.mubr.msk.bf16.mxu0 %vm445_vm0, %v1971_v3  ;;  %1859 = vmatpush3.bf16.msra.mxu0 %v1968_v1  ;;  %v1974_v8 = vld [vmem:[%s366_s28 + $0x18] sm:$0xff]   ;;  %v711_v18 = vld [vmem:[%s2691_s5 + $0x180] sm:$0xff]  ;;  %v712_v49 = vld [vmem:[%s2691_s5 + $0x188] sm:$0xff] }
  0x5e   : > { %1860 = vmatprep.subr.bf16.mxu0 %v1969_v2  ;;  %v715_v19 = vld [vmem:[%s2691_s5 + $0x1a0] sm:$0xff]  ;;  %v716_v50 = vld [vmem:[%s2691_s5 + $0x1a8] sm:$0xff] }
  0x5f   : > { %1875 = vmatpush3.bf16.msra.mxu1 %v1976_v9  ;;  %v1822_v22 = vcombine.high %v711_v18, %v715_v19  ;;  %v703_v23 = vld [vmem:[%s2691_s5 + $0x140] sm:$0xff]  ;;  %v1821_v25 = vcombine.low %v711_v18, %v715_v19  ;;  %v1824_v58 = vcombine.high %v712_v49, %v716_v50  ;;  %v704_v60 = vld [vmem:[%s2691_s5 + $0x148] sm:$0xff]  ;;  %v1823_v3 = vcombine.low %v712_v49, %v716_v50 }
  0x60   : > { %1876 = vmatprep.subr.bf16.mxu1 %v1977_v10  ;;  %v707_v24 = vld [vmem:[%s2691_s5 + $0x160] sm:$0xff]  ;;  %v708_v61 = vld [vmem:[%s2691_s5 + $0x168] sm:$0xff] }
  0x61   : > { %1861 = vmatpush3.bf16.msra.mxu0 %v1969_v2  ;;  %v1814_v26 = vcombine.high %v703_v23, %v707_v24  ;;  %v695_v27 = vld [vmem:[%s2691_s5 + $0x100] sm:$0xff]  ;;  %v1813_v29 = vcombine.low %v703_v23, %v707_v24  ;;  %v688_v12 = vld [vmem:[%s2691_s5 + $0xc8] sm:$0xff] }
  0x62   : > { %1862 = vmatprep.subr.bf16.mxu0 %v1970_v4  ;;  %v699_v28 = vld [vmem:[%s2691_s5 + $0x120] sm:$0xff]  ;;  %v692_v13 = vld [vmem:[%s2691_s5 + $0xe8] sm:$0xff] }
  0x63   : > { %1877 = vmatpush3.bf16.msra.mxu1 %v1977_v10  ;;  %v1806_v30 = vcombine.high %v695_v27, %v699_v28  ;;  %v687_v31 = vld [vmem:[%s2691_s5 + $0xc0] sm:$0xff]  ;;  %v1805_v33 = vcombine.low %v695_v27, %v699_v28  ;;  %v1815_v10 = vcombine.low %v704_v60, %v708_v61  ;;  %v680_v19 = vld [vmem:[%s2691_s5 + $0x88] sm:$0xff] }
  0x64   : > { %1878 = vmatprep.subr.bf16.mxu1 %v1978_v11  ;;  %v691_v32 = vld [vmem:[%s2691_s5 + $0xe0] sm:$0xff]  ;;  %v672_v27 = vld [vmem:[%s2691_s5 + $0x48] sm:$0xff] }
  0x65   : > { %1863 = vmatpush3.bf16.msra.mxu0 %v1970_v4  ;;  %v1798_v34 = vcombine.high %v687_v31, %v691_v32  ;;  %v1797_v35 = vcombine.low %v687_v31, %v691_v32  ;;  %v1751_v38 = vld [vmem:[#allocation5] ss:$0 sm:$0xff]  ;;  %v1816_v4 = vcombine.high %v704_v60, %v708_v61  ;;  %v714_v60 = vld [vmem:[%s2691_s5 + $0x198] sm:$0xff] }
  0x66   : > { %1089 = vmatprep.subr.bf16.mxu0 %v1830_v16  ;;  %v1799_v16 = vcombine.low %v688_v12, %v692_v13  ;;  %v679_v17 = vld [vmem:[%s2691_s5 + $0x80] sm:$0xff]  ;;  %v718_v61 = vld [vmem:[%s2691_s5 + $0x1b8] sm:$0xff] }
  0x67   : > { %1879 = vmatpush3.bf16.msra.mxu1 %v1978_v11  ;;  %v683_v18 = vld [vmem:[%s2691_s5 + $0xa0] sm:$0xff] }
  0x68   : > { %1865 = vmatmul.mubr.msk.bf16.vlgmr.msra.gmra.mxu0 %vm445_vm0, %v1972_v6  ;;  %1162 = vmatprep.subr.bf16.mxu1 %v1832_v21  ;;  %v696_v6 = vld [vmem:[%s2691_s5 + $0x108] sm:$0xff] }
  0x69   : > { %1868 = vmatprep.mubr.msk.bf16.mxu0 %vm445_vm0, %v1973_v7  ;;  %1090 = vmatpush1.bf16.msra.mxu0 %v1829_v15  ;;  %v700_v7 = vld [vmem:[%s2691_s5 + $0x128] sm:$0xff]  ;;  %v1800_v15 = vcombine.high %v688_v12, %v692_v13  ;;  %v1827_v12 = vcombine.low %v714_v60, %v718_v61 }
  0x6a   : > { %1091 = vmatprep.subr.bf16.mxu0 %v1822_v22  ;;  %v1808_v11 = vcombine.high %v696_v6, %v700_v7  ;;  %v1807_v14 = vcombine.low %v696_v6, %v700_v7  ;;  %v684_v21 = vld [vmem:[%s2691_s5 + $0xa8] sm:$0xff]  ;;  %v1789_v22 = vcombine.low %v679_v17, %v683_v18  ;;  %v709_v7 = vld [vmem:[%s2691_s5 + $0x170] sm:$0xff] }
  0x6b   : > { %v1791_v23 = vcombine.low %v680_v19, %v684_v21  ;;  %v1792_v24 = vcombine.high %v680_v19, %v684_v21  ;;  %v698_v19 = vld [vmem:[%s2691_s5 + $0x118] sm:$0xff] }
  0x6d   : > { %1092 = vmatpush1.bf16.msra.mxu0 %v1821_v25  ;;  %v671_v25 = vld [vmem:[%s2691_s5 + $0x40] sm:$0xff] }
  0x6e   : > { %1093 = vmatprep.subr.bf16.mxu0 %v1814_v26  ;;  %v675_v26 = vld [vmem:[%s2691_s5 + $0x60] sm:$0xff] }
  0x6f   : > { %v1782_v28 = vcombine.high %v671_v25, %v675_v26 }
  0x70   : > { %1869 = vmatmul.mubr.msk.bf16.gmra.mxu0 %vm445_vm0, %v1974_v8 }
  0x71   : > { %1094 = vmatpush1.bf16.msra.mxu0 %v1813_v29  ;;  %v676_v29 = vld [vmem:[%s2691_s5 + $0x68] sm:$0xff] }
  0x72   : > { %1095 = vmatprep.subr.bf16.mxu0 %v1806_v30  ;;  %v1781_v30 = vcombine.low %v671_v25, %v675_v26  ;;  %v1783_v31 = vcombine.low %v672_v27, %v676_v29  ;;  %v1784_v32 = vcombine.high %v672_v27, %v676_v29  ;;  %v693_v29 = vld [vmem:[%s2691_s5 + $0xf0] sm:$0xff] }
  0x75   : > { %1096 = vmatpush1.bf16.msra.mxu0 %v1805_v33  ;;  %v663_v33 = vld [vmem:[%s2691_s5] sm:$0xff] }
  0x76   : > { %1097 = vmatprep.subr.bf16.mxu0 %v1798_v34  ;;  %v667_v34 = vld [vmem:[%s2691_s5 + $0x20] sm:$0xff] }
  0x79   : > { %1098 = vmatpush1.bf16.msra.mxu0 %v1797_v35  ;;  %v664_v35 = vld [vmem:[%s2691_s5 + $0x8] sm:$0xff] }
 0x128   : > { %v1866_v36 = vpop.f32.mrf.mxu0 }
 0x129   : > { %v501_v42 = vadd.f32 %v1866_v36, %v1751_v38  ;;  %v1774_v36 = vcombine.high %v663_v33, %v667_v34 }
 0x12a   : > { %v492_v37 = vpop.f32.mrf.mxu0 }
 0x12b   : > { %v493_v40 = vadd.f32 %v1751_v38, %v492_v37  ;;  %v525_v51 = vmax.f32 %v501_v42, 0.0  ;;  %v668_v37 = vld [vmem:[%s2691_s5 + $0x28] sm:$0xff]  ;;  %v725_v42 = vld [vmem:[%s2691_s5 + $0x1f0] sm:$0xff] }
 0x12c   : > { %v1867_v39 = vpop.f32.mrf.mxu0 }
 0x12d   : > { %v504_v41 = vadd.f32 %v1867_v39, %v1751_v38  ;;  %v523_v47 = vmax.f32 %v493_v40, 0.0  ;;  %v1775_v39 = vcombine.low %v664_v35, %v668_v37  ;;  %v1776_v40 = vcombine.high %v664_v35, %v668_v37 }
 0x12e   : > { %v495_v43 = vpop.f32.mrf.mxu0 }
 0x12f   : > { %v496_v44 = vadd.f32 %v1751_v38, %v495_v43  ;;  %v526_v45 = vmax.f32 %v504_v41, 0.0  ;;  %v721_v41 = vld [vmem:[%s2691_s5 + $0x1d0] sm:$0xff]  ;;  %v722_v43 = vld [vmem:[%s2691_s5 + $0x1d8] sm:$0xff] }
 0x130   : > { %v1870_v46 = vpop.f32.mrf.mxu0 }
 0x131   : > { %v524_v48 = vmax.f32 %v496_v44, 0.0  ;;  %v517_v52 = vadd.f32 %v1870_v46, %v1751_v38  ;;  %v532_v56 = vpack.c.bf16 %v526_v45, %v525_v51  ;;  %v1834_v44 = vcombine.high %v721_v41, %v725_v42  ;;  %v726_v45 = vld [vmem:[%s2691_s5 + $0x1f8] sm:$0xff] }
 0x132   : > { %v508_v53 = vpop.f32.mrf.mxu0  ;;  %v2152_v46 = vmov 0   ;;  %v1836_v49 = vcombine.high %v722_v43, %v726_v45 }
 0x133   : > { %v509_v54 = vadd.f32 %v1751_v38, %v508_v53  ;;  %v531_v55 = vpack.c.bf16 %v524_v48, %v523_v47  ;;  %v529_v62 = vmax.f32 %v517_v52, 0.0  ;;  %1121 = vmatprep.mubr.bf16.mxu0 %v2152_v46  ;;  %v1833_v47 = vcombine.low %v721_v41, %v725_v42  ;;  %v2426_v52 = vld [vmem:[#allocation8] ss:$0 sm:$0xff]  ;;  %v686_v41 = vld [vmem:[%s2691_s5 + $0xb8] sm:$0xff] }
 0x134   : > { %v1871_v57 = vpop.f32.mrf.mxu0  ;;  %v1835_v48 = vcombine.low %v722_v43, %v726_v45 }
 0x135   : > { %v520_v59 = vadd.f32 %v1871_v57, %v1751_v38  ;;  %1880 = vmatprep.mubr.msk.bf16.mxu1 %vm445_vm0, %v531_v55  ;;  %v527_v0 = vmax.f32 %v509_v54, 0.0  ;;  %v713_v57 = vld [vmem:[%s2691_s5 + $0x190] sm:$0xff] }
 0x136   : > { %v511_v63 = vpop.f32.mrf.mxu0  ;;  %1881 = vmatmul.mubr.msk.bf16.vlgmr.msra.gmra.mxu1 %vm445_vm0, %v532_v56 }
 0x137   : > { %v530_v1 = vmax.f32 %v520_v59, 0.0  ;;  %v512_v2 = vadd.f32 %v1751_v38, %v511_v63  ;;  %1163 = vmatpush1.bf16.msra.mxu1 %v1831_v20  ;;  %v1790_v20 = vcombine.high %v679_v17, %v683_v18  ;;  %v1773_v38 = vcombine.low %v663_v33, %v667_v34  ;;  %v717_v59 = vld [vmem:[%s2691_s5 + $0x1b0] sm:$0xff] }
 0x138   : > { %1164 = vmatprep.subr.bf16.mxu1 %v1824_v58  ;;  %v701_v17 = vld [vmem:[%s2691_s5 + $0x130] sm:$0xff] }
 0x139   : > { %v528_v5 = vmax.f32 %v512_v2, 0.0  ;;  %v534_v8 = vpack.c.bf16 %v530_v1, %v529_v62  ;;  %1099 = vmatprep.subr.bf16.mxu0 %v1790_v20  ;;  %v702_v20 = vld [vmem:[%s2691_s5 + $0x138] sm:$0xff] }
 0x13a   : > { %1100 = vmatpush1.bf16.msra.mxu0 %v1789_v22  ;;  %v1812_v27 = vcombine.high %v698_v19, %v702_v20  ;;  %v1811_v34 = vcombine.low %v698_v19, %v702_v20 }
 0x13b   : > { %v533_v9 = vpack.c.bf16 %v528_v5, %v527_v0  ;;  %1165 = vmatpush1.bf16.msra.mxu1 %v1823_v3  ;;  %1101 = vmatprep.subr.bf16.mxu0 %v1782_v28  ;;  %v1826_v3 = vcombine.high %v713_v57, %v717_v59  ;;  %v705_v5 = vld [vmem:[%s2691_s5 + $0x150] sm:$0xff] }
 0x13c   : > { %1166 = vmatprep.subr.bf16.mxu1 %v1816_v4  ;;  %v1828_v4 = vcombine.high %v714_v60, %v718_v61  ;;  %v1817_v22 = vcombine.low %v705_v5, %v709_v7  ;;  %v689_v28 = vld [vmem:[%s2691_s5 + $0xd0] sm:$0xff] }
 0x13d   : > { %1884 = vmatprep.mubr.msk.bf16.mxu1 %vm445_vm0, %v533_v9  ;;  %v710_v9 = vld [vmem:[%s2691_s5 + $0x178] sm:$0xff]  ;;  %v1801_v43 = vcombine.low %v689_v28, %v693_v29 }
 0x13e   : > { %1885 = vmatmul.mubr.msk.bf16.gmra.mxu1 %vm445_vm0, %v534_v8  ;;  %1102 = vmatpush1.bf16.msra.mxu0 %v1781_v30  ;;  %v706_v8 = vld [vmem:[%s2691_s5 + $0x158] sm:$0xff] }
 0x13f   : > { %1167 = vmatpush1.bf16.msra.mxu1 %v1815_v10  ;;  %1103 = vmatprep.subr.bf16.mxu0 %v1774_v36  ;;  %v690_v30 = vld [vmem:[%s2691_s5 + $0xd8] sm:$0xff]  ;;  %v1802_v36 = vcombine.high %v689_v28, %v693_v29 }
 0x140   : > { %1168 = vmatprep.subr.bf16.mxu1 %v1808_v11  ;;  %1194 = vmatprep.mubr.bf16.mxu1 %v2152_v46  ;;  %v1825_v11 = vcombine.low %v713_v57, %v717_v59 }
 0x142   : > { %1104 = vmatpush1.bf16.msra.mxu0 %v1773_v38  ;;  %v681_v38 = vld [vmem:[%s2691_s5 + $0x90] sm:$0xff] }
 0x143   : > { %1169 = vmatpush1.bf16.msra.mxu1 %v1807_v14  ;;  %1235 = vmatprep.subr.bf16.mxu0 %v1834_v44  ;;  %v1818_v14 = vcombine.high %v705_v5, %v709_v7 }
 0x144   : > { %1170 = vmatprep.subr.bf16.mxu1 %v1800_v15  ;;  %v1820_v15 = vcombine.high %v706_v8, %v710_v9 }
 0x147   : > { %1171 = vmatpush1.bf16.msra.mxu1 %v1799_v16  ;;  %v697_v16 = vld [vmem:[%s2691_s5 + $0x110] sm:$0xff] }
 0x148   : > { %1172 = vmatprep.subr.bf16.mxu1 %v1792_v24  ;;  %v1810_v24 = vcombine.high %v697_v16, %v701_v17  ;;  %v1809_v33 = vcombine.low %v697_v16, %v701_v17  ;;  %v2553_v16 = vld [vmem:[#allocation10] sm:$0xff] }
 0x14b   : > { %1173 = vmatpush1.bf16.msra.mxu1 %v1791_v23  ;;  %v1819_v23 = vcombine.low %v706_v8, %v710_v9 }
 0x14c   : > { %1174 = vmatprep.subr.bf16.mxu1 %v1784_v32 }
 0x14f   : > { %1175 = vmatpush1.bf16.msra.mxu1 %v1783_v31  ;;  %v694_v31 = vld [vmem:[%s2691_s5 + $0xf8] sm:$0xff] }
 0x150   : > { %1176 = vmatprep.subr.bf16.mxu1 %v1776_v40  ;;  %v1804_v37 = vcombine.high %v690_v30, %v694_v31  ;;  %v682_v40 = vld [vmem:[%s2691_s5 + $0x98] sm:$0xff]  ;;  %v1803_v44 = vcombine.low %v690_v30, %v694_v31 }
 0x151   : > { %v1795_v57 = vcombine.low %v682_v40, %v686_v41 }
 0x153   : > { %1177 = vmatpush1.bf16.msra.mxu1 %v1775_v39  ;;  %v685_v39 = vld [vmem:[%s2691_s5 + $0xb0] sm:$0xff] }
 0x154   : > { %1308 = vmatprep.subr.bf16.mxu1 %v1836_v49  ;;  %v1794_v45 = vcombine.high %v681_v38, %v685_v39  ;;  %v1796_v49 = vcombine.high %v682_v40, %v686_v41 }
 0x1f6   : > { %v1882_v50 = vpop.f32.mrf.mxu1 }
 0x1f7   : > { %v629_v10 = vadd.f32 %v1882_v50, %v2426_v52  ;;  %v673_v50 = vld [vmem:[%s2691_s5 + $0x50] sm:$0xff] }
 0x1f8   : > { %v620_v51 = vpop.f32.mrf.mxu1 }
 0x1f9   : > { %v621_v54 = vadd.f32 %v2426_v52, %v620_v51  ;;  %v653_v21 = vmax.f32 %v629_v10, 0.0  ;;  %v677_v51 = vld [vmem:[%s2691_s5 + $0x70] sm:$0xff] }
 0x1fa   : > { %v1883_v53 = vpop.f32.mrf.mxu1  ;;  %v1786_v60 = vcombine.high %v673_v50, %v677_v51 }
 0x1fb   : > { %v651_v62 = vmax.f32 %v621_v54, 0.0  ;;  %v632_v1 = vadd.f32 %v1883_v53, %v2426_v52  ;;  %v674_v53 = vld [vmem:[%s2691_s5 + $0x58] sm:$0xff] }
 0x1fc   : > { %v623_v55 = vpop.f32.mrf.mxu1  ;;  %v678_v54 = vld [vmem:[%s2691_s5 + $0x78] sm:$0xff] }
 0x1fd   : > { %v624_v56 = vadd.f32 %v2426_v52, %v623_v55  ;;  %v654_v13 = vmax.f32 %v632_v1, 0.0  ;;  %v1788_v61 = vcombine.high %v674_v53, %v678_v54  ;;  %v1785_v1 = vcombine.low %v673_v50, %v677_v51 }
 0x1fe   : > { %v2433_v58 = vpop.f32.mrf.mxu1 }
 0x1ff   : > { %v652_v63 = vmax.f32 %v624_v56, 0.0  ;;  %v2476_v25 = vpack.c.bf16 %v654_v13, %v653_v21  ;;  %v645_v55 = vadd.f32 %v2433_v58, %v2426_v52  ;;  %v1793_v56 = vcombine.low %v681_v38, %v685_v39  ;;  %v666_v58 = vld [vmem:[%s2691_s5 + $0x18] sm:$0xff] }
 0x200   : > { %v636_v0 = vpop.f32.mrf.mxu1 }
 0x201   : > { %v2445_v2 = vpack.c.bf16 %v652_v63, %v651_v62  ;;  %v637_v32 = vadd.f32 %v2426_v52, %v636_v0  ;;  %v665_v62 = vld [vmem:[%s2691_s5 + $0x10] sm:$0xff]  ;;  %v670_v63 = vld [vmem:[%s2691_s5 + $0x38] sm:$0xff]  ;;  %v657_v0 = vmax.f32 %v645_v55, 0.0 }
 0x202   : > { %v1887_v6 = vpop.f32.mrf.mxu1  ;;  %v1779_v8 = vcombine.low %v666_v58, %v670_v63 }
 0x203   : > { %1122 = vmatmul.mubr.bf16.vlgmr.msra.gmra.mxu0 %v2445_v2  ;;  %1195 = vmatmul.mubr.bf16.vlgmr.msra.gmra.mxu1 %v2445_v2  ;;  %v655_v42 = vmax.f32 %v637_v32, 0.0 }
 0x204   : > { %1236 = vmatpush1.bf16.msra.mxu0 %v1833_v47  ;;  %1309 = vmatpush1.bf16.msra.mxu1 %v1835_v48  ;;  %v639_v18 = vpop.f32.mrf.mxu1  ;;  %v648_v47 = vadd.f32 %v1887_v6, %v2426_v52  ;;  %v1780_v6 = vcombine.high %v666_v58, %v670_v63 }
 0x205   : > { %1237 = vmatprep.subr.bf16.mxu0 %v1826_v3  ;;  %1310 = vmatprep.subr.bf16.mxu1 %v1828_v4  ;;  %v640_v26 = vadd.f32 %v2426_v52, %v639_v18  ;;  %v669_v52 = vld [vmem:[%s2691_s5 + $0x30] sm:$0xff]  ;;  %v1787_v3 = vcombine.low %v674_v53, %v678_v54 }
 0x206   : > { %1131 = vmatprep.mubr.bf16.mxu0 %v2152_v46  ;;  %1204 = vmatprep.mubr.bf16.mxu1 %v2152_v46  ;;  %v658_v59 = vmax.f32 %v648_v47, 0.0  ;;  %v1778_v5 = vcombine.high %v665_v62, %v669_v52  ;;  %v1777_v7 = vcombine.low %v665_v62, %v669_v52 }
 0x207   : > { %v656_v35 = vmax.f32 %v640_v26, 0.0 }
 0x208   : > { %1238 = vmatpush1.bf16.msra.mxu0 %v1825_v11  ;;  %1311 = vmatpush1.bf16.msra.mxu1 %v1827_v12  ;;  %v662_v4 = vpack.c.bf16 %v658_v59, %v657_v0 }
 0x209   : > { %1239 = vmatprep.subr.bf16.mxu0 %v1818_v14  ;;  %1312 = vmatprep.subr.bf16.mxu1 %v1820_v15  ;;  %v661_v48 = vpack.c.bf16 %v656_v35, %v655_v42 }
 0x20b   : > { %1132 = vmatmul.mubr.bf16.gmra.mxu0 %v2476_v25  ;;  %1205 = vmatmul.mubr.bf16.gmra.mxu1 %v2476_v25 }
 0x20c   : > { %1240 = vmatpush1.bf16.msra.mxu0 %v1817_v22  ;;  %1313 = vmatpush1.bf16.msra.mxu1 %v1819_v23 }
 0x20d   : > { %1241 = vmatprep.subr.bf16.mxu0 %v1810_v24  ;;  %1314 = vmatprep.subr.bf16.mxu1 %v1812_v27 }
 0x20e   : > { %1141 = vmatprep.mubr.bf16.mxu0 %v2152_v46  ;;  %1214 = vmatprep.mubr.bf16.mxu1 %v2152_v46 }
 0x210   : > { %1242 = vmatpush1.bf16.msra.mxu0 %v1809_v33  ;;  %1315 = vmatpush1.bf16.msra.mxu1 %v1811_v34 }
 0x211   : > { %1243 = vmatprep.subr.bf16.mxu0 %v1802_v36  ;;  %1316 = vmatprep.subr.bf16.mxu1 %v1804_v37 }
 0x213   : > { %1142 = vmatmul.mubr.bf16.gmra.mxu0 %v661_v48  ;;  %1215 = vmatmul.mubr.bf16.gmra.mxu1 %v661_v48 }
 0x214   : > { %1244 = vmatpush1.bf16.msra.mxu0 %v1801_v43  ;;  %1317 = vmatpush1.bf16.msra.mxu1 %v1803_v44 }
 0x215   : > { %1245 = vmatprep.subr.bf16.mxu0 %v1794_v45  ;;  %1318 = vmatprep.subr.bf16.mxu1 %v1796_v49 }
 0x216   : > { %1151 = vmatprep.mubr.bf16.mxu0 %v2152_v46  ;;  %1224 = vmatprep.mubr.bf16.mxu1 %v2152_v46 }
 0x218   : > { %1246 = vmatpush1.bf16.msra.mxu0 %v1793_v56  ;;  %1319 = vmatpush1.bf16.msra.mxu1 %v1795_v57 }
 0x219   : > { %1247 = vmatprep.subr.bf16.mxu0 %v1786_v60  ;;  %1320 = vmatprep.subr.bf16.mxu1 %v1788_v61 }
 0x21b   : > { %1152 = vmatmul.mubr.bf16.gmra.mxu0 %v662_v4  ;;  %1225 = vmatmul.mubr.bf16.gmra.mxu1 %v662_v4 }
 0x21c   : > { %1248 = vmatpush1.bf16.msra.mxu0 %v1785_v1  ;;  %1321 = vmatpush1.bf16.msra.mxu1 %v1787_v3 }
 0x21d   : > { %1249 = vmatprep.subr.bf16.mxu0 %v1778_v5  ;;  %1322 = vmatprep.subr.bf16.mxu1 %v1780_v6 }
 0x21e   : > { %1267 = vmatprep.mubr.bf16.mxu0 %v2152_v46  ;;  %1340 = vmatprep.mubr.bf16.mxu1 %v2152_v46 }
 0x220   : > { %1250 = vmatpush1.bf16.msra.mxu0 %v1777_v7  ;;  %1323 = vmatpush1.bf16.msra.mxu1 %v1779_v8 }
 0x223   : > { %1268 = vmatmul.mubr.bf16.vlgmr.msra.gmra.mxu0 %v2445_v2  ;;  %1341 = vmatmul.mubr.bf16.vlgmr.msra.gmra.mxu1 %v2445_v2  ;;  %v729_v2 = vlaneseq }
 0x224   : > { %1277 = vmatprep.mubr.bf16.mxu0 %v2152_v46  ;;  %1350 = vmatprep.mubr.bf16.mxu1 %v2152_v46 }
 0x225   : > { %v2549_v9 = vshrl.u32 %v729_v2, 7 }
 0x227   : > { %v731_v12 = vsub.s32 0, %v2549_v9  ;;  %v739_v13 = vsub.s32 2, %v2549_v9  ;;  %v735_v19 = vsub.s32 1, %v2549_v9  ;;  %v747_v42 = vsub.s32 4, %v2549_v9 }
 0x228   : > { %v755_v43 = vsub.s32 6, %v2549_v9 }
 0x229   : > { %v2558_v20 = vrot.slane %v2553_v16, %v731_v12  ;;  %v2561_v21 = vrot.slane %v2553_v16, %v739_v13  ;;  %v2564_v26 = vrot.slane %v2553_v16, %v735_v19 }
 0x22b   : > { %1278 = vmatmul.mubr.bf16.gmra.mxu0 %v2476_v25  ;;  %1351 = vmatmul.mubr.bf16.gmra.mxu1 %v2476_v25 }
 0x22c   : > { %1287 = vmatprep.mubr.bf16.mxu0 %v2152_v46  ;;  %1360 = vmatprep.mubr.bf16.mxu1 %v2152_v46 }
 0x233   : > { %1288 = vmatmul.mubr.bf16.gmra.mxu0 %v661_v48  ;;  %1361 = vmatmul.mubr.bf16.gmra.mxu1 %v661_v48 }
 0x234   : > { %1297 = vmatprep.mubr.bf16.mxu0 %v2152_v46  ;;  %1370 = vmatprep.mubr.bf16.mxu1 %v2152_v46  ;;  %v743_v46 = vsub.s32 3, %v2549_v9 }
 0x236   : > { %v2567_v27 = vrot.slane %v2553_v16, %v743_v46 }
 0x23b   : > { %1298 = vmatmul.mubr.bf16.gmra.mxu0 %v662_v4  ;;  %1371 = vmatmul.mubr.bf16.gmra.mxu1 %v662_v4 }
 0x2c3   : > { %v1123_v10 = vpop.f32.mrf.mxu0  ;;  %v1196_v11 = vpop.f32.mrf.mxu1 }
 0x2c4   : > { %v1124_v28 = vadd.f32 %v1123_v10, %v2558_v20  ;;  %v1197_v29 = vadd.f32 %v1196_v11, %v2561_v21 }
 0x2c5   : > { %v1125_v14 = vpop.f32.mrf.mxu0  ;;  %v1198_v15 = vpop.f32.mrf.mxu1 }
 0x2c6   : > { %v1126_v40 = vadd.f32 %v1125_v14, %v2564_v26  ;;  %v1199_v41 = vadd.f32 %v1198_v15, %v2567_v27  ;;  %v1381_v44 = vmax.f32 %v1124_v28, 0.0  ;;  %v1383_v45 = vmax.f32 %v1197_v29, 0.0 }
 0x2c7   : > { %v1127_v17 = vpop.f32.mrf.mxu0  ;;  %v1200_v18 = vpop.f32.mrf.mxu1 }
 0x2c8   : > { %v1128_v30 = vadd.f32 %v1127_v17, %v2558_v20  ;;  %v1201_v31 = vadd.f32 %v1200_v18, %v2561_v21  ;;  %v1382_v52 = vmax.f32 %v1126_v40, 0.0  ;;  %v1384_v58 = vmax.f32 %v1199_v41, 0.0 }
 0x2c9   : > { %v1129_v22 = vpop.f32.mrf.mxu0  ;;  %v1202_v23 = vpop.f32.mrf.mxu1 }
 0x2ca   : > { %v1130_v34 = vadd.f32 %v1129_v22, %v2564_v26  ;;  %v1203_v35 = vadd.f32 %v1202_v23, %v2567_v27  ;;  %v1389_v47 = vmax.f32 %v1128_v30, 0.0  ;;  %v1391_v48 = vmax.f32 %v1201_v31, 0.0 }
 0x2cb   : > { %v1133_v24 = vpop.f32.mrf.mxu0  ;;  %v1206_v25 = vpop.f32.mrf.mxu1 }
 0x2cc   : > { %v1134_v36 = vadd.f32 %v1133_v24, %v2558_v20  ;;  %v1207_v37 = vadd.f32 %v1206_v25, %v2561_v21  ;;  %v1390_v51 = vmax.f32 %v1130_v34, 0.0  ;;  %v1392_v53 = vmax.f32 %v1203_v35, 0.0 }
 0x2cd   : > { %v1135_v32 = vpop.f32.mrf.mxu0  ;;  %v1208_v33 = vpop.f32.mrf.mxu1  ;;  %v1446_v1 = vmax.f32 %v1381_v44, %v1389_v47  ;;  %v1472_v3 = vmax.f32 %v1383_v45, %v1391_v48 }
 0x2ce   : > { %v1136_v54 = vadd.f32 %v1135_v32, %v2564_v26  ;;  %v1209_v55 = vadd.f32 %v1208_v33, %v2567_v27  ;;  %v1397_v56 = vmax.f32 %v1134_v36, 0.0  ;;  %v1399_v57 = vmax.f32 %v1207_v37, 0.0 }
 0x2cf   : > { %v1137_v38 = vpop.f32.mrf.mxu0  ;;  %v1210_v39 = vpop.f32.mrf.mxu1  ;;  %v1459_v8 = vmax.f32 %v1382_v52, %v1390_v51  ;;  %v1485_v2 = vmax.f32 %v1384_v58, %v1392_v53 }
 0x2d0   : > { %v1138_v59 = vadd.f32 %v1137_v38, %v2558_v20  ;;  %v1211_v60 = vadd.f32 %v1210_v39, %v2561_v21  ;;  %v1398_v10 = vmax.f32 %v1136_v54, 0.0  ;;  %v1400_v11 = vmax.f32 %v1209_v55, 0.0 }
 0x2d1   : > { %v1139_v49 = vpop.f32.mrf.mxu0  ;;  %v1212_v50 = vpop.f32.mrf.mxu1  ;;  %v1447_v12 = vmax.f32 %v1446_v1, %v1397_v56  ;;  %v1473_v13 = vmax.f32 %v1472_v3, %v1399_v57 }
 0x2d2   : > { %v1140_v63 = vadd.f32 %v1139_v49, %v2564_v26  ;;  %v1213_v0 = vadd.f32 %v1212_v50, %v2567_v27  ;;  %v1405_v14 = vmax.f32 %v1138_v59, 0.0  ;;  %v1407_v15 = vmax.f32 %v1211_v60, 0.0 }
 0x2d3   : > { %v1143_v61 = vpop.f32.mrf.mxu0  ;;  %v1216_v62 = vpop.f32.mrf.mxu1  ;;  %v1460_v32 = vmax.f32 %v1459_v8, %v1398_v10  ;;  %v1486_v33 = vmax.f32 %v1485_v2, %v1400_v11 }
 0x2d4   : > { %v1144_v4 = vadd.f32 %v1143_v61, %v2558_v20  ;;  %v1217_v5 = vadd.f32 %v1216_v62, %v2561_v21  ;;  %v1406_v19 = vmax.f32 %v1140_v63, 0.0  ;;  %v1408_v46 = vmax.f32 %v1213_v0, 0.0 }
 0x2d5   : > { %v1145_v6 = vpop.f32.mrf.mxu0  ;;  %v1218_v7 = vpop.f32.mrf.mxu1  ;;  %v1448_v36 = vmax.f32 %v1447_v12, %v1405_v14  ;;  %v1474_v37 = vmax.f32 %v1473_v13, %v1407_v15 }
 0x2d6   : > { %v1146_v22 = vadd.f32 %v1145_v6, %v2564_v26  ;;  %v1219_v23 = vadd.f32 %v1218_v7, %v2567_v27  ;;  %v1413_v24 = vmax.f32 %v1144_v4, 0.0  ;;  %v1415_v25 = vmax.f32 %v1217_v5, 0.0 }
 0x2d7   : > { %v1147_v17 = vpop.f32.mrf.mxu0  ;;  %v1220_v18 = vpop.f32.mrf.mxu1  ;;  %v1461_v49 = vmax.f32 %v1460_v32, %v1406_v19  ;;  %v1487_v50 = vmax.f32 %v1486_v33, %v1408_v46 }
 0x2d8   : > { %v1148_v28 = vadd.f32 %v1147_v17, %v2558_v20  ;;  %v1221_v29 = vadd.f32 %v1220_v18, %v2561_v21  ;;  %v1414_v44 = vmax.f32 %v1146_v22, 0.0  ;;  %v1416_v45 = vmax.f32 %v1219_v23, 0.0 }
 0x2d9   : > { %v1149_v30 = vpop.f32.mrf.mxu0  ;;  %v1222_v31 = vpop.f32.mrf.mxu1  ;;  %v1449_v51 = vmax.f32 %v1448_v36, %v1413_v24  ;;  %v1475_v53 = vmax.f32 %v1474_v37, %v1415_v25 }
 0x2da   : > { %v1150_v34 = vadd.f32 %v1149_v30, %v2564_v26  ;;  %v1223_v35 = vadd.f32 %v1222_v31, %v2567_v27  ;;  %v1421_v38 = vmax.f32 %v1148_v28, 0.0  ;;  %v1423_v39 = vmax.f32 %v1221_v29, 0.0 }
 0x2db   : > { %v1153_v40 = vpop.f32.mrf.mxu0  ;;  %v1226_v41 = vpop.f32.mrf.mxu1  ;;  %v1462_v1 = vmax.f32 %v1461_v49, %v1414_v44  ;;  %v1488_v3 = vmax.f32 %v1487_v50, %v1416_v45  ;;  %v759_v29 = vsub.s32 7, %v2549_v9 }
 0x2dc   : > { %v1154_v47 = vadd.f32 %v1153_v40, %v2558_v20  ;;  %v1227_v48 = vadd.f32 %v1226_v41, %v2561_v21  ;;  %v1422_v56 = vmax.f32 %v1150_v34, 0.0  ;;  %v1424_v57 = vmax.f32 %v1223_v35, 0.0 }
 0x2dd   : > { %v1155_v54 = vpop.f32.mrf.mxu0  ;;  %v1228_v55 = vpop.f32.mrf.mxu1  ;;  %v1450_v61 = vmax.f32 %v1449_v51, %v1421_v38  ;;  %v1476_v62 = vmax.f32 %v1475_v53, %v1423_v39  ;;  %v2619_v39 = vrot.slane %v2553_v16, %v759_v29 }
 0x2de   : > { %v1429_v59 = vmax.f32 %v1154_v47, 0.0  ;;  %v1431_v60 = vmax.f32 %v1227_v48, 0.0  ;;  %v1156_v52 = vadd.f32 %v1155_v54, %v2564_v26  ;;  %v1229_v58 = vadd.f32 %v1228_v55, %v2567_v27 }
 0x2df   : > { %v1157_v63 = vpop.f32.mrf.mxu0  ;;  %v1230_v0 = vpop.f32.mrf.mxu1  ;;  %v1463_v17 = vmax.f32 %v1462_v1, %v1422_v56  ;;  %v1489_v18 = vmax.f32 %v1488_v3, %v1424_v57 }
 0x2e0   : > { %v1158_v4 = vadd.f32 %v1157_v63, %v2558_v20  ;;  %v1231_v5 = vadd.f32 %v1230_v0, %v2561_v21  ;;  %v1451_v6 = vmax.f32 %v1450_v61, %v1429_v59  ;;  %v1477_v7 = vmax.f32 %v1476_v62, %v1431_v60 }
 0x2e1   : > { %v1430_v8 = vmax.f32 %v1156_v52, 0.0  ;;  %v1432_v2 = vmax.f32 %v1229_v58, 0.0  ;;  %v1159_v10 = vpop.f32.mrf.mxu0  ;;  %v1232_v11 = vpop.f32.mrf.mxu1  ;;  %v751_v20 = vsub.s32 5, %v2549_v9  ;;  %v2153_v59 = vmov 1966171168  }
 0x2e2   : > { %v1437_v12 = vmax.f32 %v1158_v4, 0.0  ;;  %v1439_v13 = vmax.f32 %v1231_v5, 0.0  ;;  %v1160_v14 = vadd.f32 %v1159_v10, %v2564_v26  ;;  %v1233_v15 = vadd.f32 %v1232_v11, %v2567_v27 }
 0x2e3   : > { %v1269_v19 = vpop.f32.mrf.mxu0  ;;  %v1342_v46 = vpop.f32.mrf.mxu1  ;;  %v1464_v25 = vmax.f32 %v1463_v17, %v1430_v8  ;;  %v1490_v31 = vmax.f32 %v1489_v18, %v1432_v2  ;;  %v2608_v26 = vrot.slane %v2553_v16, %v747_v42  ;;  %v2613_v27 = vrot.slane %v2553_v16, %v755_v43 }
 0x2e4   : > { %v1452_v22 = vmax.f32 %v1451_v6, %v1437_v12  ;;  %v1478_v21 = vmax.f32 %v1477_v7, %v1439_v13  ;;  %v1438_v23 = vmax.f32 %v1160_v14, 0.0  ;;  %v1440_v24 = vmax.f32 %v1233_v15, 0.0 }
 0x2e5   : > { %v1271_v28 = vpop.f32.mrf.mxu0  ;;  %v1344_v30 = vpop.f32.mrf.mxu1  ;;  %v2616_v38 = vrot.slane %v2553_v16, %v751_v20  ;;  %v1270_v41 = vadd.f32 %v1269_v19, %v2608_v26  ;;  %v1343_v44 = vadd.f32 %v1342_v46, %v2613_v27  ;;  %v2628_v60 = vunpack.c.l.s4 %v2153_v59 }
 0x2e6   : > { %v1453_v32 = vrot.slane %v1452_v22, 4  ;;  %v1479_v33 = vrot.slane %v1478_v21, 4  ;;  %v1465_v34 = vmax.f32 %v1464_v25, %v1438_v23  ;;  %v1491_v37 = vmax.f32 %v1490_v31, %v1440_v24 }
 0x2e7   : > { %v1273_v35 = vpop.f32.mrf.mxu0  ;;  %v1346_v36 = vpop.f32.mrf.mxu1  ;;  %v1272_v51 = vadd.f32 %v1271_v28, %v2616_v38  ;;  %v1345_v54 = vadd.f32 %v1344_v30, %v2619_v39  ;;  %v1385_v61 = vmax.f32 %v1270_v41, 0.0  ;;  %v1387_v62 = vmax.f32 %v1343_v44, 0.0 }
 0x2e8   : > { %v1454_v43 = vmax.f32 %v1452_v22, %v1453_v32  ;;  %v1480_v45 = vmax.f32 %v1478_v21, %v1479_v33  ;;  %v1466_v47 = vrot.slane %v1465_v34, 4  ;;  %v1492_v50 = vrot.slane %v1491_v37, 4 }
 0x2e9   : > { %v1275_v40 = vpop.f32.mrf.mxu0  ;;  %v1348_v42 = vpop.f32.mrf.mxu1  ;;  %v1274_v53 = vadd.f32 %v1273_v35, %v2608_v26  ;;  %v1347_v16 = vadd.f32 %v1346_v36, %v2613_v27  ;;  %v1386_v6 = vmax.f32 %v1272_v51, 0.0  ;;  %v1388_v2 = vmax.f32 %v1345_v54, 0.0 }
 0x2ea   : > { %v1276_v55 = vadd.f32 %v1275_v40, %v2616_v38  ;;  %v1349_v52 = vadd.f32 %v1348_v42, %v2619_v39  ;;  %v1455_v58 = vrot.slane %v1454_v43, 2  ;;  %v1481_v63 = vrot.slane %v1480_v45, 2 }
 0x2eb   : > { %v1279_v48 = vpop.f32.mrf.mxu0  ;;  %v1352_v49 = vpop.f32.mrf.mxu1  ;;  %v1467_v0 = vmax.f32 %v1465_v34, %v1466_v47  ;;  %v1493_v5 = vmax.f32 %v1491_v37, %v1492_v50  ;;  %v1393_v7 = vmax.f32 %v1274_v53, 0.0  ;;  %v1395_v10 = vmax.f32 %v1347_v16, 0.0 }
 0x2ec   : > { %v1280_v1 = vadd.f32 %v1279_v48, %v2608_v26  ;;  %v1353_v8 = vadd.f32 %v1352_v49, %v2613_v27  ;;  %v1394_v11 = vmax.f32 %v1276_v55, 0.0  ;;  %v1396_v15 = vmax.f32 %v1349_v52, 0.0 }
 0x2ed   : > { %v1281_v56 = vpop.f32.mrf.mxu0  ;;  %v1354_v57 = vpop.f32.mrf.mxu1  ;;  %v2637_v46 = vmax.f32 %v1454_v43, %v1455_v58  ;;  %v2639_v20 = vmax.f32 %v1480_v45, %v1481_v63  ;;  %v1468_v22 = vrot.slane %v1467_v0, 2  ;;  %v1494_v25 = vrot.slane %v1493_v5, 2 }
 0x2ee   : > { %v1282_v12 = vadd.f32 %v1281_v56, %v2616_v38  ;;  %v1355_v17 = vadd.f32 %v1354_v57, %v2619_v39  ;;  %v1401_v21 = vmax.f32 %v1280_v1, 0.0  ;;  %v1498_v28 = vmax.f32 %v1385_v61, %v1393_v7 }
 0x2ef   : > { %v1283_v3 = vpop.f32.mrf.mxu0  ;;  %v1356_v4 = vpop.f32.mrf.mxu1  ;;  %v1403_v29 = vmax.f32 %v1353_v8, 0.0  ;;  %v1524_v31 = vmax.f32 %v1387_v62, %v1395_v10  ;;  %v1511_v32 = vmax.f32 %v1386_v6, %v1394_v11  ;;  %v1537_v37 = vmax.f32 %v1388_v2, %v1396_v15 }
 0x2f0   : > { %v1284_v18 = vadd.f32 %v1283_v3, %v2608_v26  ;;  %v1357_v19 = vadd.f32 %v1356_v4, %v2613_v27  ;;  %v1402_v30 = vmax.f32 %v1282_v12, 0.0  ;;  %v1404_v40 = vmax.f32 %v1355_v17, 0.0 }
 0x2f1   : > { %v1285_v13 = vpop.f32.mrf.mxu0  ;;  %v1358_v14 = vpop.f32.mrf.mxu1  ;;  %v1499_v44 = vmax.f32 %v1498_v28, %v1401_v21  ;;  %v1525_v50 = vmax.f32 %v1524_v31, %v1403_v29  ;;  %v2647_v16 = vmax.f32 %v1467_v0, %v1468_v22  ;;  %v2649_v55 = vmax.f32 %v1493_v5, %v1494_v25 }
 0x2f2   : > { %v1286_v33 = vadd.f32 %v1285_v13, %v2616_v38  ;;  %v1359_v34 = vadd.f32 %v1358_v14, %v2619_v39  ;;  %v1409_v42 = vmax.f32 %v1284_v18, 0.0  ;;  %v1411_v41 = vmax.f32 %v1357_v19, 0.0 }
 0x2f3   : > { %v1289_v23 = vpop.f32.mrf.mxu0  ;;  %v1362_v24 = vpop.f32.mrf.mxu1  ;;  %v1512_v51 = vmax.f32 %v1511_v32, %v1402_v30  ;;  %v1538_v62 = vmax.f32 %v1537_v37, %v1404_v40 }
 0x2f4   : > { %v1410_v43 = vmax.f32 %v1286_v33, 0.0  ;;  %v1290_v45 = vadd.f32 %v1289_v23, %v2608_v26  ;;  %v1363_v47 = vadd.f32 %v1362_v24, %v2613_v27  ;;  %v1412_v56 = vmax.f32 %v1359_v34, 0.0 }
 0x2f5   : > { %v1291_v35 = vpop.f32.mrf.mxu0  ;;  %v1364_v36 = vpop.f32.mrf.mxu1  ;;  %v1500_v52 = vmax.f32 %v1499_v44, %v1409_v42  ;;  %v1526_v58 = vmax.f32 %v1525_v50, %v1411_v41 }
 0x2f6   : > { %v1292_v53 = vadd.f32 %v1291_v35, %v2616_v38  ;;  %v1365_v54 = vadd.f32 %v1364_v36, %v2619_v39  ;;  %v1513_v63 = vmax.f32 %v1512_v51, %v1410_v43  ;;  %v1417_v1 = vmax.f32 %v1290_v45, 0.0 }
 0x2f7   : > { %v1293_v48 = vpop.f32.mrf.mxu0  ;;  %v1366_v49 = vpop.f32.mrf.mxu1  ;;  %v1419_v3 = vmax.f32 %v1363_v47, 0.0  ;;  %v1539_v11 = vmax.f32 %v1538_v62, %v1412_v56 }
 0x2f8   : > { %v1294_v57 = vadd.f32 %v1293_v48, %v2608_v26  ;;  %v1367_v4 = vadd.f32 %v1366_v49, %v2613_v27  ;;  %v1418_v8 = vmax.f32 %v1292_v53, 0.0  ;;  %v1420_v5 = vmax.f32 %v1365_v54, 0.0 }
 0x2f9   : > { %v1295_v59 = vpop.f32.mrf.mxu0  ;;  %v1368_v61 = vpop.f32.mrf.mxu1  ;;  %v1501_v23 = vmax.f32 %v1500_v52, %v1417_v1  ;;  %v1527_v24 = vmax.f32 %v1526_v58, %v1419_v3  ;;  %v1564_v1 = vunpack.c.0.s8 %v2628_v60 }
 0x2fa   : > { %v1296_v6 = vadd.f32 %v1295_v59, %v2616_v38  ;;  %v1369_v2 = vadd.f32 %v1368_v61, %v2619_v39  ;;  %v1425_v12 = vmax.f32 %v1294_v57, 0.0  ;;  %v1427_v13 = vmax.f32 %v1367_v4, 0.0 }
 0x2fb   : > { %v1299_v7 = vpop.f32.mrf.mxu0  ;;  %v1372_v0 = vpop.f32.mrf.mxu1  ;;  %v1514_v31 = vmax.f32 %v1513_v63, %v1418_v8  ;;  %v1540_v32 = vmax.f32 %v1539_v11, %v1420_v5 }
 0x2fc   : > { %v1300_v10 = vadd.f32 %v1299_v7, %v2608_v26  ;;  %v1373_v14 = vadd.f32 %v1372_v0, %v2613_v27  ;;  %v1426_v18 = vmax.f32 %v1296_v6, 0.0  ;;  %v1428_v19 = vmax.f32 %v1369_v2, 0.0 }
 0x2fd   : > { %v1301_v15 = vpop.f32.mrf.mxu0  ;;  %v1374_v17 = vpop.f32.mrf.mxu1  ;;  %v1502_v35 = vmax.f32 %v1501_v23, %v1425_v12  ;;  %v1528_v36 = vmax.f32 %v1527_v24, %v1427_v13 }
 0x2fe   : > { %v1302_v22 = vadd.f32 %v1301_v15, %v2616_v38  ;;  %v1375_v21 = vadd.f32 %v1374_v17, %v2619_v39  ;;  %v1433_v25 = vmax.f32 %v1300_v10, 0.0  ;;  %v1435_v28 = vmax.f32 %v1373_v14, 0.0 }
 0x2ff   : > { %v1303_v29 = vpop.f32.mrf.mxu0  ;;  %v1376_v30 = vpop.f32.mrf.mxu1  ;;  %v1515_v44 = vmax.f32 %v1514_v31, %v1426_v18  ;;  %v1541_v43 = vmax.f32 %v1540_v32, %v1428_v19  ;;  %v1567_v14 = vsub.s32 %v1564_v1, %v2549_v9 }
 0x300   : > { %v1434_v33 = vmax.f32 %v1302_v22, 0.0  ;;  %v1436_v34 = vmax.f32 %v1375_v21, 0.0  ;;  %v1304_v37 = vadd.f32 %v1303_v29, %v2608_v26  ;;  %v1377_v40 = vadd.f32 %v1376_v30, %v2613_v27 }
 0x301   : > { %v1305_v42 = vpop.f32.mrf.mxu0  ;;  %v1378_v41 = vpop.f32.mrf.mxu1  ;;  %v1503_v48 = vmax.f32 %v1502_v35, %v1433_v25  ;;  %v1529_v49 = vmax.f32 %v1528_v36, %v1435_v28  ;;  %v1470_v26 = vrot.slane %v2647_v16, 1  ;;  %v1496_v27 = vrot.slane %v2649_v55, 1 }
 0x302   : > { %v1306_v45 = vadd.f32 %v1305_v42, %v2616_v38  ;;  %v1379_v47 = vadd.f32 %v1378_v41, %v2619_v39  ;;  %v1441_v50 = vmax.f32 %v1304_v37, 0.0  ;;  %v1443_v51 = vmax.f32 %v1377_v40, 0.0 }
 0x303   : > { %v1516_v53 = vmax.f32 %v1515_v44, %v1434_v33  ;;  %v1542_v54 = vmax.f32 %v1541_v43, %v1436_v34  ;;  %v1457_v38 = vrot.slane %v2637_v46, 1  ;;  %v1483_v39 = vrot.slane %v2639_v20, 1 }
 0x304   : > { %v1442_v56 = vmax.f32 %v1306_v45, 0.0  ;;  %v1444_v57 = vmax.f32 %v1379_v47, 0.0  ;;  %v1504_v59 = vmax.f32 %v1503_v48, %v1441_v50  ;;  %v1530_v61 = vmax.f32 %v1529_v49, %v1443_v51 }
 0x305   : > { %v1471_v6 = vmax.f32 %v2647_v16, %v1470_v26  ;;  %v1497_v7 = vmax.f32 %v2649_v55, %v1496_v27  ;;  %v1458_v10 = vmax.f32 %v2637_v46, %v1457_v38  ;;  %v1484_v11 = vmax.f32 %v2639_v20, %v1483_v39 }
 0x306   : > { %v1517_v62 = vmax.f32 %v1516_v53, %v1442_v56  ;;  %v1543_v52 = vmax.f32 %v1542_v54, %v1444_v57  ;;  %v1505_v58 = vrot.slane %v1504_v59, 4  ;;  %v1531_v63 = vrot.slane %v1530_v61, 4 }
 0x307   : > { %v1558_v17 = vcombine.low %v1458_v10, %v1471_v6  ;;  %v1559_v18 = vcombine.low %v1484_v11, %v1497_v7 }
 0x308   : > { %v1518_v3 = vrot.slane %v1517_v62, 4  ;;  %v1544_v4 = vrot.slane %v1543_v52, 4  ;;  %v1506_v0 = vmax.f32 %v1504_v59, %v1505_v58  ;;  %v1532_v8 = vmax.f32 %v1530_v61, %v1531_v63 }
 0x309   : > { %v1568_v46 = vrot.slane %v1558_v17, %v1567_v14  ;;  %v1575_v28 = vrot.slane %v1559_v18, %v1567_v14 }
 0x30a   : > { %v1519_v5 = vmax.f32 %v1517_v62, %v1518_v3  ;;  %v1545_v2 = vmax.f32 %v1543_v52, %v1544_v4  ;;  %v1507_v12 = vrot.slane %v1506_v0, 2  ;;  %v1533_v13 = vrot.slane %v1532_v8, 2 }
 0x30b   : > { %v1590_v33 = vcombine.low %v1568_v46, %v1575_v28 }
 0x30c   : > { %v1520_v15 = vrot.slane %v1519_v5, 2  ;;  %v1546_v60 = vrot.slane %v1545_v2, 2  ;;  %v1508_v19 = vmax.f32 %v1506_v0, %v1507_v12  ;;  %v1534_v16 = vmax.f32 %v1532_v8, %v1533_v13 }
 0x30d   : > { %v1598_v37 = vrot.slane %v1590_v33, %v1567_v14 }
 0x30e   : > { %v1521_v22 = vmax.f32 %v1519_v5, %v1520_v15  ;;  %v1547_v55 = vmax.f32 %v1545_v2, %v1546_v60  ;;  %v1509_v21 = vrot.slane %v1508_v19, 1  ;;  %v1535_v23 = vrot.slane %v1534_v16, 1 }
 0x310   : > { %v1522_v24 = vrot.slane %v1521_v22, 1  ;;  %v1548_v25 = vrot.slane %v1547_v55, 1  ;;  %v1510_v20 = vmax.f32 %v1508_v19, %v1509_v21  ;;  %v1536_v29 = vmax.f32 %v1534_v16, %v1535_v23 }
 0x312   : > { %v1523_v30 = vmax.f32 %v1521_v22, %v1522_v24  ;;  %v1549_v31 = vmax.f32 %v1547_v55, %v1548_v25 }
 0x314   : > { %v1560_v9 = vcombine.low %v1510_v20, %v1523_v30  ;;  %v1561_v32 = vcombine.low %v1536_v29, %v1549_v31 }
 0x316   : > { %v1582_v34 = vrot.slane %v1560_v9, %v1567_v14  ;;  %v1589_v35 = vrot.slane %v1561_v32, %v1567_v14 }
 0x318   : > { %v1591_v36 = vcombine.low %v1582_v34, %v1589_v35 }
 0x31a   : > { %v1605_v40 = vrot.slane %v1591_v36, %v1567_v14 }
 0x31c   : > { %v1606_v42 = vcombine.low %v1598_v37, %v1605_v40 }
 0x31e   : > { %1614 = vst [vmem:[%s371_s14] sm:$0xff] %v1606_v42 }
 0x31f PF: > { %s20_s26 = sadd.s32 1, %s2143_s26   ;;  %s2705_s24 = smov %s2139_s25 }
 0x320   : > { %p17_p7 = scmp.ge.s32.totalorder %s20_s26, 4   ;;  %s2706_s25 = smov %s2708_s12 }
 0x322   :  { %19 = sbr.rel (!%p17_p7) target bundleno = 4 (0x4), region = 107 }
 0x327   :  { %1634 = vsyncpa [#allocation4], 1 }
 0x328   :  { %1636 = vsyncpa [#allocation4 + $0x1], 1 }
 0x329   :  { %1637 = vsyncpa [#allocation6], 1 }
 0x32a   :  { %1638 = vsyncpa [#allocation9], 1 }

// kernel: pointnet_mean_forward.8
= control target key start
LH: loop header
LB: loop body
LE: loop exit
PB: predicated region body
PF: predicated region fallthrough
CT: control target
= control target key end

     0   :  { %12 = vsyncpa [#allocation3], 0  ;;  %s3881_s0 = inlined_call_operand.vmem [shape: f32[2,1024], index: 0, kind: input, shape index: {}]   ;;  %s3882_s1 = inlined_call_operand.hbm [shape: bf16[1024,512], index: 1, kind: input, shape index: {}]   ;;  %s3883_s2 = inlined_call_operand.hbm [shape: f32[1,512], index: 2, kind: input, shape index: {}]   ;;  %s3884_s3 = inlined_call_operand.hbm [shape: bf16[512,256], index: 3, kind: input, shape index: {}]   ;;  %s3885_s4 = inlined_call_operand.hbm [shape: f32[1,256], index: 4, kind: input, shape index: {}]   ;;  %s3886_s5 = inlined_call_operand.vmem [shape: bf16[256,9], index: 5, kind: input, shape index: {}]   ;;  %s3887_s6 = inlined_call_operand.hbm [shape: f32[1,9], index: 6, kind: input, shape index: {}]   ;;  %s3888_s7 = inlined_call_operand.vmem [shape: f32[2,9], index: 7, kind: output, shape index: {}]  }
   0x1   :  { %13 = vsyncpa [#allocation5], 0 }
   0x2   :  { %14 = vsyncpa [#allocation8], 0  ;;  %s3676_s24 = smov [#allocation4]   ;;  %s3677_s26 = smov [#allocation7]  }
   0x3   :  { %s35_s25 = sshll.u32 %s3676_s24, 4  ;;  %s57_s27 = sshll.u32 %s3677_s26, 4  ;;  %s36_s25 = int_to_ptr.vmem [resolvable:$true] %s35_s25  ;;  %s58_s27 = int_to_ptr.vmem [resolvable:$true] %s57_s27 }
   0x4   :  { %s3578_s28 = scalar_lea.vmem %s36_s25, 64  ;;  %p3583_p1 = scmp.lt.s32.totalorder %s36_s25, %s36_s25 }
   0x5   :  { %p3579_p0 = scmp.ne.s32.totalorder %s36_s25, %s3578_s28  ;;  %p3584_p2 = scmp.lt.s32.totalorder %s3578_s28, %s3578_s28 }
   0x7   :  { %p3585_p3 = por %p3584_p2, %p3583_p1 }
   0x9   :  { %p3586_p4 = pnand %p3585_p3, %p3579_p0 }
   0xb   :  { %3589 = shalt.err (!%p3586_p4)
}
   0xc   :  { %38 = dma.hbm_to_vmem [thread:$0]  %s3883_s2, 64, %s36_s25, [#allocation5]  }
   0xd   :  { %s3598_s8 = scalar_lea.vmem %s58_s27, 32  ;;  %p3603_p6 = scmp.lt.s32.totalorder %s58_s27, %s58_s27 }
   0xe   :  { %p3599_p5 = scmp.ne.s32.totalorder %s58_s27, %s3598_s8  ;;  %p3604_p7 = scmp.lt.s32.totalorder %s3598_s8, %s3598_s8 }
  0x10   :  { %p3605_p8 = por %p3604_p7, %p3603_p6 }
  0x12   :  { %p3606_p9 = pnand %p3605_p8, %p3599_p5 }
  0x14   :  { %3609 = shalt.err (!%p3606_p9)
}
  0x15   :  { %60 = dma.hbm_to_vmem [thread:$0]  %s3885_s4, 32, %s58_s27, [#allocation8]  }
  0x16   :  { %s3678_s11 = smov [#allocation2]  }
  0x17   :  { %s22_s12 = sshll.u32 %s3678_s11, 4  ;;  %s23_s12 = int_to_ptr.vmem [resolvable:$true] %s22_s12 }
  0x18   :  { %s3618_s13 = scalar_lea.vmem %s23_s12, 32768  ;;  %p3623_p11 = scmp.lt.s32.totalorder %s23_s12, %s23_s12 }
  0x19   :  { %p3619_p10 = scmp.ne.s32.totalorder %s23_s12, %s3618_s13  ;;  %p3624_p12 = scmp.lt.s32.totalorder %s3618_s13, %s3618_s13 }
  0x1b   :  { %p3625_p13 = por %p3624_p12, %p3623_p11 }
  0x1d   :  { %p3626_p0 = pnand %p3625_p13, %p3619_p10 }
  0x1f   :  { %3629 = shalt.err (!%p3626_p0)
}
  0x20   :  { %s3679_s2 = smov 256   ;;  %s3680_s14 = smov 16  }
  0x21   :  { %28 = dma.hbm_to_vmem [thread:$0]  %s3882_s1, 32768, %s23_s12, [#allocation3], %s3679_s2, %s3679_s2, %s3680_s14  }
  0x22   :  { %s3681_s17 = smov [#allocation6]  }
  0x23   :  { %s44_s18 = sshll.u32 %s3681_s17, 4  ;;  %s45_s18 = int_to_ptr.vmem [resolvable:$true] %s44_s18 }
  0x24   :  { %s3638_s4 = scalar_lea.vmem %s45_s18, 8192  ;;  %p3643_p2 = scmp.lt.s32.totalorder %s45_s18, %s45_s18 }
  0x25   :  { %p3639_p1 = scmp.ne.s32.totalorder %s45_s18, %s3638_s4  ;;  %p3644_p3 = scmp.lt.s32.totalorder %s3638_s4, %s3638_s4 }
  0x27   :  { %p3645_p4 = por %p3644_p3, %p3643_p2 }
  0x29   :  { %p3646_p5 = pnand %p3645_p4, %p3639_p1 }
  0x2b   :  { %3649 = shalt.err (!%p3646_p5)
}
  0x2c   :  { %s3682_s19 = smov 128   ;;  %s3683_s20 = smov 8  }
  0x2d   :  { %50 = dma.hbm_to_vmem [thread:$0]  %s3884_s3, 8192, %s45_s18, [#allocation5], %s3682_s19, %s3682_s19, %s3683_s20  }
  0x2e   :  { %s3684_s23 = smov [#allocation9]  }
  0x2f   :  { %s69_s24 = sshll.u32 %s3684_s23, 4  ;;  %s70_s24 = int_to_ptr.vmem [resolvable:$true] %s69_s24 }
  0x30   :  { %s3658_s1 = scalar_lea.vmem %s70_s24, 16  ;;  %s3662_s25 = scalar_lea.vmem %s70_s24, 32 }
  0x31   :  { %p3659_p6 = scmp.ne.s32.totalorder %s70_s24, %s3658_s1  ;;  %p3663_p7 = scmp.lt.s32.totalorder %s70_s24, %s70_s24 }
  0x32   :  { %p3664_p8 = scmp.lt.s32.totalorder %s3662_s25, %s3658_s1 }
  0x34   :  { %p3665_p9 = por %p3664_p8, %p3663_p7 }
  0x36   :  { %p3666_p10 = pnand %p3665_p9, %p3659_p6 }
  0x38   :  { %3669 = shalt.err (!%p3666_p10)
}
  0x39   :  { %72 = dma.hbm_to_vmem [thread:$0]  %s3887_s6, 16, %s70_s24, [#allocation8]  }
  0x3a   :  { %3670 = dma.done.wait [#allocation3], 32768  }
  0x3b   :  { %3671 = vsyncadd [#allocation3], 4294934528 }
  0x3c   :  { %3672 = dma.done.wait [#allocation5], 8256  }
  0x3d   :  { %3673 = vsyncadd [#allocation5], 4294959040 }
  0x3e   :  { %3674 = dma.done.wait [#allocation8], 48  }
  0x3f   :  { %3675 = vsyncadd [#allocation8], 4294967248  ;;  %v3072_v0 = vld [vmem:[#allocation2 + $0xe4] ss:$16 sps:$4 sm:$0xff]   ;;  %v3076_v2 = vld [vmem:[#allocation2 + $0xe0] ss:$16 sps:$4 sm:$0xff]   ;;  %v97_v38 = vlaneseq }
  0x40   :  { %v3074_v1 = vld [vmem:[#allocation2 + $0x2e4] ss:$16 sps:$4 sm:$0xff]   ;;  %1701 = vmatprep.subr.bf16.mxu0 %v3072_v0  ;;  %v3077_v3 = vld [vmem:[#allocation2 + $0x2e0] ss:$16 sps:$4 sm:$0xff]   ;;  %v3685_v36 = vmov 1983009808  }
  0x41   :  { %1742 = vmatprep.subr.bf16.mxu1 %v3074_v1  ;;  %v3078_v4 = vld [vmem:[#allocation2 + $0xc4] ss:$16 sps:$4 sm:$0xff]   ;;  %1702 = vmatpush1.bf16.msra.mxu0 %v3076_v2  ;;  %v3082_v6 = vld [vmem:[#allocation2 + $0xc0] ss:$16 sps:$4 sm:$0xff]   ;;  %v95_v37 = vunpack.c.l.s4 %v3685_v36  ;;  %v3741_v43 = vshrl.u32 %v97_v38, 7  ;;  %vm2694_vm0 = vcmask 66560  }
  0x42   :  { %1743 = vmatpush1.bf16.msra.mxu1 %v3077_v3  ;;  %v3080_v5 = vld [vmem:[#allocation2 + $0x2c4] ss:$16 sps:$4 sm:$0xff]   ;;  %1703 = vmatprep.subr.bf16.mxu0 %v3078_v4  ;;  %v3083_v7 = vld [vmem:[#allocation2 + $0x2c0] ss:$16 sps:$4 sm:$0xff]  }
  0x43   :  { %1744 = vmatprep.subr.bf16.mxu1 %v3080_v5  ;;  %v3084_v8 = vld [vmem:[#allocation2 + $0xa4] ss:$16 sps:$4 sm:$0xff]   ;;  %v3088_v10 = vld [vmem:[#allocation2 + $0xa0] ss:$16 sps:$4 sm:$0xff]   ;;  %v96_v42 = vunpack.c.0.s8 %v95_v37 }
  0x44   :  { %v3086_v9 = vld [vmem:[#allocation2 + $0x2a4] ss:$16 sps:$4 sm:$0xff]   ;;  %v3089_v11 = vld [vmem:[#allocation2 + $0x2a0] ss:$16 sps:$4 sm:$0xff]  }
  0x45   :  { %1704 = vmatpush1.bf16.msra.mxu0 %v3082_v6  ;;  %v3090_v12 = vld [vmem:[#allocation2 + $0x84] ss:$16 sps:$4 sm:$0xff]   ;;  %v3094_v14 = vld [vmem:[#allocation2 + $0x80] ss:$16 sps:$4 sm:$0xff]   ;;  %v3744_v49 = vsub.s32 %v96_v42, %v3741_v43  ;;  %v90_v42 = vld [vmem:[%s3881_s0 + $0x8] sm:$0xff] }
  0x46   :  { %1745 = vmatpush1.bf16.msra.mxu1 %v3083_v7  ;;  %1705 = vmatprep.subr.bf16.mxu0 %v3084_v8  ;;  %v3092_v13 = vld [vmem:[#allocation2 + $0x284] ss:$16 sps:$4 sm:$0xff]   ;;  %v3095_v15 = vld [vmem:[#allocation2 + $0x280] ss:$16 sps:$4 sm:$0xff]  }
  0x47   :  { %1746 = vmatprep.subr.bf16.mxu1 %v3086_v9  ;;  %v3096_v16 = vld [vmem:[#allocation2 + $0x64] ss:$16 sps:$4 sm:$0xff]   ;;  %v3100_v18 = vld [vmem:[#allocation2 + $0x60] ss:$16 sps:$4 sm:$0xff]  }
  0x48   :  { %v3098_v17 = vld [vmem:[#allocation2 + $0x264] ss:$16 sps:$4 sm:$0xff]   ;;  %v3101_v19 = vld [vmem:[#allocation2 + $0x260] ss:$16 sps:$4 sm:$0xff]  }
  0x49   :  { %1706 = vmatpush1.bf16.msra.mxu0 %v3088_v10  ;;  %v3102_v20 = vld [vmem:[#allocation2 + $0x44] ss:$16 sps:$4 sm:$0xff]   ;;  %v3106_v22 = vld [vmem:[#allocation2 + $0x40] ss:$16 sps:$4 sm:$0xff]  }
  0x4a   :  { %1747 = vmatpush1.bf16.msra.mxu1 %v3089_v11  ;;  %1707 = vmatprep.subr.bf16.mxu0 %v3090_v12  ;;  %v3104_v21 = vld [vmem:[#allocation2 + $0x244] ss:$16 sps:$4 sm:$0xff]   ;;  %v3107_v23 = vld [vmem:[#allocation2 + $0x240] ss:$16 sps:$4 sm:$0xff]  }
  0x4b   :  { %1748 = vmatprep.subr.bf16.mxu1 %v3092_v13  ;;  %v3108_v24 = vld [vmem:[#allocation2 + $0x24] ss:$16 sps:$4 sm:$0xff]   ;;  %v3112_v26 = vld [vmem:[#allocation2 + $0x20] ss:$16 sps:$4 sm:$0xff]  }
  0x4c   :  { %v3110_v25 = vld [vmem:[#allocation2 + $0x224] ss:$16 sps:$4 sm:$0xff]   ;;  %v3113_v27 = vld [vmem:[#allocation2 + $0x220] ss:$16 sps:$4 sm:$0xff]  }
  0x4d   :  { %1708 = vmatpush1.bf16.msra.mxu0 %v3094_v14  ;;  %v3114_v28 = vld [vmem:[#allocation2 + $0x4] ss:$16 sps:$4 sm:$0xff]   ;;  %v3118_v30 = vld [vmem:[#allocation2] ss:$16 sps:$4 sm:$0xff]  }
  0x4e   :  { %1749 = vmatpush1.bf16.msra.mxu1 %v3095_v15  ;;  %1709 = vmatprep.subr.bf16.mxu0 %v3096_v16  ;;  %v3116_v29 = vld [vmem:[#allocation2 + $0x204] ss:$16 sps:$4 sm:$0xff]   ;;  %v3119_v31 = vld [vmem:[#allocation2 + $0x200] ss:$16 sps:$4 sm:$0xff]  }
  0x4f   :  { %1750 = vmatprep.subr.bf16.mxu1 %v3098_v17  ;;  %v3120_v32 = vld [vmem:[#allocation2 + $0x1e4] ss:$16 sps:$4 sm:$0xff]   ;;  %v3124_v34 = vld [vmem:[#allocation2 + $0x1e0] ss:$16 sps:$4 sm:$0xff]  }
  0x50   :  { %v3122_v33 = vld [vmem:[#allocation2 + $0x3e4] ss:$16 sps:$4 sm:$0xff]   ;;  %v3125_v35 = vld [vmem:[#allocation2 + $0x3e0] ss:$16 sps:$4 sm:$0xff]  }
  0x51   :  { %1710 = vmatpush1.bf16.msra.mxu0 %v3100_v18  ;;  %v3126_v39 = vld [vmem:[#allocation2 + $0x1c4] ss:$16 sps:$4 sm:$0xff]   ;;  %v3130_v41 = vld [vmem:[#allocation2 + $0x1c0] ss:$16 sps:$4 sm:$0xff]  }
  0x52   :  { %1751 = vmatpush1.bf16.msra.mxu1 %v3101_v19  ;;  %1711 = vmatprep.subr.bf16.mxu0 %v3102_v20  ;;  %v3128_v40 = vld [vmem:[#allocation2 + $0x3c4] ss:$16 sps:$4 sm:$0xff]   ;;  %v3131_v44 = vld [vmem:[#allocation2 + $0x3c0] ss:$16 sps:$4 sm:$0xff]  }
  0x53   :  { %1752 = vmatprep.subr.bf16.mxu1 %v3104_v21  ;;  %v3132_v45 = vld [vmem:[#allocation2 + $0x1a4] ss:$16 sps:$4 sm:$0xff]   ;;  %v3136_v47 = vld [vmem:[#allocation2 + $0x1a0] ss:$16 sps:$4 sm:$0xff]  }
  0x54   :  { %v3134_v46 = vld [vmem:[#allocation2 + $0x3a4] ss:$16 sps:$4 sm:$0xff]   ;;  %v3137_v48 = vld [vmem:[#allocation2 + $0x3a0] ss:$16 sps:$4 sm:$0xff]  }
  0x55   :  { %1712 = vmatpush1.bf16.msra.mxu0 %v3106_v22  ;;  %v3138_v50 = vld [vmem:[#allocation2 + $0x184] ss:$16 sps:$4 sm:$0xff]   ;;  %v3142_v53 = vld [vmem:[#allocation2 + $0x180] ss:$16 sps:$4 sm:$0xff]  }
  0x56   :  { %1753 = vmatpush1.bf16.msra.mxu1 %v3107_v23  ;;  %1713 = vmatprep.subr.bf16.mxu0 %v3108_v24  ;;  %v3140_v51 = vld [vmem:[#allocation2 + $0x384] ss:$16 sps:$4 sm:$0xff]   ;;  %v3143_v56 = vld [vmem:[#allocation2 + $0x380] ss:$16 sps:$4 sm:$0xff]  }
  0x57   :  { %1754 = vmatprep.subr.bf16.mxu1 %v3110_v25  ;;  %v89_v52 = vld [vmem:[%s3881_s0] sm:$0xff] }
  0x58   :  { %v100_v54 = vrot.slane %v89_v52, %v3744_v49  ;;  %v93_v55 = vcombine.high %v89_v52, %v89_v52  ;;  %v3144_v57 = vld [vmem:[#allocation2 + $0x164] ss:$16 sps:$4 sm:$0xff]   ;;  %v3148_v61 = vld [vmem:[#allocation2 + $0x160] ss:$16 sps:$4 sm:$0xff]  }
  0x59   :  { %1714 = vmatpush1.bf16.msra.mxu0 %v3112_v26  ;;  %v3146_v58 = vld [vmem:[#allocation2 + $0x364] ss:$16 sps:$4 sm:$0xff]   ;;  %v3149_v0 = vld [vmem:[#allocation2 + $0x360] ss:$16 sps:$4 sm:$0xff]  }
  0x5a   :  { %1755 = vmatpush1.bf16.msra.mxu1 %v3113_v27  ;;  %1715 = vmatprep.subr.bf16.mxu0 %v3114_v28  ;;  %v108_v59 = vcombine.high %v100_v54, %v100_v54  ;;  %v107_v60 = vrot.slane %v93_v55, %v3744_v49  ;;  %v3150_v1 = vld [vmem:[#allocation2 + $0x144] ss:$16 sps:$4 sm:$0xff]   ;;  %v3154_v4 = vld [vmem:[#allocation2 + $0x140] ss:$16 sps:$4 sm:$0xff]   ;;  %v3757_v16 = vpack.c.bf16 %v100_v54, %v100_v54 }
  0x5b   :  { %1756 = vmatprep.subr.bf16.mxu1 %v3116_v29  ;;  %v3152_v2 = vld [vmem:[#allocation2 + $0x344] ss:$16 sps:$4 sm:$0xff]   ;;  %v3155_v5 = vld [vmem:[#allocation2 + $0x340] ss:$16 sps:$4 sm:$0xff]  }
  0x5c   :  { %v3751_v62 = vpack.c.bf16 %v108_v59, %v108_v59  ;;  %v109_v63 = vcombine.high %v107_v60, %v107_v60  ;;  %v3156_v6 = vld [vmem:[#allocation2 + $0x124] ss:$16 sps:$4 sm:$0xff]   ;;  %v3160_v8 = vld [vmem:[#allocation2 + $0x120] ss:$16 sps:$4 sm:$0xff]   ;;  %v3759_v17 = vpack.c.bf16 %v107_v60, %v107_v60 }
  0x5d   :  { %1716 = vmatpush1.bf16.msra.mxu0 %v3118_v30  ;;  %v3158_v7 = vld [vmem:[#allocation2 + $0x324] ss:$16 sps:$4 sm:$0xff]   ;;  %v3161_v9 = vld [vmem:[#allocation2 + $0x320] ss:$16 sps:$4 sm:$0xff]  }
  0x5e   :  { %1757 = vmatpush1.bf16.msra.mxu1 %v3119_v31  ;;  %1717 = vmatprep.subr.bf16.mxu0 %v3120_v32  ;;  %v3753_v3 = vpack.c.bf16 %v109_v63, %v109_v63  ;;  %v3162_v10 = vld [vmem:[#allocation2 + $0x104] ss:$16 sps:$4 sm:$0xff]   ;;  %v3166_v12 = vld [vmem:[#allocation2 + $0x100] ss:$16 sps:$4 sm:$0xff]  }
  0x5f   :  { %1758 = vmatprep.subr.bf16.mxu1 %v3122_v33  ;;  %1733 = vmatprep.mubr.bf16.mxu0 %v3751_v62  ;;  %v3164_v11 = vld [vmem:[#allocation2 + $0x304] ss:$16 sps:$4 sm:$0xff]   ;;  %v3167_v13 = vld [vmem:[#allocation2 + $0x300] ss:$16 sps:$4 sm:$0xff]  }
  0x60   :  { %1774 = vmatprep.mubr.bf16.mxu1 %v3753_v3  ;;  %v3171_v14 = vld [vmem:[#allocation2 + $0x4e4] ss:$16 sps:$4 sm:$0xff]   ;;  %v3169_v18 = vld [vmem:[#allocation2 + $0x4e0] ss:$16 sps:$4 sm:$0xff]  }
  0x61   :  { %1718 = vmatpush2.bf16.msra.mxu0 %v3124_v34  ;;  %v3174_v15 = vld [vmem:[#allocation2 + $0x6e4] ss:$16 sps:$4 sm:$0xff]   ;;  %v3172_v19 = vld [vmem:[#allocation2 + $0x6e0] ss:$16 sps:$4 sm:$0xff]  }
  0x62   :  { %1759 = vmatpush2.bf16.msra.mxu1 %v3125_v35  ;;  %1719 = vmatprep.subr.bf16.mxu0 %v3126_v39  ;;  %v3177_v20 = vld [vmem:[#allocation2 + $0x4c4] ss:$16 sps:$4 sm:$0xff]   ;;  %v3175_v22 = vld [vmem:[#allocation2 + $0x4c0] ss:$16 sps:$4 sm:$0xff]  }
  0x63   :  { %1760 = vmatprep.subr.bf16.mxu1 %v3128_v40  ;;  %v3180_v21 = vld [vmem:[#allocation2 + $0x6c4] ss:$16 sps:$4 sm:$0xff]   ;;  %v3178_v23 = vld [vmem:[#allocation2 + $0x6c0] ss:$16 sps:$4 sm:$0xff]  }
  0x64   :  { %v3183_v24 = vld [vmem:[#allocation2 + $0x4a4] ss:$16 sps:$4 sm:$0xff]   ;;  %v3181_v26 = vld [vmem:[#allocation2 + $0x4a0] ss:$16 sps:$4 sm:$0xff]  }
  0x65   :  { %1720 = vmatpush2.bf16.msra.mxu0 %v3130_v41  ;;  %v3186_v25 = vld [vmem:[#allocation2 + $0x6a4] ss:$16 sps:$4 sm:$0xff]   ;;  %v3184_v27 = vld [vmem:[#allocation2 + $0x6a0] ss:$16 sps:$4 sm:$0xff]  }
  0x66   :  { %1761 = vmatpush2.bf16.msra.mxu1 %v3131_v44  ;;  %1721 = vmatprep.subr.bf16.mxu0 %v3132_v45  ;;  %v3189_v28 = vld [vmem:[#allocation2 + $0x484] ss:$16 sps:$4 sm:$0xff]   ;;  %v3187_v30 = vld [vmem:[#allocation2 + $0x480] ss:$16 sps:$4 sm:$0xff]   ;;  %v3767_v44 = vrot.slane %v90_v42, %v3744_v49  ;;  %v110_v45 = vcombine.high %v90_v42, %v90_v42  ;;  %v3281_v42 = vld [vmem:[#allocation2 + $0x2a8] ss:$16 sps:$4 sm:$0xff]  }
  0x67   :  { %1762 = vmatprep.subr.bf16.mxu1 %v3134_v46  ;;  %v3192_v29 = vld [vmem:[#allocation2 + $0x684] ss:$16 sps:$4 sm:$0xff]   ;;  %v3190_v31 = vld [vmem:[#allocation2 + $0x680] ss:$16 sps:$4 sm:$0xff]  }
  0x68   :  { %v3195_v32 = vld [vmem:[#allocation2 + $0x464] ss:$16 sps:$4 sm:$0xff]   ;;  %v3193_v34 = vld [vmem:[#allocation2 + $0x460] ss:$16 sps:$4 sm:$0xff]  }
  0x69   :  { %1722 = vmatpush2.bf16.msra.mxu0 %v3136_v47  ;;  %v3198_v33 = vld [vmem:[#allocation2 + $0x664] ss:$16 sps:$4 sm:$0xff]   ;;  %v3196_v35 = vld [vmem:[#allocation2 + $0x660] ss:$16 sps:$4 sm:$0xff]  }
  0x6a   :  { %1763 = vmatpush2.bf16.msra.mxu1 %v3137_v48  ;;  %1723 = vmatprep.subr.bf16.mxu0 %v3138_v50  ;;  %v3201_v36 = vld [vmem:[#allocation2 + $0x444] ss:$16 sps:$4 sm:$0xff]   ;;  %v3199_v38 = vld [vmem:[#allocation2 + $0x440] ss:$16 sps:$4 sm:$0xff]   ;;  %v125_v48 = vcombine.high %v3767_v44, %v3767_v44  ;;  %v3772_v50 = vrot.slane %v110_v45, %v3744_v49  ;;  %v3289_v45 = vld [vmem:[#allocation2 + $0x28c] ss:$16 sps:$4 sm:$0xff]  }
  0x6b   :  { %1764 = vmatprep.subr.bf16.mxu1 %v3140_v51  ;;  %v3204_v37 = vld [vmem:[#allocation2 + $0x644] ss:$16 sps:$4 sm:$0xff]   ;;  %v3202_v39 = vld [vmem:[#allocation2 + $0x640] ss:$16 sps:$4 sm:$0xff]  }
  0x6c   :  { %v3207_v40 = vld [vmem:[#allocation2 + $0x424] ss:$16 sps:$4 sm:$0xff]   ;;  %v3205_v46 = vld [vmem:[#allocation2 + $0x420] ss:$16 sps:$4 sm:$0xff]   ;;  %v126_v54 = vcombine.high %v3772_v50, %v3772_v50 }
  0x6d   :  { %1724 = vmatpush2.bf16.msra.mxu0 %v3142_v53  ;;  %v3210_v41 = vld [vmem:[#allocation2 + $0x624] ss:$16 sps:$4 sm:$0xff]   ;;  %v3208_v47 = vld [vmem:[#allocation2 + $0x620] ss:$16 sps:$4 sm:$0xff]   ;;  %v3774_v53 = vpack.c.bf16 %v125_v48, %v125_v48  ;;  %v3292_v48 = vld [vmem:[#allocation2 + $0x6c] ss:$16 sps:$4 sm:$0xff]  }
  0x6e   :  { %1765 = vmatpush2.bf16.msra.mxu1 %v3143_v56  ;;  %1725 = vmatprep.subr.bf16.mxu0 %v3144_v57  ;;  %v3213_v51 = vld [vmem:[#allocation2 + $0x404] ss:$16 sps:$4 sm:$0xff]   ;;  %v3211_v55 = vld [vmem:[#allocation2 + $0x400] ss:$16 sps:$4 sm:$0xff]   ;;  %v3778_v57 = vpack.c.bf16 %v126_v54, %v126_v54  ;;  %v3296_v54 = vld [vmem:[#allocation2 + $0x48] ss:$16 sps:$4 sm:$0xff]  }
  0x6f   :  { %1766 = vmatprep.subr.bf16.mxu1 %v3146_v58  ;;  %v3216_v52 = vld [vmem:[#allocation2 + $0x604] ss:$16 sps:$4 sm:$0xff]   ;;  %v3214_v56 = vld [vmem:[#allocation2 + $0x600] ss:$16 sps:$4 sm:$0xff]  }
  0x70   :  { %v3219_v58 = vld [vmem:[#allocation2 + $0x5e4] ss:$16 sps:$4 sm:$0xff]   ;;  %v3217_v59 = vld [vmem:[#allocation2 + $0x5e0] ss:$16 sps:$4 sm:$0xff]  }
  0x71   :  { %1726 = vmatpush2.bf16.msra.mxu0 %v3148_v61  ;;  %v3222_v49 = vld [vmem:[#allocation2 + $0x7e4] ss:$16 sps:$4 sm:$0xff]   ;;  %v3220_v60 = vld [vmem:[#allocation2 + $0x7e0] ss:$16 sps:$4 sm:$0xff]  }
  0x72   :  { %1767 = vmatpush2.bf16.msra.mxu1 %v3149_v0  ;;  %1727 = vmatprep.subr.bf16.mxu0 %v3150_v1  ;;  %v3225_v61 = vld [vmem:[#allocation2 + $0x5c4] ss:$16 sps:$4 sm:$0xff]   ;;  %v3223_v0 = vld [vmem:[#allocation2 + $0x5c0] ss:$16 sps:$4 sm:$0xff]  }
  0x73   :  { %1768 = vmatprep.subr.bf16.mxu1 %v3152_v2  ;;  %v3228_v63 = vld [vmem:[#allocation2 + $0x7c4] ss:$16 sps:$4 sm:$0xff]   ;;  %v3226_v1 = vld [vmem:[#allocation2 + $0x7c0] ss:$16 sps:$4 sm:$0xff]  }
  0x74   :  { %v3231_v2 = vld [vmem:[#allocation2 + $0x5a4] ss:$16 sps:$4 sm:$0xff]  }
  0x75   :  { %1728 = vmatpush2.bf16.msra.mxu0 %v3154_v4  ;;  %v3234_v4 = vld [vmem:[#allocation2 + $0x7a4] ss:$16 sps:$4 sm:$0xff]  }
  0x76   :  { %1769 = vmatpush2.bf16.msra.mxu1 %v3155_v5  ;;  %1729 = vmatprep.subr.bf16.mxu0 %v3156_v6  ;;  %v3229_v5 = vld [vmem:[#allocation2 + $0x5a0] ss:$16 sps:$4 sm:$0xff]  }
  0x77   :  { %1770 = vmatprep.subr.bf16.mxu1 %v3158_v7  ;;  %v3232_v6 = vld [vmem:[#allocation2 + $0x7a0] ss:$16 sps:$4 sm:$0xff]   ;;  %v3237_v7 = vld [vmem:[#allocation2 + $0x584] ss:$16 sps:$4 sm:$0xff]  }
  0x79   :  { %1730 = vmatpush2.bf16.msra.mxu0 %v3160_v8  ;;  %v3240_v8 = vld [vmem:[#allocation2 + $0x784] ss:$16 sps:$4 sm:$0xff]  }
  0x7a   :  { %1771 = vmatpush2.bf16.msra.mxu1 %v3161_v9  ;;  %1731 = vmatprep.subr.bf16.mxu0 %v3162_v10  ;;  %v3235_v9 = vld [vmem:[#allocation2 + $0x580] ss:$16 sps:$4 sm:$0xff]  }
  0x7b   :  { %1772 = vmatprep.subr.bf16.mxu1 %v3164_v11  ;;  %v3238_v10 = vld [vmem:[#allocation2 + $0x780] ss:$16 sps:$4 sm:$0xff]   ;;  %v3243_v11 = vld [vmem:[#allocation2 + $0x564] ss:$16 sps:$4 sm:$0xff]  }
  0x7d   :  { %1732 = vmatpush2.bf16.msra.mxu0 %v3166_v12  ;;  %v3246_v12 = vld [vmem:[#allocation2 + $0x764] ss:$16 sps:$4 sm:$0xff]  }
  0x7e   :  { %1773 = vmatpush2.bf16.msra.mxu1 %v3167_v13  ;;  %1783 = vmatprep.subr.bf16.mxu0 %v3171_v14  ;;  %v3241_v13 = vld [vmem:[#allocation2 + $0x560] ss:$16 sps:$4 sm:$0xff]  }
  0x7f   :  { %1824 = vmatprep.subr.bf16.mxu1 %v3174_v15  ;;  %v3244_v14 = vld [vmem:[#allocation2 + $0x760] ss:$16 sps:$4 sm:$0xff]   ;;  %v3249_v15 = vld [vmem:[#allocation2 + $0x544] ss:$16 sps:$4 sm:$0xff]  }
  0x80   :  { %1734 = vmatmul.mubr.bf16.vlgmr.msra.gmra.mxu0 %v3757_v16 }
  0x81   :  { %1775 = vmatmul.mubr.bf16.vlgmr.msra.gmra.mxu1 %v3759_v17  ;;  %1784 = vmatpush1.bf16.msra.mxu0 %v3169_v18  ;;  %v3252_v18 = vld [vmem:[#allocation2 + $0x744] ss:$16 sps:$4 sm:$0xff]  }
  0x82   :  { %1825 = vmatpush1.bf16.msra.mxu1 %v3172_v19  ;;  %1785 = vmatprep.subr.bf16.mxu0 %v3177_v20  ;;  %v3247_v19 = vld [vmem:[#allocation2 + $0x540] ss:$16 sps:$4 sm:$0xff]  }
  0x83   :  { %1826 = vmatprep.subr.bf16.mxu1 %v3180_v21  ;;  %1815 = vmatprep.mubr.bf16.mxu0 %v3774_v53  ;;  %v3250_v20 = vld [vmem:[#allocation2 + $0x740] ss:$16 sps:$4 sm:$0xff]   ;;  %v3255_v21 = vld [vmem:[#allocation2 + $0x524] ss:$16 sps:$4 sm:$0xff]  }
  0x84   :  { %1856 = vmatprep.mubr.bf16.mxu1 %v3778_v57 }
  0x85   :  { %1786 = vmatpush1.bf16.msra.mxu0 %v3175_v22  ;;  %v3258_v22 = vld [vmem:[#allocation2 + $0x724] ss:$16 sps:$4 sm:$0xff]  }
  0x86   :  { %1827 = vmatpush1.bf16.msra.mxu1 %v3178_v23  ;;  %1787 = vmatprep.subr.bf16.mxu0 %v3183_v24  ;;  %v3253_v23 = vld [vmem:[#allocation2 + $0x520] ss:$16 sps:$4 sm:$0xff]  }
  0x87   :  { %1828 = vmatprep.subr.bf16.mxu1 %v3186_v25  ;;  %v3256_v24 = vld [vmem:[#allocation2 + $0x720] ss:$16 sps:$4 sm:$0xff]   ;;  %v3261_v25 = vld [vmem:[#allocation2 + $0x504] ss:$16 sps:$4 sm:$0xff]  }
  0x89   :  { %1788 = vmatpush1.bf16.msra.mxu0 %v3181_v26  ;;  %v3264_v26 = vld [vmem:[#allocation2 + $0x704] ss:$16 sps:$4 sm:$0xff]  }
  0x8a   :  { %1829 = vmatpush1.bf16.msra.mxu1 %v3184_v27  ;;  %1789 = vmatprep.subr.bf16.mxu0 %v3189_v28  ;;  %v3259_v27 = vld [vmem:[#allocation2 + $0x500] ss:$16 sps:$4 sm:$0xff]  }
  0x8b   :  { %1830 = vmatprep.subr.bf16.mxu1 %v3192_v29  ;;  %v3262_v28 = vld [vmem:[#allocation2 + $0x700] ss:$16 sps:$4 sm:$0xff]   ;;  %v3268_v29 = vld [vmem:[#allocation2 + $0xec] ss:$16 sps:$4 sm:$0xff]  }
  0x8d   :  { %1790 = vmatpush1.bf16.msra.mxu0 %v3187_v30  ;;  %v3271_v30 = vld [vmem:[#allocation2 + $0x2ec] ss:$16 sps:$4 sm:$0xff]  }
  0x8e   :  { %1831 = vmatpush1.bf16.msra.mxu1 %v3190_v31  ;;  %1791 = vmatprep.subr.bf16.mxu0 %v3195_v32  ;;  %v3784_v31 = vpack.c.bf16 %v3767_v44, %v3767_v44  ;;  %v3788_v32 = vpack.c.bf16 %v3772_v50, %v3772_v50  ;;  %v3286_v44 = vld [vmem:[#allocation2 + $0x8c] ss:$16 sps:$4 sm:$0xff]  }
  0x8f   :  { %1832 = vmatprep.subr.bf16.mxu1 %v3198_v33  ;;  %v3266_v33 = vld [vmem:[#allocation2 + $0xe8] ss:$16 sps:$4 sm:$0xff]   ;;  %v3295_v50 = vld [vmem:[#allocation2 + $0x26c] ss:$16 sps:$4 sm:$0xff]  }
  0x91   :  { %1792 = vmatpush1.bf16.msra.mxu0 %v3193_v34  ;;  %v3269_v34 = vld [vmem:[#allocation2 + $0x2e8] ss:$16 sps:$4 sm:$0xff]  }
  0x92   :  { %1833 = vmatpush1.bf16.msra.mxu1 %v3196_v35  ;;  %1793 = vmatprep.subr.bf16.mxu0 %v3201_v36  ;;  %v3274_v35 = vld [vmem:[#allocation2 + $0xcc] ss:$16 sps:$4 sm:$0xff]  }
  0x93   :  { %1834 = vmatprep.subr.bf16.mxu1 %v3204_v37  ;;  %v3277_v36 = vld [vmem:[#allocation2 + $0x2cc] ss:$16 sps:$4 sm:$0xff]   ;;  %v3272_v37 = vld [vmem:[#allocation2 + $0xc8] ss:$16 sps:$4 sm:$0xff]  }
  0x95   :  { %1794 = vmatpush1.bf16.msra.mxu0 %v3199_v38  ;;  %v3275_v38 = vld [vmem:[#allocation2 + $0x2c8] ss:$16 sps:$4 sm:$0xff]  }
  0x96   :  { %1835 = vmatpush1.bf16.msra.mxu1 %v3202_v39  ;;  %1795 = vmatprep.subr.bf16.mxu0 %v3207_v40  ;;  %v3280_v39 = vld [vmem:[#allocation2 + $0xac] ss:$16 sps:$4 sm:$0xff]  }
  0x97   :  { %1836 = vmatprep.subr.bf16.mxu1 %v3210_v41  ;;  %v3283_v40 = vld [vmem:[#allocation2 + $0x2ac] ss:$16 sps:$4 sm:$0xff]   ;;  %v3278_v41 = vld [vmem:[#allocation2 + $0xa8] ss:$16 sps:$4 sm:$0xff]  }
  0x99   :  { %1796 = vmatpush1.bf16.msra.mxu0 %v3205_v46  ;;  %v3284_v46 = vld [vmem:[#allocation2 + $0x88] ss:$16 sps:$4 sm:$0xff]  }
  0x9a   :  { %1837 = vmatpush1.bf16.msra.mxu1 %v3208_v47  ;;  %1797 = vmatprep.subr.bf16.mxu0 %v3213_v51  ;;  %v3287_v47 = vld [vmem:[#allocation2 + $0x288] ss:$16 sps:$4 sm:$0xff]   ;;  %v3298_v51 = vld [vmem:[#allocation2 + $0x4c] ss:$16 sps:$4 sm:$0xff]  }
  0x9b   :  { %1838 = vmatprep.subr.bf16.mxu1 %v3216_v52  ;;  %v3301_v52 = vld [vmem:[#allocation2 + $0x24c] ss:$16 sps:$4 sm:$0xff]  }
  0x9d   :  { %1798 = vmatpush1.bf16.msra.mxu0 %v3211_v55  ;;  %v3299_v55 = vld [vmem:[#allocation2 + $0x248] ss:$16 sps:$4 sm:$0xff]  }
  0x9e   :  { %1839 = vmatpush1.bf16.msra.mxu1 %v3214_v56  ;;  %1799 = vmatprep.subr.bf16.mxu0 %v3219_v58  ;;  %v3304_v56 = vld [vmem:[#allocation2 + $0x2c] ss:$16 sps:$4 sm:$0xff]  }
  0x9f   :  { %1840 = vmatprep.subr.bf16.mxu1 %v3222_v49  ;;  %v3307_v58 = vld [vmem:[#allocation2 + $0x22c] ss:$16 sps:$4 sm:$0xff]   ;;  %v3302_v49 = vld [vmem:[#allocation2 + $0x28] ss:$16 sps:$4 sm:$0xff]  }
  0xa1   :  { %1800 = vmatpush2.bf16.msra.mxu0 %v3217_v59  ;;  %v3305_v59 = vld [vmem:[#allocation2 + $0x228] ss:$16 sps:$4 sm:$0xff]  }
  0xa2   :  { %1841 = vmatpush2.bf16.msra.mxu1 %v3220_v60  ;;  %1801 = vmatprep.subr.bf16.mxu0 %v3225_v61  ;;  %v3310_v60 = vld [vmem:[#allocation2 + $0xc] ss:$16 sps:$4 sm:$0xff]  }
  0xa3   :  { %1842 = vmatprep.subr.bf16.mxu1 %v3228_v63  ;;  %v3313_v61 = vld [vmem:[#allocation2 + $0x20c] ss:$16 sps:$4 sm:$0xff]   ;;  %v3308_v63 = vld [vmem:[#allocation2 + $0x8] ss:$16 sps:$4 sm:$0xff]  }
  0xa5   :  { %1802 = vmatpush2.bf16.msra.mxu0 %v3223_v0  ;;  %v3311_v0 = vld [vmem:[#allocation2 + $0x208] ss:$16 sps:$4 sm:$0xff]  }
  0xa6   :  { %1843 = vmatpush2.bf16.msra.mxu1 %v3226_v1  ;;  %1803 = vmatprep.subr.bf16.mxu0 %v3231_v2  ;;  %v3316_v1 = vld [vmem:[#allocation2 + $0x1ec] ss:$16 sps:$4 sm:$0xff]  }
  0xa7   :  { %1844 = vmatprep.subr.bf16.mxu1 %v3234_v4  ;;  %v3319_v2 = vld [vmem:[#allocation2 + $0x3ec] ss:$16 sps:$4 sm:$0xff]   ;;  %v3314_v4 = vld [vmem:[#allocation2 + $0x1e8] ss:$16 sps:$4 sm:$0xff]  }
  0xa9   :  { %1804 = vmatpush2.bf16.msra.mxu0 %v3229_v5  ;;  %v3317_v5 = vld [vmem:[#allocation2 + $0x3e8] ss:$16 sps:$4 sm:$0xff]  }
  0xaa   :  { %1845 = vmatpush2.bf16.msra.mxu1 %v3232_v6  ;;  %1805 = vmatprep.subr.bf16.mxu0 %v3237_v7  ;;  %v3322_v6 = vld [vmem:[#allocation2 + $0x1cc] ss:$16 sps:$4 sm:$0xff]  }
  0xab   :  { %1846 = vmatprep.subr.bf16.mxu1 %v3240_v8  ;;  %v3325_v7 = vld [vmem:[#allocation2 + $0x3cc] ss:$16 sps:$4 sm:$0xff]   ;;  %v3320_v8 = vld [vmem:[#allocation2 + $0x1c8] ss:$16 sps:$4 sm:$0xff]  }
  0xad   :  { %1806 = vmatpush2.bf16.msra.mxu0 %v3235_v9  ;;  %v3323_v9 = vld [vmem:[#allocation2 + $0x3c8] ss:$16 sps:$4 sm:$0xff]  }
  0xae   :  { %1847 = vmatpush2.bf16.msra.mxu1 %v3238_v10  ;;  %1807 = vmatprep.subr.bf16.mxu0 %v3243_v11  ;;  %v3328_v10 = vld [vmem:[#allocation2 + $0x1ac] ss:$16 sps:$4 sm:$0xff]  }
  0xaf   :  { %1848 = vmatprep.subr.bf16.mxu1 %v3246_v12  ;;  %v3331_v11 = vld [vmem:[#allocation2 + $0x3ac] ss:$16 sps:$4 sm:$0xff]   ;;  %v3326_v12 = vld [vmem:[#allocation2 + $0x1a8] ss:$16 sps:$4 sm:$0xff]  }
  0xb1   :  { %1808 = vmatpush2.bf16.msra.mxu0 %v3241_v13  ;;  %v3329_v13 = vld [vmem:[#allocation2 + $0x3a8] ss:$16 sps:$4 sm:$0xff]  }
  0xb2   :  { %1849 = vmatpush2.bf16.msra.mxu1 %v3244_v14  ;;  %1809 = vmatprep.subr.bf16.mxu0 %v3249_v15  ;;  %v3334_v14 = vld [vmem:[#allocation2 + $0x18c] ss:$16 sps:$4 sm:$0xff]  }
  0xb3   :  { %1850 = vmatprep.subr.bf16.mxu1 %v3252_v18  ;;  %v3337_v15 = vld [vmem:[#allocation2 + $0x38c] ss:$16 sps:$4 sm:$0xff]   ;;  %v3332_v18 = vld [vmem:[#allocation2 + $0x188] ss:$16 sps:$4 sm:$0xff]  }
  0xb5   :  { %1810 = vmatpush2.bf16.msra.mxu0 %v3247_v19  ;;  %v3335_v19 = vld [vmem:[#allocation2 + $0x388] ss:$16 sps:$4 sm:$0xff]  }
  0xb6   :  { %1851 = vmatpush2.bf16.msra.mxu1 %v3250_v20  ;;  %1811 = vmatprep.subr.bf16.mxu0 %v3255_v21  ;;  %v3340_v20 = vld [vmem:[#allocation2 + $0x16c] ss:$16 sps:$4 sm:$0xff]  }
  0xb7   :  { %1852 = vmatprep.subr.bf16.mxu1 %v3258_v22  ;;  %v3343_v21 = vld [vmem:[#allocation2 + $0x36c] ss:$16 sps:$4 sm:$0xff]   ;;  %v3338_v22 = vld [vmem:[#allocation2 + $0x168] ss:$16 sps:$4 sm:$0xff]  }
  0xb9   :  { %1812 = vmatpush2.bf16.msra.mxu0 %v3253_v23  ;;  %v3341_v23 = vld [vmem:[#allocation2 + $0x368] ss:$16 sps:$4 sm:$0xff]  }
  0xba   :  { %1853 = vmatpush2.bf16.msra.mxu1 %v3256_v24  ;;  %1813 = vmatprep.subr.bf16.mxu0 %v3261_v25  ;;  %v3346_v24 = vld [vmem:[#allocation2 + $0x14c] ss:$16 sps:$4 sm:$0xff]  }
  0xbb   :  { %1854 = vmatprep.subr.bf16.mxu1 %v3264_v26  ;;  %v3349_v25 = vld [vmem:[#allocation2 + $0x34c] ss:$16 sps:$4 sm:$0xff]   ;;  %v3344_v26 = vld [vmem:[#allocation2 + $0x148] ss:$16 sps:$4 sm:$0xff]  }
  0xbd   :  { %1814 = vmatpush2.bf16.msra.mxu0 %v3259_v27  ;;  %v3347_v27 = vld [vmem:[#allocation2 + $0x348] ss:$16 sps:$4 sm:$0xff]  }
  0xbe   :  { %1855 = vmatpush2.bf16.msra.mxu1 %v3262_v28  ;;  %1865 = vmatprep.subr.bf16.mxu0 %v3268_v29  ;;  %v3352_v28 = vld [vmem:[#allocation2 + $0x12c] ss:$16 sps:$4 sm:$0xff]  }
  0xbf   :  { %1906 = vmatprep.subr.bf16.mxu1 %v3271_v30  ;;  %v3355_v29 = vld [vmem:[#allocation2 + $0x32c] ss:$16 sps:$4 sm:$0xff]   ;;  %v3350_v30 = vld [vmem:[#allocation2 + $0x128] ss:$16 sps:$4 sm:$0xff]  }
  0xc0   :  { %1816 = vmatmul.mubr.bf16.vlgmr.msra.gmra.mxu0 %v3784_v31 }
  0xc1   :  { %1857 = vmatmul.mubr.bf16.vlgmr.msra.gmra.mxu1 %v3788_v32  ;;  %1866 = vmatpush1.bf16.msra.mxu0 %v3266_v33  ;;  %v3353_v33 = vld [vmem:[#allocation2 + $0x328] ss:$16 sps:$4 sm:$0xff]  }
  0xc2   :  { %1907 = vmatpush1.bf16.msra.mxu1 %v3269_v34  ;;  %1867 = vmatprep.subr.bf16.mxu0 %v3274_v35  ;;  %v3358_v34 = vld [vmem:[#allocation2 + $0x10c] ss:$16 sps:$4 sm:$0xff]  }
  0xc3   :  { %1908 = vmatprep.subr.bf16.mxu1 %v3277_v36  ;;  %1897 = vmatprep.mubr.bf16.mxu0 %v3751_v62  ;;  %v3290_v62 = vld [vmem:[#allocation2 + $0x68] ss:$16 sps:$4 sm:$0xff]   ;;  %v3361_v35 = vld [vmem:[#allocation2 + $0x30c] ss:$16 sps:$4 sm:$0xff]  }
  0xc4   :  { %1938 = vmatprep.mubr.bf16.mxu1 %v3753_v3  ;;  %v3293_v3 = vld [vmem:[#allocation2 + $0x268] ss:$16 sps:$4 sm:$0xff]  }
  0xc5   :  { %1868 = vmatpush1.bf16.msra.mxu0 %v3272_v37  ;;  %v3356_v36 = vld [vmem:[#allocation2 + $0x108] ss:$16 sps:$4 sm:$0xff]  }
  0xc6   :  { %1909 = vmatpush1.bf16.msra.mxu1 %v3275_v38  ;;  %1869 = vmatprep.subr.bf16.mxu0 %v3280_v39  ;;  %v3359_v37 = vld [vmem:[#allocation2 + $0x308] ss:$16 sps:$4 sm:$0xff]   ;;  %v3364_v38 = vld [vmem:[#allocation2 + $0x4ec] ss:$16 sps:$4 sm:$0xff]  }
  0xc7   :  { %1910 = vmatprep.subr.bf16.mxu1 %v3283_v40  ;;  %v3367_v39 = vld [vmem:[#allocation2 + $0x6ec] ss:$16 sps:$4 sm:$0xff]   ;;  %v3362_v40 = vld [vmem:[#allocation2 + $0x4e8] ss:$16 sps:$4 sm:$0xff]  }
  0xc9   :  { %1870 = vmatpush1.bf16.msra.mxu0 %v3278_v41  ;;  %v3365_v41 = vld [vmem:[#allocation2 + $0x6e8] ss:$16 sps:$4 sm:$0xff]  }
  0xca   :  { %1911 = vmatpush1.bf16.msra.mxu1 %v3281_v42  ;;  %1871 = vmatprep.subr.bf16.mxu0 %v3286_v44  ;;  %v3370_v42 = vld [vmem:[#allocation2 + $0x4cc] ss:$16 sps:$4 sm:$0xff]  }
  0xcb   :  { %1912 = vmatprep.subr.bf16.mxu1 %v3289_v45  ;;  %v3373_v44 = vld [vmem:[#allocation2 + $0x6cc] ss:$16 sps:$4 sm:$0xff]   ;;  %v3368_v45 = vld [vmem:[#allocation2 + $0x4c8] ss:$16 sps:$4 sm:$0xff]  }
  0xcd   :  { %1872 = vmatpush1.bf16.msra.mxu0 %v3284_v46  ;;  %v3371_v46 = vld [vmem:[#allocation2 + $0x6c8] ss:$16 sps:$4 sm:$0xff]  }
  0xce   :  { %1913 = vmatpush1.bf16.msra.mxu1 %v3287_v47  ;;  %1873 = vmatprep.subr.bf16.mxu0 %v3292_v48  ;;  %v3376_v47 = vld [vmem:[#allocation2 + $0x4ac] ss:$16 sps:$4 sm:$0xff]  }
  0xcf   :  { %1914 = vmatprep.subr.bf16.mxu1 %v3295_v50  ;;  %v3379_v48 = vld [vmem:[#allocation2 + $0x6ac] ss:$16 sps:$4 sm:$0xff]   ;;  %v3374_v50 = vld [vmem:[#allocation2 + $0x4a8] ss:$16 sps:$4 sm:$0xff]  }
  0xd1   :  { %1874 = vmatpush1.bf16.msra.mxu0 %v3290_v62  ;;  %v3377_v62 = vld [vmem:[#allocation2 + $0x6a8] ss:$16 sps:$4 sm:$0xff]  }
  0xd2   :  { %1915 = vmatpush1.bf16.msra.mxu1 %v3293_v3  ;;  %1875 = vmatprep.subr.bf16.mxu0 %v3298_v51  ;;  %v3382_v3 = vld [vmem:[#allocation2 + $0x48c] ss:$16 sps:$4 sm:$0xff]   ;;  %v3380_v51 = vld [vmem:[#allocation2 + $0x488] ss:$16 sps:$4 sm:$0xff]  }
  0xd3   :  { %1916 = vmatprep.subr.bf16.mxu1 %v3301_v52  ;;  %v3388_v52 = vld [vmem:[#allocation2 + $0x46c] ss:$16 sps:$4 sm:$0xff]  }
  0xd5   :  { %1876 = vmatpush1.bf16.msra.mxu0 %v3296_v54  ;;  %v3391_v54 = vld [vmem:[#allocation2 + $0x66c] ss:$16 sps:$4 sm:$0xff]  }
  0xd6   :  { %1917 = vmatpush1.bf16.msra.mxu1 %v3299_v55  ;;  %1877 = vmatprep.subr.bf16.mxu0 %v3304_v56  ;;  %v3386_v55 = vld [vmem:[#allocation2 + $0x468] ss:$16 sps:$4 sm:$0xff]  }
  0xd7   :  { %1918 = vmatprep.subr.bf16.mxu1 %v3307_v58  ;;  %v3389_v56 = vld [vmem:[#allocation2 + $0x668] ss:$16 sps:$4 sm:$0xff]   ;;  %v3394_v58 = vld [vmem:[#allocation2 + $0x44c] ss:$16 sps:$4 sm:$0xff]  }
  0xd9   :  { %1878 = vmatpush1.bf16.msra.mxu0 %v3302_v49  ;;  %v3395_v49 = vld [vmem:[#allocation2 + $0x648] ss:$16 sps:$4 sm:$0xff]  }
  0xda   :  { %1919 = vmatpush1.bf16.msra.mxu1 %v3305_v59  ;;  %1879 = vmatprep.subr.bf16.mxu0 %v3310_v60  ;;  %v3400_v59 = vld [vmem:[#allocation2 + $0x42c] ss:$16 sps:$4 sm:$0xff]  }
  0xdb   :  { %1920 = vmatprep.subr.bf16.mxu1 %v3313_v61  ;;  %v3403_v60 = vld [vmem:[#allocation2 + $0x62c] ss:$16 sps:$4 sm:$0xff]   ;;  %v3398_v61 = vld [vmem:[#allocation2 + $0x428] ss:$16 sps:$4 sm:$0xff]  }
  0xdd   :  { %1880 = vmatpush1.bf16.msra.mxu0 %v3308_v63  ;;  %v3401_v63 = vld [vmem:[#allocation2 + $0x628] ss:$16 sps:$4 sm:$0xff]  }
  0xde   :  { %1921 = vmatpush1.bf16.msra.mxu1 %v3311_v0  ;;  %1881 = vmatprep.subr.bf16.mxu0 %v3316_v1  ;;  %v3406_v0 = vld [vmem:[#allocation2 + $0x40c] ss:$16 sps:$4 sm:$0xff]  }
  0xdf   :  { %1922 = vmatprep.subr.bf16.mxu1 %v3319_v2  ;;  %v3409_v1 = vld [vmem:[#allocation2 + $0x60c] ss:$16 sps:$4 sm:$0xff]   ;;  %v3404_v2 = vld [vmem:[#allocation2 + $0x408] ss:$16 sps:$4 sm:$0xff]  }
  0xe1   :  { %1882 = vmatpush2.bf16.msra.mxu0 %v3314_v4  ;;  %v3407_v4 = vld [vmem:[#allocation2 + $0x608] ss:$16 sps:$4 sm:$0xff]  }
  0xe2   :  { %1923 = vmatpush2.bf16.msra.mxu1 %v3317_v5  ;;  %1883 = vmatprep.subr.bf16.mxu0 %v3322_v6  ;;  %v3412_v5 = vld [vmem:[#allocation2 + $0x5ec] ss:$16 sps:$4 sm:$0xff]  }
  0xe3   :  { %1924 = vmatprep.subr.bf16.mxu1 %v3325_v7  ;;  %v3415_v6 = vld [vmem:[#allocation2 + $0x7ec] ss:$16 sps:$4 sm:$0xff]   ;;  %v3410_v7 = vld [vmem:[#allocation2 + $0x5e8] ss:$16 sps:$4 sm:$0xff]  }
  0xe5   :  { %1884 = vmatpush2.bf16.msra.mxu0 %v3320_v8  ;;  %v3413_v8 = vld [vmem:[#allocation2 + $0x7e8] ss:$16 sps:$4 sm:$0xff]  }
  0xe6   :  { %1925 = vmatpush2.bf16.msra.mxu1 %v3323_v9  ;;  %1885 = vmatprep.subr.bf16.mxu0 %v3328_v10  ;;  %v3418_v9 = vld [vmem:[#allocation2 + $0x5cc] ss:$16 sps:$4 sm:$0xff]  }
  0xe7   :  { %1926 = vmatprep.subr.bf16.mxu1 %v3331_v11  ;;  %v3421_v10 = vld [vmem:[#allocation2 + $0x7cc] ss:$16 sps:$4 sm:$0xff]   ;;  %v3416_v11 = vld [vmem:[#allocation2 + $0x5c8] ss:$16 sps:$4 sm:$0xff]  }
  0xe9   :  { %1886 = vmatpush2.bf16.msra.mxu0 %v3326_v12  ;;  %v3419_v12 = vld [vmem:[#allocation2 + $0x7c8] ss:$16 sps:$4 sm:$0xff]  }
  0xea   :  { %1927 = vmatpush2.bf16.msra.mxu1 %v3329_v13  ;;  %1887 = vmatprep.subr.bf16.mxu0 %v3334_v14  ;;  %v3424_v13 = vld [vmem:[#allocation2 + $0x5ac] ss:$16 sps:$4 sm:$0xff]  }
  0xeb   :  { %1928 = vmatprep.subr.bf16.mxu1 %v3337_v15  ;;  %v3427_v14 = vld [vmem:[#allocation2 + $0x7ac] ss:$16 sps:$4 sm:$0xff]   ;;  %v3422_v15 = vld [vmem:[#allocation2 + $0x5a8] ss:$16 sps:$4 sm:$0xff]  }
  0xed   :  { %1888 = vmatpush2.bf16.msra.mxu0 %v3332_v18  ;;  %v3425_v18 = vld [vmem:[#allocation2 + $0x7a8] ss:$16 sps:$4 sm:$0xff]  }
  0xee   :  { %1929 = vmatpush2.bf16.msra.mxu1 %v3335_v19  ;;  %1889 = vmatprep.subr.bf16.mxu0 %v3340_v20  ;;  %v3430_v19 = vld [vmem:[#allocation2 + $0x58c] ss:$16 sps:$4 sm:$0xff]  }
  0xef   :  { %1930 = vmatprep.subr.bf16.mxu1 %v3343_v21  ;;  %v3433_v20 = vld [vmem:[#allocation2 + $0x78c] ss:$16 sps:$4 sm:$0xff]   ;;  %v3428_v21 = vld [vmem:[#allocation2 + $0x588] ss:$16 sps:$4 sm:$0xff]  }
  0xf1   :  { %1890 = vmatpush2.bf16.msra.mxu0 %v3338_v22  ;;  %v3431_v22 = vld [vmem:[#allocation2 + $0x788] ss:$16 sps:$4 sm:$0xff]  }
  0xf2   :  { %1931 = vmatpush2.bf16.msra.mxu1 %v3341_v23  ;;  %1891 = vmatprep.subr.bf16.mxu0 %v3346_v24  ;;  %v3436_v23 = vld [vmem:[#allocation2 + $0x56c] ss:$16 sps:$4 sm:$0xff]  }
  0xf3   :  { %1932 = vmatprep.subr.bf16.mxu1 %v3349_v25  ;;  %v3439_v24 = vld [vmem:[#allocation2 + $0x76c] ss:$16 sps:$4 sm:$0xff]   ;;  %v3434_v25 = vld [vmem:[#allocation2 + $0x568] ss:$16 sps:$4 sm:$0xff]  }
  0xf5   :  { %1892 = vmatpush2.bf16.msra.mxu0 %v3344_v26  ;;  %v3437_v26 = vld [vmem:[#allocation2 + $0x768] ss:$16 sps:$4 sm:$0xff]  }
  0xf6   :  { %1933 = vmatpush2.bf16.msra.mxu1 %v3347_v27  ;;  %1893 = vmatprep.subr.bf16.mxu0 %v3352_v28  ;;  %v3442_v27 = vld [vmem:[#allocation2 + $0x54c] ss:$16 sps:$4 sm:$0xff]  }
  0xf7   :  { %1934 = vmatprep.subr.bf16.mxu1 %v3355_v29  ;;  %v3445_v28 = vld [vmem:[#allocation2 + $0x74c] ss:$16 sps:$4 sm:$0xff]   ;;  %v3440_v29 = vld [vmem:[#allocation2 + $0x548] ss:$16 sps:$4 sm:$0xff]  }
  0xf9   :  { %1894 = vmatpush2.bf16.msra.mxu0 %v3350_v30  ;;  %v3443_v30 = vld [vmem:[#allocation2 + $0x748] ss:$16 sps:$4 sm:$0xff]  }
  0xfa   :  { %1935 = vmatpush2.bf16.msra.mxu1 %v3353_v33  ;;  %1895 = vmatprep.subr.bf16.mxu0 %v3358_v34  ;;  %v3448_v33 = vld [vmem:[#allocation2 + $0x52c] ss:$16 sps:$4 sm:$0xff]  }
  0xfb   :  { %1936 = vmatprep.subr.bf16.mxu1 %v3361_v35  ;;  %v3451_v34 = vld [vmem:[#allocation2 + $0x72c] ss:$16 sps:$4 sm:$0xff]   ;;  %v3446_v35 = vld [vmem:[#allocation2 + $0x528] ss:$16 sps:$4 sm:$0xff]  }
  0xfd   :  { %1896 = vmatpush2.bf16.msra.mxu0 %v3356_v36  ;;  %v3449_v36 = vld [vmem:[#allocation2 + $0x728] ss:$16 sps:$4 sm:$0xff]  }
  0xfe   :  { %1937 = vmatpush2.bf16.msra.mxu1 %v3359_v37  ;;  %1947 = vmatprep.subr.bf16.mxu0 %v3364_v38  ;;  %v3454_v37 = vld [vmem:[#allocation2 + $0x50c] ss:$16 sps:$4 sm:$0xff]  }
  0xff   :  { %1988 = vmatprep.subr.bf16.mxu1 %v3367_v39  ;;  %v3457_v38 = vld [vmem:[#allocation2 + $0x70c] ss:$16 sps:$4 sm:$0xff]   ;;  %v3452_v39 = vld [vmem:[#allocation2 + $0x508] ss:$16 sps:$4 sm:$0xff]  }
 0x100   :  { %1898 = vmatmul.mubr.bf16.vlgmr.msra.gmra.mxu0 %v3757_v16  ;;  %v3385_v16 = vld [vmem:[#allocation2 + $0x68c] ss:$16 sps:$4 sm:$0xff]  }
 0x101   :  { %1939 = vmatmul.mubr.bf16.vlgmr.msra.gmra.mxu1 %v3759_v17  ;;  %1948 = vmatpush1.bf16.msra.mxu0 %v3362_v40  ;;  %v3383_v17 = vld [vmem:[#allocation2 + $0x688] ss:$16 sps:$4 sm:$0xff]  }
 0x102   :  { %1989 = vmatpush1.bf16.msra.mxu1 %v3365_v41  ;;  %1949 = vmatprep.subr.bf16.mxu0 %v3370_v42  ;;  %v3455_v40 = vld [vmem:[#allocation2 + $0x708] ss:$16 sps:$4 sm:$0xff]   ;;  %v3458_v42 = vld [vmem:[#allocation6 + $0x70] ss:$8 sps:$4 sm:$0xff]  }
 0x103   :  { %1990 = vmatprep.subr.bf16.mxu1 %v3373_v44  ;;  %1979 = vmatprep.mubr.bf16.mxu0 %v3774_v53  ;;  %v3397_v53 = vld [vmem:[#allocation2 + $0x64c] ss:$16 sps:$4 sm:$0xff]   ;;  %v3460_v41 = vld [vmem:[#allocation6 + $0x74] ss:$8 sps:$4 sm:$0xff]   ;;  %v3463_v44 = vld [vmem:[#allocation6 + $0x64] ss:$8 sps:$4 sm:$0xff]  }
 0x104   :  { %2020 = vmatprep.mubr.bf16.mxu1 %v3778_v57  ;;  %v3392_v57 = vld [vmem:[#allocation2 + $0x448] ss:$16 sps:$4 sm:$0xff]  }
 0x105   :  { %1950 = vmatpush1.bf16.msra.mxu0 %v3368_v45 }
 0x106   :  { %1991 = vmatpush1.bf16.msra.mxu1 %v3371_v46  ;;  %1951 = vmatprep.subr.bf16.mxu0 %v3376_v47  ;;  %v3461_v47 = vld [vmem:[#allocation6 + $0x60] ss:$8 sps:$4 sm:$0xff]  }
 0x107   :  { %1992 = vmatprep.subr.bf16.mxu1 %v3379_v48 }
 0x109   :  { %1952 = vmatpush1.bf16.msra.mxu0 %v3374_v50 }
 0x10a   :  { %1993 = vmatpush1.bf16.msra.mxu1 %v3377_v62  ;;  %1953 = vmatprep.subr.bf16.mxu0 %v3382_v3  ;;  %v3466_v62 = vld [vmem:[#allocation6 + $0x54] ss:$8 sps:$4 sm:$0xff]  }
 0x10b   :  { %1994 = vmatprep.subr.bf16.mxu1 %v3385_v16 }
 0x10d   :  { %1954 = vmatpush1.bf16.msra.mxu0 %v3380_v51  ;;  %v3464_v51 = vld [vmem:[#allocation6 + $0x50] ss:$8 sps:$4 sm:$0xff]  }
 0x10e   :  { %1995 = vmatpush1.bf16.msra.mxu1 %v3383_v17  ;;  %1955 = vmatprep.subr.bf16.mxu0 %v3388_v52 }
 0x10f   :  { %1996 = vmatprep.subr.bf16.mxu1 %v3391_v54  ;;  %v3469_v54 = vld [vmem:[#allocation6 + $0x44] ss:$8 sps:$4 sm:$0xff]  }
 0x111   :  { %1956 = vmatpush1.bf16.msra.mxu0 %v3386_v55  ;;  %v3506_v55 = vld [vmem:[#allocation6 + $0x170] ss:$8 sps:$4 sm:$0xff]  }
 0x112   :  { %1997 = vmatpush1.bf16.msra.mxu1 %v3389_v56  ;;  %1957 = vmatprep.subr.bf16.mxu0 %v3394_v58  ;;  %v3511_v56 = vld [vmem:[#allocation6 + $0x164] ss:$8 sps:$4 sm:$0xff]   ;;  %v3509_v58 = vld [vmem:[#allocation6 + $0x160] ss:$8 sps:$4 sm:$0xff]  }
 0x113   :  { %1998 = vmatprep.subr.bf16.mxu1 %v3397_v53  ;;  %v3472_v53 = vld [vmem:[#allocation6 + $0x34] ss:$8 sps:$4 sm:$0xff]  }
 0x115   :  { %1958 = vmatpush1.bf16.msra.mxu0 %v3392_v57  ;;  %v3514_v57 = vld [vmem:[#allocation6 + $0x154] ss:$8 sps:$4 sm:$0xff]  }
 0x116   :  { %1999 = vmatpush1.bf16.msra.mxu1 %v3395_v49  ;;  %1959 = vmatprep.subr.bf16.mxu0 %v3400_v59  ;;  %v3470_v49 = vld [vmem:[#allocation6 + $0x30] ss:$8 sps:$4 sm:$0xff]  }
 0x117   :  { %2000 = vmatprep.subr.bf16.mxu1 %v3403_v60  ;;  %v3512_v59 = vld [vmem:[#allocation6 + $0x150] ss:$8 sps:$4 sm:$0xff]   ;;  %v3475_v60 = vld [vmem:[#allocation6 + $0x24] ss:$8 sps:$4 sm:$0xff]  }
 0x119   :  { %1960 = vmatpush1.bf16.msra.mxu0 %v3398_v61  ;;  %v3517_v61 = vld [vmem:[#allocation6 + $0x144] ss:$8 sps:$4 sm:$0xff]  }
 0x11a   :  { %2001 = vmatpush1.bf16.msra.mxu1 %v3401_v63  ;;  %1961 = vmatprep.subr.bf16.mxu0 %v3406_v0  ;;  %v3473_v63 = vld [vmem:[#allocation6 + $0x20] ss:$8 sps:$4 sm:$0xff]  }
 0x11b   :  { %2002 = vmatprep.subr.bf16.mxu1 %v3409_v1  ;;  %v3515_v0 = vld [vmem:[#allocation6 + $0x140] ss:$8 sps:$4 sm:$0xff]   ;;  %v3478_v1 = vld [vmem:[#allocation6 + $0x14] ss:$8 sps:$4 sm:$0xff]  }
 0x11d   :  { %1962 = vmatpush1.bf16.msra.mxu0 %v3404_v2  ;;  %v3520_v2 = vld [vmem:[#allocation6 + $0x134] ss:$8 sps:$4 sm:$0xff]  }
 0x11e   :  { %2003 = vmatpush1.bf16.msra.mxu1 %v3407_v4  ;;  %1963 = vmatprep.subr.bf16.mxu0 %v3412_v5  ;;  %v3476_v4 = vld [vmem:[#allocation6 + $0x10] ss:$8 sps:$4 sm:$0xff]  }
 0x11f   :  { %2004 = vmatprep.subr.bf16.mxu1 %v3415_v6  ;;  %v3518_v5 = vld [vmem:[#allocation6 + $0x130] ss:$8 sps:$4 sm:$0xff]   ;;  %v3481_v6 = vld [vmem:[#allocation6 + $0x4] ss:$8 sps:$4 sm:$0xff]  }
 0x121   :  { %1964 = vmatpush2.bf16.msra.mxu0 %v3410_v7  ;;  %v3523_v7 = vld [vmem:[#allocation6 + $0x124] ss:$8 sps:$4 sm:$0xff]  }
 0x122   :  { %2005 = vmatpush2.bf16.msra.mxu1 %v3413_v8  ;;  %1965 = vmatprep.subr.bf16.mxu0 %v3418_v9  ;;  %v3479_v8 = vld [vmem:[#allocation6] ss:$8 sps:$4 sm:$0xff]  }
 0x123   :  { %2006 = vmatprep.subr.bf16.mxu1 %v3421_v10  ;;  %v3521_v9 = vld [vmem:[#allocation6 + $0x120] ss:$8 sps:$4 sm:$0xff]   ;;  %v3484_v10 = vld [vmem:[#allocation6 + $0xf4] ss:$8 sps:$4 sm:$0xff]  }
 0x125   :  { %1966 = vmatpush2.bf16.msra.mxu0 %v3416_v11  ;;  %v3526_v11 = vld [vmem:[#allocation6 + $0x114] ss:$8 sps:$4 sm:$0xff]  }
 0x126   :  { %2007 = vmatpush2.bf16.msra.mxu1 %v3419_v12  ;;  %1967 = vmatprep.subr.bf16.mxu0 %v3424_v13  ;;  %v3482_v12 = vld [vmem:[#allocation6 + $0xf0] ss:$8 sps:$4 sm:$0xff]  }
 0x127   :  { %2008 = vmatprep.subr.bf16.mxu1 %v3427_v14  ;;  %v3524_v13 = vld [vmem:[#allocation6 + $0x110] ss:$8 sps:$4 sm:$0xff]   ;;  %v3487_v14 = vld [vmem:[#allocation6 + $0xe4] ss:$8 sps:$4 sm:$0xff]  }
 0x129   :  { %1968 = vmatpush2.bf16.msra.mxu0 %v3422_v15  ;;  %v3529_v15 = vld [vmem:[#allocation6 + $0x104] ss:$8 sps:$4 sm:$0xff]  }
 0x12a   :  { %2009 = vmatpush2.bf16.msra.mxu1 %v3425_v18  ;;  %1969 = vmatprep.subr.bf16.mxu0 %v3430_v19  ;;  %v3485_v18 = vld [vmem:[#allocation6 + $0xe0] ss:$8 sps:$4 sm:$0xff]  }
 0x12b   :  { %2010 = vmatprep.subr.bf16.mxu1 %v3433_v20  ;;  %v3527_v19 = vld [vmem:[#allocation6 + $0x100] ss:$8 sps:$4 sm:$0xff]   ;;  %v3490_v20 = vld [vmem:[#allocation6 + $0xd4] ss:$8 sps:$4 sm:$0xff]  }
 0x12d   :  { %1970 = vmatpush2.bf16.msra.mxu0 %v3428_v21  ;;  %v3532_v21 = vld [vmem:[#allocation6 + $0x1f4] ss:$8 sps:$4 sm:$0xff]  }
 0x12e   :  { %2011 = vmatpush2.bf16.msra.mxu1 %v3431_v22  ;;  %1971 = vmatprep.subr.bf16.mxu0 %v3436_v23  ;;  %v3488_v22 = vld [vmem:[#allocation6 + $0xd0] ss:$8 sps:$4 sm:$0xff]  }
 0x12f   :  { %2012 = vmatprep.subr.bf16.mxu1 %v3439_v24  ;;  %v3530_v23 = vld [vmem:[#allocation6 + $0x1f0] ss:$8 sps:$4 sm:$0xff]   ;;  %v3493_v24 = vld [vmem:[#allocation6 + $0xc4] ss:$8 sps:$4 sm:$0xff]  }
 0x131   :  { %1972 = vmatpush2.bf16.msra.mxu0 %v3434_v25  ;;  %v3535_v25 = vld [vmem:[#allocation6 + $0x1e4] ss:$8 sps:$4 sm:$0xff]  }
 0x132   :  { %2013 = vmatpush2.bf16.msra.mxu1 %v3437_v26  ;;  %1973 = vmatprep.subr.bf16.mxu0 %v3442_v27  ;;  %v3491_v26 = vld [vmem:[#allocation6 + $0xc0] ss:$8 sps:$4 sm:$0xff]  }
 0x133   :  { %2014 = vmatprep.subr.bf16.mxu1 %v3445_v28  ;;  %v3533_v27 = vld [vmem:[#allocation6 + $0x1e0] ss:$8 sps:$4 sm:$0xff]   ;;  %v3496_v28 = vld [vmem:[#allocation6 + $0xb4] ss:$8 sps:$4 sm:$0xff]  }
 0x135   :  { %1974 = vmatpush2.bf16.msra.mxu0 %v3440_v29  ;;  %v3538_v29 = vld [vmem:[#allocation6 + $0x1d4] ss:$8 sps:$4 sm:$0xff]  }
 0x136   :  { %2015 = vmatpush2.bf16.msra.mxu1 %v3443_v30  ;;  %1975 = vmatprep.subr.bf16.mxu0 %v3448_v33  ;;  %v3494_v30 = vld [vmem:[#allocation6 + $0xb0] ss:$8 sps:$4 sm:$0xff]  }
 0x137   :  { %2016 = vmatprep.subr.bf16.mxu1 %v3451_v34  ;;  %v3536_v33 = vld [vmem:[#allocation6 + $0x1d0] ss:$8 sps:$4 sm:$0xff]   ;;  %v3499_v34 = vld [vmem:[#allocation6 + $0xa4] ss:$8 sps:$4 sm:$0xff]  }
 0x139   :  { %1976 = vmatpush2.bf16.msra.mxu0 %v3446_v35  ;;  %v3541_v35 = vld [vmem:[#allocation6 + $0x1c4] ss:$8 sps:$4 sm:$0xff]  }
 0x13a   :  { %2017 = vmatpush2.bf16.msra.mxu1 %v3449_v36  ;;  %1977 = vmatprep.subr.bf16.mxu0 %v3454_v37  ;;  %v3497_v36 = vld [vmem:[#allocation6 + $0xa0] ss:$8 sps:$4 sm:$0xff]  }
 0x13b   :  { %2018 = vmatprep.subr.bf16.mxu1 %v3457_v38  ;;  %v3539_v37 = vld [vmem:[#allocation6 + $0x1c0] ss:$8 sps:$4 sm:$0xff]   ;;  %v3502_v38 = vld [vmem:[#allocation6 + $0x94] ss:$8 sps:$4 sm:$0xff]  }
 0x13d   :  { %1978 = vmatpush2.bf16.msra.mxu0 %v3452_v39  ;;  %v3544_v39 = vld [vmem:[#allocation6 + $0x1b4] ss:$8 sps:$4 sm:$0xff]  }
 0x13e   :  { %2019 = vmatpush2.bf16.msra.mxu1 %v3455_v40  ;;  %2433 = vmatprep.subr.bf16.mxu0 %v3460_v41  ;;  %v403_v40 = vsub.s32 0, %v3741_v43  ;;  %v3809_v41 = vld [vmem:[#allocation4] sm:$0xf] }
 0x140   :  { %v3798_v45 = vpop.f32.mrf.mxu0  ;;  %1980 = vmatmul.mubr.bf16.vlgmr.msra.gmra.mxu0 %v3784_v31  ;;  %v3508_v31 = vld [vmem:[#allocation6 + $0x174] ss:$8 sps:$4 sm:$0xff]  }
 0x141   :  { %v3800_v46 = vpop.f32.mrf.mxu1  ;;  %2021 = vmatmul.mubr.bf16.vlgmr.msra.gmra.mxu1 %v3788_v32  ;;  %2434 = vmatpush1.bf16.msra.mxu0 %v3458_v42  ;;  %v3467_v32 = vld [vmem:[#allocation6 + $0x40] ss:$8 sps:$4 sm:$0xff]   ;;  %v407_v42 = vsub.s32 1, %v3741_v43 }
 0x142   :  { %v3804_v48 = vpop.f32.mrf.mxu0  ;;  %2435 = vmatprep.subr.bf16.mxu0 %v3463_v44  ;;  %2474 = vmatprep.subr.bf16.mxu1 %v3508_v31  ;;  %v3500_v44 = vld [vmem:[#allocation6 + $0x90] ss:$8 sps:$4 sm:$0xff]   ;;  %v3545_v31 = vld [vmem:[#allocation6 + $0x1a0] ss:$8 sps:$4 sm:$0xff]  }
 0x143   :  { %v3806_v50 = vpop.f32.mrf.mxu1  ;;  %2475 = vmatpush1.bf16.msra.mxu1 %v3506_v55 }
 0x144   :  { %v1739_v3 = vpop.f32.mrf.mxu0  ;;  %2476 = vmatprep.subr.bf16.mxu1 %v3511_v56 }
 0x145   :  { %v1780_v16 = vpop.f32.mrf.mxu1  ;;  %2436 = vmatpush1.bf16.msra.mxu0 %v3461_v47  ;;  %v3542_v47 = vld [vmem:[#allocation6 + $0x1b0] ss:$8 sps:$4 sm:$0xff]   ;;  %v404_v3 = vrot.slane %v3809_v41, %v403_v40 }
 0x146   :  { %v1740_v17 = vpop.f32.mrf.mxu0  ;;  %2437 = vmatprep.subr.bf16.mxu0 %v3466_v62  ;;  %v3505_v62 = vld [vmem:[#allocation6 + $0x84] ss:$8 sps:$4 sm:$0xff]   ;;  %v408_v16 = vrot.slane %v3809_v41, %v407_v42 }
 0x147   :  { %v1781_v52 = vpop.f32.mrf.mxu1  ;;  %2477 = vmatpush1.bf16.msra.mxu1 %v3509_v58  ;;  %v1736_v17 = vadd.f32 %v3798_v45, %v404_v3  ;;  %v3548_v45 = vld [vmem:[#allocation6 + $0x190] ss:$8 sps:$4 sm:$0xff]  }
 0x148   :  { %2478 = vmatprep.subr.bf16.mxu1 %v3514_v57  ;;  %v1738_v52 = vadd.f32 %v3804_v48, %v408_v16 }
 0x149   :  { %2438 = vmatpush1.bf16.msra.mxu0 %v3464_v51  ;;  %v3503_v51 = vld [vmem:[#allocation6 + $0x80] ss:$8 sps:$4 sm:$0xff]   ;;  %v1777_v55 = vadd.f32 %v3800_v46, %v1736_v17 }
 0x14a   :  { %2439 = vmatprep.subr.bf16.mxu0 %v3469_v54  ;;  %v3547_v54 = vld [vmem:[#allocation6 + $0x1a4] ss:$8 sps:$4 sm:$0xff]   ;;  %v1779_v58 = vadd.f32 %v3806_v50, %v1738_v52 }
 0x14b   :  { %2479 = vmatpush1.bf16.msra.mxu1 %v3512_v59  ;;  %v3550_v59 = vld [vmem:[#allocation6 + $0x194] ss:$8 sps:$4 sm:$0xff]  }
 0x14c   :  { %2480 = vmatprep.subr.bf16.mxu1 %v3517_v61 }
 0x14d   :  { %2440 = vmatpush1.bf16.msra.mxu0 %v3467_v32 }
 0x14e   :  { %2441 = vmatprep.subr.bf16.mxu0 %v3472_v53 }
 0x14f   :  { %2481 = vmatpush1.bf16.msra.mxu1 %v3515_v0 }
 0x150   :  { %2482 = vmatprep.subr.bf16.mxu1 %v3520_v2 }
 0x151   :  { %2442 = vmatpush1.bf16.msra.mxu0 %v3470_v49 }
 0x152   :  { %2443 = vmatprep.subr.bf16.mxu0 %v3475_v60 }
 0x153   :  { %2483 = vmatpush1.bf16.msra.mxu1 %v3518_v5 }
 0x154   :  { %2484 = vmatprep.subr.bf16.mxu1 %v3523_v7 }
 0x155   :  { %2444 = vmatpush1.bf16.msra.mxu0 %v3473_v63 }
 0x156   :  { %2445 = vmatprep.subr.bf16.mxu0 %v3478_v1 }
 0x157   :  { %2485 = vmatpush1.bf16.msra.mxu1 %v3521_v9 }
 0x158   :  { %2486 = vmatprep.subr.bf16.mxu1 %v3526_v11 }
 0x159   :  { %2446 = vmatpush1.bf16.msra.mxu0 %v3476_v4  ;;  %v3553_v4 = vld [vmem:[#allocation6 + $0x184] ss:$8 sps:$4 sm:$0xff]  }
 0x15a   :  { %2447 = vmatprep.subr.bf16.mxu0 %v3481_v6  ;;  %v3551_v6 = vld [vmem:[#allocation6 + $0x180] ss:$8 sps:$4 sm:$0xff]  }
 0x15b   :  { %2487 = vmatpush1.bf16.msra.mxu1 %v3524_v13 }
 0x15c   :  { %2488 = vmatprep.subr.bf16.mxu1 %v3529_v15 }
 0x15d   :  { %2448 = vmatpush1.bf16.msra.mxu0 %v3479_v8 }
 0x15e   :  { %2449 = vmatprep.subr.bf16.mxu0 %v3484_v10 }
 0x15f   :  { %2489 = vmatpush1.bf16.msra.mxu1 %v3527_v19  ;;  %v3555_v19 = vld [vmem:[%s3886_s5 + $0x38] sm:$0xff]  }
 0x160   :  { %2490 = vmatprep.subr.bf16.mxu1 %v3532_v21  ;;  %v3557_v21 = vld [vmem:[%s3886_s5 + $0x30] sm:$0xff]  }
 0x161   :  { %2450 = vmatpush2.bf16.msra.mxu0 %v3482_v12 }
 0x162   :  { %2451 = vmatprep.subr.bf16.mxu0 %v3487_v14 }
 0x163   :  { %2491 = vmatpush2.bf16.msra.mxu1 %v3530_v23  ;;  %v3559_v23 = vld [vmem:[%s3886_s5 + $0x28] sm:$0xff]  }
 0x164   :  { %2492 = vmatprep.subr.bf16.mxu1 %v3535_v25  ;;  %v3561_v25 = vld [vmem:[%s3886_s5 + $0x20] sm:$0xff]  }
 0x165   :  { %2452 = vmatpush2.bf16.msra.mxu0 %v3485_v18  ;;  %v3554_v18 = vld [vmem:[%s3886_s5 + $0x78] sm:$0xff]  }
 0x166   :  { %2453 = vmatprep.subr.bf16.mxu0 %v3490_v20  ;;  %v3556_v20 = vld [vmem:[%s3886_s5 + $0x70] sm:$0xff]  }
 0x167   :  { %2493 = vmatpush2.bf16.msra.mxu1 %v3533_v27  ;;  %v3563_v27 = vld [vmem:[%s3886_s5 + $0x18] sm:$0xff]  }
 0x168   :  { %2494 = vmatprep.subr.bf16.mxu1 %v3538_v29  ;;  %v3565_v29 = vld [vmem:[%s3886_s5 + $0x10] sm:$0xff]  }
 0x169   :  { %2454 = vmatpush2.bf16.msra.mxu0 %v3488_v22  ;;  %v3558_v22 = vld [vmem:[%s3886_s5 + $0x68] sm:$0xff]  }
 0x16a   :  { %2455 = vmatprep.subr.bf16.mxu0 %v3493_v24  ;;  %v3560_v24 = vld [vmem:[%s3886_s5 + $0x60] sm:$0xff]  }
 0x16b   :  { %2495 = vmatpush2.bf16.msra.mxu1 %v3536_v33  ;;  %v415_v33 = vsub.s32 3, %v3741_v43 }
 0x16c   :  { %2496 = vmatprep.subr.bf16.mxu1 %v3541_v35 }
 0x16d   :  { %2456 = vmatpush2.bf16.msra.mxu0 %v3491_v26  ;;  %v3562_v26 = vld [vmem:[%s3886_s5 + $0x58] sm:$0xff]   ;;  %v416_v35 = vrot.slane %v3809_v41, %v415_v33 }
 0x16e   :  { %2457 = vmatprep.subr.bf16.mxu0 %v3496_v28  ;;  %v3564_v28 = vld [vmem:[%s3886_s5 + $0x50] sm:$0xff]  }
 0x16f   :  { %2497 = vmatpush2.bf16.msra.mxu1 %v3539_v37 }
 0x170   :  { %2498 = vmatprep.subr.bf16.mxu1 %v3544_v39 }
 0x171   :  { %2458 = vmatpush2.bf16.msra.mxu0 %v3494_v30  ;;  %v411_v30 = vsub.s32 2, %v3741_v43 }
 0x172   :  { %2459 = vmatprep.subr.bf16.mxu0 %v3499_v34 }
 0x173   :  { %2499 = vmatpush2.bf16.msra.mxu1 %v3542_v47  ;;  %v412_v34 = vrot.slane %v3809_v41, %v411_v30 }
 0x174   :  { %2500 = vmatprep.subr.bf16.mxu1 %v3547_v54 }
 0x175   :  { %2460 = vmatpush2.bf16.msra.mxu0 %v3497_v36 }
 0x176   :  { %2461 = vmatprep.subr.bf16.mxu0 %v3502_v38 }
 0x177   :  { %2501 = vmatpush2.bf16.msra.mxu1 %v3545_v31 }
 0x178   :  { %2502 = vmatprep.subr.bf16.mxu1 %v3550_v59  ;;  %v3567_v59 = vld [vmem:[%s3886_s5 + $0x8] sm:$0xff]  }
 0x179   :  { %2462 = vmatpush2.bf16.msra.mxu0 %v3500_v44 }
 0x17a   :  { %2463 = vmatprep.subr.bf16.mxu0 %v3505_v62 }
 0x17b   :  { %2503 = vmatpush2.bf16.msra.mxu1 %v3548_v45  ;;  %v3568_v45 = vld [vmem:[%s3886_s5 + $0x40] sm:$0xff]  }
 0x17c   :  { %2504 = vmatprep.subr.bf16.mxu1 %v3553_v4 }
 0x17d   :  { %2464 = vmatpush2.bf16.msra.mxu0 %v3503_v51 }
 0x17e   :  { %3040 = vmatprep.subr.bf16.mxu0 %v3554_v18 }
 0x17f   :  { %2505 = vmatpush2.bf16.msra.mxu1 %v3551_v6 }
 0x180   :  { %v1817_v56 = vpop.f32.mrf.mxu0 }
 0x181   :  { %v1858_v32 = vpop.f32.mrf.mxu1  ;;  %v1818_v53 = vadd.f32 %v1817_v56, %v1777_v55 }
 0x182   :  { %v1819_v57 = vpop.f32.mrf.mxu0 }
 0x183   :  { %v1860_v49 = vpop.f32.mrf.mxu1  ;;  %v1859_v60 = vadd.f32 %v1858_v32, %v1818_v53  ;;  %v1820_v61 = vadd.f32 %v1819_v57, %v1779_v58 }
 0x184   :  { %v1821_v63 = vpop.f32.mrf.mxu0 }
 0x185   :  { %v1862_v48 = vpop.f32.mrf.mxu1  ;;  %v1861_v0 = vadd.f32 %v1860_v49, %v1820_v61  ;;  %v2029_v46 = vmax.f32 %v1859_v60, 0.0  ;;  %v3566_v49 = vld [vmem:[%s3886_s5 + $0x48] sm:$0xff]   ;;  %v3569_v63 = vld [vmem:[%s3886_s5] sm:$0xff]  }
 0x186   :  { %v1822_v1 = vpop.f32.mrf.mxu0 }
 0x187   :  { %v1863_v2 = vpop.f32.mrf.mxu1  ;;  %v2030_v5 = vmax.f32 %v1861_v0, 0.0  ;;  %v2033_v7 = vpack.c.bf16 %v2029_v46, %v2029_v46  ;;  %v2101_v0 = vld [vmem:[#allocation7] sm:$0x3] }
 0x188   :  { %v2106_v46 = vrot.slane %v2101_v0, %v403_v40  ;;  %v2110_v1 = vrot.slane %v2101_v0, %v407_v42 }
 0x189   :  { %v2034_v50 = vpack.c.bf16 %v2030_v5, %v2030_v5 }
 0x18b   :  { %2465 = vmatprep.mubr.bf16.mxu0 %v2034_v50 }
 0x18c   :  { %2466 = vmatmul.mubr.bf16.vlgmr.msra.gmra.mxu0 %v2033_v7 }
 0x18d   :  { %3041 = vmatpush3.bf16.msra.mxu0 %v3555_v19 }
 0x18e   :  { %3042 = vmatprep.subr.bf16.mxu0 %v3556_v20 }
 0x191   :  { %3043 = vmatpush3.bf16.msra.mxu0 %v3557_v21 }
 0x192   :  { %3044 = vmatprep.subr.bf16.mxu0 %v3558_v22 }
 0x195   :  { %3045 = vmatpush3.bf16.msra.mxu0 %v3559_v23 }
 0x196   :  { %3046 = vmatprep.subr.bf16.mxu0 %v3560_v24 }
 0x199   :  { %3047 = vmatpush3.bf16.msra.mxu0 %v3561_v25 }
 0x19a   :  { %3048 = vmatprep.subr.bf16.mxu0 %v3562_v26 }
 0x19d   :  { %3049 = vmatpush3.bf16.msra.mxu0 %v3563_v27 }
 0x19e   :  { %3050 = vmatprep.subr.bf16.mxu0 %v3564_v28 }
 0x1a1   :  { %3051 = vmatpush3.bf16.msra.mxu0 %v3565_v29 }
 0x1a2   :  { %3052 = vmatprep.subr.bf16.mxu0 %v3566_v49 }
 0x1a5   :  { %3053 = vmatpush3.bf16.msra.mxu0 %v3567_v59 }
 0x1a6   :  { %3054 = vmatprep.subr.bf16.mxu0 %v3568_v45 }
 0x1a9   :  { %3055 = vmatpush3.bf16.msra.mxu0 %v3569_v63 }
 0x1c0   :  { %v1899_v8 = vpop.f32.mrf.mxu0 }
 0x1c1   :  { %v1940_v9 = vpop.f32.mrf.mxu1  ;;  %v1900_v36 = vadd.f32 %v1899_v8, %v412_v34 }
 0x1c2   :  { %v1901_v10 = vpop.f32.mrf.mxu0 }
 0x1c3   :  { %v1942_v11 = vpop.f32.mrf.mxu1  ;;  %v1902_v37 = vadd.f32 %v1901_v10, %v416_v35  ;;  %v1941_v38 = vadd.f32 %v1940_v9, %v1900_v36 }
 0x1c4   :  { %v1903_v12 = vpop.f32.mrf.mxu0 }
 0x1c5   :  { %v1944_v13 = vpop.f32.mrf.mxu1  ;;  %v1943_v47 = vadd.f32 %v1942_v11, %v1902_v37 }
 0x1c6   :  { %v1904_v14 = vpop.f32.mrf.mxu0 }
 0x1c7   :  { %v1945_v15 = vpop.f32.mrf.mxu1 }
 0x1c8   :  { %v3023_v15 = vld [vmem:[#allocation9] ss:$0 sm:$0xff] }
 0x200   :  { %v1981_v39 = vpop.f32.mrf.mxu0 }
 0x201   :  { %v2022_v44 = vpop.f32.mrf.mxu1  ;;  %v1982_v62 = vadd.f32 %v1981_v39, %v1941_v38 }
 0x202   :  { %v1983_v3 = vpop.f32.mrf.mxu0 }
 0x203   :  { %v2024_v16 = vpop.f32.mrf.mxu1  ;;  %v2023_v51 = vadd.f32 %v2022_v44, %v1982_v62  ;;  %v1984_v17 = vadd.f32 %v1983_v3, %v1943_v47 }
 0x204   :  { %v1985_v52 = vpop.f32.mrf.mxu0 }
 0x205   :  { %v2026_v54 = vpop.f32.mrf.mxu1  ;;  %v2025_v55 = vadd.f32 %v2024_v16, %v1984_v17  ;;  %v2031_v31 = vmax.f32 %v2023_v51, 0.0 }
 0x206   :  { %v1986_v56 = vpop.f32.mrf.mxu0 }
 0x207   :  { %v2027_v32 = vpop.f32.mrf.mxu1  ;;  %v2032_v58 = vmax.f32 %v2025_v55, 0.0  ;;  %v2035_v41 = vpack.c.bf16 %v2031_v31, %v2031_v31 }
 0x209   :  { %v2036_v53 = vpack.c.bf16 %v2032_v58, %v2032_v58 }
 0x20b   :  { %2506 = vmatprep.mubr.bf16.mxu1 %v2036_v53 }
 0x20c   :  { %2507 = vmatmul.mubr.bf16.vlgmr.msra.gmra.mxu1 %v2035_v41 }
 0x24c   :  { %v2467_v57 = vpop.f32.mrf.mxu0 }
 0x24d   :  { %v2468_v2 = vadd.f32 %v2467_v57, %v2106_v46 }
 0x24e   :  { %v2469_v60 = vpop.f32.mrf.mxu0 }
 0x24f   :  { %v2470_v5 = vadd.f32 %v2469_v60, %v2110_v1 }
 0x250   :  { %v2471_v61 = vpop.f32.mrf.mxu0 }
 0x252   :  { %v2472_v48 = vpop.f32.mrf.mxu0 }
 0x2cc   :  { %v2508_v4 = vpop.f32.mrf.mxu1 }
 0x2cd   :  { %v2509_v6 = vadd.f32 %v2508_v4, %v2468_v2 }
 0x2ce   :  { %v2510_v50 = vpop.f32.mrf.mxu1 }
 0x2cf   :  { %v2511_v7 = vadd.f32 %v2510_v50, %v2470_v5  ;;  %v2515_v8 = vmax.f32 %v2509_v6, 0.0 }
 0x2d0   :  { %v2512_v9 = vpop.f32.mrf.mxu1 }
 0x2d1   :  { %v2516_v10 = vmax.f32 %v2511_v7, 0.0  ;;  %v2517_v13 = vpack.c.bf16 %v2515_v8, %v2515_v8 }
 0x2d2   :  { %v2513_v11 = vpop.f32.mrf.mxu1 }
 0x2d3   :  { %v2518_v12 = vpack.c.bf16 %v2516_v10, %v2516_v10 }
 0x2d5   :  { %2686 = vmatprep.mubr.bf16.mxu0 %v2518_v12 }
 0x2d6   :  { %2687 = vmatmul.mubr.bf16.vlgmr.msra.gmra.mxu0 %v2517_v13 }
 0x396   :  { %v3056_v14 = vpop.f32.mrf.mxu0 }
 0x398   :  { %v3057_v40 = vpop.f32.mrf.mxu0 }
 0x399   :  { %v3058_v18 = vadd.f32 %v3057_v40, %v3056_v14 }
 0x39a   :  { %v3059_v43 = vpop.f32.mrf.mxu0 }
 0x39b   :  { %v2689_v42 = vadd.f32 %v3058_v18, %v3023_v15 }
 0x39c   :  { %v3060_v19 = vpop.f32.mrf.mxu0 }
 0x39d   :  { %2695 = vst.msk [vmem:[%s3888_s7] sm:$0x3] %vm2694_vm0, %v2689_v42 }
 0x39e   :  { %2700 = vsyncpa [#allocation3], 1 }
 0x39f   :  { %2701 = vsyncpa [#allocation5], 1 }
 0x3a0   :  { %2702 = vsyncpa [#allocation8], 1 }

// kernel: pointnet_mean_forward.12
= control target key start
LH: loop header
LB: loop body
LE: loop exit
PB: predicated region body
PF: predicated region fallthrough
CT: control target
= control target key end

     0   :  { %s1836_s21 = smov 0   ;;  %s1838_s22 = smov 0   ;;  %s2145_s0 = inlined_call_operand.vmem [shape: bf16[2,64,64], index: 0, kind: input, shape index: {}]   ;;  %s2146_s1 = inlined_call_operand.vmem [shape: f32[2,64,64], index: 1, kind: input, shape index: {}]   ;;  %s2147_s2 = inlined_call_operand.vmem [shape: bf16[64,128], index: 2, kind: input, shape index: {}]   ;;  %s2148_s3 = inlined_call_operand.vmem [shape: f32[1,128], index: 3, kind: input, shape index: {}]   ;;  %s2149_s4 = inlined_call_operand.vmem [shape: bf16[128,1024], index: 4, kind: input, shape index: {}]   ;;  %s2150_s5 = inlined_call_operand.vmem [shape: f32[1,1024], index: 5, kind: input, shape index: {}]   ;;  %s2151_s6 = inlined_call_operand.vmem [shape: f32[2,1,1024], index: 6, kind: output, shape index: {}]  }
   0x1   :  { %s1840_s23 = smov 0  }
   0x2 LB: > { %s28_s24 = sadd.s32 1, %s1793_s22  ;;  %p1555_p0 = scmp.ge.s32.totalorder %s1797_s23, 1  ;;  %s1797_s23 = sphi %s1840_s23, %s16_s23   ;;  %s1793_s22 = sphi %s1838_s22, %s2153_s22   ;;  %s1789_s21 = sphi %s1836_s21, %s2152_s21  }
   0x3   : > { %p30_p1 = scmp.ge.s32.totalorder %s28_s24, 2  ;;  %p241_p2 = scmp.lt.s32.totalorder %s1797_s23, 3 }
   0x5   : > { %s2155_s24 = smov (%p30_p1, %s28_s24), 0  ;;  %p242_p3 = pnand %p1555_p0, %p241_p2 }
   0x6   : > { %p280_p4 = scmp.lt.s32.totalorder (!%p242_p3), %s1789_s21, 1 }
   0x7   : > { %245 = sbr.rel (%p242_p3) target bundleno = 749 (0x2ed), region = 44 }
   0xc   : > { %v1763_v0 = vld [vmem:[%s2147_s2 + $0x18] sm:$0xff]   ;;  %v1764_v1 = vld [vmem:[%s2147_s2 + $0x10] sm:$0xff]   ;;  %s2157_s21 = smov (!%p280_p4, %s1789_s21), 1  ;;  %v1765_v2 = vld [vmem:[%s2147_s2 + $0x8] sm:$0xff]   ;;  %vm348_vm0 = vcmask 523264  }
   0xd   : > { %1705 = vmatprep.subr.bf16.mxu0 %v1763_v0  ;;  %s1657_s7 = sshll.u32 %s2157_s21, 6  ;;  %v1766_v6 = vld [vmem:[%s2147_s2] sm:$0xff]   ;;  %s1656_s13 = sshll.u32 %s2157_s21, 5  ;;  %v680_v52 = vld [vmem:[%s2149_s4 + $0x1c8] sm:$0xff] }
   0xe   : > { %1706 = vmatpush3.bf16.msra.mxu0 %v1763_v0  ;;  %s293_s10 = scalar_lea.vmem %s2146_s1, %s1657_s7  ;;  %s1880_s16 = scalar_lea.vmem %s2145_s0, %s1656_s13  ;;  %v679_v17 = vld [vmem:[%s2149_s4 + $0x1c0] sm:$0xff]  ;;  %v684_v53 = vld [vmem:[%s2149_s4 + $0x1e8] sm:$0xff] }
   0xf   : > { %1707 = vmatprep.subr.bf16.mxu0 %v1764_v1  ;;  %v304_v3 = vld [vmem:[%s293_s10] sm:$0xff]  ;;  %v305_v4 = vld [vmem:[%s293_s10 + $0x8] sm:$0xff]  ;;  %v306_v7 = vld [vmem:[%s293_s10 + $0x10] sm:$0xff]  ;;  %v1649_v55 = vcombine.high %v680_v52, %v684_v53  ;;  %v1648_v60 = vcombine.low %v680_v52, %v684_v53  ;;  %s1560_s8 = sshll.u32 %s2157_s21, 3 }
  0x10   : > { %v312_v5 = vpack.c.bf16 %v305_v4, %v304_v3  ;;  %v307_v8 = vld [vmem:[%s293_s10 + $0x18] sm:$0xff]  ;;  %v308_v9 = vld [vmem:[%s293_s10 + $0x20] sm:$0xff]  ;;  %v309_v10 = vld [vmem:[%s293_s10 + $0x28] sm:$0xff]  ;;  %s297_s13 = scalar_lea.vmem %s2151_s6, %s1560_s8 }
  0x11   : > { %v313_v11 = vpack.c.bf16 %v307_v8, %v306_v7  ;;  %v314_v12 = vpack.c.bf16 %v309_v10, %v308_v9  ;;  %v310_v13 = vld [vmem:[%s293_s10 + $0x30] sm:$0xff]  ;;  %v311_v14 = vld [vmem:[%s293_s10 + $0x38] sm:$0xff]  ;;  %v1771_v16 = vld [vmem:[%s1880_s16] sm:$0xff]  }
  0x12   : > { %1708 = vmatpush3.bf16.msra.mxu0 %v1764_v1  ;;  %1713 = vmatprep.mubr.msk.bf16.mxu0 %vm348_vm0, %v312_v5  ;;  %v315_v15 = vpack.c.bf16 %v311_v14, %v310_v13  ;;  %v683_v18 = vld [vmem:[%s2149_s4 + $0x1e0] sm:$0xff]  ;;  %v672_v56 = vld [vmem:[%s2149_s4 + $0x188] sm:$0xff]  ;;  %v1773_v59 = vld [vmem:[%s1880_s16 + $0x10] sm:$0xff]  }
  0x13   : > { %1709 = vmatprep.subr.bf16.mxu0 %v1765_v2  ;;  %1729 = vmatprep.mubr.msk.bf16.mxu1 %vm348_vm0, %v1771_v16  ;;  %v1646_v19 = vcombine.low %v679_v17, %v683_v18  ;;  %v1647_v20 = vcombine.high %v679_v17, %v683_v18  ;;  %v671_v21 = vld [vmem:[%s2149_s4 + $0x180] sm:$0xff]  ;;  %v676_v57 = vld [vmem:[%s2149_s4 + $0x1a8] sm:$0xff]  ;;  %v1774_v4 = vld [vmem:[%s1880_s16 + $0x18] sm:$0xff]  }
  0x14   : > { %v675_v22 = vld [vmem:[%s2149_s4 + $0x1a0] sm:$0xff]  ;;  %v1772_v58 = vld [vmem:[%s1880_s16 + $0x8] sm:$0xff]   ;;  %v1641_v61 = vcombine.high %v672_v56, %v676_v57  ;;  %v1640_v0 = vcombine.low %v672_v56, %v676_v57  ;;  %v673_v52 = vld [vmem:[%s2149_s4 + $0x190] sm:$0xff] }
  0x15   : > { %v1639_v23 = vcombine.high %v671_v21, %v675_v22  ;;  %v663_v24 = vld [vmem:[%s2149_s4 + $0x140] sm:$0xff]  ;;  %v1638_v26 = vcombine.low %v671_v21, %v675_v22  ;;  %v664_v62 = vld [vmem:[%s2149_s4 + $0x148] sm:$0xff]  ;;  %v678_v56 = vld [vmem:[%s2149_s4 + $0x1b8] sm:$0xff] }
  0x16   : > { %1710 = vmatpush3.bf16.msra.mxu0 %v1765_v2  ;;  %v667_v25 = vld [vmem:[%s2149_s4 + $0x160] sm:$0xff]  ;;  %v668_v63 = vld [vmem:[%s2149_s4 + $0x168] sm:$0xff] }
  0x17   : > { %1711 = vmatprep.subr.bf16.mxu0 %v1766_v6  ;;  %v1631_v27 = vcombine.high %v663_v24, %v667_v25  ;;  %v655_v28 = vld [vmem:[%s2149_s4 + $0x100] sm:$0xff]  ;;  %v1630_v30 = vcombine.low %v663_v24, %v667_v25  ;;  %v1633_v1 = vcombine.high %v664_v62, %v668_v63  ;;  %v656_v2 = vld [vmem:[%s2149_s4 + $0x108] sm:$0xff]  ;;  %v1632_v5 = vcombine.low %v664_v62, %v668_v63 }
  0x18   : > { %v659_v29 = vld [vmem:[%s2149_s4 + $0x120] sm:$0xff]  ;;  %v660_v3 = vld [vmem:[%s2149_s4 + $0x128] sm:$0xff] }
  0x19   : > { %v1623_v31 = vcombine.high %v655_v28, %v659_v29  ;;  %v647_v32 = vld [vmem:[%s2149_s4 + $0xc0] sm:$0xff]  ;;  %v1622_v34 = vcombine.low %v655_v28, %v659_v29  ;;  %v648_v7 = vld [vmem:[%s2149_s4 + $0xc8] sm:$0xff]  ;;  %v1624_v9 = vcombine.low %v656_v2, %v660_v3 }
  0x1a   : > { %1712 = vmatpush3.bf16.msra.mxu0 %v1766_v6  ;;  %v651_v33 = vld [vmem:[%s2149_s4 + $0xe0] sm:$0xff]  ;;  %v1625_v6 = vcombine.high %v656_v2, %v660_v3  ;;  %v652_v8 = vld [vmem:[%s2149_s4 + $0xe8] sm:$0xff]  ;;  %v669_v2 = vld [vmem:[%s2149_s4 + $0x170] sm:$0xff] }
  0x1b   : > { %1007 = vmatprep.subr.bf16.mxu0 %v1647_v20  ;;  %v1615_v35 = vcombine.high %v647_v32, %v651_v33  ;;  %v1614_v36 = vcombine.low %v647_v32, %v651_v33  ;;  %v1617_v10 = vcombine.high %v648_v7, %v652_v8  ;;  %v643_v13 = vld [vmem:[%s2149_s4 + $0xa0] sm:$0xff]  ;;  %v640_v14 = vld [vmem:[%s2149_s4 + $0x88] sm:$0xff]  ;;  %v666_v3 = vld [vmem:[%s2149_s4 + $0x158] sm:$0xff] }
  0x1c   : > { %v644_v16 = vld [vmem:[%s2149_s4 + $0xa8] sm:$0xff]  ;;  %v631_v20 = vld [vmem:[%s2149_s4 + $0x40] sm:$0xff] }
  0x1d   : > { %1714 = vmatmul.mubr.msk.bf16.vlgmr.msra.gmra.mxu0 %vm348_vm0, %v313_v11  ;;  %v1616_v11 = vcombine.low %v648_v7, %v652_v8  ;;  %v1608_v18 = vcombine.low %v640_v14, %v644_v16  ;;  %v635_v21 = vld [vmem:[%s2149_s4 + $0x60] sm:$0xff]  ;;  %v632_v22 = vld [vmem:[%s2149_s4 + $0x48] sm:$0xff]  ;;  %v657_v8 = vld [vmem:[%s2149_s4 + $0x110] sm:$0xff] }
  0x1e   : > { %1717 = vmatprep.mubr.msk.bf16.mxu0 %vm348_vm0, %v314_v12  ;;  %1008 = vmatpush1.bf16.msra.mxu0 %v1646_v19  ;;  %v639_v12 = vld [vmem:[%s2149_s4 + $0x80] sm:$0xff]  ;;  %v1609_v19 = vcombine.high %v640_v14, %v644_v16  ;;  %v636_v24 = vld [vmem:[%s2149_s4 + $0x68] sm:$0xff]  ;;  %v1598_v25 = vcombine.low %v631_v20, %v635_v21  ;;  %v662_v14 = vld [vmem:[%s2149_s4 + $0x138] sm:$0xff] }
  0x1f   : > { %1009 = vmatprep.subr.bf16.mxu0 %v1639_v23  ;;  %v1606_v17 = vcombine.low %v639_v12, %v643_v13  ;;  %v1599_v23 = vcombine.high %v631_v20, %v635_v21  ;;  %v623_v28 = vld [vmem:[%s2149_s4] sm:$0xff]  ;;  %v628_v32 = vld [vmem:[%s2149_s4 + $0x28] sm:$0xff] }
  0x20   : > { %v627_v29 = vld [vmem:[%s2149_s4 + $0x20] sm:$0xff] }
  0x21   : > { %v1590_v33 = vcombine.low %v623_v28, %v627_v29 }
  0x22   : > { %1010 = vmatpush1.bf16.msra.mxu0 %v1638_v26  ;;  %v1600_v26 = vcombine.low %v632_v22, %v636_v24 }
  0x23   : > { %1011 = vmatprep.subr.bf16.mxu0 %v1631_v27  ;;  %v1601_v27 = vcombine.high %v632_v22, %v636_v24  ;;  %v649_v24 = vld [vmem:[%s2149_s4 + $0xd0] sm:$0xff] }
  0x25   : > { %1718 = vmatmul.mubr.msk.bf16.gmra.mxu0 %vm348_vm0, %v315_v15  ;;  %v1607_v15 = vcombine.high %v639_v12, %v643_v13  ;;  %v661_v12 = vld [vmem:[%s2149_s4 + $0x130] sm:$0xff]  ;;  %v658_v13 = vld [vmem:[%s2149_s4 + $0x118] sm:$0xff] }
  0x26   : > { %1012 = vmatpush1.bf16.msra.mxu0 %v1630_v30  ;;  %v624_v30 = vld [vmem:[%s2149_s4 + $0x8] sm:$0xff]  ;;  %v1629_v20 = vcombine.high %v658_v13, %v662_v14 }
  0x27   : > { %1013 = vmatprep.subr.bf16.mxu0 %v1623_v31  ;;  %v1591_v31 = vcombine.high %v623_v28, %v627_v29  ;;  %v1626_v28 = vcombine.low %v657_v8, %v661_v12  ;;  %v1628_v29 = vcombine.low %v658_v13, %v662_v14 }
  0x2a   : > { %1014 = vmatpush1.bf16.msra.mxu0 %v1622_v34  ;;  %v1592_v34 = vcombine.low %v624_v30, %v628_v32 }
  0x2b   : > { %1015 = vmatprep.subr.bf16.mxu0 %v1615_v35  ;;  %v1593_v35 = vcombine.high %v624_v30, %v628_v32  ;;  %v641_v30 = vld [vmem:[%s2149_s4 + $0x90] sm:$0xff] }
  0x2e   : > { %1016 = vmatpush1.bf16.msra.mxu0 %v1614_v36  ;;  %v681_v36 = vld [vmem:[%s2149_s4 + $0x1d0] sm:$0xff] }
  0x2f   : > { %1017 = vmatprep.subr.bf16.mxu0 %v1607_v15 }
  0x32   : > { %1018 = vmatpush1.bf16.msra.mxu0 %v1606_v17 }
  0x33   : > { %1019 = vmatprep.subr.bf16.mxu0 %v1599_v23 }
  0x36   : > { %1020 = vmatpush1.bf16.msra.mxu0 %v1598_v25  ;;  %v653_v25 = vld [vmem:[%s2149_s4 + $0xf0] sm:$0xff] }
  0x37   : > { %1021 = vmatprep.subr.bf16.mxu0 %v1591_v31 }
  0x3a   : > { %1022 = vmatpush1.bf16.msra.mxu0 %v1590_v33  ;;  %v1619_v33 = vcombine.high %v649_v24, %v653_v25 }
  0xdd   : > { %v1715_v37 = vpop.f32.mrf.mxu0 }
  0xdf   : > { %v395_v38 = vpop.f32.mrf.mxu0 }
  0xe1   : > { %v1716_v39 = vpop.f32.mrf.mxu0 }
  0xe2   : > { %v1674_v40 = vpack.c.bf16 %v1716_v39, %v1715_v37  ;;  %v685_v37 = vld [vmem:[%s2149_s4 + $0x1f0] sm:$0xff] }
  0xe3   : > { %v398_v41 = vpop.f32.mrf.mxu0  ;;  %v1651_v39 = vcombine.high %v681_v36, %v685_v37 }
  0xe4   : > { %1686 = vst [vmem:[#allocation2 + $0x8] sm:$0xff] %v1674_v40   ;;  %v1669_v42 = vpack.c.bf16 %v398_v41, %v395_v38  ;;  %v682_v38 = vld [vmem:[%s2149_s4 + $0x1d8] sm:$0xff]  ;;  %v1799_v41 = vmov 0  }
  0xe5   : > { %v1719_v43 = vpop.f32.mrf.mxu0  ;;  %v686_v40 = vld [vmem:[%s2149_s4 + $0x1f8] sm:$0xff]  ;;  %1039 = vmatprep.mubr.bf16.mxu0 %v1799_v41  ;;  %1153 = vmatprep.subr.bf16.mxu0 %v1651_v39 }
  0xe6   : > { %1670 = vst [vmem:[#allocation2] sm:$0xff] %v1669_v42   ;;  %v1650_v42 = vcombine.low %v681_v36, %v685_v37  ;;  %v642_v36 = vld [vmem:[%s2149_s4 + $0x98] sm:$0xff] }
  0xe7   : > { %v411_v44 = vpop.f32.mrf.mxu0  ;;  %v646_v37 = vld [vmem:[%s2149_s4 + $0xb8] sm:$0xff] }
  0xe9   : > { %v1720_v45 = vpop.f32.mrf.mxu0 }
  0xea   : > { %v1684_v46 = vpack.c.bf16 %v1720_v45, %v1719_v43  ;;  %v1652_v43 = vcombine.low %v682_v38, %v686_v40 }
  0xeb   : > { %v414_v47 = vpop.f32.mrf.mxu0  ;;  %v1769_v51 = vld [vmem:[#allocation2 + $0x8] sm:$0xff]  }
  0xec   : > { %1688 = vst [vmem:[#allocation2 + $0x18] sm:$0xff] %v1684_v46   ;;  %v1679_v48 = vpack.c.bf16 %v414_v47, %v411_v44  ;;  %v1653_v44 = vcombine.high %v682_v38, %v686_v40  ;;  %v2003_v47 = vld [vmem:[%s2148_s3] ss:$0 sm:$0xff]  ;;  %v1618_v38 = vcombine.low %v649_v24, %v653_v25 }
  0xed   : > { %v1770_v54 = vld [vmem:[#allocation2] sm:$0xff]  }
  0xee   : > { %1687 = vst [vmem:[#allocation2 + $0x10] sm:$0xff] %v1679_v48  }
  0xf3   : > { %v1767_v49 = vld [vmem:[#allocation2 + $0x18] sm:$0xff]  }
  0xf4   : > { %1721 = vmatprep.subr.bf16.mxu1 %v1767_v49 }
  0xf5   : > { %v1768_v50 = vld [vmem:[#allocation2 + $0x10] sm:$0xff]   ;;  %1722 = vmatpush3.bf16.msra.mxu1 %v1767_v49 }
  0xf6   : > { %1723 = vmatprep.subr.bf16.mxu1 %v1768_v50 }
  0xf9   : > { %1724 = vmatpush3.bf16.msra.mxu1 %v1768_v50 }
  0xfa   : > { %1725 = vmatprep.subr.bf16.mxu1 %v1769_v51 }
  0xfd   : > { %1726 = vmatpush3.bf16.msra.mxu1 %v1769_v51 }
  0xfe   : > { %1727 = vmatprep.subr.bf16.mxu1 %v1770_v54 }
 0x101   : > { %1728 = vmatpush3.bf16.msra.mxu1 %v1770_v54  ;;  %v677_v54 = vld [vmem:[%s2149_s4 + $0x1b0] sm:$0xff] }
 0x102   : > { %1080 = vmatprep.subr.bf16.mxu1 %v1649_v55  ;;  %v674_v55 = vld [vmem:[%s2149_s4 + $0x198] sm:$0xff]  ;;  %v1643_v62 = vcombine.high %v673_v52, %v677_v54 }
 0x103   : > { %v1645_v63 = vcombine.high %v674_v55, %v678_v56  ;;  %v1644_v7 = vcombine.low %v674_v55, %v678_v56  ;;  %v625_v56 = vld [vmem:[%s2149_s4 + $0x10] sm:$0xff] }
 0x104   : > { %1730 = vmatmul.mubr.msk.bf16.vlgmr.msra.gmra.mxu1 %vm348_vm0, %v1772_v58 }
 0x105   : > { %1733 = vmatprep.mubr.msk.bf16.mxu1 %vm348_vm0, %v1773_v59  ;;  %1081 = vmatpush1.bf16.msra.mxu1 %v1648_v60 }
 0x106   : > { %1082 = vmatprep.subr.bf16.mxu1 %v1641_v61 }
 0x109   : > { %1083 = vmatpush1.bf16.msra.mxu1 %v1640_v0  ;;  %v665_v0 = vld [vmem:[%s2149_s4 + $0x150] sm:$0xff] }
 0x10a   : > { %1084 = vmatprep.subr.bf16.mxu1 %v1633_v1  ;;  %v1634_v17 = vcombine.low %v665_v0, %v669_v2 }
 0x10c   : > { %1734 = vmatmul.mubr.msk.bf16.gmra.mxu1 %vm348_vm0, %v1774_v4  ;;  %v670_v4 = vld [vmem:[%s2149_s4 + $0x178] sm:$0xff] }
 0x10d   : > { %1085 = vmatpush1.bf16.msra.mxu1 %v1632_v5  ;;  %1112 = vmatprep.mubr.bf16.mxu1 %v1799_v41 }
 0x10e   : > { %1086 = vmatprep.subr.bf16.mxu1 %v1625_v6  ;;  %v1642_v6 = vcombine.low %v673_v52, %v677_v54 }
 0x111   : > { %1087 = vmatpush1.bf16.msra.mxu1 %v1624_v9 }
 0x112   : > { %1088 = vmatprep.subr.bf16.mxu1 %v1617_v10  ;;  %v1635_v10 = vcombine.high %v665_v0, %v669_v2 }
 0x115   : > { %1089 = vmatpush1.bf16.msra.mxu1 %v1616_v11  ;;  %v1637_v11 = vcombine.high %v666_v3, %v670_v4 }
 0x116   : > { %1090 = vmatprep.subr.bf16.mxu1 %v1609_v19  ;;  %v1627_v19 = vcombine.high %v657_v8, %v661_v12 }
 0x119   : > { %1091 = vmatpush1.bf16.msra.mxu1 %v1608_v18  ;;  %v1636_v18 = vcombine.low %v666_v3, %v670_v4 }
 0x11a   : > { %1092 = vmatprep.subr.bf16.mxu1 %v1601_v27  ;;  %v654_v27 = vld [vmem:[%s2149_s4 + $0xf8] sm:$0xff] }
 0x11d   : > { %1093 = vmatpush1.bf16.msra.mxu1 %v1600_v26  ;;  %v650_v26 = vld [vmem:[%s2149_s4 + $0xd8] sm:$0xff] }
 0x11e   : > { %1094 = vmatprep.subr.bf16.mxu1 %v1593_v35  ;;  %v645_v35 = vld [vmem:[%s2149_s4 + $0xb0] sm:$0xff]  ;;  %v1620_v39 = vcombine.low %v650_v26, %v654_v27 }
 0x11f   : > { %v1611_v40 = vcombine.high %v641_v30, %v645_v35 }
 0x121   : > { %1095 = vmatpush1.bf16.msra.mxu1 %v1592_v34  ;;  %v1621_v34 = vcombine.high %v650_v26, %v654_v27 }
 0x122   : > { %1226 = vmatprep.subr.bf16.mxu1 %v1653_v44 }
 0x1c4   : > { %v1731_v45 = vpop.f32.mrf.mxu1 }
 0x1c5   : > { %v589_v5 = vadd.f32 %v1731_v45, %v2003_v47 }
 0x1c6   : > { %v580_v46 = vpop.f32.mrf.mxu1 }
 0x1c7   : > { %v581_v49 = vadd.f32 %v2003_v47, %v580_v46  ;;  %v613_v16 = vmax.f32 %v589_v5, 0.0  ;;  %v633_v46 = vld [vmem:[%s2149_s4 + $0x50] sm:$0xff] }
 0x1c8   : > { %v1732_v48 = vpop.f32.mrf.mxu1 }
 0x1c9   : > { %v611_v57 = vmax.f32 %v581_v49, 0.0  ;;  %v592_v60 = vadd.f32 %v1732_v48, %v2003_v47  ;;  %v637_v48 = vld [vmem:[%s2149_s4 + $0x70] sm:$0xff]  ;;  %v634_v49 = vld [vmem:[%s2149_s4 + $0x58] sm:$0xff] }
 0x1ca   : > { %v583_v50 = vpop.f32.mrf.mxu1  ;;  %v1603_v54 = vcombine.high %v633_v46, %v637_v48 }
 0x1cb   : > { %v584_v51 = vadd.f32 %v2003_v47, %v583_v50  ;;  %v614_v9 = vmax.f32 %v592_v60, 0.0  ;;  %v638_v50 = vld [vmem:[%s2149_s4 + $0x78] sm:$0xff]  ;;  %v1602_v60 = vcombine.low %v633_v46, %v637_v48 }
 0x1cc   : > { %v2010_v53 = vpop.f32.mrf.mxu1  ;;  %v1605_v55 = vcombine.high %v634_v49, %v638_v50 }
 0x1cd   : > { %v612_v58 = vmax.f32 %v584_v51, 0.0  ;;  %v2055_v21 = vpack.c.bf16 %v614_v9, %v613_v16  ;;  %v1612_v51 = vcombine.low %v642_v36, %v646_v37 }
 0x1ce   : > { %v596_v59 = vpop.f32.mrf.mxu1 }
 0x1cf   : > { %v2022_v61 = vpack.c.bf16 %v612_v58, %v611_v57  ;;  %v597_v22 = vadd.f32 %v2003_v47, %v596_v59  ;;  %v629_v57 = vld [vmem:[%s2149_s4 + $0x30] sm:$0xff]  ;;  %v626_v58 = vld [vmem:[%s2149_s4 + $0x18] sm:$0xff] }
 0x1d0   : > { %v2027_v1 = vpop.f32.mrf.mxu1  ;;  %v630_v59 = vld [vmem:[%s2149_s4 + $0x38] sm:$0xff]  ;;  %v1595_v0 = vcombine.high %v625_v56, %v629_v57  ;;  %v1594_v2 = vcombine.low %v625_v56, %v629_v57 }
 0x1d1   : > { %1040 = vmatmul.mubr.bf16.vlgmr.msra.gmra.mxu0 %v2022_v61  ;;  %1113 = vmatmul.mubr.bf16.vlgmr.msra.gmra.mxu1 %v2022_v61  ;;  %v615_v31 = vmax.f32 %v597_v22, 0.0  ;;  %v608_v44 = vadd.f32 %v2027_v1, %v2003_v47  ;;  %v1597_v1 = vcombine.high %v626_v58, %v630_v59  ;;  %v1596_v3 = vcombine.low %v626_v58, %v630_v59 }
 0x1d2   : > { %1154 = vmatpush1.bf16.msra.mxu0 %v1650_v42  ;;  %1227 = vmatpush1.bf16.msra.mxu1 %v1652_v43  ;;  %v599_v15 = vpop.f32.mrf.mxu1  ;;  %v1613_v42 = vcombine.high %v642_v36, %v646_v37  ;;  %v605_v43 = vadd.f32 %v2010_v53, %v2003_v47 }
 0x1d3   : > { %1155 = vmatprep.subr.bf16.mxu0 %v1643_v62  ;;  %1228 = vmatprep.subr.bf16.mxu1 %v1645_v63  ;;  %v600_v23 = vadd.f32 %v2003_v47, %v599_v15  ;;  %v1610_v47 = vcombine.low %v641_v30, %v645_v35  ;;  %v618_v53 = vmax.f32 %v608_v44, 0.0  ;;  %v1604_v62 = vcombine.low %v634_v49, %v638_v50 }
 0x1d4   : > { %1049 = vmatprep.mubr.bf16.mxu0 %v1799_v41  ;;  %1122 = vmatprep.mubr.bf16.mxu1 %v1799_v41  ;;  %v617_v52 = vmax.f32 %v605_v43, 0.0 }
 0x1d5   : > { %v616_v32 = vmax.f32 %v600_v23, 0.0 }
 0x1d6   : > { %1156 = vmatpush1.bf16.msra.mxu0 %v1642_v6  ;;  %1229 = vmatpush1.bf16.msra.mxu1 %v1644_v7  ;;  %v622_v63 = vpack.c.bf16 %v618_v53, %v617_v52 }
 0x1d7   : > { %1157 = vmatprep.subr.bf16.mxu0 %v1635_v10  ;;  %1230 = vmatprep.subr.bf16.mxu1 %v1637_v11  ;;  %v621_v45 = vpack.c.bf16 %v616_v32, %v615_v31 }
 0x1d9   : > { %1050 = vmatmul.mubr.bf16.gmra.mxu0 %v2055_v21  ;;  %1123 = vmatmul.mubr.bf16.gmra.mxu1 %v2055_v21 }
 0x1da   : > { %1158 = vmatpush1.bf16.msra.mxu0 %v1634_v17  ;;  %1231 = vmatpush1.bf16.msra.mxu1 %v1636_v18 }
 0x1db   : > { %1159 = vmatprep.subr.bf16.mxu0 %v1627_v19  ;;  %1232 = vmatprep.subr.bf16.mxu1 %v1629_v20 }
 0x1dc   : > { %1059 = vmatprep.mubr.bf16.mxu0 %v1799_v41  ;;  %1132 = vmatprep.mubr.bf16.mxu1 %v1799_v41 }
 0x1de   : > { %1160 = vmatpush1.bf16.msra.mxu0 %v1626_v28  ;;  %1233 = vmatpush1.bf16.msra.mxu1 %v1628_v29 }
 0x1df   : > { %1161 = vmatprep.subr.bf16.mxu0 %v1619_v33  ;;  %1234 = vmatprep.subr.bf16.mxu1 %v1621_v34 }
 0x1e1   : > { %1060 = vmatmul.mubr.bf16.gmra.mxu0 %v621_v45  ;;  %1133 = vmatmul.mubr.bf16.gmra.mxu1 %v621_v45 }
 0x1e2   : > { %1162 = vmatpush1.bf16.msra.mxu0 %v1618_v38  ;;  %1235 = vmatpush1.bf16.msra.mxu1 %v1620_v39 }
 0x1e3   : > { %1163 = vmatprep.subr.bf16.mxu0 %v1611_v40  ;;  %1236 = vmatprep.subr.bf16.mxu1 %v1613_v42 }
 0x1e4   : > { %1069 = vmatprep.mubr.bf16.mxu0 %v1799_v41  ;;  %1142 = vmatprep.mubr.bf16.mxu1 %v1799_v41 }
 0x1e6   : > { %1164 = vmatpush1.bf16.msra.mxu0 %v1610_v47  ;;  %1237 = vmatpush1.bf16.msra.mxu1 %v1612_v51 }
 0x1e7   : > { %1165 = vmatprep.subr.bf16.mxu0 %v1603_v54  ;;  %1238 = vmatprep.subr.bf16.mxu1 %v1605_v55 }
 0x1e9   : > { %1070 = vmatmul.mubr.bf16.gmra.mxu0 %v622_v63  ;;  %1143 = vmatmul.mubr.bf16.gmra.mxu1 %v622_v63 }
 0x1ea   : > { %1166 = vmatpush1.bf16.msra.mxu0 %v1602_v60  ;;  %1239 = vmatpush1.bf16.msra.mxu1 %v1604_v62 }
 0x1eb   : > { %1167 = vmatprep.subr.bf16.mxu0 %v1595_v0  ;;  %1240 = vmatprep.subr.bf16.mxu1 %v1597_v1 }
 0x1ec   : > { %1185 = vmatprep.mubr.bf16.mxu0 %v1799_v41  ;;  %1258 = vmatprep.mubr.bf16.mxu1 %v1799_v41 }
 0x1ee   : > { %1168 = vmatpush1.bf16.msra.mxu0 %v1594_v2  ;;  %1241 = vmatpush1.bf16.msra.mxu1 %v1596_v3 }
 0x1f1   : > { %1186 = vmatmul.mubr.bf16.vlgmr.msra.gmra.mxu0 %v2022_v61  ;;  %1259 = vmatmul.mubr.bf16.vlgmr.msra.gmra.mxu1 %v2022_v61 }
 0x1f2   : > { %1195 = vmatprep.mubr.bf16.mxu0 %v1799_v41  ;;  %1268 = vmatprep.mubr.bf16.mxu1 %v1799_v41 }
 0x1f9   : > { %1196 = vmatmul.mubr.bf16.gmra.mxu0 %v2055_v21  ;;  %1269 = vmatmul.mubr.bf16.gmra.mxu1 %v2055_v21 }
 0x1fa   : > { %1205 = vmatprep.mubr.bf16.mxu0 %v1799_v41  ;;  %1278 = vmatprep.mubr.bf16.mxu1 %v1799_v41 }
 0x201   : > { %1206 = vmatmul.mubr.bf16.gmra.mxu0 %v621_v45  ;;  %1279 = vmatmul.mubr.bf16.gmra.mxu1 %v621_v45 }
 0x202   : > { %1215 = vmatprep.mubr.bf16.mxu0 %v1799_v41  ;;  %1288 = vmatprep.mubr.bf16.mxu1 %v1799_v41 }
 0x209   : > { %1216 = vmatmul.mubr.bf16.gmra.mxu0 %v622_v63  ;;  %1289 = vmatmul.mubr.bf16.gmra.mxu1 %v622_v63 }
 0x291   : > { %v1041_v61 = vpop.f32.mrf.mxu0  ;;  %v1114_v4 = vpop.f32.mrf.mxu1 }
 0x293   : > { %v1043_v5 = vpop.f32.mrf.mxu0  ;;  %v1116_v6 = vpop.f32.mrf.mxu1 }
 0x295   : > { %v1045_v7 = vpop.f32.mrf.mxu0  ;;  %v1118_v8 = vpop.f32.mrf.mxu1 }
 0x296   : > { %v1300_v36 = vadd.f32 %v1045_v7, %v1041_v61  ;;  %v1326_v37 = vadd.f32 %v1118_v8, %v1114_v4 }
 0x297   : > { %v1047_v9 = vpop.f32.mrf.mxu0  ;;  %v1120_v10 = vpop.f32.mrf.mxu1 }
 0x298   : > { %v1313_v32 = vadd.f32 %v1047_v9, %v1043_v5  ;;  %v1339_v33 = vadd.f32 %v1120_v10, %v1116_v6 }
 0x299   : > { %v1051_v11 = vpop.f32.mrf.mxu0  ;;  %v1124_v12 = vpop.f32.mrf.mxu1 }
 0x29a   : > { %v1301_v43 = vadd.f32 %v1300_v36, %v1051_v11  ;;  %v1327_v44 = vadd.f32 %v1326_v37, %v1124_v12 }
 0x29b   : > { %v1053_v13 = vpop.f32.mrf.mxu0  ;;  %v1126_v14 = vpop.f32.mrf.mxu1 }
 0x29c   : > { %v1314_v38 = vadd.f32 %v1313_v32, %v1053_v13  ;;  %v1340_v39 = vadd.f32 %v1339_v33, %v1126_v14 }
 0x29d   : > { %v1055_v15 = vpop.f32.mrf.mxu0  ;;  %v1128_v16 = vpop.f32.mrf.mxu1 }
 0x29e   : > { %v1302_v50 = vadd.f32 %v1301_v43, %v1055_v15  ;;  %v1328_v47 = vadd.f32 %v1327_v44, %v1128_v16 }
 0x29f   : > { %v1057_v17 = vpop.f32.mrf.mxu0  ;;  %v1130_v18 = vpop.f32.mrf.mxu1 }
 0x2a0   : > { %v1315_v45 = vadd.f32 %v1314_v38, %v1057_v17  ;;  %v1341_v46 = vadd.f32 %v1340_v39, %v1130_v18 }
 0x2a1   : > { %v1061_v19 = vpop.f32.mrf.mxu0  ;;  %v1134_v41 = vpop.f32.mrf.mxu1 }
 0x2a2   : > { %v1303_v55 = vadd.f32 %v1302_v50, %v1061_v19  ;;  %v1329_v56 = vadd.f32 %v1328_v47, %v1134_v41 }
 0x2a3   : > { %v1063_v20 = vpop.f32.mrf.mxu0  ;;  %v1136_v21 = vpop.f32.mrf.mxu1 }
 0x2a4   : > { %v1316_v51 = vadd.f32 %v1315_v45, %v1063_v20  ;;  %v1342_v52 = vadd.f32 %v1341_v46, %v1136_v21 }
 0x2a5   : > { %v1065_v22 = vpop.f32.mrf.mxu0  ;;  %v1138_v23 = vpop.f32.mrf.mxu1 }
 0x2a6   : > { %v1304_v62 = vadd.f32 %v1303_v55, %v1065_v22  ;;  %v1330_v63 = vadd.f32 %v1329_v56, %v1138_v23 }
 0x2a7   : > { %v1067_v24 = vpop.f32.mrf.mxu0  ;;  %v1140_v25 = vpop.f32.mrf.mxu1 }
 0x2a8   : > { %v1317_v57 = vadd.f32 %v1316_v51, %v1067_v24  ;;  %v1343_v58 = vadd.f32 %v1342_v52, %v1140_v25 }
 0x2a9   : > { %v1071_v26 = vpop.f32.mrf.mxu0  ;;  %v1144_v27 = vpop.f32.mrf.mxu1 }
 0x2aa   : > { %v1305_v61 = vadd.f32 %v1304_v62, %v1071_v26  ;;  %v1331_v4 = vadd.f32 %v1330_v63, %v1144_v27 }
 0x2ab   : > { %v1073_v28 = vpop.f32.mrf.mxu0  ;;  %v1146_v29 = vpop.f32.mrf.mxu1 }
 0x2ac   : > { %v1318_v0 = vadd.f32 %v1317_v57, %v1073_v28  ;;  %v1344_v1 = vadd.f32 %v1343_v58, %v1146_v29 }
 0x2ad   : > { %v1075_v30 = vpop.f32.mrf.mxu0  ;;  %v1148_v31 = vpop.f32.mrf.mxu1 }
 0x2ae   : > { %v1306_v9 = vadd.f32 %v1305_v61, %v1075_v30  ;;  %v1332_v10 = vadd.f32 %v1331_v4, %v1148_v31 }
 0x2af   : > { %v1077_v34 = vpop.f32.mrf.mxu0  ;;  %v1150_v35 = vpop.f32.mrf.mxu1 }
 0x2b0   : > { %v1319_v5 = vadd.f32 %v1318_v0, %v1077_v34  ;;  %v1345_v6 = vadd.f32 %v1344_v1, %v1150_v35  ;;  %v1307_v17 = vrot.slane %v1306_v9, 4  ;;  %v1333_v18 = vrot.slane %v1332_v10, 4 }
 0x2b1   : > { %v1187_v40 = vpop.f32.mrf.mxu0  ;;  %v1260_v42 = vpop.f32.mrf.mxu1 }
 0x2b2   : > { %v1320_v13 = vrot.slane %v1319_v5, 4  ;;  %v1346_v14 = vrot.slane %v1345_v6, 4  ;;  %v1308_v30 = vadd.f32 %v1307_v17, %v1306_v9  ;;  %v1334_v31 = vadd.f32 %v1333_v18, %v1332_v10 }
 0x2b3   : > { %v1189_v48 = vpop.f32.mrf.mxu0  ;;  %v1262_v49 = vpop.f32.mrf.mxu1  ;;  %v1419_v10 = vlaneseq }
 0x2b4   : > { %v1321_v22 = vadd.f32 %v1320_v13, %v1319_v5  ;;  %v1347_v23 = vadd.f32 %v1346_v14, %v1345_v6 }
 0x2b5   : > { %v1191_v53 = vpop.f32.mrf.mxu0  ;;  %v1264_v54 = vpop.f32.mrf.mxu1 }
 0x2b6   : > { %v1352_v20 = vadd.f32 %v1191_v53, %v1187_v40  ;;  %v1378_v21 = vadd.f32 %v1264_v54, %v1260_v42  ;;  %v1322_v38 = vrot.slane %v1321_v22, 2  ;;  %v1348_v39 = vrot.slane %v1347_v23, 2 }
 0x2b7   : > { %v1193_v59 = vpop.f32.mrf.mxu0  ;;  %v1266_v60 = vpop.f32.mrf.mxu1 }
 0x2b8   : > { %v1365_v26 = vadd.f32 %v1193_v59, %v1189_v48  ;;  %v1391_v27 = vadd.f32 %v1266_v60, %v1262_v49  ;;  %v1309_v48 = vrot.slane %v1308_v30, 2  ;;  %v1335_v49 = vrot.slane %v1334_v31, 2 }
 0x2b9   : > { %v1197_v2 = vpop.f32.mrf.mxu0  ;;  %v1270_v3 = vpop.f32.mrf.mxu1  ;;  %v1323_v55 = vadd.f32 %v1322_v38, %v1321_v22  ;;  %v1349_v56 = vadd.f32 %v1348_v39, %v1347_v23 }
 0x2ba   : > { %v1353_v28 = vadd.f32 %v1352_v20, %v1197_v2  ;;  %v1379_v29 = vadd.f32 %v1378_v21, %v1270_v3  ;;  %v1310_v0 = vadd.f32 %v1309_v48, %v1308_v30  ;;  %v1336_v1 = vadd.f32 %v1335_v49, %v1334_v31 }
 0x2bb   : > { %v1199_v7 = vpop.f32.mrf.mxu0  ;;  %v1272_v8 = vpop.f32.mrf.mxu1 }
 0x2bc   : > { %v1366_v34 = vadd.f32 %v1365_v26, %v1199_v7  ;;  %v1392_v35 = vadd.f32 %v1391_v27, %v1272_v8  ;;  %v1324_v7 = vrot.slane %v1323_v55, 1  ;;  %v1800_v8 = vmov 1966171168  }
 0x2bd   : > { %v1201_v11 = vpop.f32.mrf.mxu0  ;;  %v1274_v12 = vpop.f32.mrf.mxu1  ;;  %v1417_v9 = vunpack.c.l.s4 %v1800_v8  ;;  %v1311_v18 = vrot.slane %v1310_v0, 1 }
 0x2be   : > { %v1354_v36 = vadd.f32 %v1353_v28, %v1201_v11  ;;  %v1380_v37 = vadd.f32 %v1379_v29, %v1274_v12  ;;  %v1350_v11 = vrot.slane %v1349_v56, 1  ;;  %v1325_v23 = vadd.f32 %v1324_v7, %v1323_v55 }
 0x2bf   : > { %v1203_v15 = vpop.f32.mrf.mxu0  ;;  %v1276_v16 = vpop.f32.mrf.mxu1  ;;  %v1312_v31 = vadd.f32 %v1311_v18, %v1310_v0 }
 0x2c0   : > { %v1367_v43 = vadd.f32 %v1366_v34, %v1203_v15  ;;  %v1393_v44 = vadd.f32 %v1392_v35, %v1276_v16  ;;  %v1351_v26 = vadd.f32 %v1350_v11, %v1349_v56 }
 0x2c1   : > { %v1207_v19 = vpop.f32.mrf.mxu0  ;;  %v1280_v41 = vpop.f32.mrf.mxu1 }
 0x2c2   : > { %v1355_v45 = vadd.f32 %v1354_v36, %v1207_v19  ;;  %v1381_v46 = vadd.f32 %v1380_v37, %v1280_v41  ;;  %v1337_v19 = vrot.slane %v1336_v1, 1  ;;  %v1412_v37 = vcombine.low %v1312_v31, %v1325_v23 }
 0x2c3   : > { %v1209_v24 = vpop.f32.mrf.mxu0  ;;  %v1282_v25 = vpop.f32.mrf.mxu1 }
 0x2c4   : > { %v1368_v51 = vadd.f32 %v1367_v43, %v1209_v24  ;;  %v1394_v52 = vadd.f32 %v1393_v44, %v1282_v25  ;;  %v1418_v24 = vunpack.c.0.s8 %v1417_v9  ;;  %v1420_v25 = vshrl.u32 %v1419_v10, 7 }
 0x2c5   : > { %v1211_v32 = vpop.f32.mrf.mxu0  ;;  %v1284_v33 = vpop.f32.mrf.mxu1 }
 0x2c6   : > { %v1356_v53 = vadd.f32 %v1355_v45, %v1211_v32  ;;  %v1382_v54 = vadd.f32 %v1381_v46, %v1284_v33  ;;  %v1338_v32 = vadd.f32 %v1337_v19, %v1336_v1  ;;  %v1421_v38 = vsub.s32 %v1418_v24, %v1420_v25 }
 0x2c7   : > { %v1213_v40 = vpop.f32.mrf.mxu0  ;;  %v1286_v42 = vpop.f32.mrf.mxu1 }
 0x2c8   : > { %v1369_v59 = vadd.f32 %v1368_v51, %v1213_v40  ;;  %v1395_v60 = vadd.f32 %v1394_v52, %v1286_v42  ;;  %v1413_v39 = vcombine.low %v1338_v32, %v1351_v26  ;;  %v1422_v48 = vrot.slane %v1412_v37, %v1421_v38 }
 0x2c9   : > { %v1217_v50 = vpop.f32.mrf.mxu0  ;;  %v1290_v47 = vpop.f32.mrf.mxu1 }
 0x2ca   : > { %v1357_v62 = vadd.f32 %v1356_v53, %v1217_v50  ;;  %v1383_v63 = vadd.f32 %v1382_v54, %v1290_v47  ;;  %v1429_v49 = vrot.slane %v1413_v39, %v1421_v38 }
 0x2cb   : > { %v1219_v57 = vpop.f32.mrf.mxu0  ;;  %v1292_v58 = vpop.f32.mrf.mxu1 }
 0x2cc   : > { %v1370_v61 = vadd.f32 %v1369_v59, %v1219_v57  ;;  %v1396_v4 = vadd.f32 %v1395_v60, %v1292_v58  ;;  %v1444_v55 = vcombine.low %v1422_v48, %v1429_v49 }
 0x2cd   : > { %v1221_v2 = vpop.f32.mrf.mxu0  ;;  %v1294_v3 = vpop.f32.mrf.mxu1 }
 0x2ce   : > { %v1358_v5 = vadd.f32 %v1357_v62, %v1221_v2  ;;  %v1384_v6 = vadd.f32 %v1383_v63, %v1294_v3  ;;  %v1452_v59 = vrot.slane %v1444_v55, %v1421_v38  ;;  %v1469_v63 = vld [vmem:[%s2150_s5] sm:$0xff] }
 0x2cf   : > { %v1223_v12 = vpop.f32.mrf.mxu0  ;;  %v1296_v13 = vpop.f32.mrf.mxu1 }
 0x2d0   : > { %v1359_v14 = vrot.slane %v1358_v5, 4  ;;  %v1385_v15 = vrot.slane %v1384_v6, 4  ;;  %v1371_v16 = vadd.f32 %v1370_v61, %v1223_v12  ;;  %v1397_v17 = vadd.f32 %v1396_v4, %v1296_v13 }
 0x2d2   : > { %v1360_v41 = vadd.f32 %v1359_v14, %v1358_v5  ;;  %v1386_v20 = vadd.f32 %v1385_v15, %v1384_v6  ;;  %v1372_v21 = vrot.slane %v1371_v16, 4  ;;  %v1398_v22 = vrot.slane %v1397_v17, 4 }
 0x2d4   : > { %v1361_v27 = vrot.slane %v1360_v41, 2  ;;  %v1387_v28 = vrot.slane %v1386_v20, 2  ;;  %v1373_v29 = vadd.f32 %v1372_v21, %v1371_v16  ;;  %v1399_v30 = vadd.f32 %v1398_v22, %v1397_v17 }
 0x2d6   : > { %v1362_v33 = vadd.f32 %v1361_v27, %v1360_v41  ;;  %v1388_v34 = vadd.f32 %v1387_v28, %v1386_v20  ;;  %v1374_v35 = vrot.slane %v1373_v29, 2  ;;  %v1400_v36 = vrot.slane %v1399_v30, 2 }
 0x2d8   : > { %v1363_v40 = vrot.slane %v1362_v33, 1  ;;  %v1389_v42 = vrot.slane %v1388_v34, 1  ;;  %v1375_v43 = vadd.f32 %v1374_v35, %v1373_v29  ;;  %v1401_v44 = vadd.f32 %v1400_v36, %v1399_v30 }
 0x2da   : > { %v1376_v45 = vrot.slane %v1375_v43, 1  ;;  %v1402_v46 = vrot.slane %v1401_v44, 1  ;;  %v1364_v50 = vadd.f32 %v1363_v40, %v1362_v33  ;;  %v1390_v47 = vadd.f32 %v1389_v42, %v1388_v34 }
 0x2dc   : > { %v1377_v51 = vadd.f32 %v1376_v45, %v1375_v43  ;;  %v1403_v52 = vadd.f32 %v1402_v46, %v1401_v44 }
 0x2de   : > { %v1414_v53 = vcombine.low %v1364_v50, %v1377_v51  ;;  %v1415_v54 = vcombine.low %v1390_v47, %v1403_v52 }
 0x2e0   : > { %v1436_v56 = vrot.slane %v1414_v53, %v1421_v38  ;;  %v1443_v57 = vrot.slane %v1415_v54, %v1421_v38 }
 0x2e2   : > { %v1445_v58 = vcombine.low %v1436_v56, %v1443_v57 }
 0x2e4   : > { %v1459_v60 = vrot.slane %v1445_v58, %v1421_v38 }
 0x2e6   : > { %v1460_v62 = vcombine.low %v1452_v59, %v1459_v60 }
 0x2e8   : > { %v1468_v0 = vmul.f32 0.015625, %v1460_v62 }
 0x2ea   : > { %v1470_v1 = vadd.f32 %v1469_v63, %v1468_v0 }
 0x2ec   : > { %1471 = vst [vmem:[%s297_s13] sm:$0xff] %v1470_v1 }
 0x2ed PF: > { %s16_s23 = sadd.s32 1, %s1797_s23   ;;  %s2152_s21 = smov %s1793_s22 }
 0x2ee   : > { %p13_p5 = scmp.ge.s32.totalorder %s16_s23, 4   ;;  %s2153_s22 = smov %s2155_s24 }
 0x2f0   :  { %15 = sbr.rel (!%p13_p5) target bundleno = 2 (0x2), region = 85 }

// kernel: pointnet_mean_forward.13
= control target key start
LH: loop header
LB: loop body
LE: loop exit
PB: predicated region body
PF: predicated region fallthrough
CT: control target
= control target key end

     0   :  { %v3546_v36 = vmov 1983009808   ;;  %v36_v38 = vlaneseq  ;;  %s4700_s0 = inlined_call_operand.vmem [shape: f32[2,1024], index: 0, kind: input, shape index: {}]   ;;  %s4701_s1 = inlined_call_operand.vmem [shape: bf16[1024,512], index: 1, kind: input, shape index: {}]   ;;  %s4702_s2 = inlined_call_operand.vmem [shape: f32[1,512], index: 2, kind: input, shape index: {}]   ;;  %s4703_s3 = inlined_call_operand.vmem [shape: bf16[512,256], index: 3, kind: input, shape index: {}]   ;;  %s4704_s4 = inlined_call_operand.vmem [shape: f32[1,256], index: 4, kind: input, shape index: {}]   ;;  %s4705_s5 = inlined_call_operand.vmem [shape: bf16[256,8], index: 5, kind: input, shape index: {}]   ;;  %s4706_s6 = inlined_call_operand.vmem [shape: f32[1,8], index: 6, kind: input, shape index: {}]   ;;  %s4707_s7 = inlined_call_operand.hbm [shape: f32[2,8], index: 7, kind: output, shape index: {}]  }
   0x1   :  { %v3022_v0 = vld [vmem:[%s4701_s1 + $0xe4] ss:$16 sps:$4 sm:$0xff]   ;;  %v3026_v2 = vld [vmem:[%s4701_s1 + $0xe0] ss:$16 sps:$4 sm:$0xff]   ;;  %v34_v37 = vunpack.c.l.s4 %v3546_v36 }
   0x2   :  { %v3024_v1 = vld [vmem:[%s4701_s1 + $0x2e4] ss:$16 sps:$4 sm:$0xff]   ;;  %1640 = vmatprep.subr.bf16.mxu0 %v3022_v0  ;;  %v3027_v3 = vld [vmem:[%s4701_s1 + $0x2e0] ss:$16 sps:$4 sm:$0xff]   ;;  %v3705_v43 = vshrl.u32 %v36_v38, 7 }
   0x3   :  { %1681 = vmatprep.subr.bf16.mxu1 %v3024_v1  ;;  %v3028_v4 = vld [vmem:[%s4701_s1 + $0xc4] ss:$16 sps:$4 sm:$0xff]   ;;  %1641 = vmatpush1.bf16.msra.mxu0 %v3026_v2  ;;  %v3032_v6 = vld [vmem:[%s4701_s1 + $0xc0] ss:$16 sps:$4 sm:$0xff]   ;;  %v35_v42 = vunpack.c.0.s8 %v34_v37 }
   0x4   :  { %1682 = vmatpush1.bf16.msra.mxu1 %v3027_v3  ;;  %v3030_v5 = vld [vmem:[%s4701_s1 + $0x2c4] ss:$16 sps:$4 sm:$0xff]   ;;  %1642 = vmatprep.subr.bf16.mxu0 %v3028_v4  ;;  %v3033_v7 = vld [vmem:[%s4701_s1 + $0x2c0] ss:$16 sps:$4 sm:$0xff]  }
   0x5   :  { %1683 = vmatprep.subr.bf16.mxu1 %v3030_v5  ;;  %v3034_v8 = vld [vmem:[%s4701_s1 + $0xa4] ss:$16 sps:$4 sm:$0xff]   ;;  %v3038_v10 = vld [vmem:[%s4701_s1 + $0xa0] ss:$16 sps:$4 sm:$0xff]   ;;  %v3723_v49 = vsub.s32 %v35_v42, %v3705_v43  ;;  %v29_v42 = vld [vmem:[%s4700_s0 + $0x8] sm:$0xff] }
   0x6   :  { %v3036_v9 = vld [vmem:[%s4701_s1 + $0x2a4] ss:$16 sps:$4 sm:$0xff]   ;;  %v3039_v11 = vld [vmem:[%s4701_s1 + $0x2a0] ss:$16 sps:$4 sm:$0xff]  }
   0x7   :  { %1643 = vmatpush1.bf16.msra.mxu0 %v3032_v6  ;;  %v3040_v12 = vld [vmem:[%s4701_s1 + $0x84] ss:$16 sps:$4 sm:$0xff]   ;;  %v3044_v14 = vld [vmem:[%s4701_s1 + $0x80] ss:$16 sps:$4 sm:$0xff]  }
   0x8   :  { %1684 = vmatpush1.bf16.msra.mxu1 %v3033_v7  ;;  %1644 = vmatprep.subr.bf16.mxu0 %v3034_v8  ;;  %v3042_v13 = vld [vmem:[%s4701_s1 + $0x284] ss:$16 sps:$4 sm:$0xff]   ;;  %v3045_v15 = vld [vmem:[%s4701_s1 + $0x280] ss:$16 sps:$4 sm:$0xff]  }
   0x9   :  { %1685 = vmatprep.subr.bf16.mxu1 %v3036_v9  ;;  %v3046_v16 = vld [vmem:[%s4701_s1 + $0x64] ss:$16 sps:$4 sm:$0xff]   ;;  %v3050_v18 = vld [vmem:[%s4701_s1 + $0x60] ss:$16 sps:$4 sm:$0xff]  }
   0xa   :  { %v3048_v17 = vld [vmem:[%s4701_s1 + $0x264] ss:$16 sps:$4 sm:$0xff]   ;;  %v3051_v19 = vld [vmem:[%s4701_s1 + $0x260] ss:$16 sps:$4 sm:$0xff]  }
   0xb   :  { %1645 = vmatpush1.bf16.msra.mxu0 %v3038_v10  ;;  %v3052_v20 = vld [vmem:[%s4701_s1 + $0x44] ss:$16 sps:$4 sm:$0xff]   ;;  %v3056_v22 = vld [vmem:[%s4701_s1 + $0x40] ss:$16 sps:$4 sm:$0xff]  }
   0xc   :  { %1686 = vmatpush1.bf16.msra.mxu1 %v3039_v11  ;;  %1646 = vmatprep.subr.bf16.mxu0 %v3040_v12  ;;  %v3054_v21 = vld [vmem:[%s4701_s1 + $0x244] ss:$16 sps:$4 sm:$0xff]   ;;  %v3057_v23 = vld [vmem:[%s4701_s1 + $0x240] ss:$16 sps:$4 sm:$0xff]  }
   0xd   :  { %1687 = vmatprep.subr.bf16.mxu1 %v3042_v13  ;;  %v3058_v24 = vld [vmem:[%s4701_s1 + $0x24] ss:$16 sps:$4 sm:$0xff]   ;;  %v3062_v26 = vld [vmem:[%s4701_s1 + $0x20] ss:$16 sps:$4 sm:$0xff]  }
   0xe   :  { %v3060_v25 = vld [vmem:[%s4701_s1 + $0x224] ss:$16 sps:$4 sm:$0xff]   ;;  %v3063_v27 = vld [vmem:[%s4701_s1 + $0x220] ss:$16 sps:$4 sm:$0xff]  }
   0xf   :  { %1647 = vmatpush1.bf16.msra.mxu0 %v3044_v14  ;;  %v3064_v28 = vld [vmem:[%s4701_s1 + $0x4] ss:$16 sps:$4 sm:$0xff]   ;;  %v3068_v30 = vld [vmem:[%s4701_s1] ss:$16 sps:$4 sm:$0xff]  }
  0x10   :  { %1688 = vmatpush1.bf16.msra.mxu1 %v3045_v15  ;;  %1648 = vmatprep.subr.bf16.mxu0 %v3046_v16  ;;  %v3066_v29 = vld [vmem:[%s4701_s1 + $0x204] ss:$16 sps:$4 sm:$0xff]   ;;  %v3069_v31 = vld [vmem:[%s4701_s1 + $0x200] ss:$16 sps:$4 sm:$0xff]  }
  0x11   :  { %1689 = vmatprep.subr.bf16.mxu1 %v3048_v17  ;;  %v3070_v32 = vld [vmem:[%s4701_s1 + $0x1e4] ss:$16 sps:$4 sm:$0xff]   ;;  %v3074_v34 = vld [vmem:[%s4701_s1 + $0x1e0] ss:$16 sps:$4 sm:$0xff]  }
  0x12   :  { %v3072_v33 = vld [vmem:[%s4701_s1 + $0x3e4] ss:$16 sps:$4 sm:$0xff]   ;;  %v3075_v35 = vld [vmem:[%s4701_s1 + $0x3e0] ss:$16 sps:$4 sm:$0xff]  }
  0x13   :  { %1649 = vmatpush1.bf16.msra.mxu0 %v3050_v18  ;;  %v3076_v39 = vld [vmem:[%s4701_s1 + $0x1c4] ss:$16 sps:$4 sm:$0xff]   ;;  %v3080_v41 = vld [vmem:[%s4701_s1 + $0x1c0] ss:$16 sps:$4 sm:$0xff]  }
  0x14   :  { %1690 = vmatpush1.bf16.msra.mxu1 %v3051_v19  ;;  %1650 = vmatprep.subr.bf16.mxu0 %v3052_v20  ;;  %v3078_v40 = vld [vmem:[%s4701_s1 + $0x3c4] ss:$16 sps:$4 sm:$0xff]   ;;  %v3081_v44 = vld [vmem:[%s4701_s1 + $0x3c0] ss:$16 sps:$4 sm:$0xff]  }
  0x15   :  { %1691 = vmatprep.subr.bf16.mxu1 %v3054_v21  ;;  %v3082_v45 = vld [vmem:[%s4701_s1 + $0x1a4] ss:$16 sps:$4 sm:$0xff]   ;;  %v3086_v47 = vld [vmem:[%s4701_s1 + $0x1a0] ss:$16 sps:$4 sm:$0xff]  }
  0x16   :  { %v3084_v46 = vld [vmem:[%s4701_s1 + $0x3a4] ss:$16 sps:$4 sm:$0xff]   ;;  %v3087_v48 = vld [vmem:[%s4701_s1 + $0x3a0] ss:$16 sps:$4 sm:$0xff]  }
  0x17   :  { %1651 = vmatpush1.bf16.msra.mxu0 %v3056_v22  ;;  %v3088_v50 = vld [vmem:[%s4701_s1 + $0x184] ss:$16 sps:$4 sm:$0xff]   ;;  %v3092_v53 = vld [vmem:[%s4701_s1 + $0x180] ss:$16 sps:$4 sm:$0xff]  }
  0x18   :  { %1692 = vmatpush1.bf16.msra.mxu1 %v3057_v23  ;;  %1652 = vmatprep.subr.bf16.mxu0 %v3058_v24  ;;  %v3090_v51 = vld [vmem:[%s4701_s1 + $0x384] ss:$16 sps:$4 sm:$0xff]   ;;  %v3093_v56 = vld [vmem:[%s4701_s1 + $0x380] ss:$16 sps:$4 sm:$0xff]  }
  0x19   :  { %1693 = vmatprep.subr.bf16.mxu1 %v3060_v25  ;;  %v28_v52 = vld [vmem:[%s4700_s0] sm:$0xff] }
  0x1a   :  { %v39_v54 = vrot.slane %v28_v52, %v3723_v49  ;;  %v32_v55 = vcombine.high %v28_v52, %v28_v52  ;;  %v3094_v57 = vld [vmem:[%s4701_s1 + $0x164] ss:$16 sps:$4 sm:$0xff]   ;;  %v3098_v61 = vld [vmem:[%s4701_s1 + $0x160] ss:$16 sps:$4 sm:$0xff]  }
  0x1b   :  { %1653 = vmatpush1.bf16.msra.mxu0 %v3062_v26  ;;  %v3096_v58 = vld [vmem:[%s4701_s1 + $0x364] ss:$16 sps:$4 sm:$0xff]   ;;  %v3099_v0 = vld [vmem:[%s4701_s1 + $0x360] ss:$16 sps:$4 sm:$0xff]  }
  0x1c   :  { %1694 = vmatpush1.bf16.msra.mxu1 %v3063_v27  ;;  %1654 = vmatprep.subr.bf16.mxu0 %v3064_v28  ;;  %v47_v59 = vcombine.high %v39_v54, %v39_v54  ;;  %v46_v60 = vrot.slane %v32_v55, %v3723_v49  ;;  %v3100_v1 = vld [vmem:[%s4701_s1 + $0x144] ss:$16 sps:$4 sm:$0xff]   ;;  %v3104_v4 = vld [vmem:[%s4701_s1 + $0x140] ss:$16 sps:$4 sm:$0xff]   ;;  %v3802_v16 = vpack.c.bf16 %v39_v54, %v39_v54 }
  0x1d   :  { %1695 = vmatprep.subr.bf16.mxu1 %v3066_v29  ;;  %v3102_v2 = vld [vmem:[%s4701_s1 + $0x344] ss:$16 sps:$4 sm:$0xff]   ;;  %v3105_v5 = vld [vmem:[%s4701_s1 + $0x340] ss:$16 sps:$4 sm:$0xff]  }
  0x1e   :  { %v3751_v62 = vpack.c.bf16 %v47_v59, %v47_v59  ;;  %v48_v63 = vcombine.high %v46_v60, %v46_v60  ;;  %v3106_v6 = vld [vmem:[%s4701_s1 + $0x124] ss:$16 sps:$4 sm:$0xff]   ;;  %v3110_v8 = vld [vmem:[%s4701_s1 + $0x120] ss:$16 sps:$4 sm:$0xff]   ;;  %v3804_v17 = vpack.c.bf16 %v46_v60, %v46_v60 }
  0x1f   :  { %1655 = vmatpush1.bf16.msra.mxu0 %v3068_v30  ;;  %v3108_v7 = vld [vmem:[%s4701_s1 + $0x324] ss:$16 sps:$4 sm:$0xff]   ;;  %v3111_v9 = vld [vmem:[%s4701_s1 + $0x320] ss:$16 sps:$4 sm:$0xff]  }
  0x20   :  { %1696 = vmatpush1.bf16.msra.mxu1 %v3069_v31  ;;  %1656 = vmatprep.subr.bf16.mxu0 %v3070_v32  ;;  %v3762_v3 = vpack.c.bf16 %v48_v63, %v48_v63  ;;  %v3112_v10 = vld [vmem:[%s4701_s1 + $0x104] ss:$16 sps:$4 sm:$0xff]   ;;  %v3116_v12 = vld [vmem:[%s4701_s1 + $0x100] ss:$16 sps:$4 sm:$0xff]  }
  0x21   :  { %1697 = vmatprep.subr.bf16.mxu1 %v3072_v33  ;;  %1672 = vmatprep.mubr.bf16.mxu0 %v3751_v62  ;;  %v3114_v11 = vld [vmem:[%s4701_s1 + $0x304] ss:$16 sps:$4 sm:$0xff]   ;;  %v3117_v13 = vld [vmem:[%s4701_s1 + $0x300] ss:$16 sps:$4 sm:$0xff]  }
  0x22   :  { %1713 = vmatprep.mubr.bf16.mxu1 %v3762_v3  ;;  %v3121_v14 = vld [vmem:[%s4701_s1 + $0x4e4] ss:$16 sps:$4 sm:$0xff]   ;;  %v3119_v18 = vld [vmem:[%s4701_s1 + $0x4e0] ss:$16 sps:$4 sm:$0xff]  }
  0x23   :  { %1657 = vmatpush2.bf16.msra.mxu0 %v3074_v34  ;;  %v3124_v15 = vld [vmem:[%s4701_s1 + $0x6e4] ss:$16 sps:$4 sm:$0xff]   ;;  %v3122_v19 = vld [vmem:[%s4701_s1 + $0x6e0] ss:$16 sps:$4 sm:$0xff]  }
  0x24   :  { %1698 = vmatpush2.bf16.msra.mxu1 %v3075_v35  ;;  %1658 = vmatprep.subr.bf16.mxu0 %v3076_v39  ;;  %v3127_v20 = vld [vmem:[%s4701_s1 + $0x4c4] ss:$16 sps:$4 sm:$0xff]   ;;  %v3125_v22 = vld [vmem:[%s4701_s1 + $0x4c0] ss:$16 sps:$4 sm:$0xff]  }
  0x25   :  { %1699 = vmatprep.subr.bf16.mxu1 %v3078_v40  ;;  %v3130_v21 = vld [vmem:[%s4701_s1 + $0x6c4] ss:$16 sps:$4 sm:$0xff]   ;;  %v3128_v23 = vld [vmem:[%s4701_s1 + $0x6c0] ss:$16 sps:$4 sm:$0xff]  }
  0x26   :  { %v3133_v24 = vld [vmem:[%s4701_s1 + $0x4a4] ss:$16 sps:$4 sm:$0xff]   ;;  %v3131_v26 = vld [vmem:[%s4701_s1 + $0x4a0] ss:$16 sps:$4 sm:$0xff]  }
  0x27   :  { %1659 = vmatpush2.bf16.msra.mxu0 %v3080_v41  ;;  %v3136_v25 = vld [vmem:[%s4701_s1 + $0x6a4] ss:$16 sps:$4 sm:$0xff]   ;;  %v3134_v27 = vld [vmem:[%s4701_s1 + $0x6a0] ss:$16 sps:$4 sm:$0xff]  }
  0x28   :  { %1700 = vmatpush2.bf16.msra.mxu1 %v3081_v44  ;;  %1660 = vmatprep.subr.bf16.mxu0 %v3082_v45  ;;  %v3139_v28 = vld [vmem:[%s4701_s1 + $0x484] ss:$16 sps:$4 sm:$0xff]   ;;  %v3137_v30 = vld [vmem:[%s4701_s1 + $0x480] ss:$16 sps:$4 sm:$0xff]   ;;  %v3884_v44 = vrot.slane %v29_v42, %v3723_v49  ;;  %v49_v45 = vcombine.high %v29_v42, %v29_v42  ;;  %v3231_v42 = vld [vmem:[%s4701_s1 + $0x2a8] ss:$16 sps:$4 sm:$0xff]  }
  0x29   :  { %1701 = vmatprep.subr.bf16.mxu1 %v3084_v46  ;;  %v3142_v29 = vld [vmem:[%s4701_s1 + $0x684] ss:$16 sps:$4 sm:$0xff]   ;;  %v3140_v31 = vld [vmem:[%s4701_s1 + $0x680] ss:$16 sps:$4 sm:$0xff]  }
  0x2a   :  { %v3145_v32 = vld [vmem:[%s4701_s1 + $0x464] ss:$16 sps:$4 sm:$0xff]   ;;  %v3143_v34 = vld [vmem:[%s4701_s1 + $0x460] ss:$16 sps:$4 sm:$0xff]  }
  0x2b   :  { %1661 = vmatpush2.bf16.msra.mxu0 %v3086_v47  ;;  %v3148_v33 = vld [vmem:[%s4701_s1 + $0x664] ss:$16 sps:$4 sm:$0xff]   ;;  %v3146_v35 = vld [vmem:[%s4701_s1 + $0x660] ss:$16 sps:$4 sm:$0xff]  }
  0x2c   :  { %1702 = vmatpush2.bf16.msra.mxu1 %v3087_v48  ;;  %1662 = vmatprep.subr.bf16.mxu0 %v3088_v50  ;;  %v3151_v36 = vld [vmem:[%s4701_s1 + $0x444] ss:$16 sps:$4 sm:$0xff]   ;;  %v3149_v38 = vld [vmem:[%s4701_s1 + $0x440] ss:$16 sps:$4 sm:$0xff]   ;;  %v64_v48 = vcombine.high %v3884_v44, %v3884_v44  ;;  %v3895_v50 = vrot.slane %v49_v45, %v3723_v49  ;;  %v3237_v45 = vld [vmem:[%s4701_s1 + $0x288] ss:$16 sps:$4 sm:$0xff]  }
  0x2d   :  { %1703 = vmatprep.subr.bf16.mxu1 %v3090_v51  ;;  %v3154_v37 = vld [vmem:[%s4701_s1 + $0x644] ss:$16 sps:$4 sm:$0xff]   ;;  %v3152_v39 = vld [vmem:[%s4701_s1 + $0x640] ss:$16 sps:$4 sm:$0xff]  }
  0x2e   :  { %v3157_v40 = vld [vmem:[%s4701_s1 + $0x424] ss:$16 sps:$4 sm:$0xff]   ;;  %v3155_v46 = vld [vmem:[%s4701_s1 + $0x420] ss:$16 sps:$4 sm:$0xff]   ;;  %v65_v54 = vcombine.high %v3895_v50, %v3895_v50 }
  0x2f   :  { %1663 = vmatpush2.bf16.msra.mxu0 %v3092_v53  ;;  %v3160_v41 = vld [vmem:[%s4701_s1 + $0x624] ss:$16 sps:$4 sm:$0xff]   ;;  %v3158_v47 = vld [vmem:[%s4701_s1 + $0x620] ss:$16 sps:$4 sm:$0xff]   ;;  %v3903_v53 = vpack.c.bf16 %v64_v48, %v64_v48  ;;  %v3240_v48 = vld [vmem:[%s4701_s1 + $0x68] ss:$16 sps:$4 sm:$0xff]  }
  0x30   :  { %1704 = vmatpush2.bf16.msra.mxu1 %v3093_v56  ;;  %1664 = vmatprep.subr.bf16.mxu0 %v3094_v57  ;;  %v3163_v51 = vld [vmem:[%s4701_s1 + $0x404] ss:$16 sps:$4 sm:$0xff]   ;;  %v3161_v49 = vld [vmem:[%s4701_s1 + $0x400] ss:$16 sps:$4 sm:$0xff]   ;;  %v3913_v56 = vpack.c.bf16 %v65_v54, %v65_v54  ;;  %v3246_v54 = vld [vmem:[%s4701_s1 + $0x48] ss:$16 sps:$4 sm:$0xff]  }
  0x31   :  { %1705 = vmatprep.subr.bf16.mxu1 %v3096_v58  ;;  %v3166_v52 = vld [vmem:[%s4701_s1 + $0x604] ss:$16 sps:$4 sm:$0xff]   ;;  %v3164_v55 = vld [vmem:[%s4701_s1 + $0x600] ss:$16 sps:$4 sm:$0xff]  }
  0x32   :  { %v3169_v57 = vld [vmem:[%s4701_s1 + $0x5e4] ss:$16 sps:$4 sm:$0xff]   ;;  %v3167_v59 = vld [vmem:[%s4701_s1 + $0x5e0] ss:$16 sps:$4 sm:$0xff]  }
  0x33   :  { %1665 = vmatpush2.bf16.msra.mxu0 %v3098_v61  ;;  %v3172_v58 = vld [vmem:[%s4701_s1 + $0x7e4] ss:$16 sps:$4 sm:$0xff]   ;;  %v3170_v60 = vld [vmem:[%s4701_s1 + $0x7e0] ss:$16 sps:$4 sm:$0xff]  }
  0x34   :  { %1706 = vmatpush2.bf16.msra.mxu1 %v3099_v0  ;;  %1666 = vmatprep.subr.bf16.mxu0 %v3100_v1  ;;  %v3175_v61 = vld [vmem:[%s4701_s1 + $0x5c4] ss:$16 sps:$4 sm:$0xff]   ;;  %v3173_v0 = vld [vmem:[%s4701_s1 + $0x5c0] ss:$16 sps:$4 sm:$0xff]  }
  0x35   :  { %1707 = vmatprep.subr.bf16.mxu1 %v3102_v2  ;;  %v3178_v63 = vld [vmem:[%s4701_s1 + $0x7c4] ss:$16 sps:$4 sm:$0xff]   ;;  %v3176_v1 = vld [vmem:[%s4701_s1 + $0x7c0] ss:$16 sps:$4 sm:$0xff]  }
  0x36   :  { %v3181_v2 = vld [vmem:[%s4701_s1 + $0x5a4] ss:$16 sps:$4 sm:$0xff]  }
  0x37   :  { %1667 = vmatpush2.bf16.msra.mxu0 %v3104_v4  ;;  %v3184_v4 = vld [vmem:[%s4701_s1 + $0x7a4] ss:$16 sps:$4 sm:$0xff]  }
  0x38   :  { %1708 = vmatpush2.bf16.msra.mxu1 %v3105_v5  ;;  %1668 = vmatprep.subr.bf16.mxu0 %v3106_v6  ;;  %v3179_v5 = vld [vmem:[%s4701_s1 + $0x5a0] ss:$16 sps:$4 sm:$0xff]  }
  0x39   :  { %1709 = vmatprep.subr.bf16.mxu1 %v3108_v7  ;;  %v3182_v6 = vld [vmem:[%s4701_s1 + $0x7a0] ss:$16 sps:$4 sm:$0xff]   ;;  %v3187_v7 = vld [vmem:[%s4701_s1 + $0x584] ss:$16 sps:$4 sm:$0xff]  }
  0x3b   :  { %1669 = vmatpush2.bf16.msra.mxu0 %v3110_v8  ;;  %v3190_v8 = vld [vmem:[%s4701_s1 + $0x784] ss:$16 sps:$4 sm:$0xff]  }
  0x3c   :  { %1710 = vmatpush2.bf16.msra.mxu1 %v3111_v9  ;;  %1670 = vmatprep.subr.bf16.mxu0 %v3112_v10  ;;  %v3185_v9 = vld [vmem:[%s4701_s1 + $0x580] ss:$16 sps:$4 sm:$0xff]  }
  0x3d   :  { %1711 = vmatprep.subr.bf16.mxu1 %v3114_v11  ;;  %v3188_v10 = vld [vmem:[%s4701_s1 + $0x780] ss:$16 sps:$4 sm:$0xff]   ;;  %v3193_v11 = vld [vmem:[%s4701_s1 + $0x564] ss:$16 sps:$4 sm:$0xff]  }
  0x3f   :  { %1671 = vmatpush2.bf16.msra.mxu0 %v3116_v12  ;;  %v3196_v12 = vld [vmem:[%s4701_s1 + $0x764] ss:$16 sps:$4 sm:$0xff]  }
  0x40   :  { %1712 = vmatpush2.bf16.msra.mxu1 %v3117_v13  ;;  %1722 = vmatprep.subr.bf16.mxu0 %v3121_v14  ;;  %v3191_v13 = vld [vmem:[%s4701_s1 + $0x560] ss:$16 sps:$4 sm:$0xff]  }
  0x41   :  { %1763 = vmatprep.subr.bf16.mxu1 %v3124_v15  ;;  %v3194_v14 = vld [vmem:[%s4701_s1 + $0x760] ss:$16 sps:$4 sm:$0xff]   ;;  %v3199_v15 = vld [vmem:[%s4701_s1 + $0x544] ss:$16 sps:$4 sm:$0xff]  }
  0x42   :  { %1673 = vmatmul.mubr.bf16.vlgmr.msra.gmra.mxu0 %v3802_v16 }
  0x43   :  { %1714 = vmatmul.mubr.bf16.vlgmr.msra.gmra.mxu1 %v3804_v17  ;;  %1723 = vmatpush1.bf16.msra.mxu0 %v3119_v18  ;;  %v3202_v18 = vld [vmem:[%s4701_s1 + $0x744] ss:$16 sps:$4 sm:$0xff]  }
  0x44   :  { %1764 = vmatpush1.bf16.msra.mxu1 %v3122_v19  ;;  %1724 = vmatprep.subr.bf16.mxu0 %v3127_v20  ;;  %v3197_v19 = vld [vmem:[%s4701_s1 + $0x540] ss:$16 sps:$4 sm:$0xff]  }
  0x45   :  { %1765 = vmatprep.subr.bf16.mxu1 %v3130_v21  ;;  %1754 = vmatprep.mubr.bf16.mxu0 %v3903_v53  ;;  %v3200_v20 = vld [vmem:[%s4701_s1 + $0x740] ss:$16 sps:$4 sm:$0xff]   ;;  %v3205_v21 = vld [vmem:[%s4701_s1 + $0x524] ss:$16 sps:$4 sm:$0xff]  }
  0x46   :  { %1795 = vmatprep.mubr.bf16.mxu1 %v3913_v56 }
  0x47   :  { %1725 = vmatpush1.bf16.msra.mxu0 %v3125_v22  ;;  %v3208_v22 = vld [vmem:[%s4701_s1 + $0x724] ss:$16 sps:$4 sm:$0xff]  }
  0x48   :  { %1766 = vmatpush1.bf16.msra.mxu1 %v3128_v23  ;;  %1726 = vmatprep.subr.bf16.mxu0 %v3133_v24  ;;  %v3203_v23 = vld [vmem:[%s4701_s1 + $0x520] ss:$16 sps:$4 sm:$0xff]  }
  0x49   :  { %1767 = vmatprep.subr.bf16.mxu1 %v3136_v25  ;;  %v3206_v24 = vld [vmem:[%s4701_s1 + $0x720] ss:$16 sps:$4 sm:$0xff]   ;;  %v3211_v25 = vld [vmem:[%s4701_s1 + $0x504] ss:$16 sps:$4 sm:$0xff]  }
  0x4b   :  { %1727 = vmatpush1.bf16.msra.mxu0 %v3131_v26  ;;  %v3214_v26 = vld [vmem:[%s4701_s1 + $0x704] ss:$16 sps:$4 sm:$0xff]  }
  0x4c   :  { %1768 = vmatpush1.bf16.msra.mxu1 %v3134_v27  ;;  %1728 = vmatprep.subr.bf16.mxu0 %v3139_v28  ;;  %v3209_v27 = vld [vmem:[%s4701_s1 + $0x500] ss:$16 sps:$4 sm:$0xff]  }
  0x4d   :  { %1769 = vmatprep.subr.bf16.mxu1 %v3142_v29  ;;  %v3212_v28 = vld [vmem:[%s4701_s1 + $0x700] ss:$16 sps:$4 sm:$0xff]   ;;  %v3218_v29 = vld [vmem:[%s4701_s1 + $0xec] ss:$16 sps:$4 sm:$0xff]  }
  0x4f   :  { %1729 = vmatpush1.bf16.msra.mxu0 %v3137_v30  ;;  %v3221_v30 = vld [vmem:[%s4701_s1 + $0x2ec] ss:$16 sps:$4 sm:$0xff]  }
  0x50   :  { %1770 = vmatpush1.bf16.msra.mxu1 %v3140_v31  ;;  %1730 = vmatprep.subr.bf16.mxu0 %v3145_v32  ;;  %v4021_v31 = vpack.c.bf16 %v3884_v44, %v3884_v44  ;;  %v4025_v32 = vpack.c.bf16 %v3895_v50, %v3895_v50  ;;  %v3236_v44 = vld [vmem:[%s4701_s1 + $0x8c] ss:$16 sps:$4 sm:$0xff]   ;;  %v3243_v50 = vld [vmem:[%s4701_s1 + $0x268] ss:$16 sps:$4 sm:$0xff]  }
  0x51   :  { %1771 = vmatprep.subr.bf16.mxu1 %v3148_v33  ;;  %v3216_v33 = vld [vmem:[%s4701_s1 + $0xe8] ss:$16 sps:$4 sm:$0xff]  }
  0x53   :  { %1731 = vmatpush1.bf16.msra.mxu0 %v3143_v34  ;;  %v3219_v34 = vld [vmem:[%s4701_s1 + $0x2e8] ss:$16 sps:$4 sm:$0xff]  }
  0x54   :  { %1772 = vmatpush1.bf16.msra.mxu1 %v3146_v35  ;;  %1732 = vmatprep.subr.bf16.mxu0 %v3151_v36  ;;  %v3224_v35 = vld [vmem:[%s4701_s1 + $0xcc] ss:$16 sps:$4 sm:$0xff]  }
  0x55   :  { %1773 = vmatprep.subr.bf16.mxu1 %v3154_v37  ;;  %v3227_v36 = vld [vmem:[%s4701_s1 + $0x2cc] ss:$16 sps:$4 sm:$0xff]   ;;  %v3222_v37 = vld [vmem:[%s4701_s1 + $0xc8] ss:$16 sps:$4 sm:$0xff]  }
  0x57   :  { %1733 = vmatpush1.bf16.msra.mxu0 %v3149_v38  ;;  %v3225_v38 = vld [vmem:[%s4701_s1 + $0x2c8] ss:$16 sps:$4 sm:$0xff]  }
  0x58   :  { %1774 = vmatpush1.bf16.msra.mxu1 %v3152_v39  ;;  %1734 = vmatprep.subr.bf16.mxu0 %v3157_v40  ;;  %v3230_v39 = vld [vmem:[%s4701_s1 + $0xac] ss:$16 sps:$4 sm:$0xff]  }
  0x59   :  { %1775 = vmatprep.subr.bf16.mxu1 %v3160_v41  ;;  %v3233_v40 = vld [vmem:[%s4701_s1 + $0x2ac] ss:$16 sps:$4 sm:$0xff]   ;;  %v3228_v41 = vld [vmem:[%s4701_s1 + $0xa8] ss:$16 sps:$4 sm:$0xff]  }
  0x5b   :  { %1735 = vmatpush1.bf16.msra.mxu0 %v3155_v46  ;;  %v3242_v46 = vld [vmem:[%s4701_s1 + $0x6c] ss:$16 sps:$4 sm:$0xff]  }
  0x5c   :  { %1776 = vmatpush1.bf16.msra.mxu1 %v3158_v47  ;;  %1736 = vmatprep.subr.bf16.mxu0 %v3163_v51  ;;  %v3245_v47 = vld [vmem:[%s4701_s1 + $0x26c] ss:$16 sps:$4 sm:$0xff]  }
  0x5d   :  { %1777 = vmatprep.subr.bf16.mxu1 %v3166_v52  ;;  %v3248_v51 = vld [vmem:[%s4701_s1 + $0x4c] ss:$16 sps:$4 sm:$0xff]  }
  0x5e   :  { %v3251_v52 = vld [vmem:[%s4701_s1 + $0x24c] ss:$16 sps:$4 sm:$0xff]  }
  0x5f   :  { %1737 = vmatpush1.bf16.msra.mxu0 %v3161_v49  ;;  %v3249_v49 = vld [vmem:[%s4701_s1 + $0x248] ss:$16 sps:$4 sm:$0xff]  }
  0x60   :  { %1778 = vmatpush1.bf16.msra.mxu1 %v3164_v55  ;;  %1738 = vmatprep.subr.bf16.mxu0 %v3169_v57  ;;  %v3254_v55 = vld [vmem:[%s4701_s1 + $0x2c] ss:$16 sps:$4 sm:$0xff]  }
  0x61   :  { %1779 = vmatprep.subr.bf16.mxu1 %v3172_v58  ;;  %v3257_v57 = vld [vmem:[%s4701_s1 + $0x22c] ss:$16 sps:$4 sm:$0xff]   ;;  %v3252_v58 = vld [vmem:[%s4701_s1 + $0x28] ss:$16 sps:$4 sm:$0xff]  }
  0x63   :  { %1739 = vmatpush2.bf16.msra.mxu0 %v3167_v59  ;;  %v3255_v59 = vld [vmem:[%s4701_s1 + $0x228] ss:$16 sps:$4 sm:$0xff]  }
  0x64   :  { %1780 = vmatpush2.bf16.msra.mxu1 %v3170_v60  ;;  %1740 = vmatprep.subr.bf16.mxu0 %v3175_v61  ;;  %v3260_v60 = vld [vmem:[%s4701_s1 + $0xc] ss:$16 sps:$4 sm:$0xff]  }
  0x65   :  { %1781 = vmatprep.subr.bf16.mxu1 %v3178_v63  ;;  %v3263_v61 = vld [vmem:[%s4701_s1 + $0x20c] ss:$16 sps:$4 sm:$0xff]   ;;  %v3258_v63 = vld [vmem:[%s4701_s1 + $0x8] ss:$16 sps:$4 sm:$0xff]  }
  0x67   :  { %1741 = vmatpush2.bf16.msra.mxu0 %v3173_v0  ;;  %v3261_v0 = vld [vmem:[%s4701_s1 + $0x208] ss:$16 sps:$4 sm:$0xff]  }
  0x68   :  { %1782 = vmatpush2.bf16.msra.mxu1 %v3176_v1  ;;  %1742 = vmatprep.subr.bf16.mxu0 %v3181_v2  ;;  %v3266_v1 = vld [vmem:[%s4701_s1 + $0x1ec] ss:$16 sps:$4 sm:$0xff]  }
  0x69   :  { %1783 = vmatprep.subr.bf16.mxu1 %v3184_v4  ;;  %v3269_v2 = vld [vmem:[%s4701_s1 + $0x3ec] ss:$16 sps:$4 sm:$0xff]   ;;  %v3264_v4 = vld [vmem:[%s4701_s1 + $0x1e8] ss:$16 sps:$4 sm:$0xff]  }
  0x6b   :  { %1743 = vmatpush2.bf16.msra.mxu0 %v3179_v5  ;;  %v3267_v5 = vld [vmem:[%s4701_s1 + $0x3e8] ss:$16 sps:$4 sm:$0xff]  }
  0x6c   :  { %1784 = vmatpush2.bf16.msra.mxu1 %v3182_v6  ;;  %1744 = vmatprep.subr.bf16.mxu0 %v3187_v7  ;;  %v3272_v6 = vld [vmem:[%s4701_s1 + $0x1cc] ss:$16 sps:$4 sm:$0xff]  }
  0x6d   :  { %1785 = vmatprep.subr.bf16.mxu1 %v3190_v8  ;;  %v3275_v7 = vld [vmem:[%s4701_s1 + $0x3cc] ss:$16 sps:$4 sm:$0xff]   ;;  %v3270_v8 = vld [vmem:[%s4701_s1 + $0x1c8] ss:$16 sps:$4 sm:$0xff]  }
  0x6f   :  { %1745 = vmatpush2.bf16.msra.mxu0 %v3185_v9  ;;  %v3273_v9 = vld [vmem:[%s4701_s1 + $0x3c8] ss:$16 sps:$4 sm:$0xff]  }
  0x70   :  { %1786 = vmatpush2.bf16.msra.mxu1 %v3188_v10  ;;  %1746 = vmatprep.subr.bf16.mxu0 %v3193_v11  ;;  %v3278_v10 = vld [vmem:[%s4701_s1 + $0x1ac] ss:$16 sps:$4 sm:$0xff]  }
  0x71   :  { %1787 = vmatprep.subr.bf16.mxu1 %v3196_v12  ;;  %v3281_v11 = vld [vmem:[%s4701_s1 + $0x3ac] ss:$16 sps:$4 sm:$0xff]   ;;  %v3276_v12 = vld [vmem:[%s4701_s1 + $0x1a8] ss:$16 sps:$4 sm:$0xff]  }
  0x73   :  { %1747 = vmatpush2.bf16.msra.mxu0 %v3191_v13  ;;  %v3279_v13 = vld [vmem:[%s4701_s1 + $0x3a8] ss:$16 sps:$4 sm:$0xff]  }
  0x74   :  { %1788 = vmatpush2.bf16.msra.mxu1 %v3194_v14  ;;  %1748 = vmatprep.subr.bf16.mxu0 %v3199_v15  ;;  %v3284_v14 = vld [vmem:[%s4701_s1 + $0x18c] ss:$16 sps:$4 sm:$0xff]  }
  0x75   :  { %1789 = vmatprep.subr.bf16.mxu1 %v3202_v18  ;;  %v3287_v15 = vld [vmem:[%s4701_s1 + $0x38c] ss:$16 sps:$4 sm:$0xff]   ;;  %v3282_v18 = vld [vmem:[%s4701_s1 + $0x188] ss:$16 sps:$4 sm:$0xff]  }
  0x77   :  { %1749 = vmatpush2.bf16.msra.mxu0 %v3197_v19  ;;  %v3285_v19 = vld [vmem:[%s4701_s1 + $0x388] ss:$16 sps:$4 sm:$0xff]  }
  0x78   :  { %1790 = vmatpush2.bf16.msra.mxu1 %v3200_v20  ;;  %1750 = vmatprep.subr.bf16.mxu0 %v3205_v21  ;;  %v3290_v20 = vld [vmem:[%s4701_s1 + $0x16c] ss:$16 sps:$4 sm:$0xff]  }
  0x79   :  { %1791 = vmatprep.subr.bf16.mxu1 %v3208_v22  ;;  %v3293_v21 = vld [vmem:[%s4701_s1 + $0x36c] ss:$16 sps:$4 sm:$0xff]   ;;  %v3288_v22 = vld [vmem:[%s4701_s1 + $0x168] ss:$16 sps:$4 sm:$0xff]  }
  0x7b   :  { %1751 = vmatpush2.bf16.msra.mxu0 %v3203_v23  ;;  %v3291_v23 = vld [vmem:[%s4701_s1 + $0x368] ss:$16 sps:$4 sm:$0xff]  }
  0x7c   :  { %1792 = vmatpush2.bf16.msra.mxu1 %v3206_v24  ;;  %1752 = vmatprep.subr.bf16.mxu0 %v3211_v25  ;;  %v3296_v24 = vld [vmem:[%s4701_s1 + $0x14c] ss:$16 sps:$4 sm:$0xff]  }
  0x7d   :  { %1793 = vmatprep.subr.bf16.mxu1 %v3214_v26  ;;  %v3299_v25 = vld [vmem:[%s4701_s1 + $0x34c] ss:$16 sps:$4 sm:$0xff]   ;;  %v3294_v26 = vld [vmem:[%s4701_s1 + $0x148] ss:$16 sps:$4 sm:$0xff]  }
  0x7f   :  { %1753 = vmatpush2.bf16.msra.mxu0 %v3209_v27  ;;  %v3297_v27 = vld [vmem:[%s4701_s1 + $0x348] ss:$16 sps:$4 sm:$0xff]  }
  0x80   :  { %1794 = vmatpush2.bf16.msra.mxu1 %v3212_v28  ;;  %1804 = vmatprep.subr.bf16.mxu0 %v3218_v29  ;;  %v3302_v28 = vld [vmem:[%s4701_s1 + $0x12c] ss:$16 sps:$4 sm:$0xff]  }
  0x81   :  { %1845 = vmatprep.subr.bf16.mxu1 %v3221_v30  ;;  %v3305_v29 = vld [vmem:[%s4701_s1 + $0x32c] ss:$16 sps:$4 sm:$0xff]   ;;  %v3300_v30 = vld [vmem:[%s4701_s1 + $0x128] ss:$16 sps:$4 sm:$0xff]  }
  0x82   :  { %1755 = vmatmul.mubr.bf16.vlgmr.msra.gmra.mxu0 %v4021_v31 }
  0x83   :  { %1796 = vmatmul.mubr.bf16.vlgmr.msra.gmra.mxu1 %v4025_v32  ;;  %1805 = vmatpush1.bf16.msra.mxu0 %v3216_v33  ;;  %v3303_v33 = vld [vmem:[%s4701_s1 + $0x328] ss:$16 sps:$4 sm:$0xff]  }
  0x84   :  { %1846 = vmatpush1.bf16.msra.mxu1 %v3219_v34  ;;  %1806 = vmatprep.subr.bf16.mxu0 %v3224_v35  ;;  %v3308_v34 = vld [vmem:[%s4701_s1 + $0x10c] ss:$16 sps:$4 sm:$0xff]  }
  0x85   :  { %1847 = vmatprep.subr.bf16.mxu1 %v3227_v36  ;;  %1836 = vmatprep.mubr.bf16.mxu0 %v3751_v62  ;;  %v3239_v62 = vld [vmem:[%s4701_s1 + $0x28c] ss:$16 sps:$4 sm:$0xff]   ;;  %v3306_v36 = vld [vmem:[%s4701_s1 + $0x108] ss:$16 sps:$4 sm:$0xff]  }
  0x86   :  { %1877 = vmatprep.mubr.bf16.mxu1 %v3762_v3  ;;  %v3234_v3 = vld [vmem:[%s4701_s1 + $0x88] ss:$16 sps:$4 sm:$0xff]   ;;  %v3311_v35 = vld [vmem:[%s4701_s1 + $0x30c] ss:$16 sps:$4 sm:$0xff]  }
  0x87   :  { %1807 = vmatpush1.bf16.msra.mxu0 %v3222_v37  ;;  %v3309_v37 = vld [vmem:[%s4701_s1 + $0x308] ss:$16 sps:$4 sm:$0xff]  }
  0x88   :  { %1848 = vmatpush1.bf16.msra.mxu1 %v3225_v38  ;;  %1808 = vmatprep.subr.bf16.mxu0 %v3230_v39  ;;  %v3314_v38 = vld [vmem:[%s4701_s1 + $0x4ec] ss:$16 sps:$4 sm:$0xff]  }
  0x89   :  { %1849 = vmatprep.subr.bf16.mxu1 %v3233_v40  ;;  %v3317_v39 = vld [vmem:[%s4701_s1 + $0x6ec] ss:$16 sps:$4 sm:$0xff]   ;;  %v3312_v40 = vld [vmem:[%s4701_s1 + $0x4e8] ss:$16 sps:$4 sm:$0xff]  }
  0x8b   :  { %1809 = vmatpush1.bf16.msra.mxu0 %v3228_v41  ;;  %v3315_v41 = vld [vmem:[%s4701_s1 + $0x6e8] ss:$16 sps:$4 sm:$0xff]  }
  0x8c   :  { %1850 = vmatpush1.bf16.msra.mxu1 %v3231_v42  ;;  %1810 = vmatprep.subr.bf16.mxu0 %v3236_v44  ;;  %v3320_v42 = vld [vmem:[%s4701_s1 + $0x4cc] ss:$16 sps:$4 sm:$0xff]  }
  0x8d   :  { %1851 = vmatprep.subr.bf16.mxu1 %v3239_v62  ;;  %v3323_v44 = vld [vmem:[%s4701_s1 + $0x6cc] ss:$16 sps:$4 sm:$0xff]   ;;  %v3318_v62 = vld [vmem:[%s4701_s1 + $0x4c8] ss:$16 sps:$4 sm:$0xff]  }
  0x8f   :  { %1811 = vmatpush1.bf16.msra.mxu0 %v3234_v3  ;;  %v3321_v3 = vld [vmem:[%s4701_s1 + $0x6c8] ss:$16 sps:$4 sm:$0xff]  }
  0x90   :  { %1852 = vmatpush1.bf16.msra.mxu1 %v3237_v45  ;;  %1812 = vmatprep.subr.bf16.mxu0 %v3242_v46  ;;  %v3326_v45 = vld [vmem:[%s4701_s1 + $0x4ac] ss:$16 sps:$4 sm:$0xff]  }
  0x91   :  { %1853 = vmatprep.subr.bf16.mxu1 %v3245_v47  ;;  %v3329_v46 = vld [vmem:[%s4701_s1 + $0x6ac] ss:$16 sps:$4 sm:$0xff]   ;;  %v3324_v47 = vld [vmem:[%s4701_s1 + $0x4a8] ss:$16 sps:$4 sm:$0xff]  }
  0x93   :  { %1813 = vmatpush1.bf16.msra.mxu0 %v3240_v48  ;;  %v3335_v48 = vld [vmem:[%s4701_s1 + $0x68c] ss:$16 sps:$4 sm:$0xff]  }
  0x94   :  { %1854 = vmatpush1.bf16.msra.mxu1 %v3243_v50  ;;  %1814 = vmatprep.subr.bf16.mxu0 %v3248_v51  ;;  %v3330_v50 = vld [vmem:[%s4701_s1 + $0x488] ss:$16 sps:$4 sm:$0xff]   ;;  %v3341_v51 = vld [vmem:[%s4701_s1 + $0x66c] ss:$16 sps:$4 sm:$0xff]  }
  0x95   :  { %1855 = vmatprep.subr.bf16.mxu1 %v3251_v52  ;;  %v3336_v52 = vld [vmem:[%s4701_s1 + $0x468] ss:$16 sps:$4 sm:$0xff]  }
  0x97   :  { %1815 = vmatpush1.bf16.msra.mxu0 %v3246_v54  ;;  %v3339_v54 = vld [vmem:[%s4701_s1 + $0x668] ss:$16 sps:$4 sm:$0xff]  }
  0x98   :  { %1856 = vmatpush1.bf16.msra.mxu1 %v3249_v49  ;;  %1816 = vmatprep.subr.bf16.mxu0 %v3254_v55  ;;  %v3344_v49 = vld [vmem:[%s4701_s1 + $0x44c] ss:$16 sps:$4 sm:$0xff]  }
  0x99   :  { %1857 = vmatprep.subr.bf16.mxu1 %v3257_v57  ;;  %v3347_v55 = vld [vmem:[%s4701_s1 + $0x64c] ss:$16 sps:$4 sm:$0xff]   ;;  %v3342_v57 = vld [vmem:[%s4701_s1 + $0x448] ss:$16 sps:$4 sm:$0xff]  }
  0x9b   :  { %1817 = vmatpush1.bf16.msra.mxu0 %v3252_v58  ;;  %v3345_v58 = vld [vmem:[%s4701_s1 + $0x648] ss:$16 sps:$4 sm:$0xff]  }
  0x9c   :  { %1858 = vmatpush1.bf16.msra.mxu1 %v3255_v59  ;;  %1818 = vmatprep.subr.bf16.mxu0 %v3260_v60  ;;  %v3350_v59 = vld [vmem:[%s4701_s1 + $0x42c] ss:$16 sps:$4 sm:$0xff]  }
  0x9d   :  { %1859 = vmatprep.subr.bf16.mxu1 %v3263_v61  ;;  %v3353_v60 = vld [vmem:[%s4701_s1 + $0x62c] ss:$16 sps:$4 sm:$0xff]  }
  0x9f   :  { %1819 = vmatpush1.bf16.msra.mxu0 %v3258_v63 }
  0xa0   :  { %1860 = vmatpush1.bf16.msra.mxu1 %v3261_v0  ;;  %1820 = vmatprep.subr.bf16.mxu0 %v3266_v1 }
  0xa1   :  { %1861 = vmatprep.subr.bf16.mxu1 %v3269_v2 }
  0xa3   :  { %1821 = vmatpush2.bf16.msra.mxu0 %v3264_v4 }
  0xa4   :  { %1862 = vmatpush2.bf16.msra.mxu1 %v3267_v5  ;;  %1822 = vmatprep.subr.bf16.mxu0 %v3272_v6 }
  0xa5   :  { %1863 = vmatprep.subr.bf16.mxu1 %v3275_v7 }
  0xa7   :  { %1823 = vmatpush2.bf16.msra.mxu0 %v3270_v8 }
  0xa8   :  { %1864 = vmatpush2.bf16.msra.mxu1 %v3273_v9  ;;  %1824 = vmatprep.subr.bf16.mxu0 %v3278_v10 }
  0xa9   :  { %1865 = vmatprep.subr.bf16.mxu1 %v3281_v11 }
  0xab   :  { %1825 = vmatpush2.bf16.msra.mxu0 %v3276_v12 }
  0xac   :  { %1866 = vmatpush2.bf16.msra.mxu1 %v3279_v13  ;;  %1826 = vmatprep.subr.bf16.mxu0 %v3284_v14 }
  0xad   :  { %1867 = vmatprep.subr.bf16.mxu1 %v3287_v15 }
  0xaf   :  { %1827 = vmatpush2.bf16.msra.mxu0 %v3282_v18 }
  0xb0   :  { %1868 = vmatpush2.bf16.msra.mxu1 %v3285_v19  ;;  %1828 = vmatprep.subr.bf16.mxu0 %v3290_v20 }
  0xb1   :  { %1869 = vmatprep.subr.bf16.mxu1 %v3293_v21 }
  0xb3   :  { %1829 = vmatpush2.bf16.msra.mxu0 %v3288_v22 }
  0xb4   :  { %1870 = vmatpush2.bf16.msra.mxu1 %v3291_v23  ;;  %1830 = vmatprep.subr.bf16.mxu0 %v3296_v24 }
  0xb5   :  { %1871 = vmatprep.subr.bf16.mxu1 %v3299_v25 }
  0xb7   :  { %1831 = vmatpush2.bf16.msra.mxu0 %v3294_v26 }
  0xb8   :  { %1872 = vmatpush2.bf16.msra.mxu1 %v3297_v27  ;;  %1832 = vmatprep.subr.bf16.mxu0 %v3302_v28 }
  0xb9   :  { %1873 = vmatprep.subr.bf16.mxu1 %v3305_v29 }
  0xbb   :  { %1833 = vmatpush2.bf16.msra.mxu0 %v3300_v30 }
  0xbc   :  { %1874 = vmatpush2.bf16.msra.mxu1 %v3303_v33  ;;  %1834 = vmatprep.subr.bf16.mxu0 %v3308_v34 }
  0xbd   :  { %1875 = vmatprep.subr.bf16.mxu1 %v3311_v35 }
  0xbf   :  { %1835 = vmatpush2.bf16.msra.mxu0 %v3306_v36 }
  0xc0   :  { %1876 = vmatpush2.bf16.msra.mxu1 %v3309_v37  ;;  %1886 = vmatprep.subr.bf16.mxu0 %v3314_v38 }
  0xc1   :  { %1927 = vmatprep.subr.bf16.mxu1 %v3317_v39 }
  0xc2   :  { %1837 = vmatmul.mubr.bf16.vlgmr.msra.gmra.mxu0 %v3802_v16  ;;  %v3327_v16 = vld [vmem:[%s4701_s1 + $0x6a8] ss:$16 sps:$4 sm:$0xff]  }
  0xc3   :  { %1878 = vmatmul.mubr.bf16.vlgmr.msra.gmra.mxu1 %v3804_v17  ;;  %1887 = vmatpush1.bf16.msra.mxu0 %v3312_v40  ;;  %v3332_v17 = vld [vmem:[%s4701_s1 + $0x48c] ss:$16 sps:$4 sm:$0xff]  }
  0xc4   :  { %1928 = vmatpush1.bf16.msra.mxu1 %v3315_v41  ;;  %1888 = vmatprep.subr.bf16.mxu0 %v3320_v42 }
  0xc5   :  { %1929 = vmatprep.subr.bf16.mxu1 %v3323_v44  ;;  %1918 = vmatprep.mubr.bf16.mxu0 %v3903_v53  ;;  %v3333_v53 = vld [vmem:[%s4701_s1 + $0x688] ss:$16 sps:$4 sm:$0xff]  }
  0xc6   :  { %1959 = vmatprep.mubr.bf16.mxu1 %v3913_v56  ;;  %v3338_v56 = vld [vmem:[%s4701_s1 + $0x46c] ss:$16 sps:$4 sm:$0xff]  }
  0xc7   :  { %1889 = vmatpush1.bf16.msra.mxu0 %v3318_v62 }
  0xc8   :  { %1930 = vmatpush1.bf16.msra.mxu1 %v3321_v3  ;;  %1890 = vmatprep.subr.bf16.mxu0 %v3326_v45 }
  0xc9   :  { %1931 = vmatprep.subr.bf16.mxu1 %v3329_v46 }
  0xcb   :  { %1891 = vmatpush1.bf16.msra.mxu0 %v3324_v47 }
  0xcc   :  { %1932 = vmatpush1.bf16.msra.mxu1 %v3327_v16  ;;  %1892 = vmatprep.subr.bf16.mxu0 %v3332_v17 }
  0xcd   :  { %1933 = vmatprep.subr.bf16.mxu1 %v3335_v48 }
  0xcf   :  { %1893 = vmatpush1.bf16.msra.mxu0 %v3330_v50 }
  0xd0   :  { %1934 = vmatpush1.bf16.msra.mxu1 %v3333_v53  ;;  %1894 = vmatprep.subr.bf16.mxu0 %v3338_v56 }
  0xd1   :  { %1935 = vmatprep.subr.bf16.mxu1 %v3341_v51 }
  0xd3   :  { %1895 = vmatpush1.bf16.msra.mxu0 %v3336_v52 }
  0xd4   :  { %1936 = vmatpush1.bf16.msra.mxu1 %v3339_v54  ;;  %1896 = vmatprep.subr.bf16.mxu0 %v3344_v49 }
  0xd5   :  { %1937 = vmatprep.subr.bf16.mxu1 %v3347_v55 }
  0xd6   :  { %12 = vsyncpa [#allocation3], 0  ;;  %v3348_v61 = vld [vmem:[%s4701_s1 + $0x428] ss:$16 sps:$4 sm:$0xff]   ;;  %v3356_v0 = vld [vmem:[%s4701_s1 + $0x40c] ss:$16 sps:$4 sm:$0xff]  }
  0xd7   :  { %1897 = vmatpush1.bf16.msra.mxu0 %v3342_v57  ;;  %v3351_v63 = vld [vmem:[%s4701_s1 + $0x628] ss:$16 sps:$4 sm:$0xff]   ;;  %v3359_v1 = vld [vmem:[%s4701_s1 + $0x60c] ss:$16 sps:$4 sm:$0xff]   ;;  %vm2633_vm0 = vcmask 58368  }
  0xd8   :  { %1938 = vmatpush1.bf16.msra.mxu1 %v3345_v58  ;;  %1898 = vmatprep.subr.bf16.mxu0 %v3350_v59  ;;  %v3354_v2 = vld [vmem:[%s4701_s1 + $0x408] ss:$16 sps:$4 sm:$0xff]   ;;  %v3362_v5 = vld [vmem:[%s4701_s1 + $0x5ec] ss:$16 sps:$4 sm:$0xff]  }
  0xd9   :  { %1939 = vmatprep.subr.bf16.mxu1 %v3353_v60  ;;  %v3357_v4 = vld [vmem:[%s4701_s1 + $0x608] ss:$16 sps:$4 sm:$0xff]   ;;  %v3365_v6 = vld [vmem:[%s4701_s1 + $0x7ec] ss:$16 sps:$4 sm:$0xff]  }
  0xda   :  { %v3360_v7 = vld [vmem:[%s4701_s1 + $0x5e8] ss:$16 sps:$4 sm:$0xff]   ;;  %v3368_v9 = vld [vmem:[%s4701_s1 + $0x5cc] ss:$16 sps:$4 sm:$0xff]  }
  0xdb   :  { %1899 = vmatpush1.bf16.msra.mxu0 %v3348_v61  ;;  %v3363_v8 = vld [vmem:[%s4701_s1 + $0x7e8] ss:$16 sps:$4 sm:$0xff]   ;;  %v3371_v10 = vld [vmem:[%s4701_s1 + $0x7cc] ss:$16 sps:$4 sm:$0xff]  }
  0xdc   :  { %1940 = vmatpush1.bf16.msra.mxu1 %v3351_v63  ;;  %1900 = vmatprep.subr.bf16.mxu0 %v3356_v0  ;;  %v3366_v11 = vld [vmem:[%s4701_s1 + $0x5c8] ss:$16 sps:$4 sm:$0xff]   ;;  %v3374_v13 = vld [vmem:[%s4701_s1 + $0x5ac] ss:$16 sps:$4 sm:$0xff]  }
  0xdd   :  { %1941 = vmatprep.subr.bf16.mxu1 %v3359_v1  ;;  %v3369_v12 = vld [vmem:[%s4701_s1 + $0x7c8] ss:$16 sps:$4 sm:$0xff]   ;;  %v3377_v14 = vld [vmem:[%s4701_s1 + $0x7ac] ss:$16 sps:$4 sm:$0xff]  }
  0xde   :  { %v3372_v15 = vld [vmem:[%s4701_s1 + $0x5a8] ss:$16 sps:$4 sm:$0xff]   ;;  %v3380_v19 = vld [vmem:[%s4701_s1 + $0x58c] ss:$16 sps:$4 sm:$0xff]  }
  0xdf   :  { %1901 = vmatpush1.bf16.msra.mxu0 %v3354_v2  ;;  %v3375_v18 = vld [vmem:[%s4701_s1 + $0x7a8] ss:$16 sps:$4 sm:$0xff]   ;;  %v3383_v20 = vld [vmem:[%s4701_s1 + $0x78c] ss:$16 sps:$4 sm:$0xff]  }
  0xe0   :  { %1942 = vmatpush1.bf16.msra.mxu1 %v3357_v4  ;;  %1902 = vmatprep.subr.bf16.mxu0 %v3362_v5  ;;  %v3378_v21 = vld [vmem:[%s4701_s1 + $0x588] ss:$16 sps:$4 sm:$0xff]   ;;  %v3386_v23 = vld [vmem:[%s4701_s1 + $0x56c] ss:$16 sps:$4 sm:$0xff]  }
  0xe1   :  { %1943 = vmatprep.subr.bf16.mxu1 %v3365_v6  ;;  %v3381_v22 = vld [vmem:[%s4701_s1 + $0x788] ss:$16 sps:$4 sm:$0xff]   ;;  %v3389_v24 = vld [vmem:[%s4701_s1 + $0x76c] ss:$16 sps:$4 sm:$0xff]  }
  0xe2   :  { %v3384_v25 = vld [vmem:[%s4701_s1 + $0x568] ss:$16 sps:$4 sm:$0xff]   ;;  %v3392_v27 = vld [vmem:[%s4701_s1 + $0x54c] ss:$16 sps:$4 sm:$0xff]  }
  0xe3   :  { %1903 = vmatpush2.bf16.msra.mxu0 %v3360_v7  ;;  %v3387_v26 = vld [vmem:[%s4701_s1 + $0x768] ss:$16 sps:$4 sm:$0xff]   ;;  %v3395_v28 = vld [vmem:[%s4701_s1 + $0x74c] ss:$16 sps:$4 sm:$0xff]  }
  0xe4   :  { %1944 = vmatpush2.bf16.msra.mxu1 %v3363_v8  ;;  %1904 = vmatprep.subr.bf16.mxu0 %v3368_v9  ;;  %v3390_v29 = vld [vmem:[%s4701_s1 + $0x548] ss:$16 sps:$4 sm:$0xff]   ;;  %v3398_v33 = vld [vmem:[%s4701_s1 + $0x52c] ss:$16 sps:$4 sm:$0xff]  }
  0xe5   :  { %1945 = vmatprep.subr.bf16.mxu1 %v3371_v10  ;;  %v3393_v30 = vld [vmem:[%s4701_s1 + $0x748] ss:$16 sps:$4 sm:$0xff]   ;;  %v3401_v34 = vld [vmem:[%s4701_s1 + $0x72c] ss:$16 sps:$4 sm:$0xff]  }
  0xe6   :  { %v3396_v35 = vld [vmem:[%s4701_s1 + $0x528] ss:$16 sps:$4 sm:$0xff]   ;;  %v3404_v37 = vld [vmem:[%s4701_s1 + $0x50c] ss:$16 sps:$4 sm:$0xff]  }
  0xe7   :  { %1905 = vmatpush2.bf16.msra.mxu0 %v3366_v11  ;;  %v3399_v36 = vld [vmem:[%s4701_s1 + $0x728] ss:$16 sps:$4 sm:$0xff]   ;;  %v3407_v38 = vld [vmem:[%s4701_s1 + $0x70c] ss:$16 sps:$4 sm:$0xff]  }
  0xe8   :  { %1946 = vmatpush2.bf16.msra.mxu1 %v3369_v12  ;;  %1906 = vmatprep.subr.bf16.mxu0 %v3374_v13  ;;  %v3402_v39 = vld [vmem:[%s4701_s1 + $0x508] ss:$16 sps:$4 sm:$0xff]   ;;  %v3410_v41 = vld [vmem:[%s4703_s3 + $0x74] ss:$8 sps:$4 sm:$0xff]   ;;  %v3413_v44 = vld [vmem:[%s4703_s3 + $0x64] ss:$8 sps:$4 sm:$0xff]  }
  0xe9   :  { %1947 = vmatprep.subr.bf16.mxu1 %v3377_v14  ;;  %v3405_v40 = vld [vmem:[%s4701_s1 + $0x708] ss:$16 sps:$4 sm:$0xff]   ;;  %v3416_v16 = vld [vmem:[%s4703_s3 + $0x54] ss:$8 sps:$4 sm:$0xff]   ;;  %v3419_v53 = vld [vmem:[%s4703_s3 + $0x44] ss:$8 sps:$4 sm:$0xff]  }
  0xea   :  { %v3408_v42 = vld [vmem:[%s4703_s3 + $0x70] ss:$8 sps:$4 sm:$0xff]   ;;  %v3411_v45 = vld [vmem:[%s4703_s3 + $0x60] ss:$8 sps:$4 sm:$0xff]   ;;  %v3458_v51 = vld [vmem:[%s4703_s3 + $0x174] ss:$8 sps:$4 sm:$0xff]  }
  0xeb   :  { %1907 = vmatpush2.bf16.msra.mxu0 %v3372_v15  ;;  %v3456_v56 = vld [vmem:[%s4703_s3 + $0x170] ss:$8 sps:$4 sm:$0xff]   ;;  %v3461_v52 = vld [vmem:[%s4703_s3 + $0x164] ss:$8 sps:$4 sm:$0xff]   ;;  %v3417_v54 = vld [vmem:[%s4703_s3 + $0x40] ss:$8 sps:$4 sm:$0xff]  }
  0xec   :  { %1948 = vmatpush2.bf16.msra.mxu1 %v3375_v18  ;;  %1908 = vmatprep.subr.bf16.mxu0 %v3380_v19  ;;  %v3459_v49 = vld [vmem:[%s4703_s3 + $0x160] ss:$8 sps:$4 sm:$0xff]   ;;  %v3422_v55 = vld [vmem:[%s4703_s3 + $0x34] ss:$8 sps:$4 sm:$0xff]   ;;  %v3420_v58 = vld [vmem:[%s4703_s3 + $0x30] ss:$8 sps:$4 sm:$0xff]  }
  0xed   :  { %1949 = vmatprep.subr.bf16.mxu1 %v3383_v20  ;;  %v3464_v57 = vld [vmem:[%s4703_s3 + $0x154] ss:$8 sps:$4 sm:$0xff]   ;;  %v3462_v59 = vld [vmem:[%s4703_s3 + $0x150] ss:$8 sps:$4 sm:$0xff]   ;;  %v3425_v60 = vld [vmem:[%s4703_s3 + $0x24] ss:$8 sps:$4 sm:$0xff]  }
  0xee   :  { %v3467_v61 = vld [vmem:[%s4703_s3 + $0x144] ss:$8 sps:$4 sm:$0xff]   ;;  %v3423_v63 = vld [vmem:[%s4703_s3 + $0x20] ss:$8 sps:$4 sm:$0xff]   ;;  %v3428_v1 = vld [vmem:[%s4703_s3 + $0x14] ss:$8 sps:$4 sm:$0xff]  }
  0xef   :  { %1909 = vmatpush2.bf16.msra.mxu0 %v3378_v21  ;;  %v3465_v0 = vld [vmem:[%s4703_s3 + $0x140] ss:$8 sps:$4 sm:$0xff]   ;;  %v3470_v2 = vld [vmem:[%s4703_s3 + $0x134] ss:$8 sps:$4 sm:$0xff]   ;;  %v3426_v4 = vld [vmem:[%s4703_s3 + $0x10] ss:$8 sps:$4 sm:$0xff]  }
  0xf0   :  { %1950 = vmatpush2.bf16.msra.mxu1 %v3381_v22  ;;  %1910 = vmatprep.subr.bf16.mxu0 %v3386_v23  ;;  %v3468_v5 = vld [vmem:[%s4703_s3 + $0x130] ss:$8 sps:$4 sm:$0xff]   ;;  %v3431_v6 = vld [vmem:[%s4703_s3 + $0x4] ss:$8 sps:$4 sm:$0xff]   ;;  %v3429_v8 = vld [vmem:[%s4703_s3] ss:$8 sps:$4 sm:$0xff]  }
  0xf1   :  { %1951 = vmatprep.subr.bf16.mxu1 %v3389_v24  ;;  %v3473_v7 = vld [vmem:[%s4703_s3 + $0x124] ss:$8 sps:$4 sm:$0xff]   ;;  %v3471_v9 = vld [vmem:[%s4703_s3 + $0x120] ss:$8 sps:$4 sm:$0xff]   ;;  %v3434_v10 = vld [vmem:[%s4703_s3 + $0xf4] ss:$8 sps:$4 sm:$0xff]  }
  0xf2   :  { %v3476_v11 = vld [vmem:[%s4703_s3 + $0x114] ss:$8 sps:$4 sm:$0xff]   ;;  %v3432_v12 = vld [vmem:[%s4703_s3 + $0xf0] ss:$8 sps:$4 sm:$0xff]   ;;  %v3437_v14 = vld [vmem:[%s4703_s3 + $0xe4] ss:$8 sps:$4 sm:$0xff]  }
  0xf3   :  { %1911 = vmatpush2.bf16.msra.mxu0 %v3384_v25  ;;  %v3474_v13 = vld [vmem:[%s4703_s3 + $0x110] ss:$8 sps:$4 sm:$0xff]   ;;  %v3479_v15 = vld [vmem:[%s4703_s3 + $0x104] ss:$8 sps:$4 sm:$0xff]   ;;  %v3435_v18 = vld [vmem:[%s4703_s3 + $0xe0] ss:$8 sps:$4 sm:$0xff]  }
  0xf4   :  { %1952 = vmatpush2.bf16.msra.mxu1 %v3387_v26  ;;  %1912 = vmatprep.subr.bf16.mxu0 %v3392_v27  ;;  %v3477_v19 = vld [vmem:[%s4703_s3 + $0x100] ss:$8 sps:$4 sm:$0xff]   ;;  %v3440_v20 = vld [vmem:[%s4703_s3 + $0xd4] ss:$8 sps:$4 sm:$0xff]   ;;  %v3438_v22 = vld [vmem:[%s4703_s3 + $0xd0] ss:$8 sps:$4 sm:$0xff]  }
  0xf5   :  { %1953 = vmatprep.subr.bf16.mxu1 %v3395_v28  ;;  %v3482_v21 = vld [vmem:[%s4703_s3 + $0x1f4] ss:$8 sps:$4 sm:$0xff]   ;;  %v3480_v23 = vld [vmem:[%s4703_s3 + $0x1f0] ss:$8 sps:$4 sm:$0xff]   ;;  %v3443_v24 = vld [vmem:[%s4703_s3 + $0xc4] ss:$8 sps:$4 sm:$0xff]  }
  0xf6   :  { %v3485_v25 = vld [vmem:[%s4703_s3 + $0x1e4] ss:$8 sps:$4 sm:$0xff]   ;;  %v3441_v26 = vld [vmem:[%s4703_s3 + $0xc0] ss:$8 sps:$4 sm:$0xff]   ;;  %v3446_v28 = vld [vmem:[%s4703_s3 + $0xb4] ss:$8 sps:$4 sm:$0xff]  }
  0xf7   :  { %1913 = vmatpush2.bf16.msra.mxu0 %v3390_v29  ;;  %v3483_v27 = vld [vmem:[%s4703_s3 + $0x1e0] ss:$8 sps:$4 sm:$0xff]   ;;  %v3488_v29 = vld [vmem:[%s4703_s3 + $0x1d4] ss:$8 sps:$4 sm:$0xff]  }
  0xf8   :  { %1954 = vmatpush2.bf16.msra.mxu1 %v3393_v30  ;;  %1914 = vmatprep.subr.bf16.mxu0 %v3398_v33  ;;  %v3444_v30 = vld [vmem:[%s4703_s3 + $0xb0] ss:$8 sps:$4 sm:$0xff]  }
  0xf9   :  { %1955 = vmatprep.subr.bf16.mxu1 %v3401_v34  ;;  %v3486_v33 = vld [vmem:[%s4703_s3 + $0x1d0] ss:$8 sps:$4 sm:$0xff]   ;;  %v3449_v34 = vld [vmem:[%s4703_s3 + $0xa4] ss:$8 sps:$4 sm:$0xff]  }
  0xfb   :  { %1915 = vmatpush2.bf16.msra.mxu0 %v3396_v35  ;;  %v3491_v35 = vld [vmem:[%s4703_s3 + $0x1c4] ss:$8 sps:$4 sm:$0xff]  }
  0xfc   :  { %1956 = vmatpush2.bf16.msra.mxu1 %v3399_v36  ;;  %1916 = vmatprep.subr.bf16.mxu0 %v3404_v37  ;;  %v3447_v36 = vld [vmem:[%s4703_s3 + $0xa0] ss:$8 sps:$4 sm:$0xff]  }
  0xfd   :  { %1957 = vmatprep.subr.bf16.mxu1 %v3407_v38  ;;  %v3489_v37 = vld [vmem:[%s4703_s3 + $0x1c0] ss:$8 sps:$4 sm:$0xff]   ;;  %v3452_v38 = vld [vmem:[%s4703_s3 + $0x94] ss:$8 sps:$4 sm:$0xff]  }
  0xff   :  { %1917 = vmatpush2.bf16.msra.mxu0 %v3402_v39  ;;  %v3494_v39 = vld [vmem:[%s4703_s3 + $0x1b4] ss:$8 sps:$4 sm:$0xff]  }
 0x100   :  { %1958 = vmatpush2.bf16.msra.mxu1 %v3405_v40  ;;  %2372 = vmatprep.subr.bf16.mxu0 %v3410_v41  ;;  %v342_v40 = vsub.s32 0, %v3705_v43  ;;  %v4589_v41 = vld [vmem:[%s4702_s2] sm:$0xf] }
 0x101   :  { %2413 = vmatprep.subr.bf16.mxu1 %v3458_v51  ;;  %v3495_v51 = vld [vmem:[%s4703_s3 + $0x1a0] ss:$8 sps:$4 sm:$0xff]  }
 0x102   :  { %v4422_v62 = vpop.f32.mrf.mxu0  ;;  %1919 = vmatmul.mubr.bf16.vlgmr.msra.gmra.mxu0 %v4021_v31  ;;  %v3414_v31 = vld [vmem:[%s4703_s3 + $0x50] ss:$8 sps:$4 sm:$0xff]  }
 0x103   :  { %v4424_v3 = vpop.f32.mrf.mxu1  ;;  %1960 = vmatmul.mubr.bf16.vlgmr.msra.gmra.mxu1 %v4025_v32  ;;  %2373 = vmatpush1.bf16.msra.mxu0 %v3408_v42  ;;  %v346_v42 = vsub.s32 1, %v3705_v43 }
 0x104   :  { %v4431_v46 = vpop.f32.mrf.mxu0  ;;  %2374 = vmatprep.subr.bf16.mxu0 %v3413_v44  ;;  %2414 = vmatpush1.bf16.msra.mxu1 %v3456_v56  ;;  %v3450_v44 = vld [vmem:[%s4703_s3 + $0x90] ss:$8 sps:$4 sm:$0xff]  }
 0x105   :  { %v4433_v47 = vpop.f32.mrf.mxu1  ;;  %2415 = vmatprep.subr.bf16.mxu1 %v3461_v52 }
 0x106   :  { %v1678_v17 = vpop.f32.mrf.mxu0 }
 0x107   :  { %v1719_v48 = vpop.f32.mrf.mxu1  ;;  %2375 = vmatpush1.bf16.msra.mxu0 %v3411_v45  ;;  %v3492_v45 = vld [vmem:[%s4703_s3 + $0x1b0] ss:$8 sps:$4 sm:$0xff]   ;;  %v343_v17 = vrot.slane %v4589_v41, %v342_v40 }
 0x108   :  { %v1679_v32 = vpop.f32.mrf.mxu0  ;;  %2376 = vmatprep.subr.bf16.mxu0 %v3416_v16  ;;  %2416 = vmatpush1.bf16.msra.mxu1 %v3459_v49  ;;  %v3455_v16 = vld [vmem:[%s4703_s3 + $0x84] ss:$8 sps:$4 sm:$0xff]   ;;  %v347_v48 = vrot.slane %v4589_v41, %v346_v42 }
 0x109   :  { %v1720_v50 = vpop.f32.mrf.mxu1  ;;  %2417 = vmatprep.subr.bf16.mxu1 %v3464_v57  ;;  %v1675_v32 = vadd.f32 %v4422_v62, %v343_v17  ;;  %v3500_v57 = vld [vmem:[%s4703_s3 + $0x194] ss:$8 sps:$4 sm:$0xff]  }
 0x10a   :  { %v1677_v50 = vadd.f32 %v4431_v46, %v347_v48 }
 0x10b   :  { %2377 = vmatpush1.bf16.msra.mxu0 %v3414_v31  ;;  %v3453_v31 = vld [vmem:[%s4703_s3 + $0x80] ss:$8 sps:$4 sm:$0xff]   ;;  %v1716_v56 = vadd.f32 %v4424_v3, %v1675_v32  ;;  %v3498_v3 = vld [vmem:[%s4703_s3 + $0x190] ss:$8 sps:$4 sm:$0xff]  }
 0x10c   :  { %2378 = vmatprep.subr.bf16.mxu0 %v3419_v53  ;;  %2418 = vmatpush1.bf16.msra.mxu1 %v3462_v59  ;;  %v3497_v53 = vld [vmem:[%s4703_s3 + $0x1a4] ss:$8 sps:$4 sm:$0xff]   ;;  %v1718_v49 = vadd.f32 %v4433_v47, %v1677_v50 }
 0x10d   :  { %2419 = vmatprep.subr.bf16.mxu1 %v3467_v61 }
 0x10f   :  { %2379 = vmatpush1.bf16.msra.mxu0 %v3417_v54 }
 0x110   :  { %2380 = vmatprep.subr.bf16.mxu0 %v3422_v55  ;;  %2420 = vmatpush1.bf16.msra.mxu1 %v3465_v0 }
 0x111   :  { %2421 = vmatprep.subr.bf16.mxu1 %v3470_v2  ;;  %v3503_v2 = vld [vmem:[%s4703_s3 + $0x184] ss:$8 sps:$4 sm:$0xff]  }
 0x113   :  { %2381 = vmatpush1.bf16.msra.mxu0 %v3420_v58 }
 0x114   :  { %2382 = vmatprep.subr.bf16.mxu0 %v3425_v60  ;;  %2422 = vmatpush1.bf16.msra.mxu1 %v3468_v5  ;;  %v3501_v5 = vld [vmem:[%s4703_s3 + $0x180] ss:$8 sps:$4 sm:$0xff]  }
 0x115   :  { %2423 = vmatprep.subr.bf16.mxu1 %v3473_v7 }
 0x117   :  { %2383 = vmatpush1.bf16.msra.mxu0 %v3423_v63 }
 0x118   :  { %2384 = vmatprep.subr.bf16.mxu0 %v3428_v1  ;;  %2424 = vmatpush1.bf16.msra.mxu1 %v3471_v9 }
 0x119   :  { %2425 = vmatprep.subr.bf16.mxu1 %v3476_v11 }
 0x11b   :  { %2385 = vmatpush1.bf16.msra.mxu0 %v3426_v4 }
 0x11c   :  { %2386 = vmatprep.subr.bf16.mxu0 %v3431_v6  ;;  %2426 = vmatpush1.bf16.msra.mxu1 %v3474_v13 }
 0x11d   :  { %2427 = vmatprep.subr.bf16.mxu1 %v3479_v15 }
 0x11f   :  { %2387 = vmatpush1.bf16.msra.mxu0 %v3429_v8 }
 0x120   :  { %2388 = vmatprep.subr.bf16.mxu0 %v3434_v10  ;;  %2428 = vmatpush1.bf16.msra.mxu1 %v3477_v19  ;;  %v3505_v19 = vld [vmem:[%s4705_s5 + $0x38] sm:$0xff]  }
 0x121   :  { %2429 = vmatprep.subr.bf16.mxu1 %v3482_v21  ;;  %v3507_v21 = vld [vmem:[%s4705_s5 + $0x30] sm:$0xff]  }
 0x123   :  { %2389 = vmatpush2.bf16.msra.mxu0 %v3432_v12 }
 0x124   :  { %2390 = vmatprep.subr.bf16.mxu0 %v3437_v14  ;;  %2430 = vmatpush2.bf16.msra.mxu1 %v3480_v23  ;;  %v3509_v23 = vld [vmem:[%s4705_s5 + $0x28] sm:$0xff]  }
 0x125   :  { %2431 = vmatprep.subr.bf16.mxu1 %v3485_v25  ;;  %v3511_v25 = vld [vmem:[%s4705_s5 + $0x20] sm:$0xff]  }
 0x127   :  { %2391 = vmatpush2.bf16.msra.mxu0 %v3435_v18  ;;  %v3504_v18 = vld [vmem:[%s4705_s5 + $0x78] sm:$0xff]  }
 0x128   :  { %2392 = vmatprep.subr.bf16.mxu0 %v3440_v20  ;;  %2432 = vmatpush2.bf16.msra.mxu1 %v3483_v27  ;;  %v3506_v20 = vld [vmem:[%s4705_s5 + $0x70] sm:$0xff]   ;;  %v3513_v27 = vld [vmem:[%s4705_s5 + $0x18] sm:$0xff]  }
 0x129   :  { %2433 = vmatprep.subr.bf16.mxu1 %v3488_v29  ;;  %v3515_v29 = vld [vmem:[%s4705_s5 + $0x10] sm:$0xff]  }
 0x12b   :  { %2393 = vmatpush2.bf16.msra.mxu0 %v3438_v22  ;;  %v3508_v22 = vld [vmem:[%s4705_s5 + $0x68] sm:$0xff]  }
 0x12c   :  { %2394 = vmatprep.subr.bf16.mxu0 %v3443_v24  ;;  %2434 = vmatpush2.bf16.msra.mxu1 %v3486_v33  ;;  %v3510_v24 = vld [vmem:[%s4705_s5 + $0x60] sm:$0xff]   ;;  %v354_v33 = vsub.s32 3, %v3705_v43 }
 0x12d   :  { %2435 = vmatprep.subr.bf16.mxu1 %v3491_v35 }
 0x12e   :  { %v355_v35 = vrot.slane %v4589_v41, %v354_v33 }
 0x12f   :  { %2395 = vmatpush2.bf16.msra.mxu0 %v3441_v26  ;;  %v3512_v26 = vld [vmem:[%s4705_s5 + $0x58] sm:$0xff]  }
 0x130   :  { %2396 = vmatprep.subr.bf16.mxu0 %v3446_v28  ;;  %2436 = vmatpush2.bf16.msra.mxu1 %v3489_v37  ;;  %v3514_v28 = vld [vmem:[%s4705_s5 + $0x50] sm:$0xff]  }
 0x131   :  { %2437 = vmatprep.subr.bf16.mxu1 %v3494_v39 }
 0x133   :  { %2397 = vmatpush2.bf16.msra.mxu0 %v3444_v30  ;;  %v350_v30 = vsub.s32 2, %v3705_v43  ;;  %v2981_v43 = vld [vmem:[%s4706_s6] ss:$0 sm:$0xff]  ;;  %s3547_s6 = smov [#allocation2]  }
 0x134   :  { %2398 = vmatprep.subr.bf16.mxu0 %v3449_v34  ;;  %2438 = vmatpush2.bf16.msra.mxu1 %v3492_v45  ;;  %s2653_s28 = sshll.u32 %s3547_s6, 4  ;;  %s2654_s28 = int_to_ptr.vmem [resolvable:$true] %s2653_s28 }
 0x135   :  { %2439 = vmatprep.subr.bf16.mxu1 %v3497_v53  ;;  %v351_v34 = vrot.slane %v4589_v41, %v350_v30  ;;  %s3524_s29 = scalar_lea.vmem %s2654_s28, 32  ;;  %p3529_p1 = scmp.lt.s32.totalorder %s2654_s28, %s2654_s28 }
 0x136   :  { %p3525_p0 = scmp.ne.s32.totalorder %s2654_s28, %s3524_s29  ;;  %p3530_p2 = scmp.lt.s32.totalorder %s3524_s29, %s3524_s29 }
 0x137   :  { %2399 = vmatpush2.bf16.msra.mxu0 %v3447_v36 }
 0x138   :  { %2400 = vmatprep.subr.bf16.mxu0 %v3452_v38  ;;  %2440 = vmatpush2.bf16.msra.mxu1 %v3495_v51  ;;  %p3531_p3 = por %p3530_p2, %p3529_p1 }
 0x139   :  { %2441 = vmatprep.subr.bf16.mxu1 %v3500_v57  ;;  %v3517_v57 = vld [vmem:[%s4705_s5 + $0x8] sm:$0xff]  }
 0x13a   :  { %p3532_p4 = pnand %p3531_p3, %p3525_p0 }
 0x13b   :  { %2401 = vmatpush2.bf16.msra.mxu0 %v3450_v44 }
 0x13c   :  { %2402 = vmatprep.subr.bf16.mxu0 %v3455_v16  ;;  %2442 = vmatpush2.bf16.msra.mxu1 %v3498_v3  ;;  %v3518_v3 = vld [vmem:[%s4705_s5 + $0x40] sm:$0xff]  }
 0x13d   :  { %2443 = vmatprep.subr.bf16.mxu1 %v3503_v2 }
 0x13f   :  { %2403 = vmatpush2.bf16.msra.mxu0 %v3453_v31 }
 0x140   :  { %2444 = vmatpush2.bf16.msra.mxu1 %v3501_v5  ;;  %2998 = vmatprep.subr.bf16.mxu0 %v3504_v18 }
 0x142   :  { %v1756_v52 = vpop.f32.mrf.mxu0 }
 0x143   :  { %v1797_v54 = vpop.f32.mrf.mxu1  ;;  %v1757_v55 = vadd.f32 %v1756_v52, %v1716_v56 }
 0x144   :  { %v1758_v62 = vpop.f32.mrf.mxu0 }
 0x145   :  { %v1799_v46 = vpop.f32.mrf.mxu1  ;;  %v1798_v58 = vadd.f32 %v1797_v54, %v1757_v55  ;;  %v1759_v59 = vadd.f32 %v1758_v62, %v1718_v49 }
 0x146   :  { %v1760_v60 = vpop.f32.mrf.mxu0 }
 0x147   :  { %v1801_v61 = vpop.f32.mrf.mxu1  ;;  %v1800_v63 = vadd.f32 %v1799_v46, %v1759_v59  ;;  %v1968_v47 = vmax.f32 %v1798_v58, 0.0  ;;  %v3516_v46 = vld [vmem:[%s4705_s5 + $0x48] sm:$0xff]   ;;  %v3519_v60 = vld [vmem:[%s4705_s5] sm:$0xff]  }
 0x148   :  { %v1761_v0 = vpop.f32.mrf.mxu0 }
 0x149   :  { %v1802_v1 = vpop.f32.mrf.mxu1  ;;  %v1969_v4 = vmax.f32 %v1800_v63, 0.0  ;;  %v1972_v7 = vpack.c.bf16 %v1968_v47, %v1968_v47  ;;  %v2040_v63 = vld [vmem:[%s4704_s4] sm:$0x3] }
 0x14a   :  { %v2045_v47 = vrot.slane %v2040_v63, %v342_v40  ;;  %v2049_v0 = vrot.slane %v2040_v63, %v346_v42 }
 0x14b   :  { %v1973_v6 = vpack.c.bf16 %v1969_v4, %v1969_v4 }
 0x14d   :  { %2404 = vmatprep.mubr.bf16.mxu0 %v1973_v6 }
 0x14e   :  { %2405 = vmatmul.mubr.bf16.vlgmr.msra.gmra.mxu0 %v1972_v7 }
 0x14f   :  { %2999 = vmatpush3.bf16.msra.mxu0 %v3505_v19 }
 0x150   :  { %3000 = vmatprep.subr.bf16.mxu0 %v3506_v20 }
 0x153   :  { %3001 = vmatpush3.bf16.msra.mxu0 %v3507_v21 }
 0x154   :  { %3002 = vmatprep.subr.bf16.mxu0 %v3508_v22 }
 0x157   :  { %3003 = vmatpush3.bf16.msra.mxu0 %v3509_v23 }
 0x158   :  { %3004 = vmatprep.subr.bf16.mxu0 %v3510_v24 }
 0x15b   :  { %3005 = vmatpush3.bf16.msra.mxu0 %v3511_v25 }
 0x15c   :  { %3006 = vmatprep.subr.bf16.mxu0 %v3512_v26 }
 0x15f   :  { %3007 = vmatpush3.bf16.msra.mxu0 %v3513_v27 }
 0x160   :  { %3008 = vmatprep.subr.bf16.mxu0 %v3514_v28 }
 0x163   :  { %3009 = vmatpush3.bf16.msra.mxu0 %v3515_v29 }
 0x164   :  { %3010 = vmatprep.subr.bf16.mxu0 %v3516_v46 }
 0x167   :  { %3011 = vmatpush3.bf16.msra.mxu0 %v3517_v57 }
 0x168   :  { %3012 = vmatprep.subr.bf16.mxu0 %v3518_v3 }
 0x16b   :  { %3013 = vmatpush3.bf16.msra.mxu0 %v3519_v60 }
 0x182   :  { %v1838_v8 = vpop.f32.mrf.mxu0 }
 0x183   :  { %v1879_v9 = vpop.f32.mrf.mxu1  ;;  %v1839_v36 = vadd.f32 %v1838_v8, %v351_v34 }
 0x184   :  { %v1840_v10 = vpop.f32.mrf.mxu0 }
 0x185   :  { %v1881_v11 = vpop.f32.mrf.mxu1  ;;  %v1841_v37 = vadd.f32 %v1840_v10, %v355_v35  ;;  %v1880_v38 = vadd.f32 %v1879_v9, %v1839_v36 }
 0x186   :  { %v1842_v12 = vpop.f32.mrf.mxu0 }
 0x187   :  { %v1883_v13 = vpop.f32.mrf.mxu1  ;;  %v1882_v45 = vadd.f32 %v1881_v11, %v1841_v37 }
 0x188   :  { %v1843_v14 = vpop.f32.mrf.mxu0 }
 0x189   :  { %v1884_v15 = vpop.f32.mrf.mxu1 }
 0x1c2   :  { %v1920_v39 = vpop.f32.mrf.mxu0 }
 0x1c3   :  { %v1961_v44 = vpop.f32.mrf.mxu1  ;;  %v1921_v16 = vadd.f32 %v1920_v39, %v1880_v38 }
 0x1c4   :  { %v1922_v17 = vpop.f32.mrf.mxu0 }
 0x1c5   :  { %v1963_v48 = vpop.f32.mrf.mxu1  ;;  %v1962_v31 = vadd.f32 %v1961_v44, %v1921_v16  ;;  %v1923_v32 = vadd.f32 %v1922_v17, %v1882_v45 }
 0x1c6   :  { %v1924_v50 = vpop.f32.mrf.mxu0 }
 0x1c7   :  { %v1965_v53 = vpop.f32.mrf.mxu1  ;;  %v1964_v56 = vadd.f32 %v1963_v48, %v1923_v32  ;;  %v1970_v51 = vmax.f32 %v1962_v31, 0.0 }
 0x1c8   :  { %v1925_v52 = vpop.f32.mrf.mxu0 }
 0x1c9   :  { %v1966_v54 = vpop.f32.mrf.mxu1  ;;  %v1971_v49 = vmax.f32 %v1964_v56, 0.0  ;;  %v1974_v41 = vpack.c.bf16 %v1970_v51, %v1970_v51 }
 0x1cb   :  { %v1975_v55 = vpack.c.bf16 %v1971_v49, %v1971_v49 }
 0x1cd   :  { %2445 = vmatprep.mubr.bf16.mxu1 %v1975_v55 }
 0x1ce   :  { %2446 = vmatmul.mubr.bf16.vlgmr.msra.gmra.mxu1 %v1974_v41 }
 0x20e   :  { %v2406_v62 = vpop.f32.mrf.mxu0 }
 0x20f   :  { %v2407_v1 = vadd.f32 %v2406_v62, %v2045_v47 }
 0x210   :  { %v2408_v58 = vpop.f32.mrf.mxu0 }
 0x211   :  { %v2409_v4 = vadd.f32 %v2408_v58, %v2049_v0 }
 0x212   :  { %v2410_v59 = vpop.f32.mrf.mxu0 }
 0x214   :  { %v2411_v61 = vpop.f32.mrf.mxu0 }
 0x28e   :  { %v2447_v2 = vpop.f32.mrf.mxu1 }
 0x28f   :  { %v2448_v5 = vadd.f32 %v2447_v2, %v2407_v1 }
 0x290   :  { %v2449_v6 = vpop.f32.mrf.mxu1 }
 0x291   :  { %v2450_v7 = vadd.f32 %v2449_v6, %v2409_v4  ;;  %v2454_v8 = vmax.f32 %v2448_v5, 0.0 }
 0x292   :  { %v2451_v9 = vpop.f32.mrf.mxu1 }
 0x293   :  { %v2455_v10 = vmax.f32 %v2450_v7, 0.0  ;;  %v2456_v13 = vpack.c.bf16 %v2454_v8, %v2454_v8 }
 0x294   :  { %v2452_v11 = vpop.f32.mrf.mxu1 }
 0x295   :  { %v2457_v12 = vpack.c.bf16 %v2455_v10, %v2455_v10 }
 0x297   :  { %2625 = vmatprep.mubr.bf16.mxu0 %v2457_v12 }
 0x298   :  { %2626 = vmatmul.mubr.bf16.vlgmr.msra.gmra.mxu0 %v2456_v13 }
 0x358   :  { %v3014_v14 = vpop.f32.mrf.mxu0 }
 0x35a   :  { %v3015_v15 = vpop.f32.mrf.mxu0 }
 0x35b   :  { %v3016_v40 = vadd.f32 %v3015_v15, %v3014_v14 }
 0x35c   :  { %v3017_v42 = vpop.f32.mrf.mxu0 }
 0x35d   :  { %v2628_v18 = vadd.f32 %v3016_v40, %v2981_v43 }
 0x35e   :  { %v3018_v19 = vpop.f32.mrf.mxu0 }
 0x35f   :  { %v2634_v20 = vsel %vm2633_vm0, %v2628_v18, -inf }
 0x360   :  { %2635 = vmax.xlane.f32.xlu0 %v2634_v20 }
 0x3e9   :  { %v2636_v21 = vpop.xlane.xlu0 %2635 }
 0x3ea   :  { %v2637_v22 = vsub.f32 %v2628_v18, %v2636_v21 }
 0x3ec   :  { %v2638_v23 = vmul.f32 1.442695, %v2637_v22 }
 0x3ee   :  { %3520 = vpow2.f32 %v2638_v23 }
 0x3fb   :  { %v3521_v24 = vpop.eup %3520 }
 0x3fc   :  { %v2640_v25 = vsel %vm2633_vm0, %v3521_v24, 0.0 }
 0x3fd   :  { %2641 = vadd.xlane.f32.xlu0 %v2640_v25 }
 0x486   :  { %v2642_v26 = vpop.xlane.xlu0 %2641 }
 0x487   :  { %3522 = vlog2.f32 %v2642_v26 }
 0x494   :  { %v3523_v27 = vpop.eup %3522 }
 0x495   :  { %v2644_v28 = vmul.f32 0.6931472, %v3523_v27 }
 0x497   :  { %v2645_v29 = vsub.f32 %v2637_v22, %v2644_v28 }
 0x499   :  { %2646 = vst.msk [vmem:[#allocation2] sm:$0x3] %vm2633_vm0, %v2645_v29 }
 0x49a   :  { %3535 = shalt.err (!%p3532_p4)
}
 0x49b   :  { %2656 = dma.vmem_to_hbm [thread:$0]  %s2654_s28, 32, %s4707_s7, [#allocation3]  }
 0x49c   :  { %3544 = dma.done.wait [#allocation3], 32  }
 0x49d   :  { %3545 = vsyncadd [#allocation3], 4294967264 }
 0x49e   :  { %2660 = vsyncpa [#allocation3], 1 }

// kernel: pointnet_mean_forward.11
= control target key start
LH: loop header
LB: loop body
LE: loop exit
PB: predicated region body
PF: predicated region fallthrough
CT: control target
= control target key end

     0   :  { %12 = vsyncpa [#allocation3], 0  ;;  %s9797_s0 = inlined_call_operand.vmem [shape: f32[2,1024], index: 0, kind: input, shape index: {}]   ;;  %s9798_s1 = inlined_call_operand.hbm [shape: bf16[1024,512], index: 1, kind: input, shape index: {}]   ;;  %s9799_s2 = inlined_call_operand.vmem [shape: f32[1,512], index: 2, kind: input, shape index: {}]   ;;  %s9800_s3 = inlined_call_operand.hbm [shape: bf16[512,256], index: 3, kind: input, shape index: {}]   ;;  %s9801_s4 = inlined_call_operand.vmem [shape: f32[1,256], index: 4, kind: input, shape index: {}]   ;;  %s9802_s5 = inlined_call_operand.vmem [shape: bf16[256,4096], index: 5, kind: input, shape index: {}]   ;;  %s9803_s6 = inlined_call_operand.vmem [shape: f32[1,4096], index: 6, kind: input, shape index: {}]   ;;  %s9804_s7 = inlined_call_operand.vmem [shape: f32[2,4096], index: 7, kind: output, shape index: {}]  }
   0x1   :  { %13 = vsyncpa [#allocation5], 0  ;;  %s7935_s24 = smov [#allocation2]  }
   0x2   :  { %s21_s25 = sshll.u32 %s7935_s24, 4  ;;  %s22_s25 = int_to_ptr.vmem [resolvable:$true] %s21_s25 }
   0x3   :  { %s7899_s26 = scalar_lea.vmem %s22_s25, 32768  ;;  %p7904_p1 = scmp.lt.s32.totalorder %s22_s25, %s22_s25 }
   0x4   :  { %p7900_p0 = scmp.ne.s32.totalorder %s22_s25, %s7899_s26  ;;  %p7905_p2 = scmp.lt.s32.totalorder %s7899_s26, %s7899_s26 }
   0x6   :  { %p7906_p3 = por %p7905_p2, %p7904_p1 }
   0x8   :  { %p7907_p4 = pnand %p7906_p3, %p7900_p0 }
   0xa   :  { %7910 = shalt.err (!%p7907_p4)
}
   0xb   :  { %s7936_s27 = smov 256   ;;  %s7937_s28 = smov 16  }
   0xc   :  { %27 = dma.hbm_to_vmem [thread:$0]  %s9798_s1, 32768, %s22_s25, [#allocation3], %s7936_s27, %s7936_s27, %s7937_s28  }
   0xd   :  { %s7938_s8 = smov [#allocation4]  }
   0xe   :  { %s35_s9 = sshll.u32 %s7938_s8, 4  ;;  %s36_s9 = int_to_ptr.vmem [resolvable:$true] %s35_s9 }
   0xf   :  { %s7919_s10 = scalar_lea.vmem %s36_s9, 8192  ;;  %p7924_p6 = scmp.lt.s32.totalorder %s36_s9, %s36_s9 }
  0x10   :  { %p7920_p5 = scmp.ne.s32.totalorder %s36_s9, %s7919_s10  ;;  %p7925_p7 = scmp.lt.s32.totalorder %s7919_s10, %s7919_s10 }
  0x12   :  { %p7926_p8 = por %p7925_p7, %p7924_p6 }
  0x14   :  { %p7927_p9 = pnand %p7926_p8, %p7920_p5 }
  0x16   :  { %7930 = shalt.err (!%p7927_p9)
}
  0x17   :  { %s7939_s11 = smov 128   ;;  %s7940_s12 = smov 8  }
  0x18   :  { %41 = dma.hbm_to_vmem [thread:$0]  %s9800_s3, 8192, %s36_s9, [#allocation5], %s7939_s11, %s7939_s11, %s7940_s12  }
  0x19   :  { %7931 = dma.done.wait [#allocation3], 32768  }
  0x1a   :  { %7932 = vsyncadd [#allocation3], 4294934528 }
  0x1b   :  { %7933 = dma.done.wait [#allocation5], 8192  }
  0x1c   :  { %7934 = vsyncadd [#allocation5], 4294959104  ;;  %v7409_v0 = vld [vmem:[#allocation2 + $0xe4] ss:$16 sps:$4 sm:$0xff]   ;;  %v7413_v2 = vld [vmem:[#allocation2 + $0xe0] ss:$16 sps:$4 sm:$0xff]   ;;  %v62_v38 = vlaneseq }
  0x1d   :  { %v7411_v1 = vld [vmem:[#allocation2 + $0x2e4] ss:$16 sps:$4 sm:$0xff]   ;;  %1666 = vmatprep.subr.bf16.mxu0 %v7409_v0  ;;  %v7414_v3 = vld [vmem:[#allocation2 + $0x2e0] ss:$16 sps:$4 sm:$0xff]   ;;  %v7941_v36 = vmov 1983009808  }
  0x1e   :  { %1707 = vmatprep.subr.bf16.mxu1 %v7411_v1  ;;  %v7415_v4 = vld [vmem:[#allocation2 + $0xc4] ss:$16 sps:$4 sm:$0xff]   ;;  %1667 = vmatpush1.bf16.msra.mxu0 %v7413_v2  ;;  %v7419_v6 = vld [vmem:[#allocation2 + $0xc0] ss:$16 sps:$4 sm:$0xff]   ;;  %v60_v37 = vunpack.c.l.s4 %v7941_v36  ;;  %v7988_v43 = vshrl.u32 %v62_v38, 7 }
  0x1f   :  { %1708 = vmatpush1.bf16.msra.mxu1 %v7414_v3  ;;  %v7417_v5 = vld [vmem:[#allocation2 + $0x2c4] ss:$16 sps:$4 sm:$0xff]   ;;  %1668 = vmatprep.subr.bf16.mxu0 %v7415_v4  ;;  %v7420_v7 = vld [vmem:[#allocation2 + $0x2c0] ss:$16 sps:$4 sm:$0xff]  }
  0x20   :  { %1709 = vmatprep.subr.bf16.mxu1 %v7417_v5  ;;  %v7421_v8 = vld [vmem:[#allocation2 + $0xa4] ss:$16 sps:$4 sm:$0xff]   ;;  %v7425_v10 = vld [vmem:[#allocation2 + $0xa0] ss:$16 sps:$4 sm:$0xff]   ;;  %v61_v42 = vunpack.c.0.s8 %v60_v37 }
  0x21   :  { %v7423_v9 = vld [vmem:[#allocation2 + $0x2a4] ss:$16 sps:$4 sm:$0xff]   ;;  %v7426_v11 = vld [vmem:[#allocation2 + $0x2a0] ss:$16 sps:$4 sm:$0xff]  }
  0x22   :  { %1669 = vmatpush1.bf16.msra.mxu0 %v7419_v6  ;;  %v7427_v12 = vld [vmem:[#allocation2 + $0x84] ss:$16 sps:$4 sm:$0xff]   ;;  %v7431_v14 = vld [vmem:[#allocation2 + $0x80] ss:$16 sps:$4 sm:$0xff]   ;;  %v7991_v49 = vsub.s32 %v61_v42, %v7988_v43  ;;  %v55_v42 = vld [vmem:[%s9797_s0 + $0x8] sm:$0xff] }
  0x23   :  { %1710 = vmatpush1.bf16.msra.mxu1 %v7420_v7  ;;  %1670 = vmatprep.subr.bf16.mxu0 %v7421_v8  ;;  %v7429_v13 = vld [vmem:[#allocation2 + $0x284] ss:$16 sps:$4 sm:$0xff]   ;;  %v7432_v15 = vld [vmem:[#allocation2 + $0x280] ss:$16 sps:$4 sm:$0xff]  }
  0x24   :  { %1711 = vmatprep.subr.bf16.mxu1 %v7423_v9  ;;  %v7433_v16 = vld [vmem:[#allocation2 + $0x64] ss:$16 sps:$4 sm:$0xff]   ;;  %v7437_v18 = vld [vmem:[#allocation2 + $0x60] ss:$16 sps:$4 sm:$0xff]  }
  0x25   :  { %v7435_v17 = vld [vmem:[#allocation2 + $0x264] ss:$16 sps:$4 sm:$0xff]   ;;  %v7438_v19 = vld [vmem:[#allocation2 + $0x260] ss:$16 sps:$4 sm:$0xff]  }
  0x26   :  { %1671 = vmatpush1.bf16.msra.mxu0 %v7425_v10  ;;  %v7439_v20 = vld [vmem:[#allocation2 + $0x44] ss:$16 sps:$4 sm:$0xff]   ;;  %v7443_v22 = vld [vmem:[#allocation2 + $0x40] ss:$16 sps:$4 sm:$0xff]  }
  0x27   :  { %1712 = vmatpush1.bf16.msra.mxu1 %v7426_v11  ;;  %1672 = vmatprep.subr.bf16.mxu0 %v7427_v12  ;;  %v7441_v21 = vld [vmem:[#allocation2 + $0x244] ss:$16 sps:$4 sm:$0xff]   ;;  %v7444_v23 = vld [vmem:[#allocation2 + $0x240] ss:$16 sps:$4 sm:$0xff]  }
  0x28   :  { %1713 = vmatprep.subr.bf16.mxu1 %v7429_v13  ;;  %v7445_v24 = vld [vmem:[#allocation2 + $0x24] ss:$16 sps:$4 sm:$0xff]   ;;  %v7449_v26 = vld [vmem:[#allocation2 + $0x20] ss:$16 sps:$4 sm:$0xff]  }
  0x29   :  { %v7447_v25 = vld [vmem:[#allocation2 + $0x224] ss:$16 sps:$4 sm:$0xff]   ;;  %v7450_v27 = vld [vmem:[#allocation2 + $0x220] ss:$16 sps:$4 sm:$0xff]  }
  0x2a   :  { %1673 = vmatpush1.bf16.msra.mxu0 %v7431_v14  ;;  %v7451_v28 = vld [vmem:[#allocation2 + $0x4] ss:$16 sps:$4 sm:$0xff]   ;;  %v7455_v30 = vld [vmem:[#allocation2] ss:$16 sps:$4 sm:$0xff]  }
  0x2b   :  { %1714 = vmatpush1.bf16.msra.mxu1 %v7432_v15  ;;  %1674 = vmatprep.subr.bf16.mxu0 %v7433_v16  ;;  %v7453_v29 = vld [vmem:[#allocation2 + $0x204] ss:$16 sps:$4 sm:$0xff]   ;;  %v7456_v31 = vld [vmem:[#allocation2 + $0x200] ss:$16 sps:$4 sm:$0xff]  }
  0x2c   :  { %1715 = vmatprep.subr.bf16.mxu1 %v7435_v17  ;;  %v7457_v32 = vld [vmem:[#allocation2 + $0x1e4] ss:$16 sps:$4 sm:$0xff]   ;;  %v7461_v34 = vld [vmem:[#allocation2 + $0x1e0] ss:$16 sps:$4 sm:$0xff]  }
  0x2d   :  { %v7459_v33 = vld [vmem:[#allocation2 + $0x3e4] ss:$16 sps:$4 sm:$0xff]   ;;  %v7462_v35 = vld [vmem:[#allocation2 + $0x3e0] ss:$16 sps:$4 sm:$0xff]  }
  0x2e   :  { %1675 = vmatpush1.bf16.msra.mxu0 %v7437_v18  ;;  %v7463_v39 = vld [vmem:[#allocation2 + $0x1c4] ss:$16 sps:$4 sm:$0xff]   ;;  %v7467_v41 = vld [vmem:[#allocation2 + $0x1c0] ss:$16 sps:$4 sm:$0xff]  }
  0x2f   :  { %1716 = vmatpush1.bf16.msra.mxu1 %v7438_v19  ;;  %1676 = vmatprep.subr.bf16.mxu0 %v7439_v20  ;;  %v7465_v40 = vld [vmem:[#allocation2 + $0x3c4] ss:$16 sps:$4 sm:$0xff]   ;;  %v7468_v44 = vld [vmem:[#allocation2 + $0x3c0] ss:$16 sps:$4 sm:$0xff]  }
  0x30   :  { %1717 = vmatprep.subr.bf16.mxu1 %v7441_v21  ;;  %v7469_v45 = vld [vmem:[#allocation2 + $0x1a4] ss:$16 sps:$4 sm:$0xff]   ;;  %v7473_v47 = vld [vmem:[#allocation2 + $0x1a0] ss:$16 sps:$4 sm:$0xff]  }
  0x31   :  { %v7471_v46 = vld [vmem:[#allocation2 + $0x3a4] ss:$16 sps:$4 sm:$0xff]   ;;  %v7474_v48 = vld [vmem:[#allocation2 + $0x3a0] ss:$16 sps:$4 sm:$0xff]  }
  0x32   :  { %1677 = vmatpush1.bf16.msra.mxu0 %v7443_v22  ;;  %v7475_v50 = vld [vmem:[#allocation2 + $0x184] ss:$16 sps:$4 sm:$0xff]   ;;  %v7479_v53 = vld [vmem:[#allocation2 + $0x180] ss:$16 sps:$4 sm:$0xff]  }
  0x33   :  { %1718 = vmatpush1.bf16.msra.mxu1 %v7444_v23  ;;  %1678 = vmatprep.subr.bf16.mxu0 %v7445_v24  ;;  %v7477_v51 = vld [vmem:[#allocation2 + $0x384] ss:$16 sps:$4 sm:$0xff]   ;;  %v7480_v56 = vld [vmem:[#allocation2 + $0x380] ss:$16 sps:$4 sm:$0xff]  }
  0x34   :  { %1719 = vmatprep.subr.bf16.mxu1 %v7447_v25  ;;  %v54_v52 = vld [vmem:[%s9797_s0] sm:$0xff] }
  0x35   :  { %v65_v54 = vrot.slane %v54_v52, %v7991_v49  ;;  %v58_v55 = vcombine.high %v54_v52, %v54_v52  ;;  %v7481_v57 = vld [vmem:[#allocation2 + $0x164] ss:$16 sps:$4 sm:$0xff]   ;;  %v7485_v61 = vld [vmem:[#allocation2 + $0x160] ss:$16 sps:$4 sm:$0xff]  }
  0x36   :  { %1679 = vmatpush1.bf16.msra.mxu0 %v7449_v26  ;;  %v7483_v58 = vld [vmem:[#allocation2 + $0x364] ss:$16 sps:$4 sm:$0xff]   ;;  %v7486_v0 = vld [vmem:[#allocation2 + $0x360] ss:$16 sps:$4 sm:$0xff]  }
  0x37   :  { %1720 = vmatpush1.bf16.msra.mxu1 %v7450_v27  ;;  %1680 = vmatprep.subr.bf16.mxu0 %v7451_v28  ;;  %v73_v59 = vcombine.high %v65_v54, %v65_v54  ;;  %v72_v60 = vrot.slane %v58_v55, %v7991_v49  ;;  %v7487_v1 = vld [vmem:[#allocation2 + $0x144] ss:$16 sps:$4 sm:$0xff]   ;;  %v7491_v4 = vld [vmem:[#allocation2 + $0x140] ss:$16 sps:$4 sm:$0xff]   ;;  %v8004_v16 = vpack.c.bf16 %v65_v54, %v65_v54 }
  0x38   :  { %1721 = vmatprep.subr.bf16.mxu1 %v7453_v29  ;;  %v7489_v2 = vld [vmem:[#allocation2 + $0x344] ss:$16 sps:$4 sm:$0xff]   ;;  %v7492_v5 = vld [vmem:[#allocation2 + $0x340] ss:$16 sps:$4 sm:$0xff]  }
  0x39   :  { %v7998_v62 = vpack.c.bf16 %v73_v59, %v73_v59  ;;  %v74_v63 = vcombine.high %v72_v60, %v72_v60  ;;  %v7493_v6 = vld [vmem:[#allocation2 + $0x124] ss:$16 sps:$4 sm:$0xff]   ;;  %v7497_v8 = vld [vmem:[#allocation2 + $0x120] ss:$16 sps:$4 sm:$0xff]   ;;  %v8006_v17 = vpack.c.bf16 %v72_v60, %v72_v60 }
  0x3a   :  { %1681 = vmatpush1.bf16.msra.mxu0 %v7455_v30  ;;  %v7495_v7 = vld [vmem:[#allocation2 + $0x324] ss:$16 sps:$4 sm:$0xff]   ;;  %v7498_v9 = vld [vmem:[#allocation2 + $0x320] ss:$16 sps:$4 sm:$0xff]  }
  0x3b   :  { %1722 = vmatpush1.bf16.msra.mxu1 %v7456_v31  ;;  %1682 = vmatprep.subr.bf16.mxu0 %v7457_v32  ;;  %v8000_v3 = vpack.c.bf16 %v74_v63, %v74_v63  ;;  %v7499_v10 = vld [vmem:[#allocation2 + $0x104] ss:$16 sps:$4 sm:$0xff]   ;;  %v7503_v12 = vld [vmem:[#allocation2 + $0x100] ss:$16 sps:$4 sm:$0xff]  }
  0x3c   :  { %1723 = vmatprep.subr.bf16.mxu1 %v7459_v33  ;;  %1698 = vmatprep.mubr.bf16.mxu0 %v7998_v62  ;;  %v7501_v11 = vld [vmem:[#allocation2 + $0x304] ss:$16 sps:$4 sm:$0xff]   ;;  %v7504_v13 = vld [vmem:[#allocation2 + $0x300] ss:$16 sps:$4 sm:$0xff]  }
  0x3d   :  { %1739 = vmatprep.mubr.bf16.mxu1 %v8000_v3  ;;  %v7508_v14 = vld [vmem:[#allocation2 + $0x4e4] ss:$16 sps:$4 sm:$0xff]   ;;  %v7506_v18 = vld [vmem:[#allocation2 + $0x4e0] ss:$16 sps:$4 sm:$0xff]  }
  0x3e   :  { %1683 = vmatpush2.bf16.msra.mxu0 %v7461_v34  ;;  %v7511_v15 = vld [vmem:[#allocation2 + $0x6e4] ss:$16 sps:$4 sm:$0xff]   ;;  %v7509_v19 = vld [vmem:[#allocation2 + $0x6e0] ss:$16 sps:$4 sm:$0xff]  }
  0x3f   :  { %1724 = vmatpush2.bf16.msra.mxu1 %v7462_v35  ;;  %1684 = vmatprep.subr.bf16.mxu0 %v7463_v39  ;;  %v7514_v20 = vld [vmem:[#allocation2 + $0x4c4] ss:$16 sps:$4 sm:$0xff]   ;;  %v7512_v22 = vld [vmem:[#allocation2 + $0x4c0] ss:$16 sps:$4 sm:$0xff]  }
  0x40   :  { %1725 = vmatprep.subr.bf16.mxu1 %v7465_v40  ;;  %v7517_v21 = vld [vmem:[#allocation2 + $0x6c4] ss:$16 sps:$4 sm:$0xff]   ;;  %v7515_v23 = vld [vmem:[#allocation2 + $0x6c0] ss:$16 sps:$4 sm:$0xff]  }
  0x41   :  { %v7520_v24 = vld [vmem:[#allocation2 + $0x4a4] ss:$16 sps:$4 sm:$0xff]   ;;  %v7518_v26 = vld [vmem:[#allocation2 + $0x4a0] ss:$16 sps:$4 sm:$0xff]  }
  0x42   :  { %1685 = vmatpush2.bf16.msra.mxu0 %v7467_v41  ;;  %v7523_v25 = vld [vmem:[#allocation2 + $0x6a4] ss:$16 sps:$4 sm:$0xff]   ;;  %v7521_v27 = vld [vmem:[#allocation2 + $0x6a0] ss:$16 sps:$4 sm:$0xff]  }
  0x43   :  { %1726 = vmatpush2.bf16.msra.mxu1 %v7468_v44  ;;  %1686 = vmatprep.subr.bf16.mxu0 %v7469_v45  ;;  %v7526_v28 = vld [vmem:[#allocation2 + $0x484] ss:$16 sps:$4 sm:$0xff]   ;;  %v7524_v30 = vld [vmem:[#allocation2 + $0x480] ss:$16 sps:$4 sm:$0xff]   ;;  %v8014_v44 = vrot.slane %v55_v42, %v7991_v49  ;;  %v75_v45 = vcombine.high %v55_v42, %v55_v42  ;;  %v7615_v42 = vld [vmem:[#allocation2 + $0xa8] ss:$16 sps:$4 sm:$0xff]  }
  0x44   :  { %1727 = vmatprep.subr.bf16.mxu1 %v7471_v46  ;;  %v7529_v29 = vld [vmem:[#allocation2 + $0x684] ss:$16 sps:$4 sm:$0xff]   ;;  %v7527_v31 = vld [vmem:[#allocation2 + $0x680] ss:$16 sps:$4 sm:$0xff]  }
  0x45   :  { %v7532_v32 = vld [vmem:[#allocation2 + $0x464] ss:$16 sps:$4 sm:$0xff]   ;;  %v7530_v34 = vld [vmem:[#allocation2 + $0x460] ss:$16 sps:$4 sm:$0xff]  }
  0x46   :  { %1687 = vmatpush2.bf16.msra.mxu0 %v7473_v47  ;;  %v7535_v33 = vld [vmem:[#allocation2 + $0x664] ss:$16 sps:$4 sm:$0xff]   ;;  %v7533_v35 = vld [vmem:[#allocation2 + $0x660] ss:$16 sps:$4 sm:$0xff]  }
  0x47   :  { %1728 = vmatpush2.bf16.msra.mxu1 %v7474_v48  ;;  %1688 = vmatprep.subr.bf16.mxu0 %v7475_v50  ;;  %v7538_v36 = vld [vmem:[#allocation2 + $0x444] ss:$16 sps:$4 sm:$0xff]   ;;  %v7536_v38 = vld [vmem:[#allocation2 + $0x440] ss:$16 sps:$4 sm:$0xff]   ;;  %v90_v48 = vcombine.high %v8014_v44, %v8014_v44  ;;  %v8019_v50 = vrot.slane %v75_v45, %v7991_v49  ;;  %v7623_v45 = vld [vmem:[#allocation2 + $0x8c] ss:$16 sps:$4 sm:$0xff]  }
  0x48   :  { %1729 = vmatprep.subr.bf16.mxu1 %v7477_v51  ;;  %v7541_v37 = vld [vmem:[#allocation2 + $0x644] ss:$16 sps:$4 sm:$0xff]   ;;  %v7539_v39 = vld [vmem:[#allocation2 + $0x640] ss:$16 sps:$4 sm:$0xff]  }
  0x49   :  { %v7544_v40 = vld [vmem:[#allocation2 + $0x424] ss:$16 sps:$4 sm:$0xff]   ;;  %v7542_v46 = vld [vmem:[#allocation2 + $0x420] ss:$16 sps:$4 sm:$0xff]   ;;  %v91_v54 = vcombine.high %v8019_v50, %v8019_v50 }
  0x4a   :  { %1689 = vmatpush2.bf16.msra.mxu0 %v7479_v53  ;;  %v7547_v41 = vld [vmem:[#allocation2 + $0x624] ss:$16 sps:$4 sm:$0xff]   ;;  %v7545_v47 = vld [vmem:[#allocation2 + $0x620] ss:$16 sps:$4 sm:$0xff]   ;;  %v8021_v53 = vpack.c.bf16 %v90_v48, %v90_v48  ;;  %v7624_v48 = vld [vmem:[#allocation2 + $0x288] ss:$16 sps:$4 sm:$0xff]  }
  0x4b   :  { %1730 = vmatpush2.bf16.msra.mxu1 %v7480_v56  ;;  %1690 = vmatprep.subr.bf16.mxu0 %v7481_v57  ;;  %v7550_v51 = vld [vmem:[#allocation2 + $0x404] ss:$16 sps:$4 sm:$0xff]   ;;  %v7548_v55 = vld [vmem:[#allocation2 + $0x400] ss:$16 sps:$4 sm:$0xff]   ;;  %v8025_v57 = vpack.c.bf16 %v91_v54, %v91_v54  ;;  %v7638_v54 = vld [vmem:[#allocation2 + $0x24c] ss:$16 sps:$4 sm:$0xff]  }
  0x4c   :  { %1731 = vmatprep.subr.bf16.mxu1 %v7483_v58  ;;  %v7553_v52 = vld [vmem:[#allocation2 + $0x604] ss:$16 sps:$4 sm:$0xff]   ;;  %v7551_v56 = vld [vmem:[#allocation2 + $0x600] ss:$16 sps:$4 sm:$0xff]  }
  0x4d   :  { %v7556_v58 = vld [vmem:[#allocation2 + $0x5e4] ss:$16 sps:$4 sm:$0xff]   ;;  %v7554_v60 = vld [vmem:[#allocation2 + $0x5e0] ss:$16 sps:$4 sm:$0xff]  }
  0x4e   :  { %1691 = vmatpush2.bf16.msra.mxu0 %v7485_v61  ;;  %v7559_v59 = vld [vmem:[#allocation2 + $0x7e4] ss:$16 sps:$4 sm:$0xff]   ;;  %v7557_v61 = vld [vmem:[#allocation2 + $0x7e0] ss:$16 sps:$4 sm:$0xff]  }
  0x4f   :  { %1732 = vmatpush2.bf16.msra.mxu1 %v7486_v0  ;;  %1692 = vmatprep.subr.bf16.mxu0 %v7487_v1  ;;  %v7562_v63 = vld [vmem:[#allocation2 + $0x5c4] ss:$16 sps:$4 sm:$0xff]   ;;  %v7560_v1 = vld [vmem:[#allocation2 + $0x5c0] ss:$16 sps:$4 sm:$0xff]  }
  0x50   :  { %1733 = vmatprep.subr.bf16.mxu1 %v7489_v2  ;;  %v7565_v0 = vld [vmem:[#allocation2 + $0x7c4] ss:$16 sps:$4 sm:$0xff]   ;;  %v7563_v2 = vld [vmem:[#allocation2 + $0x7c0] ss:$16 sps:$4 sm:$0xff]  }
  0x52   :  { %1693 = vmatpush2.bf16.msra.mxu0 %v7491_v4  ;;  %v7568_v4 = vld [vmem:[#allocation2 + $0x5a4] ss:$16 sps:$4 sm:$0xff]  }
  0x53   :  { %1734 = vmatpush2.bf16.msra.mxu1 %v7492_v5  ;;  %1694 = vmatprep.subr.bf16.mxu0 %v7493_v6  ;;  %v7571_v5 = vld [vmem:[#allocation2 + $0x7a4] ss:$16 sps:$4 sm:$0xff]   ;;  %v7566_v6 = vld [vmem:[#allocation2 + $0x5a0] ss:$16 sps:$4 sm:$0xff]  }
  0x54   :  { %1735 = vmatprep.subr.bf16.mxu1 %v7495_v7  ;;  %v7569_v7 = vld [vmem:[#allocation2 + $0x7a0] ss:$16 sps:$4 sm:$0xff]  }
  0x56   :  { %1695 = vmatpush2.bf16.msra.mxu0 %v7497_v8  ;;  %v7574_v8 = vld [vmem:[#allocation2 + $0x584] ss:$16 sps:$4 sm:$0xff]  }
  0x57   :  { %1736 = vmatpush2.bf16.msra.mxu1 %v7498_v9  ;;  %1696 = vmatprep.subr.bf16.mxu0 %v7499_v10  ;;  %v7577_v9 = vld [vmem:[#allocation2 + $0x784] ss:$16 sps:$4 sm:$0xff]   ;;  %v7572_v10 = vld [vmem:[#allocation2 + $0x580] ss:$16 sps:$4 sm:$0xff]  }
  0x58   :  { %1737 = vmatprep.subr.bf16.mxu1 %v7501_v11  ;;  %v7575_v11 = vld [vmem:[#allocation2 + $0x780] ss:$16 sps:$4 sm:$0xff]  }
  0x5a   :  { %1697 = vmatpush2.bf16.msra.mxu0 %v7503_v12  ;;  %v7580_v12 = vld [vmem:[#allocation2 + $0x564] ss:$16 sps:$4 sm:$0xff]  }
  0x5b   :  { %1738 = vmatpush2.bf16.msra.mxu1 %v7504_v13  ;;  %1748 = vmatprep.subr.bf16.mxu0 %v7508_v14  ;;  %v7583_v13 = vld [vmem:[#allocation2 + $0x764] ss:$16 sps:$4 sm:$0xff]   ;;  %v7578_v14 = vld [vmem:[#allocation2 + $0x560] ss:$16 sps:$4 sm:$0xff]  }
  0x5c   :  { %1789 = vmatprep.subr.bf16.mxu1 %v7511_v15  ;;  %v7581_v15 = vld [vmem:[#allocation2 + $0x760] ss:$16 sps:$4 sm:$0xff]  }
  0x5d   :  { %1699 = vmatmul.mubr.bf16.vlgmr.msra.gmra.mxu0 %v8004_v16 }
  0x5e   :  { %1740 = vmatmul.mubr.bf16.vlgmr.msra.gmra.mxu1 %v8006_v17  ;;  %1749 = vmatpush1.bf16.msra.mxu0 %v7506_v18  ;;  %v7586_v18 = vld [vmem:[#allocation2 + $0x544] ss:$16 sps:$4 sm:$0xff]  }
  0x5f   :  { %1790 = vmatpush1.bf16.msra.mxu1 %v7509_v19  ;;  %1750 = vmatprep.subr.bf16.mxu0 %v7514_v20  ;;  %v7589_v19 = vld [vmem:[#allocation2 + $0x744] ss:$16 sps:$4 sm:$0xff]   ;;  %v7584_v20 = vld [vmem:[#allocation2 + $0x540] ss:$16 sps:$4 sm:$0xff]  }
  0x60   :  { %1791 = vmatprep.subr.bf16.mxu1 %v7517_v21  ;;  %1780 = vmatprep.mubr.bf16.mxu0 %v8021_v53  ;;  %v7587_v21 = vld [vmem:[#allocation2 + $0x740] ss:$16 sps:$4 sm:$0xff]  }
  0x61   :  { %1821 = vmatprep.mubr.bf16.mxu1 %v8025_v57 }
  0x62   :  { %1751 = vmatpush1.bf16.msra.mxu0 %v7512_v22  ;;  %v7592_v22 = vld [vmem:[#allocation2 + $0x524] ss:$16 sps:$4 sm:$0xff]  }
  0x63   :  { %1792 = vmatpush1.bf16.msra.mxu1 %v7515_v23  ;;  %1752 = vmatprep.subr.bf16.mxu0 %v7520_v24  ;;  %v7595_v23 = vld [vmem:[#allocation2 + $0x724] ss:$16 sps:$4 sm:$0xff]   ;;  %v7590_v24 = vld [vmem:[#allocation2 + $0x520] ss:$16 sps:$4 sm:$0xff]  }
  0x64   :  { %1793 = vmatprep.subr.bf16.mxu1 %v7523_v25  ;;  %v7593_v25 = vld [vmem:[#allocation2 + $0x720] ss:$16 sps:$4 sm:$0xff]  }
  0x66   :  { %1753 = vmatpush1.bf16.msra.mxu0 %v7518_v26  ;;  %v7598_v26 = vld [vmem:[#allocation2 + $0x504] ss:$16 sps:$4 sm:$0xff]  }
  0x67   :  { %1794 = vmatpush1.bf16.msra.mxu1 %v7521_v27  ;;  %1754 = vmatprep.subr.bf16.mxu0 %v7526_v28  ;;  %v7601_v27 = vld [vmem:[#allocation2 + $0x704] ss:$16 sps:$4 sm:$0xff]   ;;  %v7596_v28 = vld [vmem:[#allocation2 + $0x500] ss:$16 sps:$4 sm:$0xff]  }
  0x68   :  { %1795 = vmatprep.subr.bf16.mxu1 %v7529_v29  ;;  %v7599_v29 = vld [vmem:[#allocation2 + $0x700] ss:$16 sps:$4 sm:$0xff]  }
  0x6a   :  { %1755 = vmatpush1.bf16.msra.mxu0 %v7524_v30  ;;  %v7605_v30 = vld [vmem:[#allocation2 + $0xec] ss:$16 sps:$4 sm:$0xff]  }
  0x6b   :  { %1796 = vmatpush1.bf16.msra.mxu1 %v7527_v31  ;;  %1756 = vmatprep.subr.bf16.mxu0 %v7532_v32  ;;  %v7608_v31 = vld [vmem:[#allocation2 + $0x2ec] ss:$16 sps:$4 sm:$0xff]   ;;  %v8031_v32 = vpack.c.bf16 %v8014_v44, %v8014_v44  ;;  %v7618_v44 = vld [vmem:[#allocation2 + $0x2a8] ss:$16 sps:$4 sm:$0xff]  }
  0x6c   :  { %1797 = vmatprep.subr.bf16.mxu1 %v7535_v33  ;;  %v8035_v33 = vpack.c.bf16 %v8019_v50, %v8019_v50  ;;  %v7629_v50 = vld [vmem:[#allocation2 + $0x6c] ss:$16 sps:$4 sm:$0xff]  }
  0x6e   :  { %1757 = vmatpush1.bf16.msra.mxu0 %v7530_v34  ;;  %v7603_v34 = vld [vmem:[#allocation2 + $0xe8] ss:$16 sps:$4 sm:$0xff]  }
  0x6f   :  { %1798 = vmatpush1.bf16.msra.mxu1 %v7533_v35  ;;  %1758 = vmatprep.subr.bf16.mxu0 %v7538_v36  ;;  %v7606_v35 = vld [vmem:[#allocation2 + $0x2e8] ss:$16 sps:$4 sm:$0xff]   ;;  %v7611_v36 = vld [vmem:[#allocation2 + $0xcc] ss:$16 sps:$4 sm:$0xff]  }
  0x70   :  { %1799 = vmatprep.subr.bf16.mxu1 %v7541_v37  ;;  %v7614_v37 = vld [vmem:[#allocation2 + $0x2cc] ss:$16 sps:$4 sm:$0xff]  }
  0x72   :  { %1759 = vmatpush1.bf16.msra.mxu0 %v7536_v38  ;;  %v7609_v38 = vld [vmem:[#allocation2 + $0xc8] ss:$16 sps:$4 sm:$0xff]  }
  0x73   :  { %1800 = vmatpush1.bf16.msra.mxu1 %v7539_v39  ;;  %1760 = vmatprep.subr.bf16.mxu0 %v7544_v40  ;;  %v7612_v39 = vld [vmem:[#allocation2 + $0x2c8] ss:$16 sps:$4 sm:$0xff]   ;;  %v7617_v40 = vld [vmem:[#allocation2 + $0xac] ss:$16 sps:$4 sm:$0xff]  }
  0x74   :  { %1801 = vmatprep.subr.bf16.mxu1 %v7547_v41  ;;  %v7620_v41 = vld [vmem:[#allocation2 + $0x2ac] ss:$16 sps:$4 sm:$0xff]  }
  0x76   :  { %1761 = vmatpush1.bf16.msra.mxu0 %v7542_v46  ;;  %v7626_v46 = vld [vmem:[#allocation2 + $0x28c] ss:$16 sps:$4 sm:$0xff]  }
  0x77   :  { %1802 = vmatpush1.bf16.msra.mxu1 %v7545_v47  ;;  %1762 = vmatprep.subr.bf16.mxu0 %v7550_v51  ;;  %v7621_v47 = vld [vmem:[#allocation2 + $0x88] ss:$16 sps:$4 sm:$0xff]   ;;  %v7632_v51 = vld [vmem:[#allocation2 + $0x26c] ss:$16 sps:$4 sm:$0xff]  }
  0x78   :  { %1803 = vmatprep.subr.bf16.mxu1 %v7553_v52  ;;  %v7635_v52 = vld [vmem:[#allocation2 + $0x4c] ss:$16 sps:$4 sm:$0xff]  }
  0x7a   :  { %1763 = vmatpush1.bf16.msra.mxu0 %v7548_v55  ;;  %v7633_v55 = vld [vmem:[#allocation2 + $0x48] ss:$16 sps:$4 sm:$0xff]  }
  0x7b   :  { %1804 = vmatpush1.bf16.msra.mxu1 %v7551_v56  ;;  %1764 = vmatprep.subr.bf16.mxu0 %v7556_v58  ;;  %v7636_v56 = vld [vmem:[#allocation2 + $0x248] ss:$16 sps:$4 sm:$0xff]   ;;  %v7641_v58 = vld [vmem:[#allocation2 + $0x2c] ss:$16 sps:$4 sm:$0xff]  }
  0x7c   :  { %1805 = vmatprep.subr.bf16.mxu1 %v7559_v59  ;;  %v7644_v59 = vld [vmem:[#allocation2 + $0x22c] ss:$16 sps:$4 sm:$0xff]  }
  0x7e   :  { %1765 = vmatpush2.bf16.msra.mxu0 %v7554_v60  ;;  %v7639_v60 = vld [vmem:[#allocation2 + $0x28] ss:$16 sps:$4 sm:$0xff]  }
  0x7f   :  { %1806 = vmatpush2.bf16.msra.mxu1 %v7557_v61  ;;  %1766 = vmatprep.subr.bf16.mxu0 %v7562_v63  ;;  %v7642_v61 = vld [vmem:[#allocation2 + $0x228] ss:$16 sps:$4 sm:$0xff]   ;;  %v7647_v63 = vld [vmem:[#allocation2 + $0xc] ss:$16 sps:$4 sm:$0xff]  }
  0x80   :  { %1807 = vmatprep.subr.bf16.mxu1 %v7565_v0  ;;  %v7650_v0 = vld [vmem:[#allocation2 + $0x20c] ss:$16 sps:$4 sm:$0xff]  }
  0x82   :  { %1767 = vmatpush2.bf16.msra.mxu0 %v7560_v1  ;;  %v7645_v1 = vld [vmem:[#allocation2 + $0x8] ss:$16 sps:$4 sm:$0xff]  }
  0x83   :  { %1808 = vmatpush2.bf16.msra.mxu1 %v7563_v2  ;;  %1768 = vmatprep.subr.bf16.mxu0 %v7568_v4  ;;  %v7648_v2 = vld [vmem:[#allocation2 + $0x208] ss:$16 sps:$4 sm:$0xff]   ;;  %v7653_v4 = vld [vmem:[#allocation2 + $0x1ec] ss:$16 sps:$4 sm:$0xff]  }
  0x84   :  { %1809 = vmatprep.subr.bf16.mxu1 %v7571_v5  ;;  %v7656_v5 = vld [vmem:[#allocation2 + $0x3ec] ss:$16 sps:$4 sm:$0xff]  }
  0x86   :  { %1769 = vmatpush2.bf16.msra.mxu0 %v7566_v6  ;;  %v7651_v6 = vld [vmem:[#allocation2 + $0x1e8] ss:$16 sps:$4 sm:$0xff]  }
  0x87   :  { %1810 = vmatpush2.bf16.msra.mxu1 %v7569_v7  ;;  %1770 = vmatprep.subr.bf16.mxu0 %v7574_v8  ;;  %v7654_v7 = vld [vmem:[#allocation2 + $0x3e8] ss:$16 sps:$4 sm:$0xff]   ;;  %v7659_v8 = vld [vmem:[#allocation2 + $0x1cc] ss:$16 sps:$4 sm:$0xff]  }
  0x88   :  { %1811 = vmatprep.subr.bf16.mxu1 %v7577_v9  ;;  %v7662_v9 = vld [vmem:[#allocation2 + $0x3cc] ss:$16 sps:$4 sm:$0xff]  }
  0x8a   :  { %1771 = vmatpush2.bf16.msra.mxu0 %v7572_v10  ;;  %v7657_v10 = vld [vmem:[#allocation2 + $0x1c8] ss:$16 sps:$4 sm:$0xff]  }
  0x8b   :  { %1812 = vmatpush2.bf16.msra.mxu1 %v7575_v11  ;;  %1772 = vmatprep.subr.bf16.mxu0 %v7580_v12  ;;  %v7660_v11 = vld [vmem:[#allocation2 + $0x3c8] ss:$16 sps:$4 sm:$0xff]   ;;  %v7665_v12 = vld [vmem:[#allocation2 + $0x1ac] ss:$16 sps:$4 sm:$0xff]  }
  0x8c   :  { %1813 = vmatprep.subr.bf16.mxu1 %v7583_v13  ;;  %v7668_v13 = vld [vmem:[#allocation2 + $0x3ac] ss:$16 sps:$4 sm:$0xff]  }
  0x8e   :  { %1773 = vmatpush2.bf16.msra.mxu0 %v7578_v14  ;;  %v7663_v14 = vld [vmem:[#allocation2 + $0x1a8] ss:$16 sps:$4 sm:$0xff]  }
  0x8f   :  { %1814 = vmatpush2.bf16.msra.mxu1 %v7581_v15  ;;  %1774 = vmatprep.subr.bf16.mxu0 %v7586_v18  ;;  %v7666_v15 = vld [vmem:[#allocation2 + $0x3a8] ss:$16 sps:$4 sm:$0xff]   ;;  %v7671_v18 = vld [vmem:[#allocation2 + $0x18c] ss:$16 sps:$4 sm:$0xff]  }
  0x90   :  { %1815 = vmatprep.subr.bf16.mxu1 %v7589_v19  ;;  %v7674_v19 = vld [vmem:[#allocation2 + $0x38c] ss:$16 sps:$4 sm:$0xff]  }
  0x92   :  { %1775 = vmatpush2.bf16.msra.mxu0 %v7584_v20  ;;  %v7669_v20 = vld [vmem:[#allocation2 + $0x188] ss:$16 sps:$4 sm:$0xff]  }
  0x93   :  { %1816 = vmatpush2.bf16.msra.mxu1 %v7587_v21  ;;  %1776 = vmatprep.subr.bf16.mxu0 %v7592_v22  ;;  %v7672_v21 = vld [vmem:[#allocation2 + $0x388] ss:$16 sps:$4 sm:$0xff]   ;;  %v7677_v22 = vld [vmem:[#allocation2 + $0x16c] ss:$16 sps:$4 sm:$0xff]  }
  0x94   :  { %1817 = vmatprep.subr.bf16.mxu1 %v7595_v23  ;;  %v7680_v23 = vld [vmem:[#allocation2 + $0x36c] ss:$16 sps:$4 sm:$0xff]  }
  0x96   :  { %1777 = vmatpush2.bf16.msra.mxu0 %v7590_v24  ;;  %v7675_v24 = vld [vmem:[#allocation2 + $0x168] ss:$16 sps:$4 sm:$0xff]  }
  0x97   :  { %1818 = vmatpush2.bf16.msra.mxu1 %v7593_v25  ;;  %1778 = vmatprep.subr.bf16.mxu0 %v7598_v26  ;;  %v7678_v25 = vld [vmem:[#allocation2 + $0x368] ss:$16 sps:$4 sm:$0xff]   ;;  %v7683_v26 = vld [vmem:[#allocation2 + $0x14c] ss:$16 sps:$4 sm:$0xff]  }
  0x98   :  { %1819 = vmatprep.subr.bf16.mxu1 %v7601_v27  ;;  %v7686_v27 = vld [vmem:[#allocation2 + $0x34c] ss:$16 sps:$4 sm:$0xff]  }
  0x9a   :  { %1779 = vmatpush2.bf16.msra.mxu0 %v7596_v28  ;;  %v7681_v28 = vld [vmem:[#allocation2 + $0x148] ss:$16 sps:$4 sm:$0xff]  }
  0x9b   :  { %1820 = vmatpush2.bf16.msra.mxu1 %v7599_v29  ;;  %1830 = vmatprep.subr.bf16.mxu0 %v7605_v30  ;;  %v7684_v29 = vld [vmem:[#allocation2 + $0x348] ss:$16 sps:$4 sm:$0xff]   ;;  %v7689_v30 = vld [vmem:[#allocation2 + $0x12c] ss:$16 sps:$4 sm:$0xff]  }
  0x9c   :  { %1871 = vmatprep.subr.bf16.mxu1 %v7608_v31  ;;  %v7692_v31 = vld [vmem:[#allocation2 + $0x32c] ss:$16 sps:$4 sm:$0xff]  }
  0x9d   :  { %1781 = vmatmul.mubr.bf16.vlgmr.msra.gmra.mxu0 %v8031_v32 }
  0x9e   :  { %1822 = vmatmul.mubr.bf16.vlgmr.msra.gmra.mxu1 %v8035_v33  ;;  %1831 = vmatpush1.bf16.msra.mxu0 %v7603_v34  ;;  %v7687_v34 = vld [vmem:[#allocation2 + $0x128] ss:$16 sps:$4 sm:$0xff]  }
  0x9f   :  { %1872 = vmatpush1.bf16.msra.mxu1 %v7606_v35  ;;  %1832 = vmatprep.subr.bf16.mxu0 %v7611_v36  ;;  %v7690_v35 = vld [vmem:[#allocation2 + $0x328] ss:$16 sps:$4 sm:$0xff]   ;;  %v7695_v36 = vld [vmem:[#allocation2 + $0x10c] ss:$16 sps:$4 sm:$0xff]  }
  0xa0   :  { %1873 = vmatprep.subr.bf16.mxu1 %v7614_v37  ;;  %1862 = vmatprep.mubr.bf16.mxu0 %v7998_v62  ;;  %v7627_v62 = vld [vmem:[#allocation2 + $0x68] ss:$16 sps:$4 sm:$0xff]   ;;  %v7698_v37 = vld [vmem:[#allocation2 + $0x30c] ss:$16 sps:$4 sm:$0xff]  }
  0xa1   :  { %1903 = vmatprep.mubr.bf16.mxu1 %v8000_v3  ;;  %v7630_v3 = vld [vmem:[#allocation2 + $0x268] ss:$16 sps:$4 sm:$0xff]  }
  0xa2   :  { %1833 = vmatpush1.bf16.msra.mxu0 %v7609_v38  ;;  %v7693_v38 = vld [vmem:[#allocation2 + $0x108] ss:$16 sps:$4 sm:$0xff]  }
  0xa3   :  { %1874 = vmatpush1.bf16.msra.mxu1 %v7612_v39  ;;  %1834 = vmatprep.subr.bf16.mxu0 %v7617_v40  ;;  %v7696_v39 = vld [vmem:[#allocation2 + $0x308] ss:$16 sps:$4 sm:$0xff]   ;;  %v7701_v40 = vld [vmem:[#allocation2 + $0x4ec] ss:$16 sps:$4 sm:$0xff]  }
  0xa4   :  { %1875 = vmatprep.subr.bf16.mxu1 %v7620_v41  ;;  %v7704_v41 = vld [vmem:[#allocation2 + $0x6ec] ss:$16 sps:$4 sm:$0xff]  }
  0xa6   :  { %1835 = vmatpush1.bf16.msra.mxu0 %v7615_v42  ;;  %v7699_v42 = vld [vmem:[#allocation2 + $0x4e8] ss:$16 sps:$4 sm:$0xff]  }
  0xa7   :  { %1876 = vmatpush1.bf16.msra.mxu1 %v7618_v44  ;;  %1836 = vmatprep.subr.bf16.mxu0 %v7623_v45  ;;  %v7702_v44 = vld [vmem:[#allocation2 + $0x6e8] ss:$16 sps:$4 sm:$0xff]   ;;  %v7707_v45 = vld [vmem:[#allocation2 + $0x4cc] ss:$16 sps:$4 sm:$0xff]  }
  0xa8   :  { %1877 = vmatprep.subr.bf16.mxu1 %v7626_v46  ;;  %v7710_v46 = vld [vmem:[#allocation2 + $0x6cc] ss:$16 sps:$4 sm:$0xff]  }
  0xaa   :  { %1837 = vmatpush1.bf16.msra.mxu0 %v7621_v47  ;;  %v7705_v47 = vld [vmem:[#allocation2 + $0x4c8] ss:$16 sps:$4 sm:$0xff]  }
  0xab   :  { %1878 = vmatpush1.bf16.msra.mxu1 %v7624_v48  ;;  %1838 = vmatprep.subr.bf16.mxu0 %v7629_v50  ;;  %v7708_v48 = vld [vmem:[#allocation2 + $0x6c8] ss:$16 sps:$4 sm:$0xff]   ;;  %v7713_v50 = vld [vmem:[#allocation2 + $0x4ac] ss:$16 sps:$4 sm:$0xff]  }
  0xac   :  { %1879 = vmatprep.subr.bf16.mxu1 %v7632_v51  ;;  %v7716_v51 = vld [vmem:[#allocation2 + $0x6ac] ss:$16 sps:$4 sm:$0xff]  }
  0xae   :  { %1839 = vmatpush1.bf16.msra.mxu0 %v7627_v62  ;;  %v7711_v62 = vld [vmem:[#allocation2 + $0x4a8] ss:$16 sps:$4 sm:$0xff]  }
  0xaf   :  { %1880 = vmatpush1.bf16.msra.mxu1 %v7630_v3  ;;  %1840 = vmatprep.subr.bf16.mxu0 %v7635_v52  ;;  %v7714_v3 = vld [vmem:[#allocation2 + $0x6a8] ss:$16 sps:$4 sm:$0xff]   ;;  %v7719_v52 = vld [vmem:[#allocation2 + $0x48c] ss:$16 sps:$4 sm:$0xff]  }
  0xb0   :  { %1881 = vmatprep.subr.bf16.mxu1 %v7638_v54  ;;  %v7720_v54 = vld [vmem:[#allocation2 + $0x688] ss:$16 sps:$4 sm:$0xff]  }
  0xb2   :  { %1841 = vmatpush1.bf16.msra.mxu0 %v7633_v55  ;;  %v7725_v55 = vld [vmem:[#allocation2 + $0x46c] ss:$16 sps:$4 sm:$0xff]  }
  0xb3   :  { %1882 = vmatpush1.bf16.msra.mxu1 %v7636_v56  ;;  %1842 = vmatprep.subr.bf16.mxu0 %v7641_v58  ;;  %v7728_v56 = vld [vmem:[#allocation2 + $0x66c] ss:$16 sps:$4 sm:$0xff]   ;;  %v7723_v58 = vld [vmem:[#allocation2 + $0x468] ss:$16 sps:$4 sm:$0xff]  }
  0xb4   :  { %1883 = vmatprep.subr.bf16.mxu1 %v7644_v59  ;;  %v7734_v59 = vld [vmem:[#allocation2 + $0x64c] ss:$16 sps:$4 sm:$0xff]  }
  0xb6   :  { %1843 = vmatpush1.bf16.msra.mxu0 %v7639_v60  ;;  %v7729_v60 = vld [vmem:[#allocation2 + $0x448] ss:$16 sps:$4 sm:$0xff]  }
  0xb7   :  { %1884 = vmatpush1.bf16.msra.mxu1 %v7642_v61  ;;  %1844 = vmatprep.subr.bf16.mxu0 %v7647_v63  ;;  %v7732_v61 = vld [vmem:[#allocation2 + $0x648] ss:$16 sps:$4 sm:$0xff]   ;;  %v7737_v63 = vld [vmem:[#allocation2 + $0x42c] ss:$16 sps:$4 sm:$0xff]  }
  0xb8   :  { %1885 = vmatprep.subr.bf16.mxu1 %v7650_v0  ;;  %v7740_v0 = vld [vmem:[#allocation2 + $0x62c] ss:$16 sps:$4 sm:$0xff]  }
  0xba   :  { %1845 = vmatpush1.bf16.msra.mxu0 %v7645_v1  ;;  %v7735_v1 = vld [vmem:[#allocation2 + $0x428] ss:$16 sps:$4 sm:$0xff]  }
  0xbb   :  { %1886 = vmatpush1.bf16.msra.mxu1 %v7648_v2  ;;  %1846 = vmatprep.subr.bf16.mxu0 %v7653_v4  ;;  %v7738_v2 = vld [vmem:[#allocation2 + $0x628] ss:$16 sps:$4 sm:$0xff]   ;;  %v7743_v4 = vld [vmem:[#allocation2 + $0x40c] ss:$16 sps:$4 sm:$0xff]  }
  0xbc   :  { %1887 = vmatprep.subr.bf16.mxu1 %v7656_v5  ;;  %v7746_v5 = vld [vmem:[#allocation2 + $0x60c] ss:$16 sps:$4 sm:$0xff]  }
  0xbe   :  { %1847 = vmatpush2.bf16.msra.mxu0 %v7651_v6  ;;  %v7741_v6 = vld [vmem:[#allocation2 + $0x408] ss:$16 sps:$4 sm:$0xff]  }
  0xbf   :  { %1888 = vmatpush2.bf16.msra.mxu1 %v7654_v7  ;;  %1848 = vmatprep.subr.bf16.mxu0 %v7659_v8  ;;  %v7744_v7 = vld [vmem:[#allocation2 + $0x608] ss:$16 sps:$4 sm:$0xff]   ;;  %v7749_v8 = vld [vmem:[#allocation2 + $0x5ec] ss:$16 sps:$4 sm:$0xff]  }
  0xc0   :  { %1889 = vmatprep.subr.bf16.mxu1 %v7662_v9  ;;  %v7752_v9 = vld [vmem:[#allocation2 + $0x7ec] ss:$16 sps:$4 sm:$0xff]  }
  0xc2   :  { %1849 = vmatpush2.bf16.msra.mxu0 %v7657_v10  ;;  %v7747_v10 = vld [vmem:[#allocation2 + $0x5e8] ss:$16 sps:$4 sm:$0xff]  }
  0xc3   :  { %1890 = vmatpush2.bf16.msra.mxu1 %v7660_v11  ;;  %1850 = vmatprep.subr.bf16.mxu0 %v7665_v12  ;;  %v7750_v11 = vld [vmem:[#allocation2 + $0x7e8] ss:$16 sps:$4 sm:$0xff]   ;;  %v7755_v12 = vld [vmem:[#allocation2 + $0x5cc] ss:$16 sps:$4 sm:$0xff]  }
  0xc4   :  { %1891 = vmatprep.subr.bf16.mxu1 %v7668_v13  ;;  %v7758_v13 = vld [vmem:[#allocation2 + $0x7cc] ss:$16 sps:$4 sm:$0xff]  }
  0xc6   :  { %1851 = vmatpush2.bf16.msra.mxu0 %v7663_v14  ;;  %v7753_v14 = vld [vmem:[#allocation2 + $0x5c8] ss:$16 sps:$4 sm:$0xff]  }
  0xc7   :  { %1892 = vmatpush2.bf16.msra.mxu1 %v7666_v15  ;;  %1852 = vmatprep.subr.bf16.mxu0 %v7671_v18  ;;  %v7756_v15 = vld [vmem:[#allocation2 + $0x7c8] ss:$16 sps:$4 sm:$0xff]   ;;  %v7761_v18 = vld [vmem:[#allocation2 + $0x5ac] ss:$16 sps:$4 sm:$0xff]  }
  0xc8   :  { %1893 = vmatprep.subr.bf16.mxu1 %v7674_v19  ;;  %v7764_v19 = vld [vmem:[#allocation2 + $0x7ac] ss:$16 sps:$4 sm:$0xff]  }
  0xca   :  { %1853 = vmatpush2.bf16.msra.mxu0 %v7669_v20  ;;  %v7759_v20 = vld [vmem:[#allocation2 + $0x5a8] ss:$16 sps:$4 sm:$0xff]  }
  0xcb   :  { %1894 = vmatpush2.bf16.msra.mxu1 %v7672_v21  ;;  %1854 = vmatprep.subr.bf16.mxu0 %v7677_v22  ;;  %v7762_v21 = vld [vmem:[#allocation2 + $0x7a8] ss:$16 sps:$4 sm:$0xff]   ;;  %v7767_v22 = vld [vmem:[#allocation2 + $0x58c] ss:$16 sps:$4 sm:$0xff]  }
  0xcc   :  { %1895 = vmatprep.subr.bf16.mxu1 %v7680_v23  ;;  %v7770_v23 = vld [vmem:[#allocation2 + $0x78c] ss:$16 sps:$4 sm:$0xff]  }
  0xce   :  { %1855 = vmatpush2.bf16.msra.mxu0 %v7675_v24  ;;  %v7765_v24 = vld [vmem:[#allocation2 + $0x588] ss:$16 sps:$4 sm:$0xff]  }
  0xcf   :  { %1896 = vmatpush2.bf16.msra.mxu1 %v7678_v25  ;;  %1856 = vmatprep.subr.bf16.mxu0 %v7683_v26  ;;  %v7768_v25 = vld [vmem:[#allocation2 + $0x788] ss:$16 sps:$4 sm:$0xff]   ;;  %v7773_v26 = vld [vmem:[#allocation2 + $0x56c] ss:$16 sps:$4 sm:$0xff]  }
  0xd0   :  { %1897 = vmatprep.subr.bf16.mxu1 %v7686_v27  ;;  %v7776_v27 = vld [vmem:[#allocation2 + $0x76c] ss:$16 sps:$4 sm:$0xff]  }
  0xd2   :  { %1857 = vmatpush2.bf16.msra.mxu0 %v7681_v28  ;;  %v7771_v28 = vld [vmem:[#allocation2 + $0x568] ss:$16 sps:$4 sm:$0xff]  }
  0xd3   :  { %1898 = vmatpush2.bf16.msra.mxu1 %v7684_v29  ;;  %1858 = vmatprep.subr.bf16.mxu0 %v7689_v30  ;;  %v7774_v29 = vld [vmem:[#allocation2 + $0x768] ss:$16 sps:$4 sm:$0xff]   ;;  %v7779_v30 = vld [vmem:[#allocation2 + $0x54c] ss:$16 sps:$4 sm:$0xff]  }
  0xd4   :  { %1899 = vmatprep.subr.bf16.mxu1 %v7692_v31  ;;  %v7782_v31 = vld [vmem:[#allocation2 + $0x74c] ss:$16 sps:$4 sm:$0xff]  }
  0xd6   :  { %1859 = vmatpush2.bf16.msra.mxu0 %v7687_v34  ;;  %v7777_v34 = vld [vmem:[#allocation2 + $0x548] ss:$16 sps:$4 sm:$0xff]  }
  0xd7   :  { %1900 = vmatpush2.bf16.msra.mxu1 %v7690_v35  ;;  %1860 = vmatprep.subr.bf16.mxu0 %v7695_v36  ;;  %v7780_v35 = vld [vmem:[#allocation2 + $0x748] ss:$16 sps:$4 sm:$0xff]   ;;  %v7785_v36 = vld [vmem:[#allocation2 + $0x52c] ss:$16 sps:$4 sm:$0xff]  }
  0xd8   :  { %1901 = vmatprep.subr.bf16.mxu1 %v7698_v37  ;;  %v7788_v37 = vld [vmem:[#allocation2 + $0x72c] ss:$16 sps:$4 sm:$0xff]  }
  0xda   :  { %1861 = vmatpush2.bf16.msra.mxu0 %v7693_v38  ;;  %v7783_v38 = vld [vmem:[#allocation2 + $0x528] ss:$16 sps:$4 sm:$0xff]  }
  0xdb   :  { %1902 = vmatpush2.bf16.msra.mxu1 %v7696_v39  ;;  %1912 = vmatprep.subr.bf16.mxu0 %v7701_v40  ;;  %v7786_v39 = vld [vmem:[#allocation2 + $0x728] ss:$16 sps:$4 sm:$0xff]   ;;  %v7791_v40 = vld [vmem:[#allocation2 + $0x50c] ss:$16 sps:$4 sm:$0xff]  }
  0xdc   :  { %1953 = vmatprep.subr.bf16.mxu1 %v7704_v41  ;;  %v7794_v41 = vld [vmem:[#allocation2 + $0x70c] ss:$16 sps:$4 sm:$0xff]  }
  0xdd   :  { %1863 = vmatmul.mubr.bf16.vlgmr.msra.gmra.mxu0 %v8004_v16  ;;  %v7722_v16 = vld [vmem:[#allocation2 + $0x68c] ss:$16 sps:$4 sm:$0xff]  }
  0xde   :  { %1904 = vmatmul.mubr.bf16.vlgmr.msra.gmra.mxu1 %v8006_v17  ;;  %1913 = vmatpush1.bf16.msra.mxu0 %v7699_v42  ;;  %v7717_v17 = vld [vmem:[#allocation2 + $0x488] ss:$16 sps:$4 sm:$0xff]  }
  0xdf   :  { %1954 = vmatpush1.bf16.msra.mxu1 %v7702_v44  ;;  %1914 = vmatprep.subr.bf16.mxu0 %v7707_v45  ;;  %v7789_v42 = vld [vmem:[#allocation2 + $0x508] ss:$16 sps:$4 sm:$0xff]   ;;  %v7797_v45 = vld [vmem:[#allocation4 + $0x74] ss:$8 sps:$4 sm:$0xff]  }
  0xe0   :  { %1955 = vmatprep.subr.bf16.mxu1 %v7710_v46  ;;  %1944 = vmatprep.mubr.bf16.mxu0 %v8021_v53  ;;  %v7726_v53 = vld [vmem:[#allocation2 + $0x668] ss:$16 sps:$4 sm:$0xff]  }
  0xe1   :  { %1985 = vmatprep.mubr.bf16.mxu1 %v8025_v57  ;;  %v7731_v57 = vld [vmem:[#allocation2 + $0x44c] ss:$16 sps:$4 sm:$0xff]   ;;  %v7792_v44 = vld [vmem:[#allocation2 + $0x708] ss:$16 sps:$4 sm:$0xff]  }
  0xe2   :  { %1915 = vmatpush1.bf16.msra.mxu0 %v7705_v47  ;;  %v7795_v46 = vld [vmem:[#allocation4 + $0x70] ss:$8 sps:$4 sm:$0xff]   ;;  %v7800_v47 = vld [vmem:[#allocation4 + $0x64] ss:$8 sps:$4 sm:$0xff]  }
  0xe3   :  { %1956 = vmatpush1.bf16.msra.mxu1 %v7708_v48  ;;  %1916 = vmatprep.subr.bf16.mxu0 %v7713_v50 }
  0xe4   :  { %1957 = vmatprep.subr.bf16.mxu1 %v7716_v51  ;;  %v7798_v51 = vld [vmem:[#allocation4 + $0x60] ss:$8 sps:$4 sm:$0xff]  }
  0xe6   :  { %1917 = vmatpush1.bf16.msra.mxu0 %v7711_v62 }
  0xe7   :  { %1958 = vmatpush1.bf16.msra.mxu1 %v7714_v3  ;;  %1918 = vmatprep.subr.bf16.mxu0 %v7719_v52  ;;  %v7803_v52 = vld [vmem:[#allocation4 + $0x54] ss:$8 sps:$4 sm:$0xff]  }
  0xe8   :  { %1959 = vmatprep.subr.bf16.mxu1 %v7722_v16 }
  0xea   :  { %1919 = vmatpush1.bf16.msra.mxu0 %v7717_v17 }
  0xeb   :  { %1960 = vmatpush1.bf16.msra.mxu1 %v7720_v54  ;;  %1920 = vmatprep.subr.bf16.mxu0 %v7725_v55  ;;  %v7801_v54 = vld [vmem:[#allocation4 + $0x50] ss:$8 sps:$4 sm:$0xff]  }
  0xec   :  { %1961 = vmatprep.subr.bf16.mxu1 %v7728_v56 }
  0xee   :  { %1921 = vmatpush1.bf16.msra.mxu0 %v7723_v58  ;;  %v7806_v58 = vld [vmem:[#allocation4 + $0x44] ss:$8 sps:$4 sm:$0xff]  }
  0xef   :  { %1962 = vmatpush1.bf16.msra.mxu1 %v7726_v53  ;;  %1922 = vmatprep.subr.bf16.mxu0 %v7731_v57  ;;  %v7843_v53 = vld [vmem:[#allocation4 + $0x170] ss:$8 sps:$4 sm:$0xff]   ;;  %v7848_v57 = vld [vmem:[#allocation4 + $0x164] ss:$8 sps:$4 sm:$0xff]  }
  0xf0   :  { %1963 = vmatprep.subr.bf16.mxu1 %v7734_v59  ;;  %v7846_v59 = vld [vmem:[#allocation4 + $0x160] ss:$8 sps:$4 sm:$0xff]  }
  0xf2   :  { %1923 = vmatpush1.bf16.msra.mxu0 %v7729_v60  ;;  %v7809_v60 = vld [vmem:[#allocation4 + $0x34] ss:$8 sps:$4 sm:$0xff]  }
  0xf3   :  { %1964 = vmatpush1.bf16.msra.mxu1 %v7732_v61  ;;  %1924 = vmatprep.subr.bf16.mxu0 %v7737_v63  ;;  %v7851_v61 = vld [vmem:[#allocation4 + $0x154] ss:$8 sps:$4 sm:$0xff]   ;;  %v7807_v63 = vld [vmem:[#allocation4 + $0x30] ss:$8 sps:$4 sm:$0xff]  }
  0xf4   :  { %1965 = vmatprep.subr.bf16.mxu1 %v7740_v0  ;;  %v7849_v0 = vld [vmem:[#allocation4 + $0x150] ss:$8 sps:$4 sm:$0xff]  }
  0xf6   :  { %1925 = vmatpush1.bf16.msra.mxu0 %v7735_v1  ;;  %v7812_v1 = vld [vmem:[#allocation4 + $0x24] ss:$8 sps:$4 sm:$0xff]  }
  0xf7   :  { %1966 = vmatpush1.bf16.msra.mxu1 %v7738_v2  ;;  %1926 = vmatprep.subr.bf16.mxu0 %v7743_v4  ;;  %v7854_v2 = vld [vmem:[#allocation4 + $0x144] ss:$8 sps:$4 sm:$0xff]   ;;  %v7810_v4 = vld [vmem:[#allocation4 + $0x20] ss:$8 sps:$4 sm:$0xff]  }
  0xf8   :  { %1967 = vmatprep.subr.bf16.mxu1 %v7746_v5  ;;  %v7852_v5 = vld [vmem:[#allocation4 + $0x140] ss:$8 sps:$4 sm:$0xff]  }
  0xfa   :  { %1927 = vmatpush1.bf16.msra.mxu0 %v7741_v6  ;;  %v7815_v6 = vld [vmem:[#allocation4 + $0x14] ss:$8 sps:$4 sm:$0xff]  }
  0xfb   :  { %1968 = vmatpush1.bf16.msra.mxu1 %v7744_v7  ;;  %1928 = vmatprep.subr.bf16.mxu0 %v7749_v8  ;;  %v7857_v7 = vld [vmem:[#allocation4 + $0x134] ss:$8 sps:$4 sm:$0xff]   ;;  %v7813_v8 = vld [vmem:[#allocation4 + $0x10] ss:$8 sps:$4 sm:$0xff]  }
  0xfc   :  { %1969 = vmatprep.subr.bf16.mxu1 %v7752_v9  ;;  %v7855_v9 = vld [vmem:[#allocation4 + $0x130] ss:$8 sps:$4 sm:$0xff]  }
  0xfe   :  { %1929 = vmatpush2.bf16.msra.mxu0 %v7747_v10  ;;  %v7818_v10 = vld [vmem:[#allocation4 + $0x4] ss:$8 sps:$4 sm:$0xff]  }
  0xff   :  { %1970 = vmatpush2.bf16.msra.mxu1 %v7750_v11  ;;  %1930 = vmatprep.subr.bf16.mxu0 %v7755_v12  ;;  %v7860_v11 = vld [vmem:[#allocation4 + $0x124] ss:$8 sps:$4 sm:$0xff]   ;;  %v7816_v12 = vld [vmem:[#allocation4] ss:$8 sps:$4 sm:$0xff]  }
 0x100   :  { %1971 = vmatprep.subr.bf16.mxu1 %v7758_v13  ;;  %v7858_v13 = vld [vmem:[#allocation4 + $0x120] ss:$8 sps:$4 sm:$0xff]  }
 0x102   :  { %1931 = vmatpush2.bf16.msra.mxu0 %v7753_v14  ;;  %v7821_v14 = vld [vmem:[#allocation4 + $0xf4] ss:$8 sps:$4 sm:$0xff]  }
 0x103   :  { %1972 = vmatpush2.bf16.msra.mxu1 %v7756_v15  ;;  %1932 = vmatprep.subr.bf16.mxu0 %v7761_v18  ;;  %v7863_v15 = vld [vmem:[#allocation4 + $0x114] ss:$8 sps:$4 sm:$0xff]   ;;  %v7819_v18 = vld [vmem:[#allocation4 + $0xf0] ss:$8 sps:$4 sm:$0xff]  }
 0x104   :  { %1973 = vmatprep.subr.bf16.mxu1 %v7764_v19  ;;  %v7861_v19 = vld [vmem:[#allocation4 + $0x110] ss:$8 sps:$4 sm:$0xff]  }
 0x106   :  { %1933 = vmatpush2.bf16.msra.mxu0 %v7759_v20  ;;  %v7824_v20 = vld [vmem:[#allocation4 + $0xe4] ss:$8 sps:$4 sm:$0xff]  }
 0x107   :  { %1974 = vmatpush2.bf16.msra.mxu1 %v7762_v21  ;;  %1934 = vmatprep.subr.bf16.mxu0 %v7767_v22  ;;  %v7866_v21 = vld [vmem:[#allocation4 + $0x104] ss:$8 sps:$4 sm:$0xff]   ;;  %v7822_v22 = vld [vmem:[#allocation4 + $0xe0] ss:$8 sps:$4 sm:$0xff]  }
 0x108   :  { %1975 = vmatprep.subr.bf16.mxu1 %v7770_v23  ;;  %v7864_v23 = vld [vmem:[#allocation4 + $0x100] ss:$8 sps:$4 sm:$0xff]  }
 0x10a   :  { %1935 = vmatpush2.bf16.msra.mxu0 %v7765_v24  ;;  %v7827_v24 = vld [vmem:[#allocation4 + $0xd4] ss:$8 sps:$4 sm:$0xff]  }
 0x10b   :  { %1976 = vmatpush2.bf16.msra.mxu1 %v7768_v25  ;;  %1936 = vmatprep.subr.bf16.mxu0 %v7773_v26  ;;  %v7869_v25 = vld [vmem:[#allocation4 + $0x1f4] ss:$8 sps:$4 sm:$0xff]   ;;  %v7825_v26 = vld [vmem:[#allocation4 + $0xd0] ss:$8 sps:$4 sm:$0xff]  }
 0x10c   :  { %1977 = vmatprep.subr.bf16.mxu1 %v7776_v27  ;;  %v7867_v27 = vld [vmem:[#allocation4 + $0x1f0] ss:$8 sps:$4 sm:$0xff]  }
 0x10e   :  { %1937 = vmatpush2.bf16.msra.mxu0 %v7771_v28  ;;  %v7830_v28 = vld [vmem:[#allocation4 + $0xc4] ss:$8 sps:$4 sm:$0xff]  }
 0x10f   :  { %1978 = vmatpush2.bf16.msra.mxu1 %v7774_v29  ;;  %1938 = vmatprep.subr.bf16.mxu0 %v7779_v30  ;;  %v7872_v29 = vld [vmem:[#allocation4 + $0x1e4] ss:$8 sps:$4 sm:$0xff]   ;;  %v7828_v30 = vld [vmem:[#allocation4 + $0xc0] ss:$8 sps:$4 sm:$0xff]  }
 0x110   :  { %1979 = vmatprep.subr.bf16.mxu1 %v7782_v31  ;;  %v7870_v31 = vld [vmem:[#allocation4 + $0x1e0] ss:$8 sps:$4 sm:$0xff]  }
 0x112   :  { %1939 = vmatpush2.bf16.msra.mxu0 %v7777_v34  ;;  %v7833_v34 = vld [vmem:[#allocation4 + $0xb4] ss:$8 sps:$4 sm:$0xff]  }
 0x113   :  { %1980 = vmatpush2.bf16.msra.mxu1 %v7780_v35  ;;  %1940 = vmatprep.subr.bf16.mxu0 %v7785_v36  ;;  %v7875_v35 = vld [vmem:[#allocation4 + $0x1d4] ss:$8 sps:$4 sm:$0xff]   ;;  %v7831_v36 = vld [vmem:[#allocation4 + $0xb0] ss:$8 sps:$4 sm:$0xff]  }
 0x114   :  { %1981 = vmatprep.subr.bf16.mxu1 %v7788_v37  ;;  %v7873_v37 = vld [vmem:[#allocation4 + $0x1d0] ss:$8 sps:$4 sm:$0xff]  }
 0x116   :  { %1941 = vmatpush2.bf16.msra.mxu0 %v7783_v38  ;;  %v7836_v38 = vld [vmem:[#allocation4 + $0xa4] ss:$8 sps:$4 sm:$0xff]  }
 0x117   :  { %1982 = vmatpush2.bf16.msra.mxu1 %v7786_v39  ;;  %1942 = vmatprep.subr.bf16.mxu0 %v7791_v40  ;;  %v7878_v39 = vld [vmem:[#allocation4 + $0x1c4] ss:$8 sps:$4 sm:$0xff]   ;;  %v7834_v40 = vld [vmem:[#allocation4 + $0xa0] ss:$8 sps:$4 sm:$0xff]  }
 0x118   :  { %1983 = vmatprep.subr.bf16.mxu1 %v7794_v41  ;;  %v7876_v41 = vld [vmem:[#allocation4 + $0x1c0] ss:$8 sps:$4 sm:$0xff]  }
 0x11a   :  { %1943 = vmatpush2.bf16.msra.mxu0 %v7789_v42  ;;  %v7839_v42 = vld [vmem:[#allocation4 + $0x94] ss:$8 sps:$4 sm:$0xff]  }
 0x11b   :  { %1984 = vmatpush2.bf16.msra.mxu1 %v7792_v44  ;;  %2398 = vmatprep.subr.bf16.mxu0 %v7797_v45  ;;  %v7881_v44 = vld [vmem:[#allocation4 + $0x1b4] ss:$8 sps:$4 sm:$0xff]   ;;  %v8056_v45 = vsub.s32 0, %v7988_v43 }
 0x11d   :  { %v8045_v48 = vpop.f32.mrf.mxu0  ;;  %1945 = vmatmul.mubr.bf16.vlgmr.msra.gmra.mxu0 %v8031_v32  ;;  %v7845_v32 = vld [vmem:[#allocation4 + $0x174] ss:$8 sps:$4 sm:$0xff]  }
 0x11e   :  { %v8047_v50 = vpop.f32.mrf.mxu1  ;;  %1986 = vmatmul.mubr.bf16.vlgmr.msra.gmra.mxu1 %v8035_v33  ;;  %2399 = vmatpush1.bf16.msra.mxu0 %v7795_v46  ;;  %v7804_v33 = vld [vmem:[#allocation4 + $0x40] ss:$8 sps:$4 sm:$0xff]  }
 0x11f   :  { %v8051_v62 = vpop.f32.mrf.mxu0  ;;  %2400 = vmatprep.subr.bf16.mxu0 %v7800_v47  ;;  %2439 = vmatprep.subr.bf16.mxu1 %v7845_v32  ;;  %v8061_v46 = vld [vmem:[%s9799_s2] sm:$0xf]  ;;  %v8064_v47 = vsub.s32 1, %v7988_v43 }
 0x120   :  { %v8053_v3 = vpop.f32.mrf.mxu1  ;;  %2440 = vmatpush1.bf16.msra.mxu1 %v7843_v53  ;;  %v7884_v53 = vld [vmem:[#allocation4 + $0x1a4] ss:$8 sps:$4 sm:$0xff]  }
 0x121   :  { %v1704_v16 = vpop.f32.mrf.mxu0  ;;  %2441 = vmatprep.subr.bf16.mxu1 %v7848_v57  ;;  %v7882_v57 = vld [vmem:[#allocation4 + $0x1a0] ss:$8 sps:$4 sm:$0xff]  }
 0x122   :  { %v1745_v17 = vpop.f32.mrf.mxu1  ;;  %2401 = vmatpush1.bf16.msra.mxu0 %v7798_v51  ;;  %v7837_v51 = vld [vmem:[#allocation4 + $0x90] ss:$8 sps:$4 sm:$0xff]   ;;  %v7842_v16 = vld [vmem:[#allocation4 + $0x84] ss:$8 sps:$4 sm:$0xff]  }
 0x123   :  { %v1705_v55 = vpop.f32.mrf.mxu0  ;;  %2402 = vmatprep.subr.bf16.mxu0 %v7803_v52  ;;  %v7879_v52 = vld [vmem:[#allocation4 + $0x1b0] ss:$8 sps:$4 sm:$0xff]   ;;  %v369_v17 = vrot.slane %v8061_v46, %v8056_v45 }
 0x124   :  { %v1746_v56 = vpop.f32.mrf.mxu1  ;;  %2442 = vmatpush1.bf16.msra.mxu1 %v7846_v59  ;;  %v7840_v55 = vld [vmem:[#allocation4 + $0x80] ss:$8 sps:$4 sm:$0xff]  }
 0x125   :  { %2443 = vmatprep.subr.bf16.mxu1 %v7851_v61  ;;  %v1701_v56 = vadd.f32 %v8045_v48, %v369_v17  ;;  %v7885_v48 = vld [vmem:[#allocation4 + $0x190] ss:$8 sps:$4 sm:$0xff]   ;;  %v2548_v17 = vld [vmem:[%s9802_s5 + $0x200] sm:$0xff] }
 0x126   :  { %2403 = vmatpush1.bf16.msra.mxu0 %v7801_v54  ;;  %v373_v54 = vrot.slane %v8061_v46, %v8064_v47 }
 0x127   :  { %2404 = vmatprep.subr.bf16.mxu0 %v7806_v58  ;;  %v1742_v32 = vadd.f32 %v8047_v50, %v1701_v56 }
 0x128   :  { %2444 = vmatpush1.bf16.msra.mxu1 %v7849_v0  ;;  %v1703_v58 = vadd.f32 %v8051_v62, %v373_v54  ;;  %v2564_v54 = vld [vmem:[%s9802_s5 + $0x280] sm:$0xff] }
 0x129   :  { %2445 = vmatprep.subr.bf16.mxu1 %v7854_v2  ;;  %v6955_v56 = vcombine.high %v2548_v17, %v2564_v54 }
 0x12a   :  { %2405 = vmatpush1.bf16.msra.mxu0 %v7804_v33 }
 0x12b   :  { %2406 = vmatprep.subr.bf16.mxu0 %v7809_v60  ;;  %v1744_v60 = vadd.f32 %v8053_v3, %v1703_v58  ;;  %v2516_v58 = vld [vmem:[%s9802_s5 + $0x100] sm:$0xff] }
 0x12c   :  { %2446 = vmatpush1.bf16.msra.mxu1 %v7852_v5 }
 0x12d   :  { %2447 = vmatprep.subr.bf16.mxu1 %v7857_v7 }
 0x12e   :  { %2407 = vmatpush1.bf16.msra.mxu0 %v7807_v63 }
 0x12f   :  { %2408 = vmatprep.subr.bf16.mxu0 %v7812_v1  ;;  %v7887_v1 = vld [vmem:[#allocation4 + $0x194] ss:$8 sps:$4 sm:$0xff]  }
 0x130   :  { %2448 = vmatpush1.bf16.msra.mxu1 %v7855_v9  ;;  %v7890_v9 = vld [vmem:[#allocation4 + $0x184] ss:$8 sps:$4 sm:$0xff]  }
 0x131   :  { %2449 = vmatprep.subr.bf16.mxu1 %v7860_v11  ;;  %v7888_v11 = vld [vmem:[#allocation4 + $0x180] ss:$8 sps:$4 sm:$0xff]  }
 0x132   :  { %2409 = vmatpush1.bf16.msra.mxu0 %v7810_v4 }
 0x133   :  { %2410 = vmatprep.subr.bf16.mxu0 %v7815_v6 }
 0x134   :  { %2450 = vmatpush1.bf16.msra.mxu1 %v7858_v13 }
 0x135   :  { %2451 = vmatprep.subr.bf16.mxu1 %v7863_v15 }
 0x136   :  { %2411 = vmatpush1.bf16.msra.mxu0 %v7813_v8 }
 0x137   :  { %2412 = vmatprep.subr.bf16.mxu0 %v7818_v10 }
 0x138   :  { %2452 = vmatpush1.bf16.msra.mxu1 %v7861_v19 }
 0x139   :  { %2453 = vmatprep.subr.bf16.mxu1 %v7866_v21 }
 0x13a   :  { %2413 = vmatpush1.bf16.msra.mxu0 %v7816_v12 }
 0x13b   :  { %2414 = vmatprep.subr.bf16.mxu0 %v7821_v14 }
 0x13c   :  { %2454 = vmatpush1.bf16.msra.mxu1 %v7864_v23  ;;  %v2708_v23 = vld [vmem:[%s9802_s5 + $0x700] sm:$0xff] }
 0x13d   :  { %2455 = vmatprep.subr.bf16.mxu1 %v7869_v25  ;;  %v8091_v25 = vld [vmem:[%s9802_s5 + $0x708] sm:$0xff] }
 0x13e   :  { %2415 = vmatpush2.bf16.msra.mxu0 %v7819_v18 }
 0x13f   :  { %2416 = vmatprep.subr.bf16.mxu0 %v7824_v20 }
 0x140   :  { %2456 = vmatpush2.bf16.msra.mxu1 %v7867_v27 }
 0x141   :  { %2457 = vmatprep.subr.bf16.mxu1 %v7872_v29  ;;  %v2676_v29 = vld [vmem:[%s9802_s5 + $0x600] sm:$0xff] }
 0x142   :  { %2417 = vmatpush2.bf16.msra.mxu0 %v7822_v22 }
 0x143   :  { %2418 = vmatprep.subr.bf16.mxu0 %v7827_v24  ;;  %v2724_v24 = vld [vmem:[%s9802_s5 + $0x780] sm:$0xff] }
 0x144   :  { %2458 = vmatpush2.bf16.msra.mxu1 %v7870_v31  ;;  %v7115_v27 = vcombine.high %v2708_v23, %v2724_v24 }
 0x145   :  { %2459 = vmatprep.subr.bf16.mxu1 %v7875_v35  ;;  %v2644_v35 = vld [vmem:[%s9802_s5 + $0x500] sm:$0xff] }
 0x146   :  { %2419 = vmatpush2.bf16.msra.mxu0 %v7825_v26  ;;  %v7114_v26 = vcombine.low %v2708_v23, %v2724_v24  ;;  %v2836_v23 = vld [vmem:[%s9802_s5 + $0xb00] sm:$0xff] }
 0x147   :  { %2420 = vmatprep.subr.bf16.mxu0 %v7830_v28  ;;  %v8096_v28 = vld [vmem:[%s9802_s5 + $0x788] sm:$0xff]  ;;  %v2852_v24 = vld [vmem:[%s9802_s5 + $0xb80] sm:$0xff] }
 0x148   :  { %2460 = vmatpush2.bf16.msra.mxu1 %v7873_v37  ;;  %v7117_v31 = vcombine.high %v8091_v25, %v8096_v28 }
 0x149   :  { %2461 = vmatprep.subr.bf16.mxu1 %v7878_v39  ;;  %v2612_v39 = vld [vmem:[%s9802_s5 + $0x400] sm:$0xff] }
 0x14a   :  { %2421 = vmatpush2.bf16.msra.mxu0 %v7828_v30  ;;  %v2692_v30 = vld [vmem:[%s9802_s5 + $0x680] sm:$0xff] }
 0x14b   :  { %2422 = vmatprep.subr.bf16.mxu0 %v7833_v34  ;;  %v7083_v34 = vcombine.high %v2676_v29, %v2692_v30  ;;  %v7082_v37 = vcombine.low %v2676_v29, %v2692_v30  ;;  %v7243_v29 = vcombine.high %v2836_v23, %v2852_v24 }
 0x14c   :  { %2462 = vmatpush2.bf16.msra.mxu1 %v7876_v41 }
 0x14d   :  { %2463 = vmatprep.subr.bf16.mxu1 %v7881_v44  ;;  %v2580_v44 = vld [vmem:[%s9802_s5 + $0x300] sm:$0xff] }
 0x14e   :  { %2423 = vmatpush2.bf16.msra.mxu0 %v7831_v36  ;;  %v2660_v36 = vld [vmem:[%s9802_s5 + $0x580] sm:$0xff] }
 0x14f   :  { %2424 = vmatprep.subr.bf16.mxu0 %v7836_v38  ;;  %v7051_v38 = vcombine.high %v2644_v35, %v2660_v36  ;;  %v7050_v41 = vcombine.low %v2644_v35, %v2660_v36 }
 0x150   :  { %2464 = vmatpush2.bf16.msra.mxu1 %v7879_v52 }
 0x151   :  { %2465 = vmatprep.subr.bf16.mxu1 %v7884_v53  ;;  %v2532_v53 = vld [vmem:[%s9802_s5 + $0x180] sm:$0xff] }
 0x152   :  { %2425 = vmatpush2.bf16.msra.mxu0 %v7834_v40  ;;  %v2628_v40 = vld [vmem:[%s9802_s5 + $0x480] sm:$0xff] }
 0x153   :  { %2426 = vmatprep.subr.bf16.mxu0 %v7839_v42  ;;  %v7019_v42 = vcombine.high %v2612_v39, %v2628_v40  ;;  %v7018_v52 = vcombine.low %v2612_v39, %v2628_v40 }
 0x154   :  { %2466 = vmatpush2.bf16.msra.mxu1 %v7882_v57  ;;  %v6923_v57 = vcombine.high %v2516_v58, %v2532_v53 }
 0x155   :  { %2467 = vmatprep.subr.bf16.mxu1 %v7887_v1 }
 0x156   :  { %2427 = vmatpush2.bf16.msra.mxu0 %v7837_v51  ;;  %v2596_v51 = vld [vmem:[%s9802_s5 + $0x380] sm:$0xff] }
 0x157   :  { %2428 = vmatprep.subr.bf16.mxu0 %v7842_v16  ;;  %v6987_v16 = vcombine.high %v2580_v44, %v2596_v51 }
 0x158   :  { %2468 = vmatpush2.bf16.msra.mxu1 %v7885_v48  ;;  %v2948_v48 = vld [vmem:[%s9802_s5 + $0xe80] sm:$0xff] }
 0x159   :  { %2469 = vmatprep.subr.bf16.mxu1 %v7890_v9 }
 0x15a   :  { %2429 = vmatpush2.bf16.msra.mxu0 %v7840_v55  ;;  %v6986_v55 = vcombine.low %v2580_v44, %v2596_v51 }
 0x15b   :  { %5724 = vmatprep.subr.bf16.mxu0 %v7115_v27 }
 0x15c   :  { %2470 = vmatpush2.bf16.msra.mxu1 %v7888_v11 }
 0x15d   :  { %v1782_v33 = vpop.f32.mrf.mxu0  ;;  %5765 = vmatprep.subr.bf16.mxu1 %v7117_v31  ;;  %v2804_v31 = vld [vmem:[%s9802_s5 + $0xa00] sm:$0xff] }
 0x15e   :  { %v1823_v59 = vpop.f32.mrf.mxu1  ;;  %v1783_v61 = vadd.f32 %v1782_v33, %v1742_v32  ;;  %v6954_v32 = vcombine.low %v2548_v17, %v2564_v54  ;;  %v2484_v33 = vld [vmem:[%s9802_s5] sm:$0xff] }
 0x15f   :  { %v1784_v63 = vpop.f32.mrf.mxu0 }
 0x160   :  { %v1825_v0 = vpop.f32.mrf.mxu1  ;;  %v1824_v2 = vadd.f32 %v1823_v59, %v1783_v61  ;;  %v1785_v4 = vadd.f32 %v1784_v63, %v1744_v60  ;;  %v2500_v59 = vld [vmem:[%s9802_s5 + $0x80] sm:$0xff]  ;;  %v6922_v60 = vcombine.low %v2516_v58, %v2532_v53  ;;  %v7116_v58 = vcombine.low %v8091_v25, %v8096_v28  ;;  %v2613_v25 = vld [vmem:[%s9802_s5 + $0x408] sm:$0xff] }
 0x161   :  { %v1786_v5 = vpop.f32.mrf.mxu0  ;;  %v6891_v61 = vcombine.high %v2484_v33, %v2500_v59  ;;  %v2964_v63 = vld [vmem:[%s9802_s5 + $0xf00] sm:$0xff]  ;;  %v6890_v1 = vcombine.low %v2484_v33, %v2500_v59  ;;  %v2661_v33 = vld [vmem:[%s9802_s5 + $0x588] sm:$0xff] }
 0x162   :  { %v1827_v62 = vpop.f32.mrf.mxu1  ;;  %v1826_v6 = vadd.f32 %v1825_v0, %v1785_v4  ;;  %v1994_v50 = vmax.f32 %v1824_v2, 0.0  ;;  %v2980_v0 = vld [vmem:[%s9802_s5 + $0xf80] sm:$0xff]  ;;  %v2629_v28 = vld [vmem:[%s9802_s5 + $0x488] sm:$0xff] }
 0x163   :  { %v1787_v7 = vpop.f32.mrf.mxu0  ;;  %v7371_v2 = vcombine.high %v2964_v63, %v2980_v0  ;;  %v2932_v4 = vld [vmem:[%s9802_s5 + $0xe00] sm:$0xff]  ;;  %v7370_v5 = vcombine.low %v2964_v63, %v2980_v0  ;;  %v8155_v62 = vsub.s32 2, %v7988_v43  ;;  %v7021_v63 = vcombine.high %v2613_v25, %v2629_v28  ;;  %v2581_v0 = vld [vmem:[%s9802_s5 + $0x308] sm:$0xff] }
 0x164   :  { %v1828_v8 = vpop.f32.mrf.mxu1  ;;  %v1995_v10 = vmax.f32 %v1826_v6, 0.0  ;;  %v1998_v12 = vpack.c.bf16 %v1994_v50, %v1994_v50  ;;  %v7339_v6 = vcombine.high %v2932_v4, %v2948_v48  ;;  %v2900_v50 = vld [vmem:[%s9802_s5 + $0xd00] sm:$0xff]  ;;  %v7338_v9 = vcombine.low %v2932_v4, %v2948_v48  ;;  %v2549_v48 = vld [vmem:[%s9802_s5 + $0x208] sm:$0xff] }
 0x165   :  { %v2916_v7 = vld [vmem:[%s9802_s5 + $0xd80] sm:$0xff]  ;;  %v8164_v8 = vsub.s32 3, %v7988_v43 }
 0x166   :  { %v1999_v3 = vpack.c.bf16 %v1995_v10, %v1995_v10  ;;  %v377_v10 = vrot.slane %v8061_v46, %v8155_v62  ;;  %v7307_v11 = vcombine.high %v2900_v50, %v2916_v7 }
 0x168   :  { %2430 = vmatprep.mubr.bf16.mxu0 %v1999_v3  ;;  %v2868_v3 = vld [vmem:[%s9802_s5 + $0xc00] sm:$0xff] }
 0x169   :  { %2431 = vmatmul.mubr.bf16.vlgmr.msra.gmra.mxu0 %v1998_v12  ;;  %v2884_v12 = vld [vmem:[%s9802_s5 + $0xc80] sm:$0xff] }
 0x16a   :  { %5725 = vmatpush1.bf16.msra.mxu0 %v7114_v26  ;;  %v7274_v27 = vcombine.low %v2868_v3, %v2884_v12 }
 0x16b   :  { %5726 = vmatprep.subr.bf16.mxu0 %v7083_v34  ;;  %v2820_v34 = vld [vmem:[%s9802_s5 + $0xa80] sm:$0xff] }
 0x16c   :  { %v7211_v40 = vcombine.high %v2804_v31, %v2820_v34  ;;  %v7210_v17 = vcombine.low %v2804_v31, %v2820_v34 }
 0x16e   :  { %5727 = vmatpush1.bf16.msra.mxu0 %v7082_v37 }
 0x16f   :  { %5728 = vmatprep.subr.bf16.mxu0 %v7051_v38  ;;  %v7242_v38 = vcombine.low %v2836_v23, %v2852_v24 }
 0x172   :  { %5729 = vmatpush1.bf16.msra.mxu0 %v7050_v41 }
 0x173   :  { %5730 = vmatprep.subr.bf16.mxu0 %v7019_v42 }
 0x176   :  { %5731 = vmatpush1.bf16.msra.mxu0 %v7018_v52 }
 0x177   :  { %5732 = vmatprep.subr.bf16.mxu0 %v6987_v16 }
 0x17a   :  { %5733 = vmatpush1.bf16.msra.mxu0 %v6986_v55  ;;  %v2693_v55 = vld [vmem:[%s9802_s5 + $0x688] sm:$0xff] }
 0x17b   :  { %5734 = vmatprep.subr.bf16.mxu0 %v6955_v56 }
 0x17e   :  { %5735 = vmatpush1.bf16.msra.mxu0 %v6954_v32 }
 0x17f   :  { %5736 = vmatprep.subr.bf16.mxu0 %v6923_v57  ;;  %v2645_v57 = vld [vmem:[%s9802_s5 + $0x508] sm:$0xff] }
 0x182   :  { %5737 = vmatpush1.bf16.msra.mxu0 %v6922_v60  ;;  %v7053_v60 = vcombine.high %v2645_v57, %v2661_v33 }
 0x183   :  { %5738 = vmatprep.subr.bf16.mxu0 %v6891_v61  ;;  %v7052_v61 = vcombine.low %v2645_v57, %v2661_v33  ;;  %v2740_v33 = vld [vmem:[%s9802_s5 + $0x800] sm:$0xff] }
 0x186   :  { %5739 = vmatpush1.bf16.msra.mxu0 %v6890_v1  ;;  %v2597_v1 = vld [vmem:[%s9802_s5 + $0x388] sm:$0xff] }
 0x187   :  { %5740 = vmatprep.subr.bf16.mxu0 %v7371_v2  ;;  %v7020_v2 = vcombine.low %v2613_v25, %v2629_v28  ;;  %v6989_v4 = vcombine.high %v2581_v0, %v2597_v1  ;;  %v2757_v28 = vld [vmem:[%s9802_s5 + $0x888] sm:$0xff] }
 0x18a   :  { %5741 = vmatpush2.bf16.msra.mxu0 %v7370_v5  ;;  %v2565_v5 = vld [vmem:[%s9802_s5 + $0x288] sm:$0xff] }
 0x18b   :  { %5742 = vmatprep.subr.bf16.mxu0 %v7339_v6  ;;  %v6988_v6 = vcombine.low %v2581_v0, %v2597_v1 }
 0x18e   :  { %5743 = vmatpush2.bf16.msra.mxu0 %v7338_v9  ;;  %v2533_v9 = vld [vmem:[%s9802_s5 + $0x188] sm:$0xff] }
 0x18f   :  { %5744 = vmatprep.subr.bf16.mxu0 %v7307_v11 }
 0x19d   :  { %v8074_v13 = vpop.f32.mrf.mxu0 }
 0x19e   :  { %v8076_v14 = vpop.f32.mrf.mxu1 }
 0x19f   :  { %v8078_v15 = vpop.f32.mrf.mxu0 }
 0x1a0   :  { %v8080_v18 = vpop.f32.mrf.mxu1 }
 0x1a1   :  { %v1868_v19 = vpop.f32.mrf.mxu0 }
 0x1a2   :  { %v1909_v20 = vpop.f32.mrf.mxu1  ;;  %v381_v19 = vrot.slane %v8061_v46, %v8164_v8 }
 0x1a3   :  { %v1869_v21 = vpop.f32.mrf.mxu0  ;;  %v7306_v20 = vcombine.low %v2900_v50, %v2916_v7  ;;  %v6957_v50 = vcombine.high %v2549_v48, %v2565_v5  ;;  %v2517_v7 = vld [vmem:[%s9802_s5 + $0x108] sm:$0xff] }
 0x1a4   :  { %v1910_v22 = vpop.f32.mrf.mxu1  ;;  %v1865_v21 = vadd.f32 %v8074_v13, %v377_v10  ;;  %v1867_v26 = vadd.f32 %v8078_v15, %v381_v19  ;;  %v6956_v10 = vcombine.low %v2549_v48, %v2565_v5  ;;  %v6925_v11 = vcombine.high %v2517_v7, %v2533_v9  ;;  %v2726_v48 = vld [vmem:[%s9802_s5 + $0x790] sm:$0xff]  ;;  %v2711_v5 = vld [vmem:[%s9802_s5 + $0x718] sm:$0xff] }
 0x1a5   :  { %v7275_v22 = vcombine.high %v2868_v3, %v2884_v12  ;;  %5745 = vmatpush2.bf16.msra.mxu0 %v7306_v20  ;;  %v2485_v3 = vld [vmem:[%s9802_s5 + $0x8] sm:$0xff]  ;;  %v6924_v19 = vcombine.low %v2517_v7, %v2533_v9 }
 0x1a6   :  { %v1906_v46 = vadd.f32 %v8076_v14, %v1865_v21  ;;  %v1908_v35 = vadd.f32 %v8080_v18, %v1867_v26  ;;  %v2677_v18 = vld [vmem:[%s9802_s5 + $0x608] sm:$0xff] }
 0x1a7   :  { %5746 = vmatprep.subr.bf16.mxu0 %v7275_v22  ;;  %v7085_v32 = vcombine.high %v2677_v18, %v2693_v55  ;;  %v7084_v59 = vcombine.low %v2677_v18, %v2693_v55  ;;  %v2501_v12 = vld [vmem:[%s9802_s5 + $0x88] sm:$0xff] }
 0x1a8   :  { %v6893_v20 = vcombine.high %v2485_v3, %v2501_v12  ;;  %v2965_v21 = vld [vmem:[%s9802_s5 + $0xf08] sm:$0xff]  ;;  %v6892_v23 = vcombine.low %v2485_v3, %v2501_v12 }
 0x1a9   :  { %5747 = vmatpush2.bf16.msra.mxu0 %v7274_v27  ;;  %v2981_v22 = vld [vmem:[%s9802_s5 + $0xf88] sm:$0xff] }
 0x1aa   :  { %5748 = vmatprep.subr.bf16.mxu0 %v7243_v29  ;;  %v7373_v24 = vcombine.high %v2965_v21, %v2981_v22  ;;  %v2933_v26 = vld [vmem:[%s9802_s5 + $0xe08] sm:$0xff] }
 0x1ab   :  { %v2949_v27 = vld [vmem:[%s9802_s5 + $0xe88] sm:$0xff] }
 0x1ac   :  { %v7341_v29 = vcombine.high %v2933_v26, %v2949_v27  ;;  %v7340_v31 = vcombine.low %v2933_v26, %v2949_v27  ;;  %v2789_v55 = vld [vmem:[%s9802_s5 + $0x988] sm:$0xff] }
 0x1ad   :  { %5749 = vmatpush2.bf16.msra.mxu0 %v7242_v38  ;;  %v2837_v38 = vld [vmem:[%s9802_s5 + $0xb08] sm:$0xff] }
 0x1ae   :  { %5750 = vmatprep.subr.bf16.mxu0 %v7211_v40 }
 0x1b1   :  { %5751 = vmatpush2.bf16.msra.mxu0 %v7210_v17  ;;  %v2788_v17 = vld [vmem:[%s9802_s5 + $0x980] sm:$0xff] }
 0x1dd   :  { %v1946_v30 = vpop.f32.mrf.mxu0 }
 0x1de   :  { %v1987_v13 = vpop.f32.mrf.mxu1  ;;  %v1947_v36 = vadd.f32 %v1946_v30, %v1906_v46  ;;  %v7372_v46 = vcombine.low %v2965_v21, %v2981_v22  ;;  %v2901_v30 = vld [vmem:[%s9802_s5 + $0xd08] sm:$0xff] }
 0x1df   :  { %v1948_v15 = vpop.f32.mrf.mxu0 }
 0x1e0   :  { %v1989_v37 = vpop.f32.mrf.mxu1  ;;  %v1988_v14 = vadd.f32 %v1987_v13, %v1947_v36  ;;  %v1949_v39 = vadd.f32 %v1948_v15, %v1908_v35  ;;  %v2917_v13 = vld [vmem:[%s9802_s5 + $0xd88] sm:$0xff] }
 0x1e1   :  { %v1950_v41 = vpop.f32.mrf.mxu0  ;;  %v7309_v34 = vcombine.high %v2901_v30, %v2917_v13  ;;  %v2869_v35 = vld [vmem:[%s9802_s5 + $0xc08] sm:$0xff]  ;;  %v7308_v15 = vcombine.low %v2901_v30, %v2917_v13  ;;  %v2694_v13 = vld [vmem:[%s9802_s5 + $0x690] sm:$0xff] }
 0x1e2   :  { %v1991_v42 = vpop.f32.mrf.mxu1  ;;  %v1990_v44 = vadd.f32 %v1989_v37, %v1949_v39  ;;  %v1996_v51 = vmax.f32 %v1988_v14, 0.0  ;;  %v2885_v36 = vld [vmem:[%s9802_s5 + $0xc88] sm:$0xff] }
 0x1e3   :  { %v1951_v52 = vpop.f32.mrf.mxu0  ;;  %v7277_v37 = vcombine.high %v2869_v35, %v2885_v36  ;;  %v2853_v14 = vld [vmem:[%s9802_s5 + $0xb88] sm:$0xff]  ;;  %v7276_v39 = vcombine.low %v2869_v35, %v2885_v36 }
 0x1e4   :  { %v1992_v16 = vpop.f32.mrf.mxu1  ;;  %v1997_v54 = vmax.f32 %v1990_v44, 0.0  ;;  %v2000_v53 = vpack.c.bf16 %v1996_v51, %v1996_v51  ;;  %v7245_v40 = vcombine.high %v2837_v38, %v2853_v14  ;;  %v2805_v41 = vld [vmem:[%s9802_s5 + $0xa08] sm:$0xff]  ;;  %v7244_v44 = vcombine.low %v2837_v38, %v2853_v14  ;;  %v2662_v14 = vld [vmem:[%s9802_s5 + $0x590] sm:$0xff] }
 0x1e5   :  { %v2821_v42 = vld [vmem:[%s9802_s5 + $0xa88] sm:$0xff]  ;;  %v2772_v16 = vld [vmem:[%s9802_s5 + $0x900] sm:$0xff] }
 0x1e6   :  { %v2001_v56 = vpack.c.bf16 %v1997_v54, %v1997_v54  ;;  %v7213_v51 = vcombine.high %v2805_v41, %v2821_v42  ;;  %v7212_v52 = vcombine.low %v2805_v41, %v2821_v42  ;;  %v2773_v54 = vld [vmem:[%s9802_s5 + $0x908] sm:$0xff]  ;;  %v7179_v18 = vcombine.high %v2772_v16, %v2788_v17 }
 0x1e8   :  { %2471 = vmatprep.mubr.bf16.mxu1 %v2001_v56  ;;  %5752 = vmatprep.subr.bf16.mxu0 %v7179_v18 }
 0x1e9   :  { %2472 = vmatmul.mubr.bf16.vlgmr.msra.gmra.mxu1 %v2000_v53  ;;  %v7180_v53 = vcombine.low %v2773_v54, %v2789_v55 }
 0x1ea   :  { %5766 = vmatpush1.bf16.msra.mxu1 %v7116_v58  ;;  %v7178_v58 = vcombine.low %v2772_v16, %v2788_v17  ;;  %v2630_v16 = vld [vmem:[%s9802_s5 + $0x490] sm:$0xff]  ;;  %v2615_v17 = vld [vmem:[%s9802_s5 + $0x418] sm:$0xff] }
 0x1eb   :  { %5767 = vmatprep.subr.bf16.mxu1 %v7085_v32  ;;  %v7181_v32 = vcombine.high %v2773_v54, %v2789_v55  ;;  %v2631_v54 = vld [vmem:[%s9802_s5 + $0x498] sm:$0xff] }
 0x1ec   :  { %5753 = vmatpush2.bf16.msra.mxu0 %v7178_v58  ;;  %v7025_v58 = vcombine.high %v2615_v17, %v2631_v54 }
 0x1ee   :  { %5768 = vmatpush1.bf16.msra.mxu1 %v7084_v59  ;;  %v2756_v59 = vld [vmem:[%s9802_s5 + $0x880] sm:$0xff] }
 0x1ef   :  { %5769 = vmatprep.subr.bf16.mxu1 %v7053_v60  ;;  %v2741_v60 = vld [vmem:[%s9802_s5 + $0x808] sm:$0xff]  ;;  %v7147_v25 = vcombine.high %v2740_v33, %v2756_v59 }
 0x1f0   :  { %v7148_v0 = vcombine.low %v2741_v60, %v2757_v28  ;;  %v7149_v1 = vcombine.high %v2741_v60, %v2757_v28  ;;  %v7024_v60 = vcombine.low %v2615_v17, %v2631_v54  ;;  %v2903_v17 = vld [vmem:[%s9802_s5 + $0xd18] sm:$0xff] }
 0x1f1   :  { %5754 = vmatprep.subr.bf16.mxu0 %v7147_v25  ;;  %v2919_v54 = vld [vmem:[%s9802_s5 + $0xd98] sm:$0xff] }
 0x1f2   :  { %5770 = vmatpush1.bf16.msra.mxu1 %v7052_v61 }
 0x1f3   :  { %5771 = vmatprep.subr.bf16.mxu1 %v7021_v63  ;;  %v7146_v63 = vcombine.low %v2740_v33, %v2756_v59  ;;  %v2599_v33 = vld [vmem:[%s9802_s5 + $0x398] sm:$0xff] }
 0x1f5   :  { %5755 = vmatpush2.bf16.msra.mxu0 %v7146_v63  ;;  %v2566_v63 = vld [vmem:[%s9802_s5 + $0x290] sm:$0xff] }
 0x1f6   :  { %5772 = vmatpush1.bf16.msra.mxu1 %v7020_v2 }
 0x1f7   :  { %5773 = vmatprep.subr.bf16.mxu1 %v6989_v4  ;;  %v2710_v4 = vld [vmem:[%s9802_s5 + $0x710] sm:$0xff] }
 0x1f8   :  { %v7118_v7 = vcombine.low %v2710_v4, %v2726_v48 }
 0x1fa   :  { %5774 = vmatpush1.bf16.msra.mxu1 %v6988_v6  ;;  %v7119_v6 = vcombine.high %v2710_v4, %v2726_v48 }
 0x1fb   :  { %5775 = vmatprep.subr.bf16.mxu1 %v6957_v50  ;;  %v2727_v50 = vld [vmem:[%s9802_s5 + $0x798] sm:$0xff] }
 0x1fc   :  { %v7120_v9 = vcombine.low %v2711_v5, %v2727_v50  ;;  %5806 = vmatprep.subr.bf16.mxu0 %v7119_v6  ;;  %v2518_v6 = vld [vmem:[%s9802_s5 + $0x110] sm:$0xff] }
 0x1fe   :  { %5776 = vmatpush1.bf16.msra.mxu1 %v6956_v10  ;;  %v7121_v10 = vcombine.high %v2711_v5, %v2727_v50  ;;  %v2534_v50 = vld [vmem:[%s9802_s5 + $0x190] sm:$0xff] }
 0x1ff   :  { %5777 = vmatprep.subr.bf16.mxu1 %v6925_v11  ;;  %v2066_v11 = vld [vmem:[%s9801_s4] sm:$0x3] }
 0x200   :  { %v2071_v3 = vrot.slane %v2066_v11, %v8056_v45  ;;  %v2075_v12 = vrot.slane %v2066_v11, %v8064_v47 }
 0x202   :  { %5778 = vmatpush1.bf16.msra.mxu1 %v6924_v19 }
 0x203   :  { %5779 = vmatprep.subr.bf16.mxu1 %v6893_v20 }
 0x206   :  { %5780 = vmatpush1.bf16.msra.mxu1 %v6892_v23 }
 0x207   :  { %5781 = vmatprep.subr.bf16.mxu1 %v7373_v24 }
 0x20a   :  { %5782 = vmatpush2.bf16.msra.mxu1 %v7372_v46 }
 0x20b   :  { %5783 = vmatprep.subr.bf16.mxu1 %v7341_v29  ;;  %v2678_v29 = vld [vmem:[%s9802_s5 + $0x610] sm:$0xff] }
 0x20c   :  { %v7086_v41 = vcombine.low %v2678_v29, %v2694_v13 }
 0x20e   :  { %5784 = vmatpush2.bf16.msra.mxu1 %v7340_v31  ;;  %v2679_v31 = vld [vmem:[%s9802_s5 + $0x618] sm:$0xff] }
 0x20f   :  { %5785 = vmatprep.subr.bf16.mxu1 %v7309_v34  ;;  %v2695_v34 = vld [vmem:[%s9802_s5 + $0x698] sm:$0xff] }
 0x210   :  { %v7089_v38 = vcombine.high %v2679_v31, %v2695_v34  ;;  %v7088_v42 = vcombine.low %v2679_v31, %v2695_v34 }
 0x212   :  { %5786 = vmatpush2.bf16.msra.mxu1 %v7308_v15  ;;  %v2646_v15 = vld [vmem:[%s9802_s5 + $0x510] sm:$0xff] }
 0x213   :  { %5787 = vmatprep.subr.bf16.mxu1 %v7277_v37  ;;  %v7087_v37 = vcombine.high %v2678_v29, %v2694_v13  ;;  %v7054_v18 = vcombine.low %v2646_v15, %v2662_v14  ;;  %v2982_v29 = vld [vmem:[%s9802_s5 + $0xf90] sm:$0xff]  ;;  %v2983_v13 = vld [vmem:[%s9802_s5 + $0xf98] sm:$0xff] }
 0x216   :  { %5788 = vmatpush2.bf16.msra.mxu1 %v7276_v39  ;;  %v2647_v39 = vld [vmem:[%s9802_s5 + $0x518] sm:$0xff] }
 0x217   :  { %5789 = vmatprep.subr.bf16.mxu1 %v7245_v40  ;;  %v2663_v40 = vld [vmem:[%s9802_s5 + $0x598] sm:$0xff] }
 0x218   :  { %v7056_v55 = vcombine.low %v2647_v39, %v2663_v40 }
 0x21a   :  { %5790 = vmatpush2.bf16.msra.mxu1 %v7244_v44  ;;  %v7055_v44 = vcombine.high %v2646_v15, %v2662_v14  ;;  %v2950_v14 = vld [vmem:[%s9802_s5 + $0xe90] sm:$0xff] }
 0x21b   :  { %5791 = vmatprep.subr.bf16.mxu1 %v7213_v51  ;;  %v7057_v51 = vcombine.high %v2647_v39, %v2663_v40  ;;  %v2935_v39 = vld [vmem:[%s9802_s5 + $0xe18] sm:$0xff] }
 0x21c   :  { %v2951_v40 = vld [vmem:[%s9802_s5 + $0xe98] sm:$0xff] }
 0x21e   :  { %5792 = vmatpush2.bf16.msra.mxu1 %v7212_v52  ;;  %v2614_v52 = vld [vmem:[%s9802_s5 + $0x410] sm:$0xff] }
 0x21f   :  { %5793 = vmatprep.subr.bf16.mxu1 %v7181_v32  ;;  %v2598_v32 = vld [vmem:[%s9802_s5 + $0x390] sm:$0xff]  ;;  %v7022_v59 = vcombine.low %v2614_v52, %v2630_v16 }
 0x222   :  { %5794 = vmatpush2.bf16.msra.mxu1 %v7180_v53  ;;  %v2582_v53 = vld [vmem:[%s9802_s5 + $0x310] sm:$0xff] }
 0x223   :  { %5795 = vmatprep.subr.bf16.mxu1 %v7149_v1  ;;  %v6991_v25 = vcombine.high %v2582_v53, %v2598_v32  ;;  %v2567_v1 = vld [vmem:[%s9802_s5 + $0x298] sm:$0xff] }
 0x226   :  { %5796 = vmatpush2.bf16.msra.mxu1 %v7148_v0  ;;  %v2551_v0 = vld [vmem:[%s9802_s5 + $0x218] sm:$0xff] }
 0x227   :  { %5847 = vmatprep.subr.bf16.mxu1 %v7121_v10  ;;  %v6961_v5 = vcombine.high %v2551_v0, %v2567_v1  ;;  %v6960_v11 = vcombine.low %v2551_v0, %v2567_v1  ;;  %v2839_v0 = vld [vmem:[%s9802_s5 + $0xb18] sm:$0xff] }
 0x228   :  { %v2855_v1 = vld [vmem:[%s9802_s5 + $0xb98] sm:$0xff] }
 0x229   :  { %v2432_v56 = vpop.f32.mrf.mxu0 }
 0x22a   :  { %v2433_v19 = vadd.f32 %v2432_v56, %v2071_v3  ;;  %v7023_v56 = vcombine.high %v2614_v52, %v2630_v16  ;;  %v6927_v3 = vcombine.high %v2518_v6, %v2534_v50  ;;  %v2902_v52 = vld [vmem:[%s9802_s5 + $0xd10] sm:$0xff] }
 0x22b   :  { %v2434_v57 = vpop.f32.mrf.mxu0  ;;  %v2918_v16 = vld [vmem:[%s9802_s5 + $0xd90] sm:$0xff] }
 0x22c   :  { %v2435_v21 = vadd.f32 %v2434_v57, %v2075_v12  ;;  %v2583_v57 = vld [vmem:[%s9802_s5 + $0x318] sm:$0xff] }
 0x22d   :  { %v2436_v61 = vpop.f32.mrf.mxu0  ;;  %v6993_v28 = vcombine.high %v2583_v57, %v2599_v33  ;;  %v6992_v4 = vcombine.low %v2583_v57, %v2599_v33  ;;  %v2871_v57 = vld [vmem:[%s9802_s5 + $0xc18] sm:$0xff] }
 0x22e   :  { %v2550_v61 = vld [vmem:[%s9802_s5 + $0x210] sm:$0xff]  ;;  %v2887_v33 = vld [vmem:[%s9802_s5 + $0xc98] sm:$0xff] }
 0x22f   :  { %v2437_v2 = vpop.f32.mrf.mxu0  ;;  %v6959_v48 = vcombine.high %v2550_v61, %v2566_v63  ;;  %v6958_v10 = vcombine.low %v2550_v61, %v2566_v63  ;;  %v2838_v61 = vld [vmem:[%s9802_s5 + $0xb10] sm:$0xff] }
 0x230   :  { %v6990_v2 = vcombine.low %v2582_v53, %v2598_v32  ;;  %v2870_v53 = vld [vmem:[%s9802_s5 + $0xc10] sm:$0xff] }
 0x231   :  { %v2886_v32 = vld [vmem:[%s9802_s5 + $0xc90] sm:$0xff] }
 0x232   :  { %v2854_v63 = vld [vmem:[%s9802_s5 + $0xb90] sm:$0xff] }
 0x2a9   :  { %v2473_v20 = vpop.f32.mrf.mxu1 }
 0x2aa   :  { %v2474_v22 = vadd.f32 %v2473_v20, %v2433_v19  ;;  %v2486_v19 = vld [vmem:[%s9802_s5 + $0x10] sm:$0xff] }
 0x2ab   :  { %v2475_v23 = vpop.f32.mrf.mxu1  ;;  %v2502_v20 = vld [vmem:[%s9802_s5 + $0x90] sm:$0xff] }
 0x2ac   :  { %v2476_v24 = vadd.f32 %v2475_v23, %v2435_v21  ;;  %v2480_v26 = vmax.f32 %v2474_v22, 0.0  ;;  %v2487_v21 = vld [vmem:[%s9802_s5 + $0x18] sm:$0xff]  ;;  %v6926_v23 = vcombine.low %v2518_v6, %v2534_v50  ;;  %v6894_v31 = vcombine.low %v2486_v19, %v2502_v20  ;;  %v2806_v6 = vld [vmem:[%s9802_s5 + $0xa10] sm:$0xff] }
 0x2ad   :  { %v2477_v27 = vpop.f32.mrf.mxu1  ;;  %v2503_v22 = vld [vmem:[%s9802_s5 + $0x98] sm:$0xff]  ;;  %v2822_v50 = vld [vmem:[%s9802_s5 + $0xa90] sm:$0xff] }
 0x2ae   :  { %v2481_v46 = vmax.f32 %v2476_v24, 0.0  ;;  %v8327_v36 = vpack.c.bf16 %v2480_v26, %v2480_v26  ;;  %v6895_v26 = vcombine.high %v2486_v19, %v2502_v20  ;;  %v6897_v27 = vcombine.high %v2487_v21, %v2503_v22  ;;  %v2774_v19 = vld [vmem:[%s9802_s5 + $0x910] sm:$0xff] }
 0x2af   :  { %v2478_v30 = vpop.f32.mrf.mxu1  ;;  %v6896_v34 = vcombine.low %v2487_v21, %v2503_v22  ;;  %v2790_v20 = vld [vmem:[%s9802_s5 + $0x990] sm:$0xff]  ;;  %v2775_v21 = vld [vmem:[%s9802_s5 + $0x918] sm:$0xff] }
 0x2b0   :  { %v8325_v35 = vpack.c.bf16 %v2481_v46, %v2481_v46  ;;  %v2966_v46 = vld [vmem:[%s9802_s5 + $0xf10] sm:$0xff]  ;;  %v2967_v30 = vld [vmem:[%s9802_s5 + $0xf18] sm:$0xff] }
 0x2b1   :  { %v7375_v15 = vcombine.high %v2966_v46, %v2982_v29  ;;  %v2791_v22 = vld [vmem:[%s9802_s5 + $0x998] sm:$0xff] }
 0x2b2   :  { %5756 = vmatprep.mubr.bf16.mxu0 %v8325_v35  ;;  %5797 = vmatprep.mubr.bf16.mxu1 %v8325_v35 }
 0x2b3   :  { %5757 = vmatmul.mubr.bf16.vlgmr.msra.gmra.mxu0 %v8327_v36  ;;  %5798 = vmatmul.mubr.bf16.vlgmr.msra.gmra.mxu1 %v8327_v36 }
 0x2b4   :  { %5807 = vmatpush1.bf16.msra.mxu0 %v7118_v7  ;;  %5848 = vmatpush1.bf16.msra.mxu1 %v7120_v9  ;;  %v2519_v7 = vld [vmem:[%s9802_s5 + $0x118] sm:$0xff] }
 0x2b5   :  { %5838 = vmatprep.mubr.bf16.mxu0 %v8325_v35  ;;  %5879 = vmatprep.mubr.bf16.mxu1 %v8325_v35  ;;  %v2535_v9 = vld [vmem:[%s9802_s5 + $0x198] sm:$0xff] }
 0x2b6   :  { %5808 = vmatprep.subr.bf16.mxu0 %v7087_v37  ;;  %5849 = vmatprep.subr.bf16.mxu1 %v7089_v38  ;;  %v6929_v12 = vcombine.high %v2519_v7, %v2535_v9  ;;  %v6928_v24 = vcombine.low %v2519_v7, %v2535_v9  ;;  %v7377_v37 = vcombine.high %v2967_v30, %v2983_v13  ;;  %v2934_v38 = vld [vmem:[%s9802_s5 + $0xe10] sm:$0xff]  ;;  %v2807_v7 = vld [vmem:[%s9802_s5 + $0xa18] sm:$0xff] }
 0x2b7   :  { %v2823_v9 = vld [vmem:[%s9802_s5 + $0xa98] sm:$0xff] }
 0x2b8   :  { %5809 = vmatpush1.bf16.msra.mxu0 %v7086_v41  ;;  %5850 = vmatpush1.bf16.msra.mxu1 %v7088_v42  ;;  %v7374_v41 = vcombine.low %v2966_v46, %v2982_v29  ;;  %v7376_v42 = vcombine.low %v2967_v30, %v2983_v13  ;;  %v2742_v46 = vld [vmem:[%s9802_s5 + $0x810] sm:$0xff]  ;;  %v2743_v30 = vld [vmem:[%s9802_s5 + $0x818] sm:$0xff] }
 0x2b9   :  { %5810 = vmatprep.subr.bf16.mxu0 %v7055_v44  ;;  %5851 = vmatprep.subr.bf16.mxu1 %v7057_v51  ;;  %v7343_v44 = vcombine.high %v2934_v38, %v2950_v14  ;;  %v7345_v51 = vcombine.high %v2935_v39, %v2951_v40  ;;  %v2758_v29 = vld [vmem:[%s9802_s5 + $0x890] sm:$0xff]  ;;  %v2759_v13 = vld [vmem:[%s9802_s5 + $0x898] sm:$0xff] }
 0x2bc   :  { %5811 = vmatpush1.bf16.msra.mxu0 %v7054_v18  ;;  %5852 = vmatpush1.bf16.msra.mxu1 %v7056_v55  ;;  %v7342_v18 = vcombine.low %v2934_v38, %v2950_v14  ;;  %v7344_v55 = vcombine.low %v2935_v39, %v2951_v40  ;;  %v2712_v38 = vld [vmem:[%s9802_s5 + $0x720] sm:$0xff]  ;;  %v2713_v39 = vld [vmem:[%s9802_s5 + $0x728] sm:$0xff] }
 0x2bd   :  { %5812 = vmatprep.subr.bf16.mxu0 %v7023_v56  ;;  %5853 = vmatprep.subr.bf16.mxu1 %v7025_v58  ;;  %v7311_v56 = vcombine.high %v2902_v52, %v2918_v16  ;;  %v7313_v58 = vcombine.high %v2903_v17, %v2919_v54  ;;  %v2728_v14 = vld [vmem:[%s9802_s5 + $0x7a0] sm:$0xff]  ;;  %v2729_v40 = vld [vmem:[%s9802_s5 + $0x7a8] sm:$0xff] }
 0x2c0   :  { %5813 = vmatpush1.bf16.msra.mxu0 %v7022_v59  ;;  %5854 = vmatpush1.bf16.msra.mxu1 %v7024_v60  ;;  %v7310_v59 = vcombine.low %v2902_v52, %v2918_v16  ;;  %v7312_v60 = vcombine.low %v2903_v17, %v2919_v54  ;;  %v2680_v52 = vld [vmem:[%s9802_s5 + $0x620] sm:$0xff]  ;;  %v2681_v17 = vld [vmem:[%s9802_s5 + $0x628] sm:$0xff] }
 0x2c1   :  { %5814 = vmatprep.subr.bf16.mxu0 %v6991_v25  ;;  %5855 = vmatprep.subr.bf16.mxu1 %v6993_v28  ;;  %v7279_v25 = vcombine.high %v2870_v53, %v2886_v32  ;;  %v7281_v28 = vcombine.high %v2871_v57, %v2887_v33  ;;  %v2696_v16 = vld [vmem:[%s9802_s5 + $0x6a0] sm:$0xff]  ;;  %v2697_v54 = vld [vmem:[%s9802_s5 + $0x6a8] sm:$0xff] }
 0x2c4   :  { %5815 = vmatpush1.bf16.msra.mxu0 %v6990_v2  ;;  %5856 = vmatpush1.bf16.msra.mxu1 %v6992_v4  ;;  %v7278_v2 = vcombine.low %v2870_v53, %v2886_v32  ;;  %v7280_v4 = vcombine.low %v2871_v57, %v2887_v33  ;;  %v2648_v53 = vld [vmem:[%s9802_s5 + $0x520] sm:$0xff]  ;;  %v2649_v57 = vld [vmem:[%s9802_s5 + $0x528] sm:$0xff] }
 0x2c5   :  { %5816 = vmatprep.subr.bf16.mxu0 %v6959_v48  ;;  %5857 = vmatprep.subr.bf16.mxu1 %v6961_v5  ;;  %v7247_v48 = vcombine.high %v2838_v61, %v2854_v63  ;;  %v7249_v5 = vcombine.high %v2839_v0, %v2855_v1  ;;  %v2664_v32 = vld [vmem:[%s9802_s5 + $0x5a0] sm:$0xff]  ;;  %v2665_v33 = vld [vmem:[%s9802_s5 + $0x5a8] sm:$0xff] }
 0x2c8   :  { %5817 = vmatpush1.bf16.msra.mxu0 %v6958_v10  ;;  %5858 = vmatpush1.bf16.msra.mxu1 %v6960_v11  ;;  %v7246_v10 = vcombine.low %v2838_v61, %v2854_v63  ;;  %v7248_v11 = vcombine.low %v2839_v0, %v2855_v1  ;;  %v2616_v61 = vld [vmem:[%s9802_s5 + $0x420] sm:$0xff]  ;;  %v2617_v0 = vld [vmem:[%s9802_s5 + $0x428] sm:$0xff] }
 0x2c9   :  { %5818 = vmatprep.subr.bf16.mxu0 %v6927_v3  ;;  %5859 = vmatprep.subr.bf16.mxu1 %v6929_v12  ;;  %v7215_v3 = vcombine.high %v2806_v6, %v2822_v50  ;;  %v7217_v12 = vcombine.high %v2807_v7, %v2823_v9  ;;  %v2632_v63 = vld [vmem:[%s9802_s5 + $0x4a0] sm:$0xff]  ;;  %v2633_v1 = vld [vmem:[%s9802_s5 + $0x4a8] sm:$0xff] }
 0x2cc   :  { %5819 = vmatpush1.bf16.msra.mxu0 %v6926_v23  ;;  %5860 = vmatpush1.bf16.msra.mxu1 %v6928_v24  ;;  %v7214_v23 = vcombine.low %v2806_v6, %v2822_v50  ;;  %v7216_v24 = vcombine.low %v2807_v7, %v2823_v9  ;;  %v2584_v6 = vld [vmem:[%s9802_s5 + $0x320] sm:$0xff]  ;;  %v2585_v7 = vld [vmem:[%s9802_s5 + $0x328] sm:$0xff] }
 0x2cd   :  { %5820 = vmatprep.subr.bf16.mxu0 %v6895_v26  ;;  %5861 = vmatprep.subr.bf16.mxu1 %v6897_v27  ;;  %v7183_v26 = vcombine.high %v2774_v19, %v2790_v20  ;;  %v7185_v27 = vcombine.high %v2775_v21, %v2791_v22  ;;  %v2600_v50 = vld [vmem:[%s9802_s5 + $0x3a0] sm:$0xff]  ;;  %v2601_v9 = vld [vmem:[%s9802_s5 + $0x3a8] sm:$0xff] }
 0x2d0   :  { %5821 = vmatpush1.bf16.msra.mxu0 %v6894_v31  ;;  %5862 = vmatpush1.bf16.msra.mxu1 %v6896_v34  ;;  %v7182_v31 = vcombine.low %v2774_v19, %v2790_v20  ;;  %v7184_v34 = vcombine.low %v2775_v21, %v2791_v22  ;;  %v2552_v19 = vld [vmem:[%s9802_s5 + $0x220] sm:$0xff]  ;;  %v2553_v21 = vld [vmem:[%s9802_s5 + $0x228] sm:$0xff] }
 0x2d1   :  { %5822 = vmatprep.subr.bf16.mxu0 %v7375_v15  ;;  %5863 = vmatprep.subr.bf16.mxu1 %v7377_v37  ;;  %v7151_v15 = vcombine.high %v2742_v46, %v2758_v29  ;;  %v7153_v37 = vcombine.high %v2743_v30, %v2759_v13  ;;  %v2568_v20 = vld [vmem:[%s9802_s5 + $0x2a0] sm:$0xff]  ;;  %v2569_v22 = vld [vmem:[%s9802_s5 + $0x2a8] sm:$0xff] }
 0x2d4   :  { %5823 = vmatpush2.bf16.msra.mxu0 %v7374_v41  ;;  %5864 = vmatpush2.bf16.msra.mxu1 %v7376_v42  ;;  %v7150_v41 = vcombine.low %v2742_v46, %v2758_v29  ;;  %v7152_v42 = vcombine.low %v2743_v30, %v2759_v13  ;;  %v2520_v46 = vld [vmem:[%s9802_s5 + $0x120] sm:$0xff]  ;;  %v2521_v30 = vld [vmem:[%s9802_s5 + $0x128] sm:$0xff] }
 0x2d5   :  { %5824 = vmatprep.subr.bf16.mxu0 %v7343_v44  ;;  %5865 = vmatprep.subr.bf16.mxu1 %v7345_v51  ;;  %v7123_v44 = vcombine.high %v2712_v38, %v2728_v14  ;;  %v7125_v51 = vcombine.high %v2713_v39, %v2729_v40  ;;  %v2536_v29 = vld [vmem:[%s9802_s5 + $0x1a0] sm:$0xff]  ;;  %v2537_v13 = vld [vmem:[%s9802_s5 + $0x1a8] sm:$0xff] }
 0x2d8   :  { %5825 = vmatpush2.bf16.msra.mxu0 %v7342_v18  ;;  %5866 = vmatpush2.bf16.msra.mxu1 %v7344_v55  ;;  %v7122_v18 = vcombine.low %v2712_v38, %v2728_v14  ;;  %v7124_v55 = vcombine.low %v2713_v39, %v2729_v40  ;;  %v2488_v38 = vld [vmem:[%s9802_s5 + $0x20] sm:$0xff]  ;;  %v2489_v39 = vld [vmem:[%s9802_s5 + $0x28] sm:$0xff] }
 0x2d9   :  { %5826 = vmatprep.subr.bf16.mxu0 %v7311_v56  ;;  %5867 = vmatprep.subr.bf16.mxu1 %v7313_v58  ;;  %v7091_v56 = vcombine.high %v2680_v52, %v2696_v16  ;;  %v7093_v58 = vcombine.high %v2681_v17, %v2697_v54  ;;  %v2504_v14 = vld [vmem:[%s9802_s5 + $0xa0] sm:$0xff]  ;;  %v2505_v40 = vld [vmem:[%s9802_s5 + $0xa8] sm:$0xff] }
 0x2dc   :  { %5827 = vmatpush2.bf16.msra.mxu0 %v7310_v59  ;;  %5868 = vmatpush2.bf16.msra.mxu1 %v7312_v60  ;;  %v7090_v59 = vcombine.low %v2680_v52, %v2696_v16  ;;  %v7092_v60 = vcombine.low %v2681_v17, %v2697_v54  ;;  %v2968_v52 = vld [vmem:[%s9802_s5 + $0xf20] sm:$0xff]  ;;  %v2969_v17 = vld [vmem:[%s9802_s5 + $0xf28] sm:$0xff] }
 0x2dd   :  { %5828 = vmatprep.subr.bf16.mxu0 %v7279_v25  ;;  %5869 = vmatprep.subr.bf16.mxu1 %v7281_v28  ;;  %v7059_v25 = vcombine.high %v2648_v53, %v2664_v32  ;;  %v7061_v28 = vcombine.high %v2649_v57, %v2665_v33  ;;  %v2984_v16 = vld [vmem:[%s9802_s5 + $0xfa0] sm:$0xff]  ;;  %v2985_v54 = vld [vmem:[%s9802_s5 + $0xfa8] sm:$0xff] }
 0x2e0   :  { %5829 = vmatpush2.bf16.msra.mxu0 %v7278_v2  ;;  %5870 = vmatpush2.bf16.msra.mxu1 %v7280_v4  ;;  %v7058_v2 = vcombine.low %v2648_v53, %v2664_v32  ;;  %v7060_v4 = vcombine.low %v2649_v57, %v2665_v33  ;;  %v2936_v53 = vld [vmem:[%s9802_s5 + $0xe20] sm:$0xff]  ;;  %v2937_v57 = vld [vmem:[%s9802_s5 + $0xe28] sm:$0xff] }
 0x2e1   :  { %5830 = vmatprep.subr.bf16.mxu0 %v7247_v48  ;;  %5871 = vmatprep.subr.bf16.mxu1 %v7249_v5  ;;  %v7027_v48 = vcombine.high %v2616_v61, %v2632_v63  ;;  %v7029_v5 = vcombine.high %v2617_v0, %v2633_v1  ;;  %v2952_v32 = vld [vmem:[%s9802_s5 + $0xea0] sm:$0xff]  ;;  %v2953_v33 = vld [vmem:[%s9802_s5 + $0xea8] sm:$0xff] }
 0x2e4   :  { %5831 = vmatpush2.bf16.msra.mxu0 %v7246_v10  ;;  %5872 = vmatpush2.bf16.msra.mxu1 %v7248_v11  ;;  %v7026_v10 = vcombine.low %v2616_v61, %v2632_v63  ;;  %v7028_v11 = vcombine.low %v2617_v0, %v2633_v1  ;;  %v2904_v61 = vld [vmem:[%s9802_s5 + $0xd20] sm:$0xff]  ;;  %v2905_v0 = vld [vmem:[%s9802_s5 + $0xd28] sm:$0xff] }
 0x2e5   :  { %5832 = vmatprep.subr.bf16.mxu0 %v7215_v3  ;;  %5873 = vmatprep.subr.bf16.mxu1 %v7217_v12  ;;  %v6995_v3 = vcombine.high %v2584_v6, %v2600_v50  ;;  %v6997_v12 = vcombine.high %v2585_v7, %v2601_v9  ;;  %v2920_v63 = vld [vmem:[%s9802_s5 + $0xda0] sm:$0xff]  ;;  %v2921_v1 = vld [vmem:[%s9802_s5 + $0xda8] sm:$0xff] }
 0x2e8   :  { %5833 = vmatpush2.bf16.msra.mxu0 %v7214_v23  ;;  %5874 = vmatpush2.bf16.msra.mxu1 %v7216_v24  ;;  %v6994_v23 = vcombine.low %v2584_v6, %v2600_v50  ;;  %v6996_v24 = vcombine.low %v2585_v7, %v2601_v9  ;;  %v2872_v6 = vld [vmem:[%s9802_s5 + $0xc20] sm:$0xff]  ;;  %v2873_v7 = vld [vmem:[%s9802_s5 + $0xc28] sm:$0xff] }
 0x2e9   :  { %5834 = vmatprep.subr.bf16.mxu0 %v7183_v26  ;;  %5875 = vmatprep.subr.bf16.mxu1 %v7185_v27  ;;  %v6963_v26 = vcombine.high %v2552_v19, %v2568_v20  ;;  %v6965_v27 = vcombine.high %v2553_v21, %v2569_v22  ;;  %v2888_v50 = vld [vmem:[%s9802_s5 + $0xca0] sm:$0xff]  ;;  %v2889_v9 = vld [vmem:[%s9802_s5 + $0xca8] sm:$0xff] }
 0x2ec   :  { %5835 = vmatpush2.bf16.msra.mxu0 %v7182_v31  ;;  %5876 = vmatpush2.bf16.msra.mxu1 %v7184_v34  ;;  %v6962_v31 = vcombine.low %v2552_v19, %v2568_v20  ;;  %v6964_v34 = vcombine.low %v2553_v21, %v2569_v22  ;;  %v2840_v19 = vld [vmem:[%s9802_s5 + $0xb20] sm:$0xff]  ;;  %v2841_v21 = vld [vmem:[%s9802_s5 + $0xb28] sm:$0xff] }
 0x2ed   :  { %5836 = vmatprep.subr.bf16.mxu0 %v7151_v15  ;;  %5877 = vmatprep.subr.bf16.mxu1 %v7153_v37  ;;  %v6931_v15 = vcombine.high %v2520_v46, %v2536_v29  ;;  %v6933_v37 = vcombine.high %v2521_v30, %v2537_v13  ;;  %v2856_v20 = vld [vmem:[%s9802_s5 + $0xba0] sm:$0xff]  ;;  %v2857_v22 = vld [vmem:[%s9802_s5 + $0xba8] sm:$0xff] }
 0x2f0   :  { %5837 = vmatpush2.bf16.msra.mxu0 %v7150_v41  ;;  %5878 = vmatpush2.bf16.msra.mxu1 %v7152_v42  ;;  %v6930_v41 = vcombine.low %v2520_v46, %v2536_v29  ;;  %v6932_v42 = vcombine.low %v2521_v30, %v2537_v13  ;;  %v2808_v46 = vld [vmem:[%s9802_s5 + $0xa20] sm:$0xff]  ;;  %v2809_v30 = vld [vmem:[%s9802_s5 + $0xa28] sm:$0xff] }
 0x2f1   :  { %5888 = vmatprep.subr.bf16.mxu0 %v7123_v44  ;;  %5929 = vmatprep.subr.bf16.mxu1 %v7125_v51  ;;  %v6899_v44 = vcombine.high %v2488_v38, %v2504_v14  ;;  %v6901_v51 = vcombine.high %v2489_v39, %v2505_v40  ;;  %v2824_v29 = vld [vmem:[%s9802_s5 + $0xaa0] sm:$0xff]  ;;  %v2825_v13 = vld [vmem:[%s9802_s5 + $0xaa8] sm:$0xff] }
 0x2f3   :  { %5839 = vmatmul.mubr.bf16.vlgmr.msra.gmra.mxu0 %v8327_v36  ;;  %5880 = vmatmul.mubr.bf16.vlgmr.msra.gmra.mxu1 %v8327_v36 }
 0x2f4   :  { %5889 = vmatpush1.bf16.msra.mxu0 %v7122_v18  ;;  %5920 = vmatprep.mubr.bf16.mxu0 %v8325_v35  ;;  %v6898_v18 = vcombine.low %v2488_v38, %v2504_v14  ;;  %v2776_v38 = vld [vmem:[%s9802_s5 + $0x920] sm:$0xff] }
 0x2f5   :  { %5930 = vmatpush1.bf16.msra.mxu1 %v7124_v55  ;;  %5961 = vmatprep.mubr.bf16.mxu1 %v8325_v35  ;;  %v6900_v55 = vcombine.low %v2489_v39, %v2505_v40  ;;  %v2792_v14 = vld [vmem:[%s9802_s5 + $0x9a0] sm:$0xff]  ;;  %v2777_v39 = vld [vmem:[%s9802_s5 + $0x928] sm:$0xff] }
 0x2f6   :  { %5890 = vmatprep.subr.bf16.mxu0 %v7091_v56  ;;  %5931 = vmatprep.subr.bf16.mxu1 %v7093_v58  ;;  %v7379_v56 = vcombine.high %v2968_v52, %v2984_v16  ;;  %v7381_v58 = vcombine.high %v2969_v17, %v2985_v54  ;;  %v2793_v40 = vld [vmem:[%s9802_s5 + $0x9a8] sm:$0xff] }
 0x2f8   :  { %5891 = vmatpush1.bf16.msra.mxu0 %v7090_v59  ;;  %v7378_v59 = vcombine.low %v2968_v52, %v2984_v16  ;;  %v2744_v52 = vld [vmem:[%s9802_s5 + $0x820] sm:$0xff] }
 0x2f9   :  { %5932 = vmatpush1.bf16.msra.mxu1 %v7092_v60  ;;  %5892 = vmatprep.subr.bf16.mxu0 %v7059_v25  ;;  %v7380_v60 = vcombine.low %v2969_v17, %v2985_v54  ;;  %v7347_v25 = vcombine.high %v2936_v53, %v2952_v32  ;;  %v2760_v16 = vld [vmem:[%s9802_s5 + $0x8a0] sm:$0xff]  ;;  %v2745_v17 = vld [vmem:[%s9802_s5 + $0x828] sm:$0xff] }
 0x2fa   :  { %5933 = vmatprep.subr.bf16.mxu1 %v7061_v28  ;;  %v7349_v28 = vcombine.high %v2937_v57, %v2953_v33  ;;  %v2761_v54 = vld [vmem:[%s9802_s5 + $0x8a8] sm:$0xff] }
 0x2fc   :  { %5893 = vmatpush1.bf16.msra.mxu0 %v7058_v2  ;;  %v7346_v2 = vcombine.low %v2936_v53, %v2952_v32  ;;  %v2714_v53 = vld [vmem:[%s9802_s5 + $0x730] sm:$0xff] }
 0x2fd   :  { %5934 = vmatpush1.bf16.msra.mxu1 %v7060_v4  ;;  %5894 = vmatprep.subr.bf16.mxu0 %v7027_v48  ;;  %v7348_v4 = vcombine.low %v2937_v57, %v2953_v33  ;;  %v7315_v48 = vcombine.high %v2904_v61, %v2920_v63  ;;  %v2730_v32 = vld [vmem:[%s9802_s5 + $0x7b0] sm:$0xff]  ;;  %v2715_v57 = vld [vmem:[%s9802_s5 + $0x738] sm:$0xff] }
 0x2fe   :  { %5935 = vmatprep.subr.bf16.mxu1 %v7029_v5  ;;  %v7317_v5 = vcombine.high %v2905_v0, %v2921_v1  ;;  %v2731_v33 = vld [vmem:[%s9802_s5 + $0x7b8] sm:$0xff] }
 0x300   :  { %5895 = vmatpush1.bf16.msra.mxu0 %v7026_v10  ;;  %v7314_v10 = vcombine.low %v2904_v61, %v2920_v63  ;;  %v2682_v61 = vld [vmem:[%s9802_s5 + $0x630] sm:$0xff] }
 0x301   :  { %5936 = vmatpush1.bf16.msra.mxu1 %v7028_v11  ;;  %5896 = vmatprep.subr.bf16.mxu0 %v6995_v3  ;;  %v7316_v11 = vcombine.low %v2905_v0, %v2921_v1  ;;  %v7283_v3 = vcombine.high %v2872_v6, %v2888_v50  ;;  %v2698_v63 = vld [vmem:[%s9802_s5 + $0x6b0] sm:$0xff]  ;;  %v7126_v0 = vcombine.low %v2714_v53, %v2730_v32  ;;  %v2683_v1 = vld [vmem:[%s9802_s5 + $0x638] sm:$0xff] }
 0x302   :  { %5937 = vmatprep.subr.bf16.mxu1 %v6997_v12  ;;  %v7285_v12 = vcombine.high %v2873_v7, %v2889_v9 }
 0x304   :  { %5897 = vmatpush1.bf16.msra.mxu0 %v6994_v23  ;;  %v7282_v23 = vcombine.low %v2872_v6, %v2888_v50  ;;  %v2666_v6 = vld [vmem:[%s9802_s5 + $0x5b0] sm:$0xff] }
 0x305   :  { %5938 = vmatpush1.bf16.msra.mxu1 %v6996_v24  ;;  %5898 = vmatprep.subr.bf16.mxu0 %v6963_v26  ;;  %v7284_v24 = vcombine.low %v2873_v7, %v2889_v9  ;;  %v7251_v26 = vcombine.high %v2840_v19, %v2856_v20  ;;  %v2651_v7 = vld [vmem:[%s9802_s5 + $0x538] sm:$0xff] }
 0x306   :  { %5939 = vmatprep.subr.bf16.mxu1 %v6965_v27  ;;  %v7253_v27 = vcombine.high %v2841_v21, %v2857_v22  ;;  %v2667_v9 = vld [vmem:[%s9802_s5 + $0x5b8] sm:$0xff] }
 0x308   :  { %5899 = vmatpush1.bf16.msra.mxu0 %v6962_v31  ;;  %v7250_v31 = vcombine.low %v2840_v19, %v2856_v20  ;;  %v2618_v19 = vld [vmem:[%s9802_s5 + $0x430] sm:$0xff] }
 0x309   :  { %5940 = vmatpush1.bf16.msra.mxu1 %v6964_v34  ;;  %5900 = vmatprep.subr.bf16.mxu0 %v6931_v15  ;;  %v7252_v34 = vcombine.low %v2841_v21, %v2857_v22  ;;  %v7219_v15 = vcombine.high %v2808_v46, %v2824_v29  ;;  %v2634_v20 = vld [vmem:[%s9802_s5 + $0x4b0] sm:$0xff]  ;;  %v2619_v21 = vld [vmem:[%s9802_s5 + $0x438] sm:$0xff] }
 0x30a   :  { %5941 = vmatprep.subr.bf16.mxu1 %v6933_v37  ;;  %v7221_v37 = vcombine.high %v2809_v30, %v2825_v13  ;;  %v2635_v22 = vld [vmem:[%s9802_s5 + $0x4b8] sm:$0xff] }
 0x30c   :  { %5901 = vmatpush1.bf16.msra.mxu0 %v6930_v41  ;;  %v7218_v41 = vcombine.low %v2808_v46, %v2824_v29  ;;  %v2586_v46 = vld [vmem:[%s9802_s5 + $0x330] sm:$0xff] }
 0x30d   :  { %5942 = vmatpush1.bf16.msra.mxu1 %v6932_v42  ;;  %5902 = vmatprep.subr.bf16.mxu0 %v6899_v44  ;;  %v7220_v42 = vcombine.low %v2809_v30, %v2825_v13  ;;  %v7187_v44 = vcombine.high %v2776_v38, %v2792_v14  ;;  %v2602_v29 = vld [vmem:[%s9802_s5 + $0x3b0] sm:$0xff]  ;;  %v2587_v30 = vld [vmem:[%s9802_s5 + $0x338] sm:$0xff] }
 0x30e   :  { %5943 = vmatprep.subr.bf16.mxu1 %v6901_v51  ;;  %v7189_v51 = vcombine.high %v2777_v39, %v2793_v40  ;;  %v2603_v13 = vld [vmem:[%s9802_s5 + $0x3b8] sm:$0xff] }
 0x310   :  { %5903 = vmatpush1.bf16.msra.mxu0 %v6898_v18  ;;  %v7186_v18 = vcombine.low %v2776_v38, %v2792_v14  ;;  %v2554_v38 = vld [vmem:[%s9802_s5 + $0x230] sm:$0xff] }
 0x311   :  { %5944 = vmatpush1.bf16.msra.mxu1 %v6900_v55  ;;  %5904 = vmatprep.subr.bf16.mxu0 %v7379_v56  ;;  %v7188_v55 = vcombine.low %v2777_v39, %v2793_v40  ;;  %v7155_v56 = vcombine.high %v2744_v52, %v2760_v16  ;;  %v2570_v14 = vld [vmem:[%s9802_s5 + $0x2b0] sm:$0xff]  ;;  %v2555_v39 = vld [vmem:[%s9802_s5 + $0x238] sm:$0xff] }
 0x312   :  { %5945 = vmatprep.subr.bf16.mxu1 %v7381_v58  ;;  %v7157_v58 = vcombine.high %v2745_v17, %v2761_v54  ;;  %v2571_v40 = vld [vmem:[%s9802_s5 + $0x2b8] sm:$0xff] }
 0x314   :  { %5905 = vmatpush2.bf16.msra.mxu0 %v7378_v59  ;;  %v7154_v59 = vcombine.low %v2744_v52, %v2760_v16  ;;  %v2522_v52 = vld [vmem:[%s9802_s5 + $0x130] sm:$0xff] }
 0x315   :  { %5946 = vmatpush2.bf16.msra.mxu1 %v7380_v60  ;;  %5906 = vmatprep.subr.bf16.mxu0 %v7347_v25  ;;  %v7156_v60 = vcombine.low %v2745_v17, %v2761_v54  ;;  %v7127_v25 = vcombine.high %v2714_v53, %v2730_v32  ;;  %v2538_v16 = vld [vmem:[%s9802_s5 + $0x1b0] sm:$0xff]  ;;  %v2523_v17 = vld [vmem:[%s9802_s5 + $0x138] sm:$0xff] }
 0x316   :  { %5947 = vmatprep.subr.bf16.mxu1 %v7349_v28  ;;  %v7129_v28 = vcombine.high %v2715_v57, %v2731_v33  ;;  %v2539_v54 = vld [vmem:[%s9802_s5 + $0x1b8] sm:$0xff]  ;;  %v2490_v53 = vld [vmem:[%s9802_s5 + $0x30] sm:$0xff] }
 0x317   :  { %v2506_v32 = vld [vmem:[%s9802_s5 + $0xb0] sm:$0xff] }
 0x318   :  { %5907 = vmatpush2.bf16.msra.mxu0 %v7346_v2  ;;  %v2699_v2 = vld [vmem:[%s9802_s5 + $0x6b8] sm:$0xff] }
 0x319   :  { %5948 = vmatpush2.bf16.msra.mxu1 %v7348_v4  ;;  %5908 = vmatprep.subr.bf16.mxu0 %v7315_v48  ;;  %v7128_v4 = vcombine.low %v2715_v57, %v2731_v33  ;;  %v7095_v48 = vcombine.high %v2682_v61, %v2698_v63  ;;  %v7097_v50 = vcombine.high %v2683_v1, %v2699_v2  ;;  %v2491_v57 = vld [vmem:[%s9802_s5 + $0x38] sm:$0xff] }
 0x31a   :  { %5949 = vmatprep.subr.bf16.mxu1 %v7317_v5  ;;  %v2650_v5 = vld [vmem:[%s9802_s5 + $0x530] sm:$0xff]  ;;  %v2507_v33 = vld [vmem:[%s9802_s5 + $0xb8] sm:$0xff] }
 0x31c   :  { %5909 = vmatpush2.bf16.msra.mxu0 %v7314_v10  ;;  %v7094_v10 = vcombine.low %v2682_v61, %v2698_v63  ;;  %v2970_v61 = vld [vmem:[%s9802_s5 + $0xf30] sm:$0xff] }
 0x31d   :  { %5950 = vmatpush2.bf16.msra.mxu1 %v7316_v11  ;;  %5910 = vmatprep.subr.bf16.mxu0 %v7283_v3  ;;  %v7096_v11 = vcombine.low %v2683_v1, %v2699_v2  ;;  %v7063_v3 = vcombine.high %v2650_v5, %v2666_v6  ;;  %v2986_v63 = vld [vmem:[%s9802_s5 + $0xfb0] sm:$0xff]  ;;  %v2987_v1 = vld [vmem:[%s9802_s5 + $0xfb8] sm:$0xff]  ;;  %v6902_v2 = vcombine.low %v2490_v53, %v2506_v32 }
 0x31e   :  { %5951 = vmatprep.subr.bf16.mxu1 %v7285_v12  ;;  %v7065_v12 = vcombine.high %v2651_v7, %v2667_v9 }
 0x320   :  { %5911 = vmatpush2.bf16.msra.mxu0 %v7282_v23  ;;  %v7062_v23 = vcombine.low %v2650_v5, %v2666_v6  ;;  %v2938_v6 = vld [vmem:[%s9802_s5 + $0xe30] sm:$0xff] }
 0x321   :  { %5952 = vmatpush2.bf16.msra.mxu1 %v7284_v24  ;;  %5912 = vmatprep.subr.bf16.mxu0 %v7251_v26  ;;  %v7064_v24 = vcombine.low %v2651_v7, %v2667_v9  ;;  %v7031_v26 = vcombine.high %v2618_v19, %v2634_v20  ;;  %v2939_v7 = vld [vmem:[%s9802_s5 + $0xe38] sm:$0xff] }
 0x322   :  { %5953 = vmatprep.subr.bf16.mxu1 %v7253_v27  ;;  %v7033_v27 = vcombine.high %v2619_v21, %v2635_v22  ;;  %v2955_v9 = vld [vmem:[%s9802_s5 + $0xeb8] sm:$0xff] }
 0x324   :  { %5913 = vmatpush2.bf16.msra.mxu0 %v7250_v31  ;;  %v7030_v31 = vcombine.low %v2618_v19, %v2634_v20  ;;  %v2906_v19 = vld [vmem:[%s9802_s5 + $0xd30] sm:$0xff] }
 0x325   :  { %5954 = vmatpush2.bf16.msra.mxu1 %v7252_v34  ;;  %5914 = vmatprep.subr.bf16.mxu0 %v7219_v15  ;;  %v7032_v34 = vcombine.low %v2619_v21, %v2635_v22  ;;  %v6999_v15 = vcombine.high %v2586_v46, %v2602_v29  ;;  %v2922_v20 = vld [vmem:[%s9802_s5 + $0xdb0] sm:$0xff]  ;;  %v2907_v21 = vld [vmem:[%s9802_s5 + $0xd38] sm:$0xff] }
 0x326   :  { %5955 = vmatprep.subr.bf16.mxu1 %v7221_v37  ;;  %v7001_v37 = vcombine.high %v2587_v30, %v2603_v13  ;;  %v2923_v22 = vld [vmem:[%s9802_s5 + $0xdb8] sm:$0xff] }
 0x328   :  { %5915 = vmatpush2.bf16.msra.mxu0 %v7218_v41  ;;  %v6998_v41 = vcombine.low %v2586_v46, %v2602_v29  ;;  %v2874_v46 = vld [vmem:[%s9802_s5 + $0xc30] sm:$0xff] }
 0x329   :  { %5956 = vmatpush2.bf16.msra.mxu1 %v7220_v42  ;;  %5916 = vmatprep.subr.bf16.mxu0 %v7187_v44  ;;  %v7000_v42 = vcombine.low %v2587_v30, %v2603_v13  ;;  %v6967_v44 = vcombine.high %v2554_v38, %v2570_v14  ;;  %v2890_v29 = vld [vmem:[%s9802_s5 + $0xcb0] sm:$0xff]  ;;  %v2875_v30 = vld [vmem:[%s9802_s5 + $0xc38] sm:$0xff] }
 0x32a   :  { %5957 = vmatprep.subr.bf16.mxu1 %v7189_v51  ;;  %v6969_v51 = vcombine.high %v2555_v39, %v2571_v40  ;;  %v2891_v13 = vld [vmem:[%s9802_s5 + $0xcb8] sm:$0xff] }
 0x32c   :  { %5917 = vmatpush2.bf16.msra.mxu0 %v7186_v18  ;;  %v6966_v18 = vcombine.low %v2554_v38, %v2570_v14  ;;  %v2842_v38 = vld [vmem:[%s9802_s5 + $0xb30] sm:$0xff] }
 0x32d   :  { %5958 = vmatpush2.bf16.msra.mxu1 %v7188_v55  ;;  %5918 = vmatprep.subr.bf16.mxu0 %v7155_v56  ;;  %v6968_v55 = vcombine.low %v2555_v39, %v2571_v40  ;;  %v6935_v56 = vcombine.high %v2522_v52, %v2538_v16  ;;  %v2858_v14 = vld [vmem:[%s9802_s5 + $0xbb0] sm:$0xff]  ;;  %v2843_v39 = vld [vmem:[%s9802_s5 + $0xb38] sm:$0xff] }
 0x32e   :  { %5959 = vmatprep.subr.bf16.mxu1 %v7157_v58  ;;  %v6937_v58 = vcombine.high %v2523_v17, %v2539_v54  ;;  %v2859_v40 = vld [vmem:[%s9802_s5 + $0xbb8] sm:$0xff] }
 0x330   :  { %5919 = vmatpush2.bf16.msra.mxu0 %v7154_v59  ;;  %v6934_v59 = vcombine.low %v2522_v52, %v2538_v16  ;;  %v2810_v52 = vld [vmem:[%s9802_s5 + $0xa30] sm:$0xff] }
 0x331   :  { %5960 = vmatpush2.bf16.msra.mxu1 %v7156_v60  ;;  %5970 = vmatprep.subr.bf16.mxu0 %v7127_v25  ;;  %v6936_v60 = vcombine.low %v2523_v17, %v2539_v54  ;;  %v6903_v25 = vcombine.high %v2490_v53, %v2506_v32  ;;  %v2826_v16 = vld [vmem:[%s9802_s5 + $0xab0] sm:$0xff]  ;;  %v2811_v17 = vld [vmem:[%s9802_s5 + $0xa38] sm:$0xff] }
 0x332   :  { %6011 = vmatprep.subr.bf16.mxu1 %v7129_v28  ;;  %v6905_v28 = vcombine.high %v2491_v57, %v2507_v33  ;;  %v2827_v54 = vld [vmem:[%s9802_s5 + $0xab8] sm:$0xff]  ;;  %v2778_v53 = vld [vmem:[%s9802_s5 + $0x930] sm:$0xff] }
 0x333   :  { %5921 = vmatmul.mubr.bf16.vlgmr.msra.gmra.mxu0 %v8327_v36  ;;  %v2794_v32 = vld [vmem:[%s9802_s5 + $0x9b0] sm:$0xff] }
 0x334   :  { %5962 = vmatmul.mubr.bf16.vlgmr.msra.gmra.mxu1 %v8327_v36  ;;  %5971 = vmatpush1.bf16.msra.mxu0 %v7126_v0  ;;  %v2971_v0 = vld [vmem:[%s9802_s5 + $0xf38] sm:$0xff] }
 0x335   :  { %6002 = vmatprep.mubr.bf16.mxu0 %v8325_v35  ;;  %6012 = vmatpush1.bf16.msra.mxu1 %v7128_v4  ;;  %v6904_v4 = vcombine.low %v2491_v57, %v2507_v33  ;;  %v7385_v5 = vcombine.high %v2971_v0, %v2987_v1  ;;  %v2779_v57 = vld [vmem:[%s9802_s5 + $0x938] sm:$0xff] }
 0x336   :  { %6043 = vmatprep.mubr.bf16.mxu1 %v8325_v35  ;;  %5972 = vmatprep.subr.bf16.mxu0 %v7095_v48  ;;  %v7383_v48 = vcombine.high %v2970_v61, %v2986_v63  ;;  %v2795_v33 = vld [vmem:[%s9802_s5 + $0x9b8] sm:$0xff] }
 0x337   :  { %6013 = vmatprep.subr.bf16.mxu1 %v7097_v50  ;;  %v2954_v50 = vld [vmem:[%s9802_s5 + $0xeb0] sm:$0xff] }
 0x338   :  { %5973 = vmatpush1.bf16.msra.mxu0 %v7094_v10  ;;  %v7382_v10 = vcombine.low %v2970_v61, %v2986_v63  ;;  %v2746_v61 = vld [vmem:[%s9802_s5 + $0x830] sm:$0xff] }
 0x339   :  { %6014 = vmatpush1.bf16.msra.mxu1 %v7096_v11  ;;  %5974 = vmatprep.subr.bf16.mxu0 %v7063_v3  ;;  %v7384_v11 = vcombine.low %v2971_v0, %v2987_v1  ;;  %v7351_v3 = vcombine.high %v2938_v6, %v2954_v50  ;;  %v2762_v63 = vld [vmem:[%s9802_s5 + $0x8b0] sm:$0xff]  ;;  %v2747_v0 = vld [vmem:[%s9802_s5 + $0x838] sm:$0xff] }
 0x33a   :  { %6015 = vmatprep.subr.bf16.mxu1 %v7065_v12  ;;  %v7353_v12 = vcombine.high %v2939_v7, %v2955_v9  ;;  %v2763_v1 = vld [vmem:[%s9802_s5 + $0x8b8] sm:$0xff] }
 0x33c   :  { %5975 = vmatpush1.bf16.msra.mxu0 %v7062_v23  ;;  %v7350_v23 = vcombine.low %v2938_v6, %v2954_v50  ;;  %v2716_v6 = vld [vmem:[%s9802_s5 + $0x740] sm:$0xff] }
 0x33d   :  { %6016 = vmatpush1.bf16.msra.mxu1 %v7064_v24  ;;  %5976 = vmatprep.subr.bf16.mxu0 %v7031_v26  ;;  %v7352_v24 = vcombine.low %v2939_v7, %v2955_v9  ;;  %v7319_v26 = vcombine.high %v2906_v19, %v2922_v20  ;;  %v2732_v50 = vld [vmem:[%s9802_s5 + $0x7c0] sm:$0xff]  ;;  %v2717_v7 = vld [vmem:[%s9802_s5 + $0x748] sm:$0xff] }
 0x33e   :  { %6017 = vmatprep.subr.bf16.mxu1 %v7033_v27  ;;  %v7321_v27 = vcombine.high %v2907_v21, %v2923_v22  ;;  %v2733_v9 = vld [vmem:[%s9802_s5 + $0x7c8] sm:$0xff] }
 0x340   :  { %5977 = vmatpush1.bf16.msra.mxu0 %v7030_v31  ;;  %v7318_v31 = vcombine.low %v2906_v19, %v2922_v20  ;;  %v8910_v19 = vld [vmem:[%s9803_s6] sm:$0xff] }
 0x341   :  { %6018 = vmatpush1.bf16.msra.mxu1 %v7032_v34  ;;  %5978 = vmatprep.subr.bf16.mxu0 %v6999_v15  ;;  %v7320_v34 = vcombine.low %v2907_v21, %v2923_v22  ;;  %v7287_v15 = vcombine.high %v2874_v46, %v2890_v29  ;;  %v2684_v20 = vld [vmem:[%s9802_s5 + $0x640] sm:$0xff]  ;;  %v7130_v22 = vcombine.low %v2716_v6, %v2732_v50 }
 0x342   :  { %6019 = vmatprep.subr.bf16.mxu1 %v7001_v37  ;;  %v7289_v37 = vcombine.high %v2875_v30, %v2891_v13  ;;  %v2700_v21 = vld [vmem:[%s9802_s5 + $0x6c0] sm:$0xff] }
 0x344   :  { %5979 = vmatpush1.bf16.msra.mxu0 %v6998_v41  ;;  %v7286_v41 = vcombine.low %v2874_v46, %v2890_v29  ;;  %v2652_v46 = vld [vmem:[%s9802_s5 + $0x540] sm:$0xff]  ;;  %v3015_v29 = vrot.slane %v8910_v19, %v8155_v62 }
 0x345   :  { %6020 = vmatpush1.bf16.msra.mxu1 %v7000_v42  ;;  %5980 = vmatprep.subr.bf16.mxu0 %v6967_v44  ;;  %v7288_v42 = vcombine.low %v2875_v30, %v2891_v13  ;;  %v7255_v44 = vcombine.high %v2842_v38, %v2858_v14  ;;  %v3011_v30 = vrot.slane %v8910_v19, %v8064_v47 }
 0x346   :  { %6021 = vmatprep.subr.bf16.mxu1 %v6969_v51  ;;  %v7257_v51 = vcombine.high %v2843_v39, %v2859_v40  ;;  %v3019_v13 = vrot.slane %v8910_v19, %v8164_v8 }
 0x348   :  { %5981 = vmatpush1.bf16.msra.mxu0 %v6966_v18  ;;  %v7254_v18 = vcombine.low %v2842_v38, %v2858_v14 }
 0x349   :  { %6022 = vmatpush1.bf16.msra.mxu1 %v6968_v55  ;;  %5982 = vmatprep.subr.bf16.mxu0 %v6935_v56  ;;  %v7256_v55 = vcombine.low %v2843_v39, %v2859_v40  ;;  %v7223_v56 = vcombine.high %v2810_v52, %v2826_v16  ;;  %v7098_v40 = vcombine.low %v2684_v20, %v2700_v21 }
 0x34a   :  { %6023 = vmatprep.subr.bf16.mxu1 %v6937_v58  ;;  %v7225_v58 = vcombine.high %v2811_v17, %v2827_v54 }
 0x34c   :  { %5983 = vmatpush1.bf16.msra.mxu0 %v6934_v59  ;;  %v7222_v59 = vcombine.low %v2810_v52, %v2826_v16 }
 0x34d   :  { %6024 = vmatpush1.bf16.msra.mxu1 %v6936_v60  ;;  %5984 = vmatprep.subr.bf16.mxu0 %v6903_v25  ;;  %v7224_v60 = vcombine.low %v2811_v17, %v2827_v54  ;;  %v7191_v25 = vcombine.high %v2778_v53, %v2794_v32 }
 0x34e   :  { %6025 = vmatprep.subr.bf16.mxu1 %v6905_v28  ;;  %v7193_v28 = vcombine.high %v2779_v57, %v2795_v33 }
 0x350   :  { %5985 = vmatpush1.bf16.msra.mxu0 %v6902_v2  ;;  %v7190_v2 = vcombine.low %v2778_v53, %v2794_v32  ;;  %v2621_v32 = vld [vmem:[%s9802_s5 + $0x448] sm:$0xff] }
 0x351   :  { %6026 = vmatpush1.bf16.msra.mxu1 %v6904_v4  ;;  %5986 = vmatprep.subr.bf16.mxu0 %v7383_v48  ;;  %v7192_v4 = vcombine.low %v2779_v57, %v2795_v33  ;;  %v7159_v48 = vcombine.high %v2746_v61, %v2762_v63  ;;  %v2637_v57 = vld [vmem:[%s9802_s5 + $0x4c8] sm:$0xff] }
 0x352   :  { %6027 = vmatprep.subr.bf16.mxu1 %v7385_v5  ;;  %v7161_v5 = vcombine.high %v2747_v0, %v2763_v1 }
 0x354   :  { %5987 = vmatpush2.bf16.msra.mxu0 %v7382_v10  ;;  %v7158_v10 = vcombine.low %v2746_v61, %v2762_v63 }
 0x355   :  { %6028 = vmatpush2.bf16.msra.mxu1 %v7384_v11  ;;  %5988 = vmatprep.subr.bf16.mxu0 %v7351_v3  ;;  %v7160_v11 = vcombine.low %v2747_v0, %v2763_v1  ;;  %v7131_v3 = vcombine.high %v2716_v6, %v2732_v50  ;;  %v2605_v6 = vld [vmem:[%s9802_s5 + $0x3c8] sm:$0xff] }
 0x356   :  { %6029 = vmatprep.subr.bf16.mxu1 %v7353_v12  ;;  %v7133_v12 = vcombine.high %v2717_v7, %v2733_v9 }
 0x358   :  { %5989 = vmatpush2.bf16.msra.mxu0 %v7350_v23  ;;  %v2685_v23 = vld [vmem:[%s9802_s5 + $0x648] sm:$0xff] }
 0x359   :  { %6030 = vmatpush2.bf16.msra.mxu1 %v7352_v24  ;;  %5990 = vmatprep.subr.bf16.mxu0 %v7319_v26  ;;  %v2701_v24 = vld [vmem:[%s9802_s5 + $0x6c8] sm:$0xff]  ;;  %v7132_v26 = vcombine.low %v2717_v7, %v2733_v9  ;;  %v7036_v9 = vcombine.low %v2621_v32, %v2637_v57 }
 0x35a   :  { %6031 = vmatprep.subr.bf16.mxu1 %v7321_v27  ;;  %v3007_v27 = vrot.slane %v8910_v19, %v8056_v45  ;;  %v7101_v39 = vcombine.high %v2685_v23, %v2701_v24 }
 0x35c   :  { %5991 = vmatpush2.bf16.msra.mxu0 %v7318_v31  ;;  %v7099_v31 = vcombine.high %v2684_v20, %v2700_v21  ;;  %v2557_v20 = vld [vmem:[%s9802_s5 + $0x248] sm:$0xff] }
 0x35d   :  { %6032 = vmatpush2.bf16.msra.mxu1 %v7320_v34  ;;  %5992 = vmatprep.subr.bf16.mxu0 %v7287_v15  ;;  %v2668_v34 = vld [vmem:[%s9802_s5 + $0x5c0] sm:$0xff]  ;;  %v2653_v15 = vld [vmem:[%s9802_s5 + $0x548] sm:$0xff] }
 0x35e   :  { %6033 = vmatprep.subr.bf16.mxu1 %v7289_v37  ;;  %v2669_v37 = vld [vmem:[%s9802_s5 + $0x5c8] sm:$0xff]  ;;  %v7067_v52 = vcombine.high %v2652_v46, %v2668_v34 }
 0x35f   :  { %v7069_v16 = vcombine.high %v2653_v15, %v2669_v37  ;;  %v7068_v61 = vcombine.low %v2653_v15, %v2669_v37  ;;  %v2573_v21 = vld [vmem:[%s9802_s5 + $0x2c8] sm:$0xff]  ;;  %v2492_v37 = vld [vmem:[%s9802_s5 + $0x40] sm:$0xff] }
 0x360   :  { %5993 = vmatpush2.bf16.msra.mxu0 %v7286_v41  ;;  %v7100_v41 = vcombine.low %v2685_v23, %v2701_v24 }
 0x361   :  { %6034 = vmatpush2.bf16.msra.mxu1 %v7288_v42  ;;  %5994 = vmatprep.subr.bf16.mxu0 %v7255_v44 }
 0x362   :  { %6035 = vmatprep.subr.bf16.mxu1 %v7257_v51 }
 0x364   :  { %5995 = vmatpush2.bf16.msra.mxu0 %v7254_v18 }
 0x365   :  { %6036 = vmatpush2.bf16.msra.mxu1 %v7256_v55  ;;  %5996 = vmatprep.subr.bf16.mxu0 %v7223_v56  ;;  %v2620_v55 = vld [vmem:[%s9802_s5 + $0x440] sm:$0xff] }
 0x366   :  { %6037 = vmatprep.subr.bf16.mxu1 %v7225_v58  ;;  %v2636_v56 = vld [vmem:[%s9802_s5 + $0x4c0] sm:$0xff] }
 0x367   :  { %v7035_v63 = vcombine.high %v2620_v55, %v2636_v56  ;;  %v7034_v7 = vcombine.low %v2620_v55, %v2636_v56 }
 0x368   :  { %5997 = vmatpush2.bf16.msra.mxu0 %v7222_v59 }
 0x369   :  { %6038 = vmatpush2.bf16.msra.mxu1 %v7224_v60  ;;  %5998 = vmatprep.subr.bf16.mxu0 %v7191_v25  ;;  %v7066_v60 = vcombine.low %v2652_v46, %v2668_v34  ;;  %v2540_v46 = vld [vmem:[%s9802_s5 + $0x1c0] sm:$0xff] }
 0x36a   :  { %6039 = vmatprep.subr.bf16.mxu1 %v7193_v28 }
 0x36c   :  { %5999 = vmatpush2.bf16.msra.mxu0 %v7190_v2  ;;  %v7037_v2 = vcombine.high %v2621_v32, %v2637_v57  ;;  %v2941_v32 = vld [vmem:[%s9802_s5 + $0xe48] sm:$0xff] }
 0x36d   :  { %6040 = vmatpush2.bf16.msra.mxu1 %v7192_v4  ;;  %6000 = vmatprep.subr.bf16.mxu0 %v7159_v48  ;;  %v2588_v4 = vld [vmem:[%s9802_s5 + $0x340] sm:$0xff]  ;;  %v2957_v57 = vld [vmem:[%s9802_s5 + $0xec8] sm:$0xff] }
 0x36e   :  { %6041 = vmatprep.subr.bf16.mxu1 %v7161_v5  ;;  %v2604_v48 = vld [vmem:[%s9802_s5 + $0x3c0] sm:$0xff]  ;;  %v2589_v5 = vld [vmem:[%s9802_s5 + $0x348] sm:$0xff] }
 0x36f   :  { %v7004_v23 = vcombine.low %v2589_v5, %v2605_v6 }
 0x370   :  { %6001 = vmatpush2.bf16.msra.mxu0 %v7158_v10  ;;  %v7003_v10 = vcombine.high %v2588_v4, %v2604_v48 }
 0x371   :  { %6042 = vmatpush2.bf16.msra.mxu1 %v7160_v11  ;;  %6052 = vmatprep.subr.bf16.mxu0 %v7131_v3  ;;  %v7005_v11 = vcombine.high %v2589_v5, %v2605_v6  ;;  %v2556_v3 = vld [vmem:[%s9802_s5 + $0x240] sm:$0xff] }
 0x372   :  { %6093 = vmatprep.subr.bf16.mxu1 %v7133_v12  ;;  %v2572_v12 = vld [vmem:[%s9802_s5 + $0x2c0] sm:$0xff] }
 0x373   :  { %6003 = vmatmul.mubr.bf16.vlgmr.msra.gmra.mxu0 %v8327_v36  ;;  %v5758_v38 = vpop.f32.mrf.mxu0  ;;  %v5799_v14 = vpop.f32.mrf.mxu1  ;;  %v6971_v24 = vcombine.high %v2556_v3, %v2572_v12  ;;  %v2876_v5 = vld [vmem:[%s9802_s5 + $0xc40] sm:$0xff] }
 0x374   :  { %6044 = vmatmul.mubr.bf16.vlgmr.msra.gmra.mxu1 %v8327_v36  ;;  %6053 = vmatpush1.bf16.msra.mxu0 %v7130_v22  ;;  %v5759_v42 = vadd.f32 %v5758_v38, %v3007_v27  ;;  %v5800_v17 = vadd.f32 %v5799_v14, %v3015_v29  ;;  %v7002_v22 = vcombine.low %v2588_v4, %v2604_v48  ;;  %v2524_v27 = vld [vmem:[%s9802_s5 + $0x140] sm:$0xff]  ;;  %v2525_v29 = vld [vmem:[%s9802_s5 + $0x148] sm:$0xff] }
 0x375   :  { %6084 = vmatprep.mubr.bf16.mxu0 %v8325_v35  ;;  %6094 = vmatpush1.bf16.msra.mxu1 %v7132_v26  ;;  %v5760_v44 = vpop.f32.mrf.mxu0  ;;  %v5801_v51 = vpop.f32.mrf.mxu1  ;;  %v6973_v26 = vcombine.high %v2557_v20, %v2573_v21  ;;  %v6939_v34 = vcombine.high %v2524_v27, %v2540_v46  ;;  %v2508_v38 = vld [vmem:[%s9802_s5 + $0xc0] sm:$0xff]  ;;  %v2493_v14 = vld [vmem:[%s9802_s5 + $0x48] sm:$0xff] }
 0x376   :  { %6125 = vmatprep.mubr.bf16.mxu1 %v8325_v35  ;;  %v5761_v54 = vadd.f32 %v5760_v44, %v3011_v30  ;;  %v5802_v18 = vadd.f32 %v5801_v51, %v3019_v13  ;;  %6054 = vmatprep.subr.bf16.mxu0 %v7099_v31  ;;  %v2541_v30 = vld [vmem:[%s9802_s5 + $0x1c8] sm:$0xff]  ;;  %v6970_v13 = vcombine.low %v2556_v3, %v2572_v12  ;;  %v2972_v51 = vld [vmem:[%s9802_s5 + $0xf40] sm:$0xff] }
 0x377   :  { %6095 = vmatprep.subr.bf16.mxu1 %v7101_v39  ;;  %v5762_v58 = vpop.f32.mrf.mxu0  ;;  %v5803_v53 = vpop.f32.mrf.mxu1  ;;  %v6972_v31 = vcombine.low %v2557_v20, %v2573_v21  ;;  %v6941_v15 = vcombine.high %v2525_v29, %v2541_v30  ;;  %v2509_v39 = vld [vmem:[%s9802_s5 + $0xc8] sm:$0xff]  ;;  %v2892_v6 = vld [vmem:[%s9802_s5 + $0xcc0] sm:$0xff] }
 0x378   :  { %v6412_v33 = vcombine.low %v5759_v42, %v5761_v54  ;;  %v6413_v59 = vcombine.low %v5800_v17, %v5802_v18  ;;  %6055 = vmatpush1.bf16.msra.mxu0 %v7098_v40  ;;  %v6938_v40 = vcombine.low %v2524_v27, %v2540_v46  ;;  %v6907_v42 = vcombine.high %v2492_v37, %v2508_v38  ;;  %v2989_v17 = vld [vmem:[%s9802_s5 + $0xfc8] sm:$0xff]  ;;  %v2940_v58 = vld [vmem:[%s9802_s5 + $0xe40] sm:$0xff] }
 0x379   :  { %6096 = vmatpush1.bf16.msra.mxu1 %v7100_v41  ;;  %v5763_v25 = vpop.f32.mrf.mxu0  ;;  %v5804_v28 = vpop.f32.mrf.mxu1  ;;  %6056 = vmatprep.subr.bf16.mxu0 %v7067_v52  ;;  %v6940_v41 = vcombine.low %v2525_v29, %v2541_v30  ;;  %v6909_v44 = vcombine.high %v2493_v14, %v2509_v39  ;;  %v2988_v52 = vld [vmem:[%s9802_s5 + $0xfc0] sm:$0xff]  ;;  %v6906_v54 = vcombine.low %v2492_v37, %v2508_v38  ;;  %v2845_v21 = vld [vmem:[%s9802_s5 + $0xb48] sm:$0xff] }
 0x37a   :  { %v6420_v0 = vrot.slane %v6412_v33, %v7991_v49  ;;  %v6427_v1 = vrot.slane %v6413_v59, %v7991_v49  ;;  %6097 = vmatprep.subr.bf16.mxu1 %v7069_v16  ;;  %v2973_v16 = vld [vmem:[%s9802_s5 + $0xf48] sm:$0xff]  ;;  %v6908_v18 = vcombine.low %v2493_v14, %v2509_v39  ;;  %v7387_v55 = vcombine.high %v2972_v51, %v2988_v52  ;;  %v2956_v53 = vld [vmem:[%s9802_s5 + $0xec0] sm:$0xff] }
 0x37b   :  { %v7389_v56 = vcombine.high %v2973_v16, %v2989_v17  ;;  %v7386_v33 = vcombine.low %v2972_v51, %v2988_v52  ;;  %v7388_v59 = vcombine.low %v2973_v16, %v2989_v17  ;;  %v7357_v25 = vcombine.high %v2941_v32, %v2957_v57  ;;  %v2908_v28 = vld [vmem:[%s9802_s5 + $0xd40] sm:$0xff]  ;;  %v2813_v30 = vld [vmem:[%s9802_s5 + $0xa48] sm:$0xff] }
 0x37c   :  { %v6428_v50 = vcombine.low %v6420_v0, %v6427_v1  ;;  %6057 = vmatpush1.bf16.msra.mxu0 %v7066_v60  ;;  %v7355_v60 = vcombine.high %v2940_v58, %v2956_v53  ;;  %v2925_v0 = vld [vmem:[%s9802_s5 + $0xdc8] sm:$0xff]  ;;  %v7354_v1 = vcombine.low %v2940_v58, %v2956_v53  ;;  %v2844_v12 = vld [vmem:[%s9802_s5 + $0xb40] sm:$0xff]  ;;  %v2718_v53 = vld [vmem:[%s9802_s5 + $0x750] sm:$0xff] }
 0x37d   :  { %6098 = vmatpush1.bf16.msra.mxu1 %v7068_v61  ;;  %6058 = vmatprep.subr.bf16.mxu0 %v7035_v63  ;;  %v2924_v61 = vld [vmem:[%s9802_s5 + $0xdc0] sm:$0xff]  ;;  %v2909_v63 = vld [vmem:[%s9802_s5 + $0xd48] sm:$0xff] }
 0x37e   :  { %6556 = vst [vmem:[%s9804_s7] sm:$0xff] %v6428_v50  ;;  %6099 = vmatprep.subr.bf16.mxu1 %v7037_v2  ;;  %v7356_v2 = vcombine.low %v2941_v32, %v2957_v57  ;;  %v7323_v4 = vcombine.high %v2908_v28, %v2924_v61  ;;  %v7325_v48 = vcombine.high %v2909_v63, %v2925_v0  ;;  %v2877_v50 = vld [vmem:[%s9802_s5 + $0xc48] sm:$0xff]  ;;  %v2860_v20 = vld [vmem:[%s9802_s5 + $0xbc0] sm:$0xff]  ;;  %v2734_v32 = vld [vmem:[%s9802_s5 + $0x7d0] sm:$0xff] }
 0x37f   :  { %v2812_v46 = vld [vmem:[%s9802_s5 + $0xa40] sm:$0xff]  ;;  %v2781_v39 = vld [vmem:[%s9802_s5 + $0x948] sm:$0xff]  ;;  %v2719_v57 = vld [vmem:[%s9802_s5 + $0x758] sm:$0xff] }
 0x380   :  { %6059 = vmatpush1.bf16.msra.mxu0 %v7034_v7  ;;  %v2893_v7 = vld [vmem:[%s9802_s5 + $0xcc8] sm:$0xff]  ;;  %v2828_v29 = vld [vmem:[%s9802_s5 + $0xac0] sm:$0xff] }
 0x381   :  { %6100 = vmatpush1.bf16.msra.mxu1 %v7036_v9  ;;  %6060 = vmatprep.subr.bf16.mxu0 %v7003_v10  ;;  %v7322_v9 = vcombine.low %v2908_v28, %v2924_v61  ;;  %v7324_v10 = vcombine.low %v2909_v63, %v2925_v0  ;;  %v7293_v3 = vcombine.high %v2877_v50, %v2893_v7  ;;  %v2780_v38 = vld [vmem:[%s9802_s5 + $0x940] sm:$0xff]  ;;  %v2749_v17 = vld [vmem:[%s9802_s5 + $0x848] sm:$0xff]  ;;  %v9125_v61 = vsub.s32 6, %v7988_v43 }
 0x382   :  { %6101 = vmatprep.subr.bf16.mxu1 %v7005_v11  ;;  %v7291_v11 = vcombine.high %v2876_v5, %v2892_v6  ;;  %v2796_v14 = vld [vmem:[%s9802_s5 + $0x9c0] sm:$0xff]  ;;  %v7135_v28 = vcombine.high %v2718_v53, %v2734_v32  ;;  %v9128_v0 = vsub.s32 5, %v7988_v43 }
 0x383   :  { %v2748_v52 = vld [vmem:[%s9802_s5 + $0x840] sm:$0xff] }
 0x384   :  { %6061 = vmatpush1.bf16.msra.mxu0 %v7002_v22  ;;  %v2861_v22 = vld [vmem:[%s9802_s5 + $0xbc8] sm:$0xff]  ;;  %v2764_v16 = vld [vmem:[%s9802_s5 + $0x8c0] sm:$0xff] }
 0x385   :  { %6102 = vmatpush1.bf16.msra.mxu1 %v7004_v23  ;;  %6062 = vmatprep.subr.bf16.mxu0 %v6971_v24  ;;  %v7290_v23 = vcombine.low %v2876_v5, %v2892_v6  ;;  %v7292_v24 = vcombine.low %v2877_v50, %v2893_v7  ;;  %v7261_v27 = vcombine.high %v2845_v21, %v2861_v22  ;;  %v2687_v5 = vld [vmem:[%s9802_s5 + $0x658] sm:$0xff]  ;;  %v2654_v7 = vld [vmem:[%s9802_s5 + $0x550] sm:$0xff] }
 0x386   :  { %6103 = vmatprep.subr.bf16.mxu1 %v6973_v26  ;;  %v7259_v26 = vcombine.high %v2844_v12, %v2860_v20  ;;  %v2703_v6 = vld [vmem:[%s9802_s5 + $0x6d8] sm:$0xff] }
 0x388   :  { %6063 = vmatpush1.bf16.msra.mxu0 %v6970_v13  ;;  %v2829_v13 = vld [vmem:[%s9802_s5 + $0xac8] sm:$0xff] }
 0x389   :  { %6104 = vmatpush1.bf16.msra.mxu1 %v6972_v31  ;;  %6064 = vmatprep.subr.bf16.mxu0 %v6939_v34  ;;  %v7258_v31 = vcombine.low %v2844_v12, %v2860_v20  ;;  %v7260_v34 = vcombine.low %v2845_v21, %v2861_v22  ;;  %v7229_v37 = vcombine.high %v2813_v30, %v2829_v13  ;;  %v2670_v12 = vld [vmem:[%s9802_s5 + $0x5d0] sm:$0xff]  ;;  %v2655_v20 = vld [vmem:[%s9802_s5 + $0x558] sm:$0xff] }
 0x38a   :  { %6105 = vmatprep.subr.bf16.mxu1 %v6941_v15  ;;  %v7227_v15 = vcombine.high %v2812_v46, %v2828_v29  ;;  %v2671_v21 = vld [vmem:[%s9802_s5 + $0x5d8] sm:$0xff] }
 0x38c   :  { %6065 = vmatpush1.bf16.msra.mxu0 %v6938_v40  ;;  %v2797_v40 = vld [vmem:[%s9802_s5 + $0x9c8] sm:$0xff] }
 0x38d   :  { %6106 = vmatpush1.bf16.msra.mxu1 %v6940_v41  ;;  %6066 = vmatprep.subr.bf16.mxu0 %v6907_v42  ;;  %v7226_v41 = vcombine.low %v2812_v46, %v2828_v29  ;;  %v7228_v42 = vcombine.low %v2813_v30, %v2829_v13  ;;  %v7197_v51 = vcombine.high %v2781_v39, %v2797_v40 }
 0x38e   :  { %6107 = vmatprep.subr.bf16.mxu1 %v6909_v44  ;;  %v7195_v44 = vcombine.high %v2780_v38, %v2796_v14  ;;  %v7071_v30 = vcombine.high %v2654_v7, %v2670_v12  ;;  %v7073_v13 = vcombine.high %v2655_v20, %v2671_v21 }
 0x390   :  { %6067 = vmatpush1.bf16.msra.mxu0 %v6906_v54  ;;  %v2765_v54 = vld [vmem:[%s9802_s5 + $0x8c8] sm:$0xff] }
 0x391   :  { %6108 = vmatpush1.bf16.msra.mxu1 %v6908_v18  ;;  %6068 = vmatprep.subr.bf16.mxu0 %v7387_v55  ;;  %v7194_v18 = vcombine.low %v2780_v38, %v2796_v14  ;;  %v7196_v55 = vcombine.low %v2781_v39, %v2797_v40  ;;  %v7165_v58 = vcombine.high %v2749_v17, %v2765_v54  ;;  %v2638_v38 = vld [vmem:[%s9802_s5 + $0x4d0] sm:$0xff]  ;;  %v2623_v40 = vld [vmem:[%s9802_s5 + $0x458] sm:$0xff] }
 0x392   :  { %6109 = vmatprep.subr.bf16.mxu1 %v7389_v56  ;;  %v7163_v56 = vcombine.high %v2748_v52, %v2764_v16 }
 0x394   :  { %6069 = vmatpush2.bf16.msra.mxu0 %v7386_v33  ;;  %v2735_v33 = vld [vmem:[%s9802_s5 + $0x7d8] sm:$0xff] }
 0x395   :  { %6110 = vmatpush2.bf16.msra.mxu1 %v7388_v59  ;;  %6070 = vmatprep.subr.bf16.mxu0 %v7355_v60  ;;  %v7162_v59 = vcombine.low %v2748_v52, %v2764_v16  ;;  %v7164_v60 = vcombine.low %v2749_v17, %v2765_v54  ;;  %v7137_v63 = vcombine.high %v2719_v57, %v2735_v33 }
 0x396   :  { %6111 = vmatprep.subr.bf16.mxu1 %v7357_v25  ;;  %v9122_v25 = vsub.s32 4, %v7988_v43  ;;  %v7136_v50 = vcombine.low %v2719_v57, %v2735_v33  ;;  %v7072_v17 = vcombine.low %v2655_v20, %v2671_v21  ;;  %v2607_v57 = vld [vmem:[%s9802_s5 + $0x3d8] sm:$0xff] }
 0x398   :  { %6071 = vmatpush2.bf16.msra.mxu0 %v7354_v1  ;;  %v9131_v1 = vsub.s32 7, %v7988_v43  ;;  %v3023_v43 = vrot.slane %v8910_v19, %v9122_v25 }
 0x399   :  { %6112 = vmatpush2.bf16.msra.mxu1 %v7356_v2  ;;  %6072 = vmatprep.subr.bf16.mxu0 %v7323_v4  ;;  %v2686_v2 = vld [vmem:[%s9802_s5 + $0x650] sm:$0xff] }
 0x39a   :  { %6113 = vmatprep.subr.bf16.mxu1 %v7325_v48  ;;  %v2702_v4 = vld [vmem:[%s9802_s5 + $0x6d0] sm:$0xff]  ;;  %v7134_v48 = vcombine.low %v2718_v53, %v2734_v32  ;;  %v2591_v32 = vld [vmem:[%s9802_s5 + $0x358] sm:$0xff] }
 0x39b   :  { %v2606_v53 = vld [vmem:[%s9802_s5 + $0x3d0] sm:$0xff] }
 0x39c   :  { %6073 = vmatpush2.bf16.msra.mxu0 %v7322_v9  ;;  %v3031_v9 = vrot.slane %v8910_v19, %v9125_v61 }
 0x39d   :  { %6114 = vmatpush2.bf16.msra.mxu1 %v7324_v10  ;;  %6074 = vmatprep.subr.bf16.mxu0 %v7291_v11  ;;  %v3027_v10 = vrot.slane %v8910_v19, %v9128_v0  ;;  %v3035_v11 = vrot.slane %v8910_v19, %v9131_v1  ;;  %v7102_v19 = vcombine.low %v2686_v2, %v2702_v4 }
 0x39e   :  { %6115 = vmatprep.subr.bf16.mxu1 %v7293_v3  ;;  %v7103_v3 = vcombine.high %v2686_v2, %v2702_v4  ;;  %v2558_v2 = vld [vmem:[%s9802_s5 + $0x250] sm:$0xff] }
 0x39f   :  { %v2574_v4 = vld [vmem:[%s9802_s5 + $0x2d0] sm:$0xff] }
 0x3a0   :  { %6075 = vmatpush2.bf16.msra.mxu0 %v7290_v23 }
 0x3a1   :  { %6116 = vmatpush2.bf16.msra.mxu1 %v7292_v24  ;;  %6076 = vmatprep.subr.bf16.mxu0 %v7259_v26  ;;  %v7105_v24 = vcombine.high %v2687_v5, %v2703_v6  ;;  %v7104_v26 = vcombine.low %v2687_v5, %v2703_v6  ;;  %v2575_v5 = vld [vmem:[%s9802_s5 + $0x2d8] sm:$0xff] }
 0x3a2   :  { %6117 = vmatprep.subr.bf16.mxu1 %v7261_v27 }
 0x3a4   :  { %6077 = vmatpush2.bf16.msra.mxu0 %v7258_v31 }
 0x3a5   :  { %6118 = vmatpush2.bf16.msra.mxu1 %v7260_v34  ;;  %6078 = vmatprep.subr.bf16.mxu0 %v7227_v15 }
 0x3a6   :  { %6119 = vmatprep.subr.bf16.mxu1 %v7229_v37  ;;  %v2622_v37 = vld [vmem:[%s9802_s5 + $0x450] sm:$0xff] }
 0x3a7   :  { %v7039_v54 = vcombine.high %v2622_v37, %v2638_v38 }
 0x3a8   :  { %6079 = vmatpush2.bf16.msra.mxu0 %v7226_v41  ;;  %v2639_v41 = vld [vmem:[%s9802_s5 + $0x4d8] sm:$0xff] }
 0x3a9   :  { %6120 = vmatpush2.bf16.msra.mxu1 %v7228_v42  ;;  %6080 = vmatprep.subr.bf16.mxu0 %v7195_v44 }
 0x3aa   :  { %6121 = vmatprep.subr.bf16.mxu1 %v7197_v51  ;;  %v7070_v51 = vcombine.low %v2654_v7, %v2670_v12  ;;  %v6974_v12 = vcombine.low %v2558_v2, %v2574_v4 }
 0x3ac   :  { %6081 = vmatpush2.bf16.msra.mxu0 %v7194_v18 }
 0x3ad   :  { %6122 = vmatpush2.bf16.msra.mxu1 %v7196_v55  ;;  %6082 = vmatprep.subr.bf16.mxu0 %v7163_v56  ;;  %v7041_v56 = vcombine.high %v2623_v40, %v2639_v41 }
 0x3ae   :  { %6123 = vmatprep.subr.bf16.mxu1 %v7165_v58  ;;  %v2590_v58 = vld [vmem:[%s9802_s5 + $0x350] sm:$0xff] }
 0x3af   :  { %v7006_v6 = vcombine.low %v2590_v58, %v2606_v53 }
 0x3b0   :  { %6083 = vmatpush2.bf16.msra.mxu0 %v7162_v59  ;;  %v7038_v59 = vcombine.low %v2622_v37, %v2638_v38 }
 0x3b1   :  { %6124 = vmatpush2.bf16.msra.mxu1 %v7164_v60  ;;  %6134 = vmatprep.subr.bf16.mxu0 %v7135_v28  ;;  %v7040_v60 = vcombine.low %v2623_v40, %v2639_v41  ;;  %v7007_v28 = vcombine.high %v2590_v58, %v2606_v53  ;;  %v2942_v40 = vld [vmem:[%s9802_s5 + $0xe50] sm:$0xff] }
 0x3b2   :  { %6175 = vmatprep.subr.bf16.mxu1 %v7137_v63  ;;  %v7009_v63 = vcombine.high %v2591_v32, %v2607_v57  ;;  %v2958_v41 = vld [vmem:[%s9802_s5 + $0xed0] sm:$0xff] }
 0x3b3   :  { %v5840_v22 = vpop.f32.mrf.mxu0  ;;  %v5881_v23 = vpop.f32.mrf.mxu1  ;;  %6085 = vmatmul.mubr.bf16.vlgmr.msra.gmra.mxu0 %v8327_v36  ;;  %v7358_v58 = vcombine.low %v2942_v40, %v2958_v41 }
 0x3b4   :  { %6126 = vmatmul.mubr.bf16.vlgmr.msra.gmra.mxu1 %v8327_v36  ;;  %6135 = vmatpush1.bf16.msra.mxu0 %v7134_v48  ;;  %v5841_v27 = vadd.f32 %v5840_v22, %v3023_v43  ;;  %v5882_v31 = vadd.f32 %v5881_v23, %v3031_v9  ;;  %v2559_v48 = vld [vmem:[%s9802_s5 + $0x258] sm:$0xff]  ;;  %v7008_v43 = vcombine.low %v2591_v32, %v2607_v57  ;;  %v2526_v9 = vld [vmem:[%s9802_s5 + $0x150] sm:$0xff] }
 0x3b5   :  { %6166 = vmatprep.mubr.bf16.mxu0 %v8325_v35  ;;  %6176 = vmatpush1.bf16.msra.mxu1 %v7136_v50  ;;  %v5842_v46 = vpop.f32.mrf.mxu0  ;;  %v5883_v29 = vpop.f32.mrf.mxu1  ;;  %v6975_v50 = vcombine.high %v2558_v2, %v2574_v4  ;;  %v6977_v7 = vcombine.high %v2559_v48, %v2575_v5  ;;  %v6976_v20 = vcombine.low %v2559_v48, %v2575_v5  ;;  %v2494_v23 = vld [vmem:[%s9802_s5 + $0x50] sm:$0xff] }
 0x3b6   :  { %6207 = vmatprep.mubr.bf16.mxu1 %v8325_v35  ;;  %v5843_v34 = vadd.f32 %v5842_v46, %v3027_v10  ;;  %v5884_v15 = vadd.f32 %v5883_v29, %v3035_v11  ;;  %6136 = vmatprep.subr.bf16.mxu0 %v7103_v3  ;;  %v2542_v10 = vld [vmem:[%s9802_s5 + $0x1d0] sm:$0xff]  ;;  %v2527_v11 = vld [vmem:[%s9802_s5 + $0x158] sm:$0xff] }
 0x3b7   :  { %v5844_v14 = vpop.f32.mrf.mxu0  ;;  %v5885_v39 = vpop.f32.mrf.mxu1  ;;  %6177 = vmatprep.subr.bf16.mxu1 %v7105_v24  ;;  %v2543_v3 = vld [vmem:[%s9802_s5 + $0x1d8] sm:$0xff]  ;;  %v6943_v21 = vcombine.high %v2526_v9, %v2542_v10  ;;  %v2510_v24 = vld [vmem:[%s9802_s5 + $0xd0] sm:$0xff] }
 0x3b8   :  { %v6429_v42 = vcombine.low %v5841_v27, %v5843_v34  ;;  %v6430_v44 = vcombine.low %v5882_v31, %v5884_v15  ;;  %6137 = vmatpush1.bf16.msra.mxu0 %v7102_v19  ;;  %v6945_v22 = vcombine.high %v2527_v11, %v2543_v3  ;;  %v2495_v19 = vld [vmem:[%s9802_s5 + $0x58] sm:$0xff]  ;;  %v6942_v27 = vcombine.low %v2526_v9, %v2542_v10  ;;  %v2990_v31 = vld [vmem:[%s9802_s5 + $0xfd0] sm:$0xff] }
 0x3b9   :  { %6178 = vmatpush1.bf16.msra.mxu1 %v7104_v26  ;;  %v5845_v52 = vpop.f32.mrf.mxu0  ;;  %v5886_v16 = vpop.f32.mrf.mxu1  ;;  %6138 = vmatprep.subr.bf16.mxu0 %v7071_v30  ;;  %v2511_v26 = vld [vmem:[%s9802_s5 + $0xd8] sm:$0xff]  ;;  %v6944_v46 = vcombine.low %v2527_v11, %v2543_v3  ;;  %v6911_v29 = vcombine.high %v2494_v23, %v2510_v24  ;;  %v6910_v37 = vcombine.low %v2494_v23, %v2510_v24  ;;  %v2846_v5 = vld [vmem:[%s9802_s5 + $0xb50] sm:$0xff] }
 0x3ba   :  { %v6437_v18 = vrot.slane %v6429_v42, %v7991_v49  ;;  %v6444_v55 = vrot.slane %v6430_v44, %v7991_v49  ;;  %6179 = vmatprep.subr.bf16.mxu1 %v7073_v13  ;;  %v6913_v30 = vcombine.high %v2495_v19, %v2511_v26  ;;  %v2974_v13 = vld [vmem:[%s9802_s5 + $0xf50] sm:$0xff]  ;;  %v2975_v34 = vld [vmem:[%s9802_s5 + $0xf58] sm:$0xff]  ;;  %v6912_v38 = vcombine.low %v2495_v19, %v2511_v26 }
 0x3bb   :  { %v2991_v15 = vld [vmem:[%s9802_s5 + $0xfd8] sm:$0xff]  ;;  %v7391_v14 = vcombine.high %v2974_v13, %v2990_v31  ;;  %v7359_v16 = vcombine.high %v2942_v40, %v2958_v41  ;;  %v2814_v3 = vld [vmem:[%s9802_s5 + $0xa50] sm:$0xff] }
 0x3bc   :  { %v6445_v33 = vcombine.low %v6437_v18, %v6444_v55  ;;  %6139 = vmatpush1.bf16.msra.mxu0 %v7070_v51  ;;  %v7393_v39 = vcombine.high %v2975_v34, %v2991_v15  ;;  %v2943_v42 = vld [vmem:[%s9802_s5 + $0xe58] sm:$0xff]  ;;  %v7390_v51 = vcombine.low %v2974_v13, %v2990_v31  ;;  %v7392_v52 = vcombine.low %v2975_v34, %v2991_v15  ;;  %v2926_v18 = vld [vmem:[%s9802_s5 + $0xdd0] sm:$0xff] }
 0x3bd   :  { %6180 = vmatpush1.bf16.msra.mxu1 %v7072_v17  ;;  %6140 = vmatprep.subr.bf16.mxu0 %v7039_v54  ;;  %v2959_v44 = vld [vmem:[%s9802_s5 + $0xed8] sm:$0xff]  ;;  %v2910_v54 = vld [vmem:[%s9802_s5 + $0xd50] sm:$0xff] }
 0x3be   :  { %6557 = vst [vmem:[%s9804_s7 + $0x8] sm:$0xff] %v6445_v33  ;;  %6181 = vmatprep.subr.bf16.mxu1 %v7041_v56  ;;  %v7361_v17 = vcombine.high %v2943_v42, %v2959_v44  ;;  %v2911_v55 = vld [vmem:[%s9802_s5 + $0xd58] sm:$0xff]  ;;  %v7360_v53 = vcombine.low %v2943_v42, %v2959_v44  ;;  %v7327_v32 = vcombine.high %v2910_v54, %v2926_v18  ;;  %v2878_v33 = vld [vmem:[%s9802_s5 + $0xc50] sm:$0xff]  ;;  %v2720_v44 = vld [vmem:[%s9802_s5 + $0x760] sm:$0xff] }
 0x3bf   :  { %v2927_v56 = vld [vmem:[%s9802_s5 + $0xdd8] sm:$0xff]  ;;  %v2782_v26 = vld [vmem:[%s9802_s5 + $0x950] sm:$0xff] }
 0x3c0   :  { %6141 = vmatpush1.bf16.msra.mxu0 %v7038_v59  ;;  %v7329_v57 = vcombine.high %v2911_v55, %v2927_v56  ;;  %v2894_v59 = vld [vmem:[%s9802_s5 + $0xcd0] sm:$0xff]  ;;  %v7328_v2 = vcombine.low %v2911_v55, %v2927_v56  ;;  %v9345_v56 = vld [vmem:[%s9803_s6 + $0x8] sm:$0xff] }
 0x3c1   :  { %6182 = vmatpush1.bf16.msra.mxu1 %v7040_v60  ;;  %6142 = vmatprep.subr.bf16.mxu0 %v7007_v28  ;;  %v2879_v60 = vld [vmem:[%s9802_s5 + $0xc58] sm:$0xff]  ;;  %v7295_v4 = vcombine.high %v2878_v33, %v2894_v59  ;;  %v2750_v15 = vld [vmem:[%s9802_s5 + $0x850] sm:$0xff] }
 0x3c2   :  { %6183 = vmatprep.subr.bf16.mxu1 %v7009_v63  ;;  %v2895_v28 = vld [vmem:[%s9802_s5 + $0xcd8] sm:$0xff]  ;;  %v7326_v63 = vcombine.low %v2910_v54, %v2926_v18 }
 0x3c3   :  { %v7297_v48 = vcombine.high %v2879_v60, %v2895_v28  ;;  %v7296_v9 = vcombine.low %v2879_v60, %v2895_v28  ;;  %v3039_v60 = vrot.slane %v9345_v56, %v8056_v45  ;;  %v3043_v28 = vrot.slane %v9345_v56, %v8064_v47 }
 0x3c4   :  { %6143 = vmatpush1.bf16.msra.mxu0 %v7006_v6  ;;  %v2862_v6 = vld [vmem:[%s9802_s5 + $0xbd0] sm:$0xff] }
 0x3c5   :  { %6184 = vmatpush1.bf16.msra.mxu1 %v7008_v43  ;;  %6144 = vmatprep.subr.bf16.mxu0 %v6975_v50  ;;  %v2847_v43 = vld [vmem:[%s9802_s5 + $0xb58] sm:$0xff]  ;;  %v7263_v10 = vcombine.high %v2846_v5, %v2862_v6 }
 0x3c6   :  { %6185 = vmatprep.subr.bf16.mxu1 %v6977_v7  ;;  %v2863_v50 = vld [vmem:[%s9802_s5 + $0xbd8] sm:$0xff]  ;;  %v7294_v7 = vcombine.low %v2878_v33, %v2894_v59  ;;  %v2705_v33 = vld [vmem:[%s9802_s5 + $0x6e8] sm:$0xff] }
 0x3c7   :  { %v7265_v11 = vcombine.high %v2847_v43, %v2863_v50  ;;  %v7264_v23 = vcombine.low %v2847_v43, %v2863_v50  ;;  %v2657_v50 = vld [vmem:[%s9802_s5 + $0x568] sm:$0xff] }
 0x3c8   :  { %6145 = vmatpush1.bf16.msra.mxu0 %v6974_v12  ;;  %v2830_v12 = vld [vmem:[%s9802_s5 + $0xad0] sm:$0xff] }
 0x3c9   :  { %6186 = vmatpush1.bf16.msra.mxu1 %v6976_v20  ;;  %6146 = vmatprep.subr.bf16.mxu0 %v6943_v21  ;;  %v2815_v20 = vld [vmem:[%s9802_s5 + $0xa58] sm:$0xff]  ;;  %v7231_v24 = vcombine.high %v2814_v3, %v2830_v12 }
 0x3ca   :  { %6187 = vmatprep.subr.bf16.mxu1 %v6945_v22  ;;  %v2831_v21 = vld [vmem:[%s9802_s5 + $0xad8] sm:$0xff]  ;;  %v7262_v22 = vcombine.low %v2846_v5, %v2862_v6  ;;  %v3047_v5 = vrot.slane %v9345_v56, %v8155_v62  ;;  %v3051_v6 = vrot.slane %v9345_v56, %v8164_v8 }
 0x3cb   :  { %v7233_v19 = vcombine.high %v2815_v20, %v2831_v21  ;;  %v7232_v13 = vcombine.low %v2815_v20, %v2831_v21 }
 0x3cc   :  { %6147 = vmatpush1.bf16.msra.mxu0 %v6942_v27  ;;  %v2798_v27 = vld [vmem:[%s9802_s5 + $0x9d0] sm:$0xff] }
 0x3cd   :  { %6188 = vmatpush1.bf16.msra.mxu1 %v6944_v46  ;;  %6148 = vmatprep.subr.bf16.mxu0 %v6911_v29  ;;  %v2783_v46 = vld [vmem:[%s9802_s5 + $0x958] sm:$0xff]  ;;  %v7199_v31 = vcombine.high %v2782_v26, %v2798_v27 }
 0x3ce   :  { %6189 = vmatprep.subr.bf16.mxu1 %v6913_v30  ;;  %v2799_v29 = vld [vmem:[%s9802_s5 + $0x9d8] sm:$0xff]  ;;  %v7230_v30 = vcombine.low %v2814_v3, %v2830_v12 }
 0x3cf   :  { %v7201_v34 = vcombine.high %v2783_v46, %v2799_v29  ;;  %v7200_v40 = vcombine.low %v2783_v46, %v2799_v29  ;;  %v2625_v29 = vld [vmem:[%s9802_s5 + $0x468] sm:$0xff] }
 0x3d0   :  { %6149 = vmatpush1.bf16.msra.mxu0 %v6910_v37  ;;  %v2766_v37 = vld [vmem:[%s9802_s5 + $0x8d0] sm:$0xff] }
 0x3d1   :  { %6190 = vmatpush1.bf16.msra.mxu1 %v6912_v38  ;;  %6150 = vmatprep.subr.bf16.mxu0 %v7391_v14  ;;  %v2751_v38 = vld [vmem:[%s9802_s5 + $0x858] sm:$0xff]  ;;  %v7167_v41 = vcombine.high %v2750_v15, %v2766_v37 }
 0x3d2   :  { %6191 = vmatprep.subr.bf16.mxu1 %v7393_v39  ;;  %v2767_v14 = vld [vmem:[%s9802_s5 + $0x8d8] sm:$0xff]  ;;  %v7198_v39 = vcombine.low %v2782_v26, %v2798_v27 }
 0x3d3   :  { %v7169_v42 = vcombine.high %v2751_v38, %v2767_v14  ;;  %v7168_v54 = vcombine.low %v2751_v38, %v2767_v14 }
 0x3d4   :  { %6151 = vmatpush2.bf16.msra.mxu0 %v7390_v51  ;;  %v2736_v51 = vld [vmem:[%s9802_s5 + $0x7e0] sm:$0xff] }
 0x3d5   :  { %6192 = vmatpush2.bf16.msra.mxu1 %v7392_v52  ;;  %6152 = vmatprep.subr.bf16.mxu0 %v7359_v16  ;;  %v2721_v52 = vld [vmem:[%s9802_s5 + $0x768] sm:$0xff]  ;;  %v7139_v18 = vcombine.high %v2720_v44, %v2736_v51 }
 0x3d6   :  { %6193 = vmatprep.subr.bf16.mxu1 %v7361_v17  ;;  %v2737_v16 = vld [vmem:[%s9802_s5 + $0x7e8] sm:$0xff]  ;;  %v7166_v17 = vcombine.low %v2750_v15, %v2766_v37 }
 0x3d7   :  { %v7141_v55 = vcombine.high %v2721_v52, %v2737_v16  ;;  %v7140_v59 = vcombine.low %v2721_v52, %v2737_v16  ;;  %v2593_v52 = vld [vmem:[%s9802_s5 + $0x368] sm:$0xff] }
 0x3d8   :  { %6153 = vmatpush2.bf16.msra.mxu0 %v7358_v58  ;;  %v2688_v58 = vld [vmem:[%s9802_s5 + $0x660] sm:$0xff]  ;;  %v2609_v16 = vld [vmem:[%s9802_s5 + $0x3e8] sm:$0xff] }
 0x3d9   :  { %6194 = vmatpush2.bf16.msra.mxu1 %v7360_v53  ;;  %6154 = vmatprep.subr.bf16.mxu0 %v7327_v32  ;;  %v2704_v53 = vld [vmem:[%s9802_s5 + $0x6e0] sm:$0xff]  ;;  %v7138_v32 = vcombine.low %v2720_v44, %v2736_v51 }
 0x3da   :  { %6195 = vmatprep.subr.bf16.mxu1 %v7329_v57  ;;  %v2689_v57 = vld [vmem:[%s9802_s5 + $0x668] sm:$0xff]  ;;  %v2608_v44 = vld [vmem:[%s9802_s5 + $0x3e0] sm:$0xff] }
 0x3db   :  { %v7109_v43 = vcombine.high %v2689_v57, %v2705_v33  ;;  %v7108_v3 = vcombine.low %v2689_v57, %v2705_v33  ;;  %v2561_v57 = vld [vmem:[%s9802_s5 + $0x268] sm:$0xff] }
 0x3dc   :  { %6155 = vmatpush2.bf16.msra.mxu0 %v7326_v63  ;;  %v7107_v63 = vcombine.high %v2688_v58, %v2704_v53  ;;  %v2577_v33 = vld [vmem:[%s9802_s5 + $0x2e8] sm:$0xff] }
 0x3dd   :  { %6196 = vmatpush2.bf16.msra.mxu1 %v7328_v2  ;;  %6156 = vmatprep.subr.bf16.mxu0 %v7295_v4  ;;  %v2656_v2 = vld [vmem:[%s9802_s5 + $0x560] sm:$0xff] }
 0x3de   :  { %6197 = vmatprep.subr.bf16.mxu1 %v7297_v48  ;;  %v2672_v4 = vld [vmem:[%s9802_s5 + $0x5e0] sm:$0xff] }
 0x3df   :  { %v7075_v12 = vcombine.high %v2656_v2, %v2672_v4 }
 0x3e0   :  { %6157 = vmatpush2.bf16.msra.mxu0 %v7294_v7  ;;  %v2673_v7 = vld [vmem:[%s9802_s5 + $0x5e8] sm:$0xff] }
 0x3e1   :  { %6198 = vmatpush2.bf16.msra.mxu1 %v7296_v9  ;;  %6158 = vmatprep.subr.bf16.mxu0 %v7263_v10  ;;  %v7106_v10 = vcombine.low %v2688_v58, %v2704_v53  ;;  %v7076_v38 = vcombine.low %v2657_v50, %v2673_v7  ;;  %v7013_v58 = vcombine.high %v2593_v52, %v2609_v16  ;;  %v2560_v53 = vld [vmem:[%s9802_s5 + $0x260] sm:$0xff] }
 0x3e2   :  { %6199 = vmatprep.subr.bf16.mxu1 %v7265_v11 }
 0x3e4   :  { %6159 = vmatpush2.bf16.msra.mxu0 %v7262_v22 }
 0x3e5   :  { %6200 = vmatpush2.bf16.msra.mxu1 %v7264_v23  ;;  %6160 = vmatprep.subr.bf16.mxu0 %v7231_v24  ;;  %v7077_v23 = vcombine.high %v2657_v50, %v2673_v7  ;;  %v2624_v24 = vld [vmem:[%s9802_s5 + $0x460] sm:$0xff] }
 0x3e6   :  { %6201 = vmatprep.subr.bf16.mxu1 %v7233_v19  ;;  %v2640_v19 = vld [vmem:[%s9802_s5 + $0x4e0] sm:$0xff] }
 0x3e7   :  { %v7043_v14 = vcombine.high %v2624_v24, %v2640_v19 }
 0x3e8   :  { %6161 = vmatpush2.bf16.msra.mxu0 %v7230_v30  ;;  %v2641_v30 = vld [vmem:[%s9802_s5 + $0x4e8] sm:$0xff] }
 0x3e9   :  { %6202 = vmatpush2.bf16.msra.mxu1 %v7232_v13  ;;  %6162 = vmatprep.subr.bf16.mxu0 %v7199_v31 }
 0x3ea   :  { %6203 = vmatprep.subr.bf16.mxu1 %v7201_v34  ;;  %v7074_v34 = vcombine.low %v2656_v2, %v2672_v4  ;;  %v2528_v2 = vld [vmem:[%s9802_s5 + $0x160] sm:$0xff] }
 0x3eb   :  { %v2544_v4 = vld [vmem:[%s9802_s5 + $0x1e0] sm:$0xff] }
 0x3ec   :  { %6163 = vmatpush2.bf16.msra.mxu0 %v7198_v39  ;;  %v6947_v50 = vcombine.high %v2528_v2, %v2544_v4 }
 0x3ed   :  { %6204 = vmatpush2.bf16.msra.mxu1 %v7200_v40  ;;  %6164 = vmatprep.subr.bf16.mxu0 %v7167_v41  ;;  %v7045_v41 = vcombine.high %v2625_v29, %v2641_v30 }
 0x3ee   :  { %6205 = vmatprep.subr.bf16.mxu1 %v7169_v42  ;;  %v2592_v42 = vld [vmem:[%s9802_s5 + $0x360] sm:$0xff] }
 0x3f0   :  { %6165 = vmatpush2.bf16.msra.mxu0 %v7166_v17  ;;  %v7042_v17 = vcombine.low %v2624_v24, %v2640_v19  ;;  %v2992_v24 = vld [vmem:[%s9802_s5 + $0xfe0] sm:$0xff]  ;;  %v2977_v19 = vld [vmem:[%s9802_s5 + $0xf68] sm:$0xff] }
 0x3f1   :  { %6206 = vmatpush2.bf16.msra.mxu1 %v7168_v54  ;;  %6216 = vmatprep.subr.bf16.mxu0 %v7139_v18  ;;  %v7044_v18 = vcombine.low %v2625_v29, %v2641_v30 }
 0x3f2   :  { %6257 = vmatprep.subr.bf16.mxu1 %v7141_v55  ;;  %v7011_v55 = vcombine.high %v2592_v42, %v2608_v44 }
 0x3f3   :  { %v5922_v48 = vpop.f32.mrf.mxu0  ;;  %6167 = vmatmul.mubr.bf16.vlgmr.msra.gmra.mxu0 %v8327_v36 }
 0x3f4   :  { %v5963_v9 = vpop.f32.mrf.mxu1  ;;  %6208 = vmatmul.mubr.bf16.vlgmr.msra.gmra.mxu1 %v8327_v36  ;;  %6217 = vmatpush1.bf16.msra.mxu0 %v7138_v32  ;;  %v5923_v20 = vadd.f32 %v5922_v48, %v3039_v60  ;;  %v2576_v32 = vld [vmem:[%s9802_s5 + $0x2e0] sm:$0xff]  ;;  %v7012_v60 = vcombine.low %v2593_v52, %v2609_v16  ;;  %v2529_v48 = vld [vmem:[%s9802_s5 + $0x168] sm:$0xff] }
 0x3f5   :  { %6248 = vmatprep.mubr.bf16.mxu0 %v8325_v35  ;;  %6258 = vmatpush1.bf16.msra.mxu1 %v7140_v59  ;;  %v5924_v11 = vpop.f32.mrf.mxu0  ;;  %v5964_v26 = vadd.f32 %v5963_v9, %v3047_v5  ;;  %v7010_v59 = vcombine.low %v2592_v42, %v2608_v44  ;;  %v2545_v5 = vld [vmem:[%s9802_s5 + $0x1e8] sm:$0xff]  ;;  %v2496_v9 = vld [vmem:[%s9802_s5 + $0x60] sm:$0xff] }
 0x3f6   :  { %6289 = vmatprep.mubr.bf16.mxu1 %v8325_v35  ;;  %v5925_v21 = vadd.f32 %v5924_v11, %v3043_v28  ;;  %v5965_v22 = vpop.f32.mrf.mxu1  ;;  %6218 = vmatprep.subr.bf16.mxu0 %v7107_v63  ;;  %v6979_v28 = vcombine.high %v2560_v53, %v2576_v32  ;;  %v6981_v63 = vcombine.high %v2561_v57, %v2577_v33  ;;  %v2497_v11 = vld [vmem:[%s9802_s5 + $0x68] sm:$0xff] }
 0x3f7   :  { %v5966_v27 = vadd.f32 %v5965_v22, %v3051_v6  ;;  %v5926_v46 = vpop.f32.mrf.mxu0  ;;  %6259 = vmatprep.subr.bf16.mxu1 %v7109_v43  ;;  %v6978_v6 = vcombine.low %v2560_v53, %v2576_v32  ;;  %v6980_v43 = vcombine.low %v2561_v57, %v2577_v33  ;;  %v6949_v7 = vcombine.high %v2529_v48, %v2545_v5  ;;  %v2913_v42 = vld [vmem:[%s9802_s5 + $0xd68] sm:$0xff] }
 0x3f8   :  { %v6446_v13 = vcombine.low %v5923_v20, %v5925_v21  ;;  %v5967_v31 = vpop.f32.mrf.mxu1  ;;  %6219 = vmatpush1.bf16.msra.mxu0 %v7106_v10  ;;  %v2512_v10 = vld [vmem:[%s9802_s5 + $0xe0] sm:$0xff]  ;;  %v6948_v20 = vcombine.low %v2529_v48, %v2545_v5  ;;  %v2929_v44 = vld [vmem:[%s9802_s5 + $0xde8] sm:$0xff] }
 0x3f9   :  { %v6447_v15 = vcombine.low %v5964_v26, %v5966_v27  ;;  %6260 = vmatpush1.bf16.msra.mxu1 %v7108_v3  ;;  %v5927_v37 = vpop.f32.mrf.mxu0  ;;  %6220 = vmatprep.subr.bf16.mxu0 %v7075_v12  ;;  %v2513_v3 = vld [vmem:[%s9802_s5 + $0xe8] sm:$0xff]  ;;  %v6946_v12 = vcombine.low %v2528_v2, %v2544_v4  ;;  %v6915_v21 = vcombine.high %v2496_v9, %v2512_v10  ;;  %v2960_v31 = vld [vmem:[%s9802_s5 + $0xee0] sm:$0xff] }
 0x3fa   :  { %v6454_v39 = vrot.slane %v6446_v13, %v7991_v49  ;;  %v5968_v40 = vpop.f32.mrf.mxu1  ;;  %6261 = vmatprep.subr.bf16.mxu1 %v7077_v23  ;;  %v6917_v22 = vcombine.high %v2497_v11, %v2513_v3  ;;  %v2976_v23 = vld [vmem:[%s9802_s5 + $0xf60] sm:$0xff]  ;;  %v2993_v26 = vld [vmem:[%s9802_s5 + $0xfe8] sm:$0xff]  ;;  %v6914_v27 = vcombine.low %v2496_v9, %v2512_v10  ;;  %v6916_v46 = vcombine.low %v2497_v11, %v2513_v3 }
 0x3fb   :  { %v6461_v51 = vrot.slane %v6447_v15, %v7991_v49  ;;  %v7395_v29 = vcombine.high %v2976_v23, %v2992_v24  ;;  %v7397_v30 = vcombine.high %v2977_v19, %v2993_v26  ;;  %v2944_v13 = vld [vmem:[%s9802_s5 + $0xe60] sm:$0xff]  ;;  %v2961_v15 = vld [vmem:[%s9802_s5 + $0xee8] sm:$0xff]  ;;  %v7394_v37 = vcombine.low %v2976_v23, %v2992_v24 }
 0x3fc   :  { %6221 = vmatpush1.bf16.msra.mxu0 %v7074_v34  ;;  %v2945_v34 = vld [vmem:[%s9802_s5 + $0xe68] sm:$0xff]  ;;  %v2912_v40 = vld [vmem:[%s9802_s5 + $0xd60] sm:$0xff]  ;;  %v7332_v32 = vcombine.low %v2913_v42, %v2929_v44 }
 0x3fd   :  { %v6462_v54 = vcombine.low %v6454_v39, %v6461_v51  ;;  %6262 = vmatpush1.bf16.msra.mxu1 %v7076_v38  ;;  %6222 = vmatprep.subr.bf16.mxu0 %v7043_v14  ;;  %v7396_v38 = vcombine.low %v2977_v19, %v2993_v26  ;;  %v7363_v14 = vcombine.high %v2944_v13, %v2960_v31 }
 0x3fe   :  { %6263 = vmatprep.subr.bf16.mxu1 %v7045_v41  ;;  %v7365_v39 = vcombine.high %v2945_v34, %v2961_v15  ;;  %v2928_v41 = vld [vmem:[%s9802_s5 + $0xde0] sm:$0xff]  ;;  %v7362_v51 = vcombine.low %v2944_v13, %v2960_v31  ;;  %v7364_v52 = vcombine.low %v2945_v34, %v2961_v15 }
 0x3ff   :  { %6558 = vst [vmem:[%s9804_s7 + $0x10] sm:$0xff] %v6462_v54  ;;  %v7331_v16 = vcombine.high %v2912_v40, %v2928_v41  ;;  %v2880_v54 = vld [vmem:[%s9802_s5 + $0xc60] sm:$0xff]  ;;  %v7330_v53 = vcombine.low %v2912_v40, %v2928_v41 }
 0x400   :  { %6223 = vmatpush1.bf16.msra.mxu0 %v7042_v17  ;;  %v7333_v17 = vcombine.high %v2913_v42, %v2929_v44 }
 0x401   :  { %6264 = vmatpush1.bf16.msra.mxu1 %v7044_v18  ;;  %6224 = vmatprep.subr.bf16.mxu0 %v7011_v55  ;;  %v2896_v18 = vld [vmem:[%s9802_s5 + $0xce0] sm:$0xff]  ;;  %v2881_v55 = vld [vmem:[%s9802_s5 + $0xc68] sm:$0xff] }
 0x402   :  { %6265 = vmatprep.subr.bf16.mxu1 %v7013_v58  ;;  %v2897_v58 = vld [vmem:[%s9802_s5 + $0xce8] sm:$0xff]  ;;  %v7299_v57 = vcombine.high %v2880_v54, %v2896_v18  ;;  %v7298_v2 = vcombine.low %v2880_v54, %v2896_v18  ;;  %v2707_v54 = vld [vmem:[%s9802_s5 + $0x6f8] sm:$0xff] }
 0x403   :  { %v7301_v33 = vcombine.high %v2881_v55, %v2897_v58  ;;  %v7300_v4 = vcombine.low %v2881_v55, %v2897_v58  ;;  %v3055_v55 = vrot.slane %v9345_v56, %v9122_v25  ;;  %v3059_v58 = vrot.slane %v9345_v56, %v9128_v0 }
 0x404   :  { %6225 = vmatpush1.bf16.msra.mxu0 %v7010_v59  ;;  %v2848_v59 = vld [vmem:[%s9802_s5 + $0xb60] sm:$0xff] }
 0x405   :  { %6266 = vmatpush1.bf16.msra.mxu1 %v7012_v60  ;;  %6226 = vmatprep.subr.bf16.mxu0 %v6979_v28  ;;  %v2864_v60 = vld [vmem:[%s9802_s5 + $0xbe0] sm:$0xff]  ;;  %v2849_v28 = vld [vmem:[%s9802_s5 + $0xb68] sm:$0xff] }
 0x406   :  { %6267 = vmatprep.subr.bf16.mxu1 %v6981_v63  ;;  %v2865_v63 = vld [vmem:[%s9802_s5 + $0xbe8] sm:$0xff]  ;;  %v7267_v48 = vcombine.high %v2848_v59, %v2864_v60  ;;  %v7266_v9 = vcombine.low %v2848_v59, %v2864_v60  ;;  %v3063_v59 = vrot.slane %v9345_v56, %v9125_v61  ;;  %v3067_v60 = vrot.slane %v9345_v56, %v9131_v1 }
 0x407   :  { %v7269_v5 = vcombine.high %v2849_v28, %v2865_v63  ;;  %v7268_v10 = vcombine.low %v2849_v28, %v2865_v63  ;;  %v2659_v63 = vld [vmem:[%s9802_s5 + $0x578] sm:$0xff] }
 0x408   :  { %6227 = vmatpush1.bf16.msra.mxu0 %v6978_v6  ;;  %v2816_v6 = vld [vmem:[%s9802_s5 + $0xa60] sm:$0xff] }
 0x409   :  { %6268 = vmatpush1.bf16.msra.mxu1 %v6980_v43  ;;  %6228 = vmatprep.subr.bf16.mxu0 %v6947_v50  ;;  %v2832_v43 = vld [vmem:[%s9802_s5 + $0xae0] sm:$0xff]  ;;  %v2817_v50 = vld [vmem:[%s9802_s5 + $0xa68] sm:$0xff] }
 0x40a   :  { %6269 = vmatprep.subr.bf16.mxu1 %v6949_v7  ;;  %v2833_v7 = vld [vmem:[%s9802_s5 + $0xae8] sm:$0xff]  ;;  %v7235_v11 = vcombine.high %v2816_v6, %v2832_v43  ;;  %v7234_v23 = vcombine.low %v2816_v6, %v2832_v43 }
 0x40b   :  { %v7237_v3 = vcombine.high %v2817_v50, %v2833_v7  ;;  %v7236_v24 = vcombine.low %v2817_v50, %v2833_v7 }
 0x40c   :  { %6229 = vmatpush1.bf16.msra.mxu0 %v6946_v12  ;;  %v2784_v12 = vld [vmem:[%s9802_s5 + $0x960] sm:$0xff] }
 0x40d   :  { %6270 = vmatpush1.bf16.msra.mxu1 %v6948_v20  ;;  %6230 = vmatprep.subr.bf16.mxu0 %v6915_v21  ;;  %v2800_v20 = vld [vmem:[%s9802_s5 + $0x9e0] sm:$0xff]  ;;  %v2785_v21 = vld [vmem:[%s9802_s5 + $0x968] sm:$0xff] }
 0x40e   :  { %6271 = vmatprep.subr.bf16.mxu1 %v6917_v22  ;;  %v2801_v22 = vld [vmem:[%s9802_s5 + $0x9e8] sm:$0xff]  ;;  %v7203_v19 = vcombine.high %v2784_v12, %v2800_v20  ;;  %v7202_v13 = vcombine.low %v2784_v12, %v2800_v20 }
 0x40f   :  { %v7205_v26 = vcombine.high %v2785_v21, %v2801_v22  ;;  %v7204_v31 = vcombine.low %v2785_v21, %v2801_v22  ;;  %v2643_v21 = vld [vmem:[%s9802_s5 + $0x4f8] sm:$0xff] }
 0x410   :  { %6231 = vmatpush1.bf16.msra.mxu0 %v6914_v27  ;;  %v2752_v27 = vld [vmem:[%s9802_s5 + $0x860] sm:$0xff] }
 0x411   :  { %6272 = vmatpush1.bf16.msra.mxu1 %v6916_v46  ;;  %6232 = vmatprep.subr.bf16.mxu0 %v7395_v29  ;;  %v2768_v46 = vld [vmem:[%s9802_s5 + $0x8e0] sm:$0xff]  ;;  %v2753_v29 = vld [vmem:[%s9802_s5 + $0x868] sm:$0xff] }
 0x412   :  { %6273 = vmatprep.subr.bf16.mxu1 %v7397_v30  ;;  %v2769_v30 = vld [vmem:[%s9802_s5 + $0x8e8] sm:$0xff]  ;;  %v7171_v34 = vcombine.high %v2752_v27, %v2768_v46  ;;  %v7170_v40 = vcombine.low %v2752_v27, %v2768_v46 }
 0x413   :  { %v7173_v15 = vcombine.high %v2753_v29, %v2769_v30  ;;  %v7172_v41 = vcombine.low %v2753_v29, %v2769_v30 }
 0x414   :  { %6233 = vmatpush2.bf16.msra.mxu0 %v7394_v37  ;;  %v2722_v37 = vld [vmem:[%s9802_s5 + $0x770] sm:$0xff] }
 0x415   :  { %6274 = vmatpush2.bf16.msra.mxu1 %v7396_v38  ;;  %6234 = vmatprep.subr.bf16.mxu0 %v7363_v14  ;;  %v2738_v38 = vld [vmem:[%s9802_s5 + $0x7f0] sm:$0xff]  ;;  %v2723_v14 = vld [vmem:[%s9802_s5 + $0x778] sm:$0xff] }
 0x416   :  { %6275 = vmatprep.subr.bf16.mxu1 %v7365_v39  ;;  %v2739_v39 = vld [vmem:[%s9802_s5 + $0x7f8] sm:$0xff]  ;;  %v7143_v42 = vcombine.high %v2722_v37, %v2738_v38 }
 0x417   :  { %v7145_v44 = vcombine.high %v2723_v14, %v2739_v39  ;;  %v7144_v18 = vcombine.low %v2723_v14, %v2739_v39 }
 0x418   :  { %6235 = vmatpush2.bf16.msra.mxu0 %v7362_v51  ;;  %v2690_v51 = vld [vmem:[%s9802_s5 + $0x670] sm:$0xff] }
 0x419   :  { %6276 = vmatpush2.bf16.msra.mxu1 %v7364_v52  ;;  %6236 = vmatprep.subr.bf16.mxu0 %v7331_v16  ;;  %v2706_v52 = vld [vmem:[%s9802_s5 + $0x6f0] sm:$0xff]  ;;  %v7142_v16 = vcombine.low %v2722_v37, %v2738_v38  ;;  %v2595_v37 = vld [vmem:[%s9802_s5 + $0x378] sm:$0xff] }
 0x41a   :  { %6277 = vmatprep.subr.bf16.mxu1 %v7333_v17  ;;  %v2691_v17 = vld [vmem:[%s9802_s5 + $0x678] sm:$0xff] }
 0x41b   :  { %v7113_v28 = vcombine.high %v2691_v17, %v2707_v54  ;;  %v7112_v6 = vcombine.low %v2691_v17, %v2707_v54  ;;  %v2611_v38 = vld [vmem:[%s9802_s5 + $0x3f8] sm:$0xff] }
 0x41c   :  { %6237 = vmatpush2.bf16.msra.mxu0 %v7330_v53  ;;  %v7111_v53 = vcombine.high %v2690_v51, %v2706_v52  ;;  %v7016_v54 = vcombine.low %v2595_v37, %v2611_v38 }
 0x41d   :  { %6278 = vmatpush2.bf16.msra.mxu1 %v7332_v32  ;;  %6238 = vmatprep.subr.bf16.mxu0 %v7299_v57  ;;  %v2658_v32 = vld [vmem:[%s9802_s5 + $0x570] sm:$0xff] }
 0x41e   :  { %6279 = vmatprep.subr.bf16.mxu1 %v7301_v33  ;;  %v2674_v57 = vld [vmem:[%s9802_s5 + $0x5f0] sm:$0xff] }
 0x41f   :  { %v7079_v56 = vcombine.high %v2658_v32, %v2674_v57 }
 0x420   :  { %6239 = vmatpush2.bf16.msra.mxu0 %v7298_v2  ;;  %v2675_v2 = vld [vmem:[%s9802_s5 + $0x5f8] sm:$0xff] }
 0x421   :  { %6280 = vmatpush2.bf16.msra.mxu1 %v7300_v4  ;;  %6240 = vmatprep.subr.bf16.mxu0 %v7267_v48  ;;  %v7110_v48 = vcombine.low %v2690_v51, %v2706_v52  ;;  %v7080_v27 = vcombine.low %v2659_v63, %v2675_v2  ;;  %v2578_v51 = vld [vmem:[%s9802_s5 + $0x2f0] sm:$0xff]  ;;  %v2563_v52 = vld [vmem:[%s9802_s5 + $0x278] sm:$0xff] }
 0x422   :  { %6281 = vmatprep.subr.bf16.mxu1 %v7269_v5 }
 0x424   :  { %6241 = vmatpush2.bf16.msra.mxu0 %v7266_v9  ;;  %v7081_v9 = vcombine.high %v2659_v63, %v2675_v2  ;;  %v2498_v63 = vld [vmem:[%s9802_s5 + $0x70] sm:$0xff] }
 0x425   :  { %6282 = vmatpush2.bf16.msra.mxu1 %v7268_v10  ;;  %6242 = vmatprep.subr.bf16.mxu0 %v7235_v11  ;;  %v2626_v10 = vld [vmem:[%s9802_s5 + $0x470] sm:$0xff] }
 0x426   :  { %6283 = vmatprep.subr.bf16.mxu1 %v7237_v3  ;;  %v2642_v11 = vld [vmem:[%s9802_s5 + $0x4f0] sm:$0xff] }
 0x427   :  { %v7047_v46 = vcombine.high %v2626_v10, %v2642_v11  ;;  %v7046_v14 = vcombine.low %v2626_v10, %v2642_v11  ;;  %v2514_v2 = vld [vmem:[%s9802_s5 + $0xf0] sm:$0xff]  ;;  %v2995_v10 = vld [vmem:[%s9802_s5 + $0xff8] sm:$0xff] }
 0x428   :  { %6243 = vmatpush2.bf16.msra.mxu0 %v7234_v23  ;;  %v6918_v11 = vcombine.low %v2498_v63, %v2514_v2 }
 0x429   :  { %6284 = vmatpush2.bf16.msra.mxu1 %v7236_v24  ;;  %6244 = vmatprep.subr.bf16.mxu0 %v7203_v19  ;;  %v7078_v24 = vcombine.low %v2658_v32, %v2674_v57  ;;  %v2531_v32 = vld [vmem:[%s9802_s5 + $0x178] sm:$0xff] }
 0x42a   :  { %6285 = vmatprep.subr.bf16.mxu1 %v7205_v26  ;;  %v2547_v57 = vld [vmem:[%s9802_s5 + $0x1f8] sm:$0xff] }
 0x42c   :  { %6245 = vmatpush2.bf16.msra.mxu0 %v7202_v13 }
 0x42d   :  { %6286 = vmatpush2.bf16.msra.mxu1 %v7204_v31  ;;  %6246 = vmatprep.subr.bf16.mxu0 %v7171_v34  ;;  %v2594_v31 = vld [vmem:[%s9802_s5 + $0x370] sm:$0xff] }
 0x42e   :  { %6287 = vmatprep.subr.bf16.mxu1 %v7173_v15  ;;  %v2610_v34 = vld [vmem:[%s9802_s5 + $0x3f0] sm:$0xff] }
 0x42f   :  { %v7014_v17 = vcombine.low %v2594_v31, %v2610_v34 }
 0x430   :  { %6247 = vmatpush2.bf16.msra.mxu0 %v7170_v40 }
 0x431   :  { %6288 = vmatpush2.bf16.msra.mxu1 %v7172_v41  ;;  %6298 = vmatprep.subr.bf16.mxu0 %v7143_v42  ;;  %v7015_v41 = vcombine.high %v2594_v31, %v2610_v34  ;;  %v7017_v42 = vcombine.high %v2595_v37, %v2611_v38  ;;  %v2882_v38 = vld [vmem:[%s9802_s5 + $0xc70] sm:$0xff] }
 0x432   :  { %6339 = vmatprep.subr.bf16.mxu1 %v7145_v44  ;;  %v2562_v44 = vld [vmem:[%s9802_s5 + $0x270] sm:$0xff] }
 0x433   :  { %v6004_v33 = vpop.f32.mrf.mxu0  ;;  %6249 = vmatmul.mubr.bf16.vlgmr.msra.gmra.mxu0 %v8327_v36 }
 0x434   :  { %v6045_v4 = vpop.f32.mrf.mxu1  ;;  %6290 = vmatmul.mubr.bf16.vlgmr.msra.gmra.mxu1 %v8327_v36  ;;  %6299 = vmatpush1.bf16.msra.mxu0 %v7142_v16  ;;  %v6005_v43 = vadd.f32 %v6004_v33, %v3055_v55  ;;  %v2579_v16 = vld [vmem:[%s9802_s5 + $0x2f8] sm:$0xff]  ;;  %v6982_v33 = vcombine.low %v2562_v44, %v2578_v51 }
 0x435   :  { %6330 = vmatprep.mubr.bf16.mxu0 %v8325_v35  ;;  %6340 = vmatpush1.bf16.msra.mxu1 %v7144_v18  ;;  %v6006_v5 = vpop.f32.mrf.mxu0  ;;  %v6046_v3 = vadd.f32 %v6045_v4, %v3063_v59  ;;  %v6983_v18 = vcombine.high %v2562_v44, %v2578_v51  ;;  %v6985_v55 = vcombine.high %v2563_v52, %v2579_v16  ;;  %v2499_v4 = vld [vmem:[%s9802_s5 + $0x78] sm:$0xff] }
 0x436   :  { %6371 = vmatprep.mubr.bf16.mxu1 %v8325_v35  ;;  %v6007_v50 = vadd.f32 %v6006_v5, %v3059_v58  ;;  %v6047_v7 = vpop.f32.mrf.mxu1  ;;  %6300 = vmatprep.subr.bf16.mxu0 %v7111_v53  ;;  %v2627_v35 = vld [vmem:[%s9802_s5 + $0x478] sm:$0xff]  ;;  %v2530_v58 = vld [vmem:[%s9802_s5 + $0x170] sm:$0xff]  ;;  %v6984_v59 = vcombine.low %v2563_v52, %v2579_v16 }
 0x437   :  { %v6048_v12 = vadd.f32 %v6047_v7, %v3067_v60  ;;  %v6008_v20 = vpop.f32.mrf.mxu0  ;;  %6341 = vmatprep.subr.bf16.mxu1 %v7113_v28  ;;  %v7049_v13 = vcombine.high %v2627_v35, %v2643_v21  ;;  %v7048_v40 = vcombine.low %v2627_v35, %v2643_v21  ;;  %v2546_v53 = vld [vmem:[%s9802_s5 + $0x1f0] sm:$0xff]  ;;  %v6953_v28 = vcombine.high %v2531_v32, %v2547_v57 }
 0x438   :  { %v6463_v22 = vcombine.low %v6005_v43, %v6007_v50  ;;  %v6049_v23 = vpop.f32.mrf.mxu1  ;;  %6301 = vmatpush1.bf16.msra.mxu0 %v7110_v48  ;;  %v6951_v60 = vcombine.high %v2530_v58, %v2546_v53  ;;  %v2515_v48 = vld [vmem:[%s9802_s5 + $0xf8] sm:$0xff]  ;;  %v6950_v5 = vcombine.low %v2530_v58, %v2546_v53  ;;  %v2978_v50 = vld [vmem:[%s9802_s5 + $0xf70] sm:$0xff] }
 0x439   :  { %v6464_v19 = vcombine.low %v6046_v3, %v6048_v12  ;;  %6342 = vmatpush1.bf16.msra.mxu1 %v7112_v6  ;;  %v6009_v26 = vpop.f32.mrf.mxu0  ;;  %6302 = vmatprep.subr.bf16.mxu0 %v7079_v56  ;;  %v6952_v6 = vcombine.low %v2531_v32, %v2547_v57  ;;  %v6919_v56 = vcombine.high %v2498_v63, %v2514_v2  ;;  %v2994_v7 = vld [vmem:[%s9802_s5 + $0xff0] sm:$0xff]  ;;  %v2963_v23 = vld [vmem:[%s9802_s5 + $0xef8] sm:$0xff] }
 0x43a   :  { %v6471_v29 = vrot.slane %v6463_v22, %v7991_v49  ;;  %v6050_v30 = vpop.f32.mrf.mxu1  ;;  %6343 = vmatprep.subr.bf16.mxu1 %v7081_v9  ;;  %v6921_v43 = vcombine.high %v2499_v4, %v2515_v48  ;;  %v2979_v9 = vld [vmem:[%s9802_s5 + $0xf78] sm:$0xff]  ;;  %v6920_v3 = vcombine.low %v2499_v4, %v2515_v48  ;;  %v7399_v12 = vcombine.high %v2978_v50, %v2994_v7  ;;  %v2946_v35 = vld [vmem:[%s9802_s5 + $0xe70] sm:$0xff] }
 0x43b   :  { %v6478_v15 = vrot.slane %v6464_v19, %v7991_v49  ;;  %v7401_v20 = vcombine.high %v2979_v9, %v2995_v10  ;;  %v2962_v21 = vld [vmem:[%s9802_s5 + $0xef0] sm:$0xff]  ;;  %v2947_v22 = vld [vmem:[%s9802_s5 + $0xe78] sm:$0xff]  ;;  %v7400_v19 = vcombine.low %v2979_v9, %v2995_v10 }
 0x43c   :  { %6303 = vmatpush1.bf16.msra.mxu0 %v7078_v24  ;;  %v7398_v24 = vcombine.low %v2978_v50, %v2994_v7  ;;  %v7367_v26 = vcombine.high %v2946_v35, %v2962_v21  ;;  %v2915_v30 = vld [vmem:[%s9802_s5 + $0xd78] sm:$0xff]  ;;  %v7366_v31 = vcombine.low %v2946_v35, %v2962_v21  ;;  %v7368_v34 = vcombine.low %v2947_v22, %v2963_v23  ;;  %v2850_v52 = vld [vmem:[%s9802_s5 + $0xb70] sm:$0xff] }
 0x43d   :  { %v6479_v39 = vcombine.low %v6471_v29, %v6478_v15  ;;  %6344 = vmatpush1.bf16.msra.mxu1 %v7080_v27  ;;  %6304 = vmatprep.subr.bf16.mxu0 %v7047_v46  ;;  %v7369_v27 = vcombine.high %v2947_v22, %v2963_v23  ;;  %v2914_v46 = vld [vmem:[%s9802_s5 + $0xd70] sm:$0xff] }
 0x43e   :  { %6345 = vmatprep.subr.bf16.mxu1 %v7049_v13  ;;  %v2930_v29 = vld [vmem:[%s9802_s5 + $0xdf0] sm:$0xff]  ;;  %v2931_v13 = vld [vmem:[%s9802_s5 + $0xdf8] sm:$0xff] }
 0x43f   :  { %6559 = vst [vmem:[%s9804_s7 + $0x18] sm:$0xff] %v6479_v39  ;;  %v7335_v15 = vcombine.high %v2914_v46, %v2930_v29  ;;  %v7337_v37 = vcombine.high %v2915_v30, %v2931_v13  ;;  %v2883_v39 = vld [vmem:[%s9802_s5 + $0xc78] sm:$0xff]  ;;  %v2866_v16 = vld [vmem:[%s9802_s5 + $0xbf0] sm:$0xff] }
 0x440   :  { %6305 = vmatpush1.bf16.msra.mxu0 %v7046_v14  ;;  %v2898_v14 = vld [vmem:[%s9802_s5 + $0xcf0] sm:$0xff]  ;;  %v7271_v58 = vcombine.high %v2850_v52, %v2866_v16 }
 0x441   :  { %6346 = vmatpush1.bf16.msra.mxu1 %v7048_v40  ;;  %6306 = vmatprep.subr.bf16.mxu0 %v7015_v41  ;;  %v2899_v40 = vld [vmem:[%s9802_s5 + $0xcf8] sm:$0xff]  ;;  %v7334_v41 = vcombine.low %v2914_v46, %v2930_v29  ;;  %v7303_v44 = vcombine.high %v2882_v38, %v2898_v14  ;;  %v2818_v32 = vld [vmem:[%s9802_s5 + $0xa70] sm:$0xff] }
 0x442   :  { %6347 = vmatprep.subr.bf16.mxu1 %v7017_v42  ;;  %v7336_v42 = vcombine.low %v2915_v30, %v2931_v13  ;;  %v7305_v51 = vcombine.high %v2883_v39, %v2899_v40  ;;  %v2834_v57 = vld [vmem:[%s9802_s5 + $0xaf0] sm:$0xff] }
 0x443   :  { %v7239_v63 = vcombine.high %v2818_v32, %v2834_v57  ;;  %v2786_v4 = vld [vmem:[%s9802_s5 + $0x970] sm:$0xff] }
 0x444   :  { %6307 = vmatpush1.bf16.msra.mxu0 %v7014_v17  ;;  %v2851_v17 = vld [vmem:[%s9802_s5 + $0xb78] sm:$0xff]  ;;  %v2802_v48 = vld [vmem:[%s9802_s5 + $0x9f0] sm:$0xff] }
 0x445   :  { %6348 = vmatpush1.bf16.msra.mxu1 %v7016_v54  ;;  %6308 = vmatprep.subr.bf16.mxu0 %v6983_v18  ;;  %v2867_v54 = vld [vmem:[%s9802_s5 + $0xbf8] sm:$0xff]  ;;  %v7302_v18 = vcombine.low %v2882_v38, %v2898_v14  ;;  %v7207_v50 = vcombine.high %v2786_v4, %v2802_v48  ;;  %v2754_v9 = vld [vmem:[%s9802_s5 + $0x870] sm:$0xff] }
 0x446   :  { %6349 = vmatprep.subr.bf16.mxu1 %v6985_v55  ;;  %v7304_v55 = vcombine.low %v2883_v39, %v2899_v40  ;;  %v7273_v53 = vcombine.high %v2851_v17, %v2867_v54  ;;  %v2770_v10 = vld [vmem:[%s9802_s5 + $0x8f0] sm:$0xff] }
 0x447   :  { %v7175_v35 = vcombine.high %v2754_v9, %v2770_v10  ;;  %v7174_v22 = vcombine.low %v2754_v9, %v2770_v10 }
 0x448   :  { %6309 = vmatpush1.bf16.msra.mxu0 %v6982_v33  ;;  %v2819_v33 = vld [vmem:[%s9802_s5 + $0xa78] sm:$0xff] }
 0x449   :  { %6350 = vmatpush1.bf16.msra.mxu1 %v6984_v59  ;;  %6310 = vmatprep.subr.bf16.mxu0 %v6951_v60  ;;  %v2835_v59 = vld [vmem:[%s9802_s5 + $0xaf8] sm:$0xff]  ;;  %v7270_v60 = vcombine.low %v2850_v52, %v2866_v16 }
 0x44a   :  { %6351 = vmatprep.subr.bf16.mxu1 %v6953_v28  ;;  %v7272_v28 = vcombine.low %v2851_v17, %v2867_v54  ;;  %v7241_v2 = vcombine.high %v2819_v33, %v2835_v59 }
 0x44c   :  { %6311 = vmatpush1.bf16.msra.mxu0 %v6950_v5  ;;  %v2787_v5 = vld [vmem:[%s9802_s5 + $0x978] sm:$0xff] }
 0x44d   :  { %6352 = vmatpush1.bf16.msra.mxu1 %v6952_v6  ;;  %6312 = vmatprep.subr.bf16.mxu0 %v6919_v56  ;;  %v2803_v6 = vld [vmem:[%s9802_s5 + $0x9f8] sm:$0xff]  ;;  %v7238_v56 = vcombine.low %v2818_v32, %v2834_v57 }
 0x44e   :  { %6353 = vmatprep.subr.bf16.mxu1 %v6921_v43  ;;  %v7240_v43 = vcombine.low %v2819_v33, %v2835_v59  ;;  %v7209_v7 = vcombine.high %v2787_v5, %v2803_v6 }
 0x450   :  { %6313 = vmatpush1.bf16.msra.mxu0 %v6918_v11  ;;  %v2755_v11 = vld [vmem:[%s9802_s5 + $0x878] sm:$0xff] }
 0x451   :  { %6354 = vmatpush1.bf16.msra.mxu1 %v6920_v3  ;;  %6314 = vmatprep.subr.bf16.mxu0 %v7399_v12  ;;  %v2771_v3 = vld [vmem:[%s9802_s5 + $0x8f8] sm:$0xff]  ;;  %v7206_v12 = vcombine.low %v2786_v4, %v2802_v48 }
 0x452   :  { %6355 = vmatprep.subr.bf16.mxu1 %v7401_v20  ;;  %v7208_v20 = vcombine.low %v2787_v5, %v2803_v6  ;;  %v7177_v21 = vcombine.high %v2755_v11, %v2771_v3  ;;  %v7176_v23 = vcombine.low %v2755_v11, %v2771_v3 }
 0x454   :  { %6315 = vmatpush2.bf16.msra.mxu0 %v7398_v24  ;;  %v2998_v24 = vld [vmem:[%s9803_s6 + $0x10] sm:$0xff] }
 0x455   :  { %6356 = vmatpush2.bf16.msra.mxu1 %v7400_v19  ;;  %6316 = vmatprep.subr.bf16.mxu0 %v7367_v26  ;;  %v3071_v19 = vrot.slane %v2998_v24, %v8056_v45  ;;  %v3075_v26 = vrot.slane %v2998_v24, %v8064_v47  ;;  %v3079_v46 = vrot.slane %v2998_v24, %v8155_v62 }
 0x456   :  { %6357 = vmatprep.subr.bf16.mxu1 %v7369_v27  ;;  %v3083_v29 = vrot.slane %v2998_v24, %v8164_v8  ;;  %v3091_v17 = vrot.slane %v2998_v24, %v9128_v0 }
 0x458   :  { %6317 = vmatpush2.bf16.msra.mxu0 %v7366_v31 }
 0x459   :  { %6358 = vmatpush2.bf16.msra.mxu1 %v7368_v34  ;;  %6318 = vmatprep.subr.bf16.mxu0 %v7335_v15 }
 0x45a   :  { %6359 = vmatprep.subr.bf16.mxu1 %v7337_v37 }
 0x45c   :  { %6319 = vmatpush2.bf16.msra.mxu0 %v7334_v41 }
 0x45d   :  { %6360 = vmatpush2.bf16.msra.mxu1 %v7336_v42  ;;  %6320 = vmatprep.subr.bf16.mxu0 %v7303_v44 }
 0x45e   :  { %6361 = vmatprep.subr.bf16.mxu1 %v7305_v51 }
 0x460   :  { %6321 = vmatpush2.bf16.msra.mxu0 %v7302_v18  ;;  %v3095_v18 = vrot.slane %v2998_v24, %v9125_v61 }
 0x461   :  { %6362 = vmatpush2.bf16.msra.mxu1 %v7304_v55  ;;  %6322 = vmatprep.subr.bf16.mxu0 %v7271_v58  ;;  %v3099_v55 = vrot.slane %v2998_v24, %v9131_v1 }
 0x462   :  { %6363 = vmatprep.subr.bf16.mxu1 %v7273_v53 }
 0x464   :  { %6323 = vmatpush2.bf16.msra.mxu0 %v7270_v60 }
 0x465   :  { %6364 = vmatpush2.bf16.msra.mxu1 %v7272_v28  ;;  %6324 = vmatprep.subr.bf16.mxu0 %v7239_v63 }
 0x466   :  { %6365 = vmatprep.subr.bf16.mxu1 %v7241_v2 }
 0x468   :  { %6325 = vmatpush2.bf16.msra.mxu0 %v7238_v56 }
 0x469   :  { %6366 = vmatpush2.bf16.msra.mxu1 %v7240_v43  ;;  %6326 = vmatprep.subr.bf16.mxu0 %v7207_v50  ;;  %v2999_v50 = vld [vmem:[%s9803_s6 + $0x18] sm:$0xff] }
 0x46a   :  { %6367 = vmatprep.subr.bf16.mxu1 %v7209_v7  ;;  %v3103_v7 = vrot.slane %v2999_v50, %v8056_v45  ;;  %v3107_v9 = vrot.slane %v2999_v50, %v8064_v47  ;;  %v3111_v11 = vrot.slane %v2999_v50, %v8155_v62  ;;  %v3115_v3 = vrot.slane %v2999_v50, %v8164_v8 }
 0x46b   :  { %v3119_v8 = vrot.slane %v2999_v50, %v9122_v25 }
 0x46c   :  { %6327 = vmatpush2.bf16.msra.mxu0 %v7206_v12 }
 0x46d   :  { %6368 = vmatpush2.bf16.msra.mxu1 %v7208_v20  ;;  %6328 = vmatprep.subr.bf16.mxu0 %v7175_v35 }
 0x46e   :  { %6369 = vmatprep.subr.bf16.mxu1 %v7177_v21 }
 0x470   :  { %6329 = vmatpush2.bf16.msra.mxu0 %v7174_v22 }
 0x471   :  { %6370 = vmatpush2.bf16.msra.mxu1 %v7176_v23 }
 0x473   :  { %v6086_v27 = vpop.f32.mrf.mxu0  ;;  %6331 = vmatmul.mubr.bf16.vlgmr.msra.gmra.mxu0 %v8327_v36 }
 0x474   :  { %v6127_v30 = vpop.f32.mrf.mxu1  ;;  %6372 = vmatmul.mubr.bf16.vlgmr.msra.gmra.mxu1 %v8327_v36  ;;  %v6087_v31 = vadd.f32 %v6086_v27, %v3071_v19  ;;  %v3087_v36 = vrot.slane %v2998_v24, %v9122_v25 }
 0x475   :  { %v6088_v13 = vpop.f32.mrf.mxu0  ;;  %v6128_v37 = vadd.f32 %v6127_v30, %v3079_v46 }
 0x476   :  { %v6089_v34 = vadd.f32 %v6088_v13, %v3075_v26  ;;  %v6129_v15 = vpop.f32.mrf.mxu1  ;;  %v3123_v13 = vrot.slane %v2999_v50, %v9128_v0 }
 0x477   :  { %v6130_v38 = vadd.f32 %v6129_v15, %v3083_v29  ;;  %v6090_v14 = vpop.f32.mrf.mxu0  ;;  %v3131_v15 = vrot.slane %v2999_v50, %v9131_v1 }
 0x478   :  { %v6480_v39 = vcombine.low %v6087_v31, %v6089_v34  ;;  %v6131_v40 = vpop.f32.mrf.mxu1  ;;  %v3127_v34 = vrot.slane %v2999_v50, %v9125_v61 }
 0x479   :  { %v6481_v41 = vcombine.low %v6128_v37, %v6130_v38  ;;  %v6091_v42 = vpop.f32.mrf.mxu0 }
 0x47a   :  { %v6488_v44 = vrot.slane %v6480_v39, %v7991_v49  ;;  %v6132_v51 = vpop.f32.mrf.mxu1 }
 0x47b   :  { %v6495_v52 = vrot.slane %v6481_v41, %v7991_v49 }
 0x47d   :  { %v6496_v16 = vcombine.low %v6488_v44, %v6495_v52 }
 0x47f   :  { %6560 = vst [vmem:[%s9804_s7 + $0x20] sm:$0xff] %v6496_v16 }
 0x4b3   :  { %v6168_v54 = vpop.f32.mrf.mxu0 }
 0x4b4   :  { %v6209_v58 = vpop.f32.mrf.mxu1  ;;  %v6169_v32 = vadd.f32 %v6168_v54, %v3087_v36 }
 0x4b5   :  { %v6170_v53 = vpop.f32.mrf.mxu0  ;;  %v6210_v59 = vadd.f32 %v6209_v58, %v3095_v18 }
 0x4b6   :  { %v6171_v57 = vadd.f32 %v6170_v53, %v3091_v17  ;;  %v6211_v33 = vpop.f32.mrf.mxu1 }
 0x4b7   :  { %v6212_v60 = vadd.f32 %v6211_v33, %v3099_v55  ;;  %v6172_v28 = vpop.f32.mrf.mxu0 }
 0x4b8   :  { %v6497_v63 = vcombine.low %v6169_v32, %v6171_v57  ;;  %v6213_v2 = vpop.f32.mrf.mxu1 }
 0x4b9   :  { %v6498_v4 = vcombine.low %v6210_v59, %v6212_v60  ;;  %v6173_v48 = vpop.f32.mrf.mxu0 }
 0x4ba   :  { %v6505_v5 = vrot.slane %v6497_v63, %v7991_v49  ;;  %v6214_v6 = vpop.f32.mrf.mxu1 }
 0x4bb   :  { %v6512_v56 = vrot.slane %v6498_v4, %v7991_v49 }
 0x4bd   :  { %v6513_v43 = vcombine.low %v6505_v5, %v6512_v56 }
 0x4bf   :  { %6561 = vst [vmem:[%s9804_s7 + $0x28] sm:$0xff] %v6513_v43 }
 0x4f3   :  { %v6250_v10 = vpop.f32.mrf.mxu0 }
 0x4f4   :  { %v6291_v12 = vpop.f32.mrf.mxu1  ;;  %v6251_v35 = vadd.f32 %v6250_v10, %v3103_v7 }
 0x4f5   :  { %v6252_v20 = vpop.f32.mrf.mxu0  ;;  %v6292_v23 = vadd.f32 %v6291_v12, %v3111_v11 }
 0x4f6   :  { %v6253_v21 = vadd.f32 %v6252_v20, %v3107_v9  ;;  %v6293_v22 = vpop.f32.mrf.mxu1 }
 0x4f7   :  { %v6294_v24 = vadd.f32 %v6293_v22, %v3115_v3  ;;  %v6254_v19 = vpop.f32.mrf.mxu0 }
 0x4f8   :  { %v6514_v26 = vcombine.low %v6251_v35, %v6253_v21  ;;  %v6295_v27 = vpop.f32.mrf.mxu1 }
 0x4f9   :  { %v6515_v46 = vcombine.low %v6292_v23, %v6294_v24  ;;  %v6255_v29 = vpop.f32.mrf.mxu0 }
 0x4fa   :  { %v6522_v45 = vrot.slane %v6514_v26, %v7991_v49  ;;  %v6296_v47 = vpop.f32.mrf.mxu1 }
 0x4fb   :  { %v6529_v30 = vrot.slane %v6515_v46, %v7991_v49 }
 0x4fd   :  { %v6530_v62 = vcombine.low %v6522_v45, %v6529_v30 }
 0x4ff   :  { %6562 = vst [vmem:[%s9804_s7 + $0x30] sm:$0xff] %v6530_v62 }
 0x533   :  { %v6332_v31 = vpop.f32.mrf.mxu0 }
 0x534   :  { %v6373_v37 = vpop.f32.mrf.mxu1  ;;  %v6333_v14 = vadd.f32 %v6332_v31, %v3119_v8 }
 0x535   :  { %v6334_v38 = vpop.f32.mrf.mxu0  ;;  %v6374_v41 = vadd.f32 %v6373_v37, %v3127_v34 }
 0x536   :  { %v6335_v39 = vadd.f32 %v6334_v38, %v3123_v13  ;;  %v6375_v40 = vpop.f32.mrf.mxu1 }
 0x537   :  { %v6376_v42 = vadd.f32 %v6375_v40, %v3131_v15  ;;  %v6336_v44 = vpop.f32.mrf.mxu0 }
 0x538   :  { %v6531_v51 = vcombine.low %v6333_v14, %v6335_v39  ;;  %v6377_v52 = vpop.f32.mrf.mxu1 }
 0x539   :  { %v6532_v16 = vcombine.low %v6374_v41, %v6376_v42  ;;  %v6337_v36 = vpop.f32.mrf.mxu0 }
 0x53a   :  { %v6539_v25 = vrot.slane %v6531_v51, %v7991_v49  ;;  %v6378_v0 = vpop.f32.mrf.mxu1 }
 0x53b   :  { %v6546_v17 = vrot.slane %v6532_v16, %v7991_v49 }
 0x53d   :  { %v6547_v61 = vcombine.low %v6539_v25, %v6546_v17 }
 0x53f   :  { %6563 = vst [vmem:[%s9804_s7 + $0x38] sm:$0xff] %v6547_v61 }
 0x540   :  { %6568 = vsyncpa [#allocation3], 1 }
 0x541   :  { %6569 = vsyncpa [#allocation5], 1 }

</bundles_post_ra>
